<compile_context>
chip_gen: v5e
topology: v5e:2x2
jax: 0.10.0
libtpu: 0.0.40
codegen_flags: <defaults>
</compile_context>

<pallas_src>
import numpy as np
import jax
import jax.numpy as jnp
from jax.experimental import pallas as pl
from jax.experimental.pallas import tpu as pltpu

_LN10 = 2.302585092994046


# ----------------------------------------------------------------------------
# Fused whole-network kernel (one batch element per grid step).
# ----------------------------------------------------------------------------
def _make_fused_kernel(layer_dims, H, W, KH, KW, post_add):
    n_layers = len(layer_dims)
    HW = H * W
    ph, pw = KH // 2, KW // 2

    # Static per-tap metadata: (dh, dw, lane-roll amount).
    # patches[p] must equal act[p + dh*W + dw]  =>  roll shift = -(dh*W + dw).
    taps = []
    for kh in range(KH):
        for kw in range(KW):
            dh, dw = kh - ph, kw - pw
            taps.append((dh, dw, (-(dh * W + dw)) % HW))

    def kernel(*refs):
        x_ref = refs[0]                                   # (1, Cin0, HW)
        mask_ref = refs[1]                                # (KH*KW, HW) f32 0/1
        w_refs = refs[2:2 + n_layers]                     # (Cout_i, KH*KW*Cin_i)
        b_refs = refs[2 + n_layers:2 + 2 * n_layers]      # (Cout_i, 1)
        y_ref = refs[2 + 2 * n_layers]                    # (1, Cout_last, HW)
        psum_ref = refs[3 + 2 * n_layers]                 # (1, 1, 128)
        patches_ref = refs[4 + 2 * n_layers]              # (K_max, HW) scratch

        # One (1, HW) mask row per tap, loaded ONCE and reused by all layers.
        mask_rows = [mask_ref[t:t + 1, :] for t in range(len(taps))]

        act = x_ref[0].astype(jnp.float32)                # (Cin0, HW) lane-dense

        for li, (cin, cout) in enumerate(layer_dims):
            K = KH * KW * cin
            # ---- im2col into VMEM scratch: lane roll + edge mask per tap ----
            for t, (dh, dw, amt) in enumerate(taps):
                if dh == 0 and dw == 0:
                    val = act                              # center tap: no shift
                else:
                    val = pltpu.roll(act, amt, axis=1) * mask_rows[t]
                patches_ref[t * cin:(t + 1) * cin, :] = val
            # ---- one big MXU matmul per layer: (Cout, K) @ (K, HW) ----
            acc = jnp.dot(w_refs[li][...], patches_ref[0:K, :],
                          preferred_element_type=jnp.float32)
            acc = jnp.maximum(acc + b_refs[li][...], 0.0)  # bias + ReLU
            if li == n_layers - 1:
                # torch: conv_f2 (Conv + ReLU) then subtract log10(0.25)
                acc = acc + jnp.float32(post_add)
            act = acc

        y_ref[...] = act.reshape(y_ref.shape).astype(y_ref.dtype)

        # Fused per-batch partial of sum(10 ** y).
        # (kept as plain 10**x like torch; no max-shift, for parity)
        t10 = jnp.exp(act * jnp.float32(_LN10))
        s = jnp.sum(jnp.sum(t10, axis=1, keepdims=True), axis=0, keepdims=True)
        psum_ref[...] = jnp.broadcast_to(s.reshape(1, 1, 1), psum_ref.shape)

    return kernel


# ----------------------------------------------------------------------------
# Host-side helpers: edge masks and weight packing.
# ----------------------------------------------------------------------------
def _edge_masks(H, W, KH, KW):
    """(KH*KW, H*W) f32 {0,1}: validity of each tap at each output position."""
    ph, pw = KH // 2, KW // 2
    idx = np.arange(H * W)
    r, c = idx // W, idx % W
    rows = []
    for kh in range(KH):
        for kw in range(KW):
            dh, dw = kh - ph, kw - pw
            valid = (r + dh >= 0) & (r + dh < H) & (c + dw >= 0) & (c + dw < W)
            rows.append(valid.astype(np.float32))
    return np.stack(rows, axis=0)


def _pack_weights(params, in_chan):
    """Fold the input preprocessing into layer 1 and flatten each HWIO weight
    into im2col (Cout, KH*KW*Cin) order (tap-major, channel-minor)."""
    w0, b0 = params[0]                       # (KH, KW, in_chan-1, mid)
    KH, KW, _, mid0 = w0.shape
    w0e = jnp.zeros((KH, KW, in_chan, mid0), w0.dtype)
    w0e = w0e.at[:, :, 0:5, :].set(w0[:, :, 0:5, :])
    w0e = w0e.at[:, :, 5, :].set(100.0 * w0[:, :, 5, :])   # img[:, 5] *= 100
    # raw channel 6 is dropped by the torch forward -> weight rows stay zero
    w0e = w0e.at[:, :, 7:, :].set(w0[:, :, 6:, :])          # VT channel(s)
    packed = [(w0e, b0)] + list(params[1:])

    w2ds, bs, dims = [], [], []
    for w, b in packed:
        kh, kw, ci, co = w.shape
        w2ds.append(jnp.transpose(w.reshape(kh * kw * ci, co)))  # (Cout, K)
        bs.append(b.reshape(co, 1))
        dims.append((ci, co))
    return w2ds, bs, dims


# ----------------------------------------------------------------------------
# Parameter init (deterministic, mimics PyTorch Conv2d default uniform init).
# ----------------------------------------------------------------------------
def init_params(key, in_chan=8, mid=32, out=1, kernel_size=5, n_layers=3):
    ks = kernel_size
    layer_io = [(in_chan - 1, mid)]                       # conv_1
    layer_io += [(mid, mid)] * (n_layers - 1)             # conv (hidden stack)
    layer_io += [(mid, mid // 2), (mid // 2, out)]        # conv_f1, conv_f2
    params = []
    for (ci, co) in layer_io:
        key, kw_, kb_ = jax.random.split(key, 3)
        bound = 1.0 / np.sqrt(ci * ks * ks)
        w = jax.random.uniform(kw_, (ks, ks, ci, co), jnp.float32,
                               minval=-bound, maxval=bound)
        b = jax.random.uniform(kb_, (co,), jnp.float32,
                               minval=-bound, maxval=bound)
        params.append((w, b))
    return params


# ----------------------------------------------------------------------------
# Full forward pass (matches CNN_noVT.forward).
# ----------------------------------------------------------------------------
def cnn_novt_forward(params, x_nchw):
    N, C, H, W = x_nchw.shape
    HW = H * W
    KH, KW = params[0][0].shape[0], params[0][0].shape[1]

    w2ds, bs, layer_dims = _pack_weights(params, C)
    out_c = layer_dims[-1][1]
    k_max = KH * KW * max(ci for ci, _ in layer_dims)
    post_add = float(-np.log10(0.25))

    masks = jnp.asarray(_edge_masks(H, W, KH, KW))        # (KH*KW, HW)
    x_flat = x_nchw.reshape(N, C, HW).astype(jnp.float32)  # NCHW flattened

    kernel = _make_fused_kernel(tuple(layer_dims), H, W, KH, KW, post_add)

    in_specs = [pl.BlockSpec((1, C, HW), lambda n: (n, 0, 0)),
                pl.BlockSpec((KH * KW, HW), lambda n: (0, 0))]
    in_specs += [pl.BlockSpec(w.shape, lambda n: (0, 0)) for w in w2ds]
    in_specs += [pl.BlockSpec(b.shape, lambda n: (0, 0)) for b in bs]

    y_flat, psums = pl.pallas_call(
        kernel,
        out_shape=(jax.ShapeDtypeStruct((N, out_c, HW), jnp.float32),
                   jax.ShapeDtypeStruct((N, 1, 128), jnp.float32)),
        grid_spec=pltpu.PrefetchScalarGridSpec(
            num_scalar_prefetch=0,
            grid=(N,),
            in_specs=in_specs,
            out_specs=(pl.BlockSpec((1, out_c, HW), lambda n: (n, 0, 0)),
                       pl.BlockSpec((1, 1, 128), lambda n: (n, 0, 0))),
            scratch_shapes=[pltpu.VMEM((k_max, HW), jnp.float32)],
        ),
        compiler_params=pltpu.CompilerParams(
            dimension_semantics=("parallel",)),   # batch across TCs (v7x)
    )(x_flat, masks, *w2ds, *bs)

    y = y_flat.reshape(N, out_c, H, W)
    # Tiny N-element finish outside the kernel: keeps the batch grid axis
    # safely "parallel" on multi-TensorCore chips while avoiding a second
    # pallas_call that re-reads y from HBM.
    total = jnp.log10(jnp.sum(psums[:, 0, 0]))
    return y, total


# ----------------------------------------------------------------------------
# Plain-JAX reference (mirrors the torch forward) for the self-check.
# ----------------------------------------------------------------------------
def _reference_forward(params, x_nchw):
    img = x_nchw[:, :6, :, :]
    img = img.at[:, 5, :, :].multiply(100.0)
    vt = x_nchw[:, 7:, :, :]
    h = jnp.concatenate([img, vt], axis=1)
    n = len(params)
    for i, (w, b) in enumerate(params):
        h = jax.lax.conv_general_dilated(
            h, w, window_strides=(1, 1), padding="SAME",
            dimension_numbers=("NCHW", "HWIO", "NCHW"))
        h = jnp.maximum(h + b.reshape(1, -1, 1, 1), 0.0)
        if i == n - 1:
            h = h - np.log10(0.25)
    return h, jnp.log10(jnp.sum(10.0 ** h))


if __name__ == "__main__":
    key = jax.random.PRNGKey(0)
    kp, kx = jax.random.split(key)
    # small shapes: batch=2, 8 input channels, 16x16 spatial, mid=32, out=1,
    # kernel=5, n_layers=3  ->  conv stack 8->32->32->32->16->1
    params = init_params(kp, in_chan=8, mid=32, out=1, kernel_size=5, n_layers=3)
    x = jax.random.normal(kx, (2, 8, 16, 16), dtype=jnp.float32)

    fwd = jax.jit(cnn_novt_forward)
    y, total = fwd(params, x)
    jax.block_until_ready((y, total))
    assert y.shape == (2, 1, 16, 16) and total.shape == ()

    # Loose-tolerance check vs an XLA-conv reference (loose because both sides
    # may use reduced-precision MXU passes and channel 5 is scaled by 100;
    # structural errors would be off by O(1-10) at many pixels).
    y_ref, total_ref = _reference_forward(params, x)
    np.testing.assert_allclose(np.asarray(y), np.asarray(y_ref),
                               rtol=1e-1, atol=1.0)
    np.testing.assert_allclose(float(total), float(total_ref),
                               rtol=5e-2, atol=0.5)

    print("KERNEL_OK")
</pallas_src>

<mosaic_0001>
module attributes {stable_mosaic.version = 11 : i64} {
  func.func @kernel(%arg0: i32, %arg1: memref<1x8x256xf32, #tpu.memory_space<vmem>>, %arg2: memref<25x256xf32, #tpu.memory_space<vmem>>, %arg3: memref<32x200xf32, #tpu.memory_space<vmem>>, %arg4: memref<32x800xf32, #tpu.memory_space<vmem>>, %arg5: memref<32x800xf32, #tpu.memory_space<vmem>>, %arg6: memref<16x800xf32, #tpu.memory_space<vmem>>, %arg7: memref<1x400xf32, #tpu.memory_space<vmem>>, %arg8: memref<32x1xf32, #tpu.memory_space<vmem>>, %arg9: memref<32x1xf32, #tpu.memory_space<vmem>>, %arg10: memref<32x1xf32, #tpu.memory_space<vmem>>, %arg11: memref<16x1xf32, #tpu.memory_space<vmem>>, %arg12: memref<1x1xf32, #tpu.memory_space<vmem>>, %arg13: memref<1x1x256xf32, #tpu.memory_space<vmem>>, %arg14: memref<1x1x128xf32, #tpu.memory_space<vmem>>, %arg15: memref<800x256xf32, #tpu.memory_space<vmem>>) attributes {dimension_semantics = [#tpu.dimension_semantics<parallel>], iteration_bounds = array<i64: 2>, scalar_prefetch = 0 : i64, scratch_operands = 1 : i64, tpu.core_type = #tpu.core_type<tc>, window_params = [{transform_indices = @transform_0, window_bounds = array<i64: 1, 8, 256>}, {pipeline_mode = #tpu.pipeline_mode<synchronous>, transform_indices = @transform_1, window_bounds = array<i64: 25, 256>}, {pipeline_mode = #tpu.pipeline_mode<synchronous>, transform_indices = @transform_2, window_bounds = array<i64: 32, 200>}, {pipeline_mode = #tpu.pipeline_mode<synchronous>, transform_indices = @transform_3, window_bounds = array<i64: 32, 800>}, {pipeline_mode = #tpu.pipeline_mode<synchronous>, transform_indices = @transform_4, window_bounds = array<i64: 32, 800>}, {pipeline_mode = #tpu.pipeline_mode<synchronous>, transform_indices = @transform_5, window_bounds = array<i64: 16, 800>}, {pipeline_mode = #tpu.pipeline_mode<synchronous>, transform_indices = @transform_6, window_bounds = array<i64: 1, 400>}, {pipeline_mode = #tpu.pipeline_mode<synchronous>, transform_indices = @transform_7, window_bounds = array<i64: 32, 1>}, {pipeline_mode = #tpu.pipeline_mode<synchronous>, transform_indices = @transform_8, window_bounds = array<i64: 32, 1>}, {pipeline_mode = #tpu.pipeline_mode<synchronous>, transform_indices = @transform_9, window_bounds = array<i64: 32, 1>}, {pipeline_mode = #tpu.pipeline_mode<synchronous>, transform_indices = @transform_10, window_bounds = array<i64: 16, 1>}, {pipeline_mode = #tpu.pipeline_mode<synchronous>, transform_indices = @transform_11, window_bounds = array<i64: 1, 1>}, {transform_indices = @transform_12, window_bounds = array<i64: 1, 1, 256>}, {transform_indices = @transform_13, window_bounds = array<i64: 1, 1, 128>}]} {
    %c0 = arith.constant 0 : index
    %c0_0 = arith.constant 0 : index
    %0 = vector.load %arg2[%c0, %c0_0] : memref<25x256xf32, #tpu.memory_space<vmem>>, vector<1x256xf32>
    %c1 = arith.constant 1 : index
    %c0_1 = arith.constant 0 : index
    %1 = vector.load %arg2[%c1, %c0_1] : memref<25x256xf32, #tpu.memory_space<vmem>>, vector<1x256xf32>
    %c2 = arith.constant 2 : index
    %c0_2 = arith.constant 0 : index
    %2 = vector.load %arg2[%c2, %c0_2] : memref<25x256xf32, #tpu.memory_space<vmem>>, vector<1x256xf32>
    %c3 = arith.constant 3 : index
    %c0_3 = arith.constant 0 : index
    %3 = vector.load %arg2[%c3, %c0_3] : memref<25x256xf32, #tpu.memory_space<vmem>>, vector<1x256xf32>
    %c4 = arith.constant 4 : index
    %c0_4 = arith.constant 0 : index
    %4 = vector.load %arg2[%c4, %c0_4] : memref<25x256xf32, #tpu.memory_space<vmem>>, vector<1x256xf32>
    %c5 = arith.constant 5 : index
    %c0_5 = arith.constant 0 : index
    %5 = vector.load %arg2[%c5, %c0_5] : memref<25x256xf32, #tpu.memory_space<vmem>>, vector<1x256xf32>
    %c6 = arith.constant 6 : index
    %c0_6 = arith.constant 0 : index
    %6 = vector.load %arg2[%c6, %c0_6] : memref<25x256xf32, #tpu.memory_space<vmem>>, vector<1x256xf32>
    %c7 = arith.constant 7 : index
    %c0_7 = arith.constant 0 : index
    %7 = vector.load %arg2[%c7, %c0_7] : memref<25x256xf32, #tpu.memory_space<vmem>>, vector<1x256xf32>
    %c8 = arith.constant 8 : index
    %c0_8 = arith.constant 0 : index
    %8 = vector.load %arg2[%c8, %c0_8] : memref<25x256xf32, #tpu.memory_space<vmem>>, vector<1x256xf32>
    %c9 = arith.constant 9 : index
    %c0_9 = arith.constant 0 : index
    %9 = vector.load %arg2[%c9, %c0_9] : memref<25x256xf32, #tpu.memory_space<vmem>>, vector<1x256xf32>
    %c10 = arith.constant 10 : index
    %c0_10 = arith.constant 0 : index
    %10 = vector.load %arg2[%c10, %c0_10] : memref<25x256xf32, #tpu.memory_space<vmem>>, vector<1x256xf32>
    %c11 = arith.constant 11 : index
    %c0_11 = arith.constant 0 : index
    %11 = vector.load %arg2[%c11, %c0_11] : memref<25x256xf32, #tpu.memory_space<vmem>>, vector<1x256xf32>
    %c13 = arith.constant 13 : index
    %c0_12 = arith.constant 0 : index
    %12 = vector.load %arg2[%c13, %c0_12] : memref<25x256xf32, #tpu.memory_space<vmem>>, vector<1x256xf32>
    %c14 = arith.constant 14 : index
    %c0_13 = arith.constant 0 : index
    %13 = vector.load %arg2[%c14, %c0_13] : memref<25x256xf32, #tpu.memory_space<vmem>>, vector<1x256xf32>
    %c15 = arith.constant 15 : index
    %c0_14 = arith.constant 0 : index
    %14 = vector.load %arg2[%c15, %c0_14] : memref<25x256xf32, #tpu.memory_space<vmem>>, vector<1x256xf32>
    %c16 = arith.constant 16 : index
    %c0_15 = arith.constant 0 : index
    %15 = vector.load %arg2[%c16, %c0_15] : memref<25x256xf32, #tpu.memory_space<vmem>>, vector<1x256xf32>
    %c17 = arith.constant 17 : index
    %c0_16 = arith.constant 0 : index
    %16 = vector.load %arg2[%c17, %c0_16] : memref<25x256xf32, #tpu.memory_space<vmem>>, vector<1x256xf32>
    %c18 = arith.constant 18 : index
    %c0_17 = arith.constant 0 : index
    %17 = vector.load %arg2[%c18, %c0_17] : memref<25x256xf32, #tpu.memory_space<vmem>>, vector<1x256xf32>
    %c19 = arith.constant 19 : index
    %c0_18 = arith.constant 0 : index
    %18 = vector.load %arg2[%c19, %c0_18] : memref<25x256xf32, #tpu.memory_space<vmem>>, vector<1x256xf32>
    %c20 = arith.constant 20 : index
    %c0_19 = arith.constant 0 : index
    %19 = vector.load %arg2[%c20, %c0_19] : memref<25x256xf32, #tpu.memory_space<vmem>>, vector<1x256xf32>
    %c21 = arith.constant 21 : index
    %c0_20 = arith.constant 0 : index
    %20 = vector.load %arg2[%c21, %c0_20] : memref<25x256xf32, #tpu.memory_space<vmem>>, vector<1x256xf32>
    %c22 = arith.constant 22 : index
    %c0_21 = arith.constant 0 : index
    %21 = vector.load %arg2[%c22, %c0_21] : memref<25x256xf32, #tpu.memory_space<vmem>>, vector<1x256xf32>
    %c23 = arith.constant 23 : index
    %c0_22 = arith.constant 0 : index
    %22 = vector.load %arg2[%c23, %c0_22] : memref<25x256xf32, #tpu.memory_space<vmem>>, vector<1x256xf32>
    %c24 = arith.constant 24 : index
    %c0_23 = arith.constant 0 : index
    %23 = vector.load %arg2[%c24, %c0_23] : memref<25x256xf32, #tpu.memory_space<vmem>>, vector<1x256xf32>
    %c0_24 = arith.constant 0 : index
    %c0_25 = arith.constant 0 : index
    %c0_26 = arith.constant 0 : index
    %24 = vector.load %arg1[%c0_24, %c0_25, %c0_26] : memref<1x8x256xf32, #tpu.memory_space<vmem>>, vector<1x8x256xf32>
    %25 = vector.shape_cast %24 : vector<1x8x256xf32> to vector<8x256xf32>
    %c34_i32 = arith.constant 34 : i32
    %26 = tpu.dynamic_rotate %25 by %c34_i32 dim 1 : vector<8x256xf32>, i32 -> vector<8x256xf32>
    %27 = vector.broadcast %0 : vector<1x256xf32> to vector<8x256xf32>
    %28 = arith.mulf %26, %27 : vector<8x256xf32>
    %c0_27 = arith.constant 0 : index
    %c0_28 = arith.constant 0 : index
    %29 = vector.load %arg15[%c0_27, %c0_28] : memref<800x256xf32, #tpu.memory_space<vmem>>, vector<8x256xf32>
    tpu.vector_store %arg15[%c0_27, %c0_28], %28 {strides = array<i32>} : memref<800x256xf32, #tpu.memory_space<vmem>>, vector<8x256xf32>,
    %c33_i32 = arith.constant 33 : i32
    %30 = tpu.dynamic_rotate %25 by %c33_i32 dim 1 : vector<8x256xf32>, i32 -> vector<8x256xf32>
    %31 = vector.broadcast %1 : vector<1x256xf32> to vector<8x256xf32>
    %32 = arith.mulf %30, %31 : vector<8x256xf32>
    %c8_29 = arith.constant 8 : index
    %c0_30 = arith.constant 0 : index
    %33 = vector.load %arg15[%c8_29, %c0_30] : memref<800x256xf32, #tpu.memory_space<vmem>>, vector<8x256xf32>
    tpu.vector_store %arg15[%c8_29, %c0_30], %32 {strides = array<i32>} : memref<800x256xf32, #tpu.memory_space<vmem>>, vector<8x256xf32>,
    %c32_i32 = arith.constant 32 : i32
    %34 = tpu.dynamic_rotate %25 by %c32_i32 dim 1 : vector<8x256xf32>, i32 -> vector<8x256xf32>
    %35 = vector.broadcast %2 : vector<1x256xf32> to vector<8x256xf32>
    %36 = arith.mulf %34, %35 : vector<8x256xf32>
    %c16_31 = arith.constant 16 : index
    %c0_32 = arith.constant 0 : index
    %37 = vector.load %arg15[%c16_31, %c0_32] : memref<800x256xf32, #tpu.memory_space<vmem>>, vector<8x256xf32>
    tpu.vector_store %arg15[%c16_31, %c0_32], %36 {strides = array<i32>} : memref<800x256xf32, #tpu.memory_space<vmem>>, vector<8x256xf32>,
    %c31_i32 = arith.constant 31 : i32
    %38 = tpu.dynamic_rotate %25 by %c31_i32 dim 1 : vector<8x256xf32>, i32 -> vector<8x256xf32>
    %39 = vector.broadcast %3 : vector<1x256xf32> to vector<8x256xf32>
    %40 = arith.mulf %38, %39 : vector<8x256xf32>
    %c24_33 = arith.constant 24 : index
    %c0_34 = arith.constant 0 : index
    %41 = vector.load %arg15[%c24_33, %c0_34] : memref<800x256xf32, #tpu.memory_space<vmem>>, vector<8x256xf32>
    tpu.vector_store %arg15[%c24_33, %c0_34], %40 {strides = array<i32>} : memref<800x256xf32, #tpu.memory_space<vmem>>, vector<8x256xf32>,
    %c30_i32 = arith.constant 30 : i32
    %42 = tpu.dynamic_rotate %25 by %c30_i32 dim 1 : vector<8x256xf32>, i32 -> vector<8x256xf32>
    %43 = vector.broadcast %4 : vector<1x256xf32> to vector<8x256xf32>
    %44 = arith.mulf %42, %43 : vector<8x256xf32>
    %c32 = arith.constant 32 : index
    %c0_35 = arith.constant 0 : index
    %45 = vector.load %arg15[%c32, %c0_35] : memref<800x256xf32, #tpu.memory_space<vmem>>, vector<8x256xf32>
    tpu.vector_store %arg15[%c32, %c0_35], %44 {strides = array<i32>} : memref<800x256xf32, #tpu.memory_space<vmem>>, vector<8x256xf32>,
    %c18_i32 = arith.constant 18 : i32
    %46 = tpu.dynamic_rotate %25 by %c18_i32 dim 1 : vector<8x256xf32>, i32 -> vector<8x256xf32>
    %47 = vector.broadcast %5 : vector<1x256xf32> to vector<8x256xf32>
    %48 = arith.mulf %46, %47 : vector<8x256xf32>
    %c40 = arith.constant 40 : index
    %c0_36 = arith.constant 0 : index
    %49 = vector.load %arg15[%c40, %c0_36] : memref<800x256xf32, #tpu.memory_space<vmem>>, vector<8x256xf32>
    tpu.vector_store %arg15[%c40, %c0_36], %48 {strides = array<i32>} : memref<800x256xf32, #tpu.memory_space<vmem>>, vector<8x256xf32>,
    %c17_i32 = arith.constant 17 : i32
    %50 = tpu.dynamic_rotate %25 by %c17_i32 dim 1 : vector<8x256xf32>, i32 -> vector<8x256xf32>
    %51 = vector.broadcast %6 : vector<1x256xf32> to vector<8x256xf32>
    %52 = arith.mulf %50, %51 : vector<8x256xf32>
    %c48 = arith.constant 48 : index
    %c0_37 = arith.constant 0 : index
    %53 = vector.load %arg15[%c48, %c0_37] : memref<800x256xf32, #tpu.memory_space<vmem>>, vector<8x256xf32>
    tpu.vector_store %arg15[%c48, %c0_37], %52 {strides = array<i32>} : memref<800x256xf32, #tpu.memory_space<vmem>>, vector<8x256xf32>,
    %c16_i32 = arith.constant 16 : i32
    %54 = tpu.dynamic_rotate %25 by %c16_i32 dim 1 : vector<8x256xf32>, i32 -> vector<8x256xf32>
    %55 = vector.broadcast %7 : vector<1x256xf32> to vector<8x256xf32>
    %56 = arith.mulf %54, %55 : vector<8x256xf32>
    %c56 = arith.constant 56 : index
    %c0_38 = arith.constant 0 : index
    %57 = vector.load %arg15[%c56, %c0_38] : memref<800x256xf32, #tpu.memory_space<vmem>>, vector<8x256xf32>
    tpu.vector_store %arg15[%c56, %c0_38], %56 {strides = array<i32>} : memref<800x256xf32, #tpu.memory_space<vmem>>, vector<8x256xf32>,
    %c15_i32 = arith.constant 15 : i32
    %58 = tpu.dynamic_rotate %25 by %c15_i32 dim 1 : vector<8x256xf32>, i32 -> vector<8x256xf32>
    %59 = vector.broadcast %8 : vector<1x256xf32> to vector<8x256xf32>
    %60 = arith.mulf %58, %59 : vector<8x256xf32>
    %c64 = arith.constant 64 : index
    %c0_39 = arith.constant 0 : index
    %61 = vector.load %arg15[%c64, %c0_39] : memref<800x256xf32, #tpu.memory_space<vmem>>, vector<8x256xf32>
    tpu.vector_store %arg15[%c64, %c0_39], %60 {strides = array<i32>} : memref<800x256xf32, #tpu.memory_space<vmem>>, vector<8x256xf32>,
    %c14_i32 = arith.constant 14 : i32
    %62 = tpu.dynamic_rotate %25 by %c14_i32 dim 1 : vector<8x256xf32>, i32 -> vector<8x256xf32>
    %63 = vector.broadcast %9 : vector<1x256xf32> to vector<8x256xf32>
    %64 = arith.mulf %62, %63 : vector<8x256xf32>
    %c72 = arith.constant 72 : index
    %c0_40 = arith.constant 0 : index
    %65 = vector.load %arg15[%c72, %c0_40] : memref<800x256xf32, #tpu.memory_space<vmem>>, vector<8x256xf32>
    tpu.vector_store %arg15[%c72, %c0_40], %64 {strides = array<i32>} : memref<800x256xf32, #tpu.memory_space<vmem>>, vector<8x256xf32>,
    %c2_i32 = arith.constant 2 : i32
    %66 = tpu.dynamic_rotate %25 by %c2_i32 dim 1 : vector<8x256xf32>, i32 -> vector<8x256xf32>
    %67 = vector.broadcast %10 : vector<1x256xf32> to vector<8x256xf32>
    %68 = arith.mulf %66, %67 : vector<8x256xf32>
    %c80 = arith.constant 80 : index
    %c0_41 = arith.constant 0 : index
    %69 = vector.load %arg15[%c80, %c0_41] : memref<800x256xf32, #tpu.memory_space<vmem>>, vector<8x256xf32>
    tpu.vector_store %arg15[%c80, %c0_41], %68 {strides = array<i32>} : memref<800x256xf32, #tpu.memory_space<vmem>>, vector<8x256xf32>,
    %c1_i32 = arith.constant 1 : i32
    %70 = tpu.dynamic_rotate %25 by %c1_i32 dim 1 : vector<8x256xf32>, i32 -> vector<8x256xf32>
    %71 = vector.broadcast %11 : vector<1x256xf32> to vector<8x256xf32>
    %72 = arith.mulf %70, %71 : vector<8x256xf32>
    %c88 = arith.constant 88 : index
    %c0_42 = arith.constant 0 : index
    %73 = vector.load %arg15[%c88, %c0_42] : memref<800x256xf32, #tpu.memory_space<vmem>>, vector<8x256xf32>
    tpu.vector_store %arg15[%c88, %c0_42], %72 {strides = array<i32>} : memref<800x256xf32, #tpu.memory_space<vmem>>, vector<8x256xf32>,
    %c96 = arith.constant 96 : index
    %c0_43 = arith.constant 0 : index
    %74 = vector.load %arg15[%c96, %c0_43] : memref<800x256xf32, #tpu.memory_space<vmem>>, vector<8x256xf32>
    tpu.vector_store %arg15[%c96, %c0_43], %25 {strides = array<i32>} : memref<800x256xf32, #tpu.memory_space<vmem>>, vector<8x256xf32>,
    %c255_i32 = arith.constant 255 : i32
    %75 = tpu.dynamic_rotate %25 by %c255_i32 dim 1 : vector<8x256xf32>, i32 -> vector<8x256xf32>
    %76 = vector.broadcast %12 : vector<1x256xf32> to vector<8x256xf32>
    %77 = arith.mulf %75, %76 : vector<8x256xf32>
    %c104 = arith.constant 104 : index
    %c0_44 = arith.constant 0 : index
    %78 = vector.load %arg15[%c104, %c0_44] : memref<800x256xf32, #tpu.memory_space<vmem>>, vector<8x256xf32>
    tpu.vector_store %arg15[%c104, %c0_44], %77 {strides = array<i32>} : memref<800x256xf32, #tpu.memory_space<vmem>>, vector<8x256xf32>,
    %c254_i32 = arith.constant 254 : i32
    %79 = tpu.dynamic_rotate %25 by %c254_i32 dim 1 : vector<8x256xf32>, i32 -> vector<8x256xf32>
    %80 = vector.broadcast %13 : vector<1x256xf32> to vector<8x256xf32>
    %81 = arith.mulf %79, %80 : vector<8x256xf32>
    %c112 = arith.constant 112 : index
    %c0_45 = arith.constant 0 : index
    %82 = vector.load %arg15[%c112, %c0_45] : memref<800x256xf32, #tpu.memory_space<vmem>>, vector<8x256xf32>
    tpu.vector_store %arg15[%c112, %c0_45], %81 {strides = array<i32>} : memref<800x256xf32, #tpu.memory_space<vmem>>, vector<8x256xf32>,
    %c242_i32 = arith.constant 242 : i32
    %83 = tpu.dynamic_rotate %25 by %c242_i32 dim 1 : vector<8x256xf32>, i32 -> vector<8x256xf32>
    %84 = vector.broadcast %14 : vector<1x256xf32> to vector<8x256xf32>
    %85 = arith.mulf %83, %84 : vector<8x256xf32>
    %c120 = arith.constant 120 : index
    %c0_46 = arith.constant 0 : index
    %86 = vector.load %arg15[%c120, %c0_46] : memref<800x256xf32, #tpu.memory_space<vmem>>, vector<8x256xf32>
    tpu.vector_store %arg15[%c120, %c0_46], %85 {strides = array<i32>} : memref<800x256xf32, #tpu.memory_space<vmem>>, vector<8x256xf32>,
    %c241_i32 = arith.constant 241 : i32
    %87 = tpu.dynamic_rotate %25 by %c241_i32 dim 1 : vector<8x256xf32>, i32 -> vector<8x256xf32>
    %88 = vector.broadcast %15 : vector<1x256xf32> to vector<8x256xf32>
    %89 = arith.mulf %87, %88 : vector<8x256xf32>
    %c128 = arith.constant 128 : index
    %c0_47 = arith.constant 0 : index
    %90 = vector.load %arg15[%c128, %c0_47] : memref<800x256xf32, #tpu.memory_space<vmem>>, vector<8x256xf32>
    tpu.vector_store %arg15[%c128, %c0_47], %89 {strides = array<i32>} : memref<800x256xf32, #tpu.memory_space<vmem>>, vector<8x256xf32>,
    %c240_i32 = arith.constant 240 : i32
    %91 = tpu.dynamic_rotate %25 by %c240_i32 dim 1 : vector<8x256xf32>, i32 -> vector<8x256xf32>
    %92 = vector.broadcast %16 : vector<1x256xf32> to vector<8x256xf32>
    %93 = arith.mulf %91, %92 : vector<8x256xf32>
    %c136 = arith.constant 136 : index
    %c0_48 = arith.constant 0 : index
    %94 = vector.load %arg15[%c136, %c0_48] : memref<800x256xf32, #tpu.memory_space<vmem>>, vector<8x256xf32>
    tpu.vector_store %arg15[%c136, %c0_48], %93 {strides = array<i32>} : memref<800x256xf32, #tpu.memory_space<vmem>>, vector<8x256xf32>,
    %c239_i32 = arith.constant 239 : i32
    %95 = tpu.dynamic_rotate %25 by %c239_i32 dim 1 : vector<8x256xf32>, i32 -> vector<8x256xf32>
    %96 = vector.broadcast %17 : vector<1x256xf32> to vector<8x256xf32>
    %97 = arith.mulf %95, %96 : vector<8x256xf32>
    %c144 = arith.constant 144 : index
    %c0_49 = arith.constant 0 : index
    %98 = vector.load %arg15[%c144, %c0_49] : memref<800x256xf32, #tpu.memory_space<vmem>>, vector<8x256xf32>
    tpu.vector_store %arg15[%c144, %c0_49], %97 {strides = array<i32>} : memref<800x256xf32, #tpu.memory_space<vmem>>, vector<8x256xf32>,
    %c238_i32 = arith.constant 238 : i32
    %99 = tpu.dynamic_rotate %25 by %c238_i32 dim 1 : vector<8x256xf32>, i32 -> vector<8x256xf32>
    %100 = vector.broadcast %18 : vector<1x256xf32> to vector<8x256xf32>
    %101 = arith.mulf %99, %100 : vector<8x256xf32>
    %c152 = arith.constant 152 : index
    %c0_50 = arith.constant 0 : index
    %102 = vector.load %arg15[%c152, %c0_50] : memref<800x256xf32, #tpu.memory_space<vmem>>, vector<8x256xf32>
    tpu.vector_store %arg15[%c152, %c0_50], %101 {strides = array<i32>} : memref<800x256xf32, #tpu.memory_space<vmem>>, vector<8x256xf32>,
    %c226_i32 = arith.constant 226 : i32
    %103 = tpu.dynamic_rotate %25 by %c226_i32 dim 1 : vector<8x256xf32>, i32 -> vector<8x256xf32>
    %104 = vector.broadcast %19 : vector<1x256xf32> to vector<8x256xf32>
    %105 = arith.mulf %103, %104 : vector<8x256xf32>
    %c160 = arith.constant 160 : index
    %c0_51 = arith.constant 0 : index
    %106 = vector.load %arg15[%c160, %c0_51] : memref<800x256xf32, #tpu.memory_space<vmem>>, vector<8x256xf32>
    tpu.vector_store %arg15[%c160, %c0_51], %105 {strides = array<i32>} : memref<800x256xf32, #tpu.memory_space<vmem>>, vector<8x256xf32>,
    %c225_i32 = arith.constant 225 : i32
    %107 = tpu.dynamic_rotate %25 by %c225_i32 dim 1 : vector<8x256xf32>, i32 -> vector<8x256xf32>
    %108 = vector.broadcast %20 : vector<1x256xf32> to vector<8x256xf32>
    %109 = arith.mulf %107, %108 : vector<8x256xf32>
    %c168 = arith.constant 168 : index
    %c0_52 = arith.constant 0 : index
    %110 = vector.load %arg15[%c168, %c0_52] : memref<800x256xf32, #tpu.memory_space<vmem>>, vector<8x256xf32>
    tpu.vector_store %arg15[%c168, %c0_52], %109 {strides = array<i32>} : memref<800x256xf32, #tpu.memory_space<vmem>>, vector<8x256xf32>,
    %c224_i32 = arith.constant 224 : i32
    %111 = tpu.dynamic_rotate %25 by %c224_i32 dim 1 : vector<8x256xf32>, i32 -> vector<8x256xf32>
    %112 = vector.broadcast %21 : vector<1x256xf32> to vector<8x256xf32>
    %113 = arith.mulf %111, %112 : vector<8x256xf32>
    %c176 = arith.constant 176 : index
    %c0_53 = arith.constant 0 : index
    %114 = vector.load %arg15[%c176, %c0_53] : memref<800x256xf32, #tpu.memory_space<vmem>>, vector<8x256xf32>
    tpu.vector_store %arg15[%c176, %c0_53], %113 {strides = array<i32>} : memref<800x256xf32, #tpu.memory_space<vmem>>, vector<8x256xf32>,
    %c223_i32 = arith.constant 223 : i32
    %115 = tpu.dynamic_rotate %25 by %c223_i32 dim 1 : vector<8x256xf32>, i32 -> vector<8x256xf32>
    %116 = vector.broadcast %22 : vector<1x256xf32> to vector<8x256xf32>
    %117 = arith.mulf %115, %116 : vector<8x256xf32>
    %c184 = arith.constant 184 : index
    %c0_54 = arith.constant 0 : index
    %118 = vector.load %arg15[%c184, %c0_54] : memref<800x256xf32, #tpu.memory_space<vmem>>, vector<8x256xf32>
    tpu.vector_store %arg15[%c184, %c0_54], %117 {strides = array<i32>} : memref<800x256xf32, #tpu.memory_space<vmem>>, vector<8x256xf32>,
    %c222_i32 = arith.constant 222 : i32
    %119 = tpu.dynamic_rotate %25 by %c222_i32 dim 1 : vector<8x256xf32>, i32 -> vector<8x256xf32>
    %120 = vector.broadcast %23 : vector<1x256xf32> to vector<8x256xf32>
    %121 = arith.mulf %119, %120 : vector<8x256xf32>
    %c192 = arith.constant 192 : index
    %c0_55 = arith.constant 0 : index
    %122 = vector.load %arg15[%c192, %c0_55] : memref<800x256xf32, #tpu.memory_space<vmem>>, vector<8x256xf32>
    tpu.vector_store %arg15[%c192, %c0_55], %121 {strides = array<i32>} : memref<800x256xf32, #tpu.memory_space<vmem>>, vector<8x256xf32>,
    %c0_56 = arith.constant 0 : index
    %c0_57 = arith.constant 0 : index
    %123 = vector.load %arg3[%c0_56, %c0_57] : memref<32x200xf32, #tpu.memory_space<vmem>>, vector<32x200xf32>
    %c0_58 = arith.constant 0 : index
    %c0_59 = arith.constant 0 : index
    %124 = vector.load %arg15[%c0_58, %c0_59] : memref<800x256xf32, #tpu.memory_space<vmem>>, vector<200x256xf32>
    %cst = arith.constant dense<0.000000e+00> : vector<32x256xf32>
    %125 = tpu.matmul %123, %124, %cst {dimension_numbers = #tpu.dot_dimension_numbers<[1], [0], [0], [1], [0, 0, 1, 1], [], []>} : vector<32x200xf32>, vector<200x256xf32>, vector<32x256xf32> -> vector<32x256xf32>
    %c0_60 = arith.constant 0 : index
    %c0_61 = arith.constant 0 : index
    %126 = vector.load %arg8[%c0_60, %c0_61] : memref<32x1xf32, #tpu.memory_space<vmem>>, vector<32x1xf32>
    %127 = vector.broadcast %126 : vector<32x1xf32> to vector<32x256xf32>
    %128 = arith.addf %125, %127 : vector<32x256xf32>
    %cst_62 = arith.constant 0.000000e+00 : f32
    %129 = vector.broadcast %cst_62 : f32 to vector<32x256xf32>
    %130 = arith.maximumf %128, %129 : vector<32x256xf32>
    %c34_i32_63 = arith.constant 34 : i32
    %131 = tpu.dynamic_rotate %130 by %c34_i32_63 dim 1 : vector<32x256xf32>, i32 -> vector<32x256xf32>
    %132 = vector.broadcast %0 : vector<1x256xf32> to vector<32x256xf32>
    %133 = arith.mulf %131, %132 : vector<32x256xf32>
    %c0_64 = arith.constant 0 : index
    %c0_65 = arith.constant 0 : index
    %134 = vector.load %arg15[%c0_64, %c0_65] : memref<800x256xf32, #tpu.memory_space<vmem>>, vector<32x256xf32>
    tpu.vector_store %arg15[%c0_64, %c0_65], %133 {strides = array<i32>} : memref<800x256xf32, #tpu.memory_space<vmem>>, vector<32x256xf32>,
    %c33_i32_66 = arith.constant 33 : i32
    %135 = tpu.dynamic_rotate %130 by %c33_i32_66 dim 1 : vector<32x256xf32>, i32 -> vector<32x256xf32>
    %136 = vector.broadcast %1 : vector<1x256xf32> to vector<32x256xf32>
    %137 = arith.mulf %135, %136 : vector<32x256xf32>
    %c32_67 = arith.constant 32 : index
    %c0_68 = arith.constant 0 : index
    %138 = vector.load %arg15[%c32_67, %c0_68] : memref<800x256xf32, #tpu.memory_space<vmem>>, vector<32x256xf32>
    tpu.vector_store %arg15[%c32_67, %c0_68], %137 {strides = array<i32>} : memref<800x256xf32, #tpu.memory_space<vmem>>, vector<32x256xf32>,
    %c32_i32_69 = arith.constant 32 : i32
    %139 = tpu.dynamic_rotate %130 by %c32_i32_69 dim 1 : vector<32x256xf32>, i32 -> vector<32x256xf32>
    %140 = vector.broadcast %2 : vector<1x256xf32> to vector<32x256xf32>
    %141 = arith.mulf %139, %140 : vector<32x256xf32>
    %c64_70 = arith.constant 64 : index
    %c0_71 = arith.constant 0 : index
    %142 = vector.load %arg15[%c64_70, %c0_71] : memref<800x256xf32, #tpu.memory_space<vmem>>, vector<32x256xf32>
    tpu.vector_store %arg15[%c64_70, %c0_71], %141 {strides = array<i32>} : memref<800x256xf32, #tpu.memory_space<vmem>>, vector<32x256xf32>,
    %c31_i32_72 = arith.constant 31 : i32
    %143 = tpu.dynamic_rotate %130 by %c31_i32_72 dim 1 : vector<32x256xf32>, i32 -> vector<32x256xf32>
    %144 = vector.broadcast %3 : vector<1x256xf32> to vector<32x256xf32>
    %145 = arith.mulf %143, %144 : vector<32x256xf32>
    %c96_73 = arith.constant 96 : index
    %c0_74 = arith.constant 0 : index
    %146 = vector.load %arg15[%c96_73, %c0_74] : memref<800x256xf32, #tpu.memory_space<vmem>>, vector<32x256xf32>
    tpu.vector_store %arg15[%c96_73, %c0_74], %145 {strides = array<i32>} : memref<800x256xf32, #tpu.memory_space<vmem>>, vector<32x256xf32>,
    %c30_i32_75 = arith.constant 30 : i32
    %147 = tpu.dynamic_rotate %130 by %c30_i32_75 dim 1 : vector<32x256xf32>, i32 -> vector<32x256xf32>
    %148 = vector.broadcast %4 : vector<1x256xf32> to vector<32x256xf32>
    %149 = arith.mulf %147, %148 : vector<32x256xf32>
    %c128_76 = arith.constant 128 : index
    %c0_77 = arith.constant 0 : index
    %150 = vector.load %arg15[%c128_76, %c0_77] : memref<800x256xf32, #tpu.memory_space<vmem>>, vector<32x256xf32>
    tpu.vector_store %arg15[%c128_76, %c0_77], %149 {strides = array<i32>} : memref<800x256xf32, #tpu.memory_space<vmem>>, vector<32x256xf32>,
    %c18_i32_78 = arith.constant 18 : i32
    %151 = tpu.dynamic_rotate %130 by %c18_i32_78 dim 1 : vector<32x256xf32>, i32 -> vector<32x256xf32>
    %152 = vector.broadcast %5 : vector<1x256xf32> to vector<32x256xf32>
    %153 = arith.mulf %151, %152 : vector<32x256xf32>
    %c160_79 = arith.constant 160 : index
    %c0_80 = arith.constant 0 : index
    %154 = vector.load %arg15[%c160_79, %c0_80] : memref<800x256xf32, #tpu.memory_space<vmem>>, vector<32x256xf32>
    tpu.vector_store %arg15[%c160_79, %c0_80], %153 {strides = array<i32>} : memref<800x256xf32, #tpu.memory_space<vmem>>, vector<32x256xf32>,
    %c17_i32_81 = arith.constant 17 : i32
    %155 = tpu.dynamic_rotate %130 by %c17_i32_81 dim 1 : vector<32x256xf32>, i32 -> vector<32x256xf32>
    %156 = vector.broadcast %6 : vector<1x256xf32> to vector<32x256xf32>
    %157 = arith.mulf %155, %156 : vector<32x256xf32>
    %c192_82 = arith.constant 192 : index
    %c0_83 = arith.constant 0 : index
    %158 = vector.load %arg15[%c192_82, %c0_83] : memref<800x256xf32, #tpu.memory_space<vmem>>, vector<32x256xf32>
    tpu.vector_store %arg15[%c192_82, %c0_83], %157 {strides = array<i32>} : memref<800x256xf32, #tpu.memory_space<vmem>>, vector<32x256xf32>,
    %c16_i32_84 = arith.constant 16 : i32
    %159 = tpu.dynamic_rotate %130 by %c16_i32_84 dim 1 : vector<32x256xf32>, i32 -> vector<32x256xf32>
    %160 = vector.broadcast %7 : vector<1x256xf32> to vector<32x256xf32>
    %161 = arith.mulf %159, %160 : vector<32x256xf32>
    %c224 = arith.constant 224 : index
    %c0_85 = arith.constant 0 : index
    %162 = vector.load %arg15[%c224, %c0_85] : memref<800x256xf32, #tpu.memory_space<vmem>>, vector<32x256xf32>
    tpu.vector_store %arg15[%c224, %c0_85], %161 {strides = array<i32>} : memref<800x256xf32, #tpu.memory_space<vmem>>, vector<32x256xf32>,
    %c15_i32_86 = arith.constant 15 : i32
    %163 = tpu.dynamic_rotate %130 by %c15_i32_86 dim 1 : vector<32x256xf32>, i32 -> vector<32x256xf32>
    %164 = vector.broadcast %8 : vector<1x256xf32> to vector<32x256xf32>
    %165 = arith.mulf %163, %164 : vector<32x256xf32>
    %c256 = arith.constant 256 : index
    %c0_87 = arith.constant 0 : index
    %166 = vector.load %arg15[%c256, %c0_87] : memref<800x256xf32, #tpu.memory_space<vmem>>, vector<32x256xf32>
    tpu.vector_store %arg15[%c256, %c0_87], %165 {strides = array<i32>} : memref<800x256xf32, #tpu.memory_space<vmem>>, vector<32x256xf32>,
    %c14_i32_88 = arith.constant 14 : i32
    %167 = tpu.dynamic_rotate %130 by %c14_i32_88 dim 1 : vector<32x256xf32>, i32 -> vector<32x256xf32>
    %168 = vector.broadcast %9 : vector<1x256xf32> to vector<32x256xf32>
    %169 = arith.mulf %167, %168 : vector<32x256xf32>
    %c288 = arith.constant 288 : index
    %c0_89 = arith.constant 0 : index
    %170 = vector.load %arg15[%c288, %c0_89] : memref<800x256xf32, #tpu.memory_space<vmem>>, vector<32x256xf32>
    tpu.vector_store %arg15[%c288, %c0_89], %169 {strides = array<i32>} : memref<800x256xf32, #tpu.memory_space<vmem>>, vector<32x256xf32>,
    %c2_i32_90 = arith.constant 2 : i32
    %171 = tpu.dynamic_rotate %130 by %c2_i32_90 dim 1 : vector<32x256xf32>, i32 -> vector<32x256xf32>
    %172 = vector.broadcast %10 : vector<1x256xf32> to vector<32x256xf32>
    %173 = arith.mulf %171, %172 : vector<32x256xf32>
    %c320 = arith.constant 320 : index
    %c0_91 = arith.constant 0 : index
    %174 = vector.load %arg15[%c320, %c0_91] : memref<800x256xf32, #tpu.memory_space<vmem>>, vector<32x256xf32>
    tpu.vector_store %arg15[%c320, %c0_91], %173 {strides = array<i32>} : memref<800x256xf32, #tpu.memory_space<vmem>>, vector<32x256xf32>,
    %c1_i32_92 = arith.constant 1 : i32
    %175 = tpu.dynamic_rotate %130 by %c1_i32_92 dim 1 : vector<32x256xf32>, i32 -> vector<32x256xf32>
    %176 = vector.broadcast %11 : vector<1x256xf32> to vector<32x256xf32>
    %177 = arith.mulf %175, %176 : vector<32x256xf32>
    %c352 = arith.constant 352 : index
    %c0_93 = arith.constant 0 : index
    %178 = vector.load %arg15[%c352, %c0_93] : memref<800x256xf32, #tpu.memory_space<vmem>>, vector<32x256xf32>
    tpu.vector_store %arg15[%c352, %c0_93], %177 {strides = array<i32>} : memref<800x256xf32, #tpu.memory_space<vmem>>, vector<32x256xf32>,
    %c384 = arith.constant 384 : index
    %c0_94 = arith.constant 0 : index
    %179 = vector.load %arg15[%c384, %c0_94] : memref<800x256xf32, #tpu.memory_space<vmem>>, vector<32x256xf32>
    tpu.vector_store %arg15[%c384, %c0_94], %130 {strides = array<i32>} : memref<800x256xf32, #tpu.memory_space<vmem>>, vector<32x256xf32>,
    %c255_i32_95 = arith.constant 255 : i32
    %180 = tpu.dynamic_rotate %130 by %c255_i32_95 dim 1 : vector<32x256xf32>, i32 -> vector<32x256xf32>
    %181 = vector.broadcast %12 : vector<1x256xf32> to vector<32x256xf32>
    %182 = arith.mulf %180, %181 : vector<32x256xf32>
    %c416 = arith.constant 416 : index
    %c0_96 = arith.constant 0 : index
    %183 = vector.load %arg15[%c416, %c0_96] : memref<800x256xf32, #tpu.memory_space<vmem>>, vector<32x256xf32>
    tpu.vector_store %arg15[%c416, %c0_96], %182 {strides = array<i32>} : memref<800x256xf32, #tpu.memory_space<vmem>>, vector<32x256xf32>,
    %c254_i32_97 = arith.constant 254 : i32
    %184 = tpu.dynamic_rotate %130 by %c254_i32_97 dim 1 : vector<32x256xf32>, i32 -> vector<32x256xf32>
    %185 = vector.broadcast %13 : vector<1x256xf32> to vector<32x256xf32>
    %186 = arith.mulf %184, %185 : vector<32x256xf32>
    %c448 = arith.constant 448 : index
    %c0_98 = arith.constant 0 : index
    %187 = vector.load %arg15[%c448, %c0_98] : memref<800x256xf32, #tpu.memory_space<vmem>>, vector<32x256xf32>
    tpu.vector_store %arg15[%c448, %c0_98], %186 {strides = array<i32>} : memref<800x256xf32, #tpu.memory_space<vmem>>, vector<32x256xf32>,
    %c242_i32_99 = arith.constant 242 : i32
    %188 = tpu.dynamic_rotate %130 by %c242_i32_99 dim 1 : vector<32x256xf32>, i32 -> vector<32x256xf32>
    %189 = vector.broadcast %14 : vector<1x256xf32> to vector<32x256xf32>
    %190 = arith.mulf %188, %189 : vector<32x256xf32>
    %c480 = arith.constant 480 : index
    %c0_100 = arith.constant 0 : index
    %191 = vector.load %arg15[%c480, %c0_100] : memref<800x256xf32, #tpu.memory_space<vmem>>, vector<32x256xf32>
    tpu.vector_store %arg15[%c480, %c0_100], %190 {strides = array<i32>} : memref<800x256xf32, #tpu.memory_space<vmem>>, vector<32x256xf32>,
    %c241_i32_101 = arith.constant 241 : i32
    %192 = tpu.dynamic_rotate %130 by %c241_i32_101 dim 1 : vector<32x256xf32>, i32 -> vector<32x256xf32>
    %193 = vector.broadcast %15 : vector<1x256xf32> to vector<32x256xf32>
    %194 = arith.mulf %192, %193 : vector<32x256xf32>
    %c512 = arith.constant 512 : index
    %c0_102 = arith.constant 0 : index
    %195 = vector.load %arg15[%c512, %c0_102] : memref<800x256xf32, #tpu.memory_space<vmem>>, vector<32x256xf32>
    tpu.vector_store %arg15[%c512, %c0_102], %194 {strides = array<i32>} : memref<800x256xf32, #tpu.memory_space<vmem>>, vector<32x256xf32>,
    %c240_i32_103 = arith.constant 240 : i32
    %196 = tpu.dynamic_rotate %130 by %c240_i32_103 dim 1 : vector<32x256xf32>, i32 -> vector<32x256xf32>
    %197 = vector.broadcast %16 : vector<1x256xf32> to vector<32x256xf32>
    %198 = arith.mulf %196, %197 : vector<32x256xf32>
    %c544 = arith.constant 544 : index
    %c0_104 = arith.constant 0 : index
    %199 = vector.load %arg15[%c544, %c0_104] : memref<800x256xf32, #tpu.memory_space<vmem>>, vector<32x256xf32>
    tpu.vector_store %arg15[%c544, %c0_104], %198 {strides = array<i32>} : memref<800x256xf32, #tpu.memory_space<vmem>>, vector<32x256xf32>,
    %c239_i32_105 = arith.constant 239 : i32
    %200 = tpu.dynamic_rotate %130 by %c239_i32_105 dim 1 : vector<32x256xf32>, i32 -> vector<32x256xf32>
    %201 = vector.broadcast %17 : vector<1x256xf32> to vector<32x256xf32>
    %202 = arith.mulf %200, %201 : vector<32x256xf32>
    %c576 = arith.constant 576 : index
    %c0_106 = arith.constant 0 : index
    %203 = vector.load %arg15[%c576, %c0_106] : memref<800x256xf32, #tpu.memory_space<vmem>>, vector<32x256xf32>
    tpu.vector_store %arg15[%c576, %c0_106], %202 {strides = array<i32>} : memref<800x256xf32, #tpu.memory_space<vmem>>, vector<32x256xf32>,
    %c238_i32_107 = arith.constant 238 : i32
    %204 = tpu.dynamic_rotate %130 by %c238_i32_107 dim 1 : vector<32x256xf32>, i32 -> vector<32x256xf32>
    %205 = vector.broadcast %18 : vector<1x256xf32> to vector<32x256xf32>
    %206 = arith.mulf %204, %205 : vector<32x256xf32>
    %c608 = arith.constant 608 : index
    %c0_108 = arith.constant 0 : index
    %207 = vector.load %arg15[%c608, %c0_108] : memref<800x256xf32, #tpu.memory_space<vmem>>, vector<32x256xf32>
    tpu.vector_store %arg15[%c608, %c0_108], %206 {strides = array<i32>} : memref<800x256xf32, #tpu.memory_space<vmem>>, vector<32x256xf32>,
    %c226_i32_109 = arith.constant 226 : i32
    %208 = tpu.dynamic_rotate %130 by %c226_i32_109 dim 1 : vector<32x256xf32>, i32 -> vector<32x256xf32>
    %209 = vector.broadcast %19 : vector<1x256xf32> to vector<32x256xf32>
    %210 = arith.mulf %208, %209 : vector<32x256xf32>
    %c640 = arith.constant 640 : index
    %c0_110 = arith.constant 0 : index
    %211 = vector.load %arg15[%c640, %c0_110] : memref<800x256xf32, #tpu.memory_space<vmem>>, vector<32x256xf32>
    tpu.vector_store %arg15[%c640, %c0_110], %210 {strides = array<i32>} : memref<800x256xf32, #tpu.memory_space<vmem>>, vector<32x256xf32>,
    %c225_i32_111 = arith.constant 225 : i32
    %212 = tpu.dynamic_rotate %130 by %c225_i32_111 dim 1 : vector<32x256xf32>, i32 -> vector<32x256xf32>
    %213 = vector.broadcast %20 : vector<1x256xf32> to vector<32x256xf32>
    %214 = arith.mulf %212, %213 : vector<32x256xf32>
    %c672 = arith.constant 672 : index
    %c0_112 = arith.constant 0 : index
    %215 = vector.load %arg15[%c672, %c0_112] : memref<800x256xf32, #tpu.memory_space<vmem>>, vector<32x256xf32>
    tpu.vector_store %arg15[%c672, %c0_112], %214 {strides = array<i32>} : memref<800x256xf32, #tpu.memory_space<vmem>>, vector<32x256xf32>,
    %c224_i32_113 = arith.constant 224 : i32
    %216 = tpu.dynamic_rotate %130 by %c224_i32_113 dim 1 : vector<32x256xf32>, i32 -> vector<32x256xf32>
    %217 = vector.broadcast %21 : vector<1x256xf32> to vector<32x256xf32>
    %218 = arith.mulf %216, %217 : vector<32x256xf32>
    %c704 = arith.constant 704 : index
    %c0_114 = arith.constant 0 : index
    %219 = vector.load %arg15[%c704, %c0_114] : memref<800x256xf32, #tpu.memory_space<vmem>>, vector<32x256xf32>
    tpu.vector_store %arg15[%c704, %c0_114], %218 {strides = array<i32>} : memref<800x256xf32, #tpu.memory_space<vmem>>, vector<32x256xf32>,
    %c223_i32_115 = arith.constant 223 : i32
    %220 = tpu.dynamic_rotate %130 by %c223_i32_115 dim 1 : vector<32x256xf32>, i32 -> vector<32x256xf32>
    %221 = vector.broadcast %22 : vector<1x256xf32> to vector<32x256xf32>
    %222 = arith.mulf %220, %221 : vector<32x256xf32>
    %c736 = arith.constant 736 : index
    %c0_116 = arith.constant 0 : index
    %223 = vector.load %arg15[%c736, %c0_116] : memref<800x256xf32, #tpu.memory_space<vmem>>, vector<32x256xf32>
    tpu.vector_store %arg15[%c736, %c0_116], %222 {strides = array<i32>} : memref<800x256xf32, #tpu.memory_space<vmem>>, vector<32x256xf32>,
    %c222_i32_117 = arith.constant 222 : i32
    %224 = tpu.dynamic_rotate %130 by %c222_i32_117 dim 1 : vector<32x256xf32>, i32 -> vector<32x256xf32>
    %225 = vector.broadcast %23 : vector<1x256xf32> to vector<32x256xf32>
    %226 = arith.mulf %224, %225 : vector<32x256xf32>
    %c768 = arith.constant 768 : index
    %c0_118 = arith.constant 0 : index
    %227 = vector.load %arg15[%c768, %c0_118] : memref<800x256xf32, #tpu.memory_space<vmem>>, vector<32x256xf32>
    tpu.vector_store %arg15[%c768, %c0_118], %226 {strides = array<i32>} : memref<800x256xf32, #tpu.memory_space<vmem>>, vector<32x256xf32>,
    %c0_119 = arith.constant 0 : index
    %c0_120 = arith.constant 0 : index
    %228 = vector.load %arg4[%c0_119, %c0_120] : memref<32x800xf32, #tpu.memory_space<vmem>>, vector<32x800xf32>
    %c0_121 = arith.constant 0 : index
    %c0_122 = arith.constant 0 : index
    %229 = vector.load %arg15[%c0_121, %c0_122] : memref<800x256xf32, #tpu.memory_space<vmem>>, vector<800x256xf32>
    %cst_123 = arith.constant dense<0.000000e+00> : vector<32x256xf32>
    %230 = tpu.matmul %228, %229, %cst_123 {dimension_numbers = #tpu.dot_dimension_numbers<[1], [0], [0], [1], [0, 0, 1, 1], [], []>} : vector<32x800xf32>, vector<800x256xf32>, vector<32x256xf32> -> vector<32x256xf32>
    %c0_124 = arith.constant 0 : index
    %c0_125 = arith.constant 0 : index
    %231 = vector.load %arg9[%c0_124, %c0_125] : memref<32x1xf32, #tpu.memory_space<vmem>>, vector<32x1xf32>
    %232 = vector.broadcast %231 : vector<32x1xf32> to vector<32x256xf32>
    %233 = arith.addf %230, %232 : vector<32x256xf32>
    %cst_126 = arith.constant 0.000000e+00 : f32
    %234 = vector.broadcast %cst_126 : f32 to vector<32x256xf32>
    %235 = arith.maximumf %233, %234 : vector<32x256xf32>
    %c34_i32_127 = arith.constant 34 : i32
    %236 = tpu.dynamic_rotate %235 by %c34_i32_127 dim 1 : vector<32x256xf32>, i32 -> vector<32x256xf32>
    %237 = vector.broadcast %0 : vector<1x256xf32> to vector<32x256xf32>
    %238 = arith.mulf %236, %237 : vector<32x256xf32>
    %c0_128 = arith.constant 0 : index
    %c0_129 = arith.constant 0 : index
    %239 = vector.load %arg15[%c0_128, %c0_129] : memref<800x256xf32, #tpu.memory_space<vmem>>, vector<32x256xf32>
    tpu.vector_store %arg15[%c0_128, %c0_129], %238 {strides = array<i32>} : memref<800x256xf32, #tpu.memory_space<vmem>>, vector<32x256xf32>,
    %c33_i32_130 = arith.constant 33 : i32
    %240 = tpu.dynamic_rotate %235 by %c33_i32_130 dim 1 : vector<32x256xf32>, i32 -> vector<32x256xf32>
    %241 = vector.broadcast %1 : vector<1x256xf32> to vector<32x256xf32>
    %242 = arith.mulf %240, %241 : vector<32x256xf32>
    %c32_131 = arith.constant 32 : index
    %c0_132 = arith.constant 0 : index
    %243 = vector.load %arg15[%c32_131, %c0_132] : memref<800x256xf32, #tpu.memory_space<vmem>>, vector<32x256xf32>
    tpu.vector_store %arg15[%c32_131, %c0_132], %242 {strides = array<i32>} : memref<800x256xf32, #tpu.memory_space<vmem>>, vector<32x256xf32>,
    %c32_i32_133 = arith.constant 32 : i32
    %244 = tpu.dynamic_rotate %235 by %c32_i32_133 dim 1 : vector<32x256xf32>, i32 -> vector<32x256xf32>
    %245 = vector.broadcast %2 : vector<1x256xf32> to vector<32x256xf32>
    %246 = arith.mulf %244, %245 : vector<32x256xf32>
    %c64_134 = arith.constant 64 : index
    %c0_135 = arith.constant 0 : index
    %247 = vector.load %arg15[%c64_134, %c0_135] : memref<800x256xf32, #tpu.memory_space<vmem>>, vector<32x256xf32>
    tpu.vector_store %arg15[%c64_134, %c0_135], %246 {strides = array<i32>} : memref<800x256xf32, #tpu.memory_space<vmem>>, vector<32x256xf32>,
    %c31_i32_136 = arith.constant 31 : i32
    %248 = tpu.dynamic_rotate %235 by %c31_i32_136 dim 1 : vector<32x256xf32>, i32 -> vector<32x256xf32>
    %249 = vector.broadcast %3 : vector<1x256xf32> to vector<32x256xf32>
    %250 = arith.mulf %248, %249 : vector<32x256xf32>
    %c96_137 = arith.constant 96 : index
    %c0_138 = arith.constant 0 : index
    %251 = vector.load %arg15[%c96_137, %c0_138] : memref<800x256xf32, #tpu.memory_space<vmem>>, vector<32x256xf32>
    tpu.vector_store %arg15[%c96_137, %c0_138], %250 {strides = array<i32>} : memref<800x256xf32, #tpu.memory_space<vmem>>, vector<32x256xf32>,
    %c30_i32_139 = arith.constant 30 : i32
    %252 = tpu.dynamic_rotate %235 by %c30_i32_139 dim 1 : vector<32x256xf32>, i32 -> vector<32x256xf32>
    %253 = vector.broadcast %4 : vector<1x256xf32> to vector<32x256xf32>
    %254 = arith.mulf %252, %253 : vector<32x256xf32>
    %c128_140 = arith.constant 128 : index
    %c0_141 = arith.constant 0 : index
    %255 = vector.load %arg15[%c128_140, %c0_141] : memref<800x256xf32, #tpu.memory_space<vmem>>, vector<32x256xf32>
    tpu.vector_store %arg15[%c128_140, %c0_141], %254 {strides = array<i32>} : memref<800x256xf32, #tpu.memory_space<vmem>>, vector<32x256xf32>,
    %c18_i32_142 = arith.constant 18 : i32
    %256 = tpu.dynamic_rotate %235 by %c18_i32_142 dim 1 : vector<32x256xf32>, i32 -> vector<32x256xf32>
    %257 = vector.broadcast %5 : vector<1x256xf32> to vector<32x256xf32>
    %258 = arith.mulf %256, %257 : vector<32x256xf32>
    %c160_143 = arith.constant 160 : index
    %c0_144 = arith.constant 0 : index
    %259 = vector.load %arg15[%c160_143, %c0_144] : memref<800x256xf32, #tpu.memory_space<vmem>>, vector<32x256xf32>
    tpu.vector_store %arg15[%c160_143, %c0_144], %258 {strides = array<i32>} : memref<800x256xf32, #tpu.memory_space<vmem>>, vector<32x256xf32>,
    %c17_i32_145 = arith.constant 17 : i32
    %260 = tpu.dynamic_rotate %235 by %c17_i32_145 dim 1 : vector<32x256xf32>, i32 -> vector<32x256xf32>
    %261 = vector.broadcast %6 : vector<1x256xf32> to vector<32x256xf32>
    %262 = arith.mulf %260, %261 : vector<32x256xf32>
    %c192_146 = arith.constant 192 : index
    %c0_147 = arith.constant 0 : index
    %263 = vector.load %arg15[%c192_146, %c0_147] : memref<800x256xf32, #tpu.memory_space<vmem>>, vector<32x256xf32>
    tpu.vector_store %arg15[%c192_146, %c0_147], %262 {strides = array<i32>} : memref<800x256xf32, #tpu.memory_space<vmem>>, vector<32x256xf32>,
    %c16_i32_148 = arith.constant 16 : i32
    %264 = tpu.dynamic_rotate %235 by %c16_i32_148 dim 1 : vector<32x256xf32>, i32 -> vector<32x256xf32>
    %265 = vector.broadcast %7 : vector<1x256xf32> to vector<32x256xf32>
    %266 = arith.mulf %264, %265 : vector<32x256xf32>
    %c224_149 = arith.constant 224 : index
    %c0_150 = arith.constant 0 : index
    %267 = vector.load %arg15[%c224_149, %c0_150] : memref<800x256xf32, #tpu.memory_space<vmem>>, vector<32x256xf32>
    tpu.vector_store %arg15[%c224_149, %c0_150], %266 {strides = array<i32>} : memref<800x256xf32, #tpu.memory_space<vmem>>, vector<32x256xf32>,
    %c15_i32_151 = arith.constant 15 : i32
    %268 = tpu.dynamic_rotate %235 by %c15_i32_151 dim 1 : vector<32x256xf32>, i32 -> vector<32x256xf32>
    %269 = vector.broadcast %8 : vector<1x256xf32> to vector<32x256xf32>
    %270 = arith.mulf %268, %269 : vector<32x256xf32>
    %c256_152 = arith.constant 256 : index
    %c0_153 = arith.constant 0 : index
    %271 = vector.load %arg15[%c256_152, %c0_153] : memref<800x256xf32, #tpu.memory_space<vmem>>, vector<32x256xf32>
    tpu.vector_store %arg15[%c256_152, %c0_153], %270 {strides = array<i32>} : memref<800x256xf32, #tpu.memory_space<vmem>>, vector<32x256xf32>,
    %c14_i32_154 = arith.constant 14 : i32
    %272 = tpu.dynamic_rotate %235 by %c14_i32_154 dim 1 : vector<32x256xf32>, i32 -> vector<32x256xf32>
    %273 = vector.broadcast %9 : vector<1x256xf32> to vector<32x256xf32>
    %274 = arith.mulf %272, %273 : vector<32x256xf32>
    %c288_155 = arith.constant 288 : index
    %c0_156 = arith.constant 0 : index
    %275 = vector.load %arg15[%c288_155, %c0_156] : memref<800x256xf32, #tpu.memory_space<vmem>>, vector<32x256xf32>
    tpu.vector_store %arg15[%c288_155, %c0_156], %274 {strides = array<i32>} : memref<800x256xf32, #tpu.memory_space<vmem>>, vector<32x256xf32>,
    %c2_i32_157 = arith.constant 2 : i32
    %276 = tpu.dynamic_rotate %235 by %c2_i32_157 dim 1 : vector<32x256xf32>, i32 -> vector<32x256xf32>
    %277 = vector.broadcast %10 : vector<1x256xf32> to vector<32x256xf32>
    %278 = arith.mulf %276, %277 : vector<32x256xf32>
    %c320_158 = arith.constant 320 : index
    %c0_159 = arith.constant 0 : index
    %279 = vector.load %arg15[%c320_158, %c0_159] : memref<800x256xf32, #tpu.memory_space<vmem>>, vector<32x256xf32>
    tpu.vector_store %arg15[%c320_158, %c0_159], %278 {strides = array<i32>} : memref<800x256xf32, #tpu.memory_space<vmem>>, vector<32x256xf32>,
    %c1_i32_160 = arith.constant 1 : i32
    %280 = tpu.dynamic_rotate %235 by %c1_i32_160 dim 1 : vector<32x256xf32>, i32 -> vector<32x256xf32>
    %281 = vector.broadcast %11 : vector<1x256xf32> to vector<32x256xf32>
    %282 = arith.mulf %280, %281 : vector<32x256xf32>
    %c352_161 = arith.constant 352 : index
    %c0_162 = arith.constant 0 : index
    %283 = vector.load %arg15[%c352_161, %c0_162] : memref<800x256xf32, #tpu.memory_space<vmem>>, vector<32x256xf32>
    tpu.vector_store %arg15[%c352_161, %c0_162], %282 {strides = array<i32>} : memref<800x256xf32, #tpu.memory_space<vmem>>, vector<32x256xf32>,
    %c384_163 = arith.constant 384 : index
    %c0_164 = arith.constant 0 : index
    %284 = vector.load %arg15[%c384_163, %c0_164] : memref<800x256xf32, #tpu.memory_space<vmem>>, vector<32x256xf32>
    tpu.vector_store %arg15[%c384_163, %c0_164], %235 {strides = array<i32>} : memref<800x256xf32, #tpu.memory_space<vmem>>, vector<32x256xf32>,
    %c255_i32_165 = arith.constant 255 : i32
    %285 = tpu.dynamic_rotate %235 by %c255_i32_165 dim 1 : vector<32x256xf32>, i32 -> vector<32x256xf32>
    %286 = vector.broadcast %12 : vector<1x256xf32> to vector<32x256xf32>
    %287 = arith.mulf %285, %286 : vector<32x256xf32>
    %c416_166 = arith.constant 416 : index
    %c0_167 = arith.constant 0 : index
    %288 = vector.load %arg15[%c416_166, %c0_167] : memref<800x256xf32, #tpu.memory_space<vmem>>, vector<32x256xf32>
    tpu.vector_store %arg15[%c416_166, %c0_167], %287 {strides = array<i32>} : memref<800x256xf32, #tpu.memory_space<vmem>>, vector<32x256xf32>,
    %c254_i32_168 = arith.constant 254 : i32
    %289 = tpu.dynamic_rotate %235 by %c254_i32_168 dim 1 : vector<32x256xf32>, i32 -> vector<32x256xf32>
    %290 = vector.broadcast %13 : vector<1x256xf32> to vector<32x256xf32>
    %291 = arith.mulf %289, %290 : vector<32x256xf32>
    %c448_169 = arith.constant 448 : index
    %c0_170 = arith.constant 0 : index
    %292 = vector.load %arg15[%c448_169, %c0_170] : memref<800x256xf32, #tpu.memory_space<vmem>>, vector<32x256xf32>
    tpu.vector_store %arg15[%c448_169, %c0_170], %291 {strides = array<i32>} : memref<800x256xf32, #tpu.memory_space<vmem>>, vector<32x256xf32>,
    %c242_i32_171 = arith.constant 242 : i32
    %293 = tpu.dynamic_rotate %235 by %c242_i32_171 dim 1 : vector<32x256xf32>, i32 -> vector<32x256xf32>
    %294 = vector.broadcast %14 : vector<1x256xf32> to vector<32x256xf32>
    %295 = arith.mulf %293, %294 : vector<32x256xf32>
    %c480_172 = arith.constant 480 : index
    %c0_173 = arith.constant 0 : index
    %296 = vector.load %arg15[%c480_172, %c0_173] : memref<800x256xf32, #tpu.memory_space<vmem>>, vector<32x256xf32>
    tpu.vector_store %arg15[%c480_172, %c0_173], %295 {strides = array<i32>} : memref<800x256xf32, #tpu.memory_space<vmem>>, vector<32x256xf32>,
    %c241_i32_174 = arith.constant 241 : i32
    %297 = tpu.dynamic_rotate %235 by %c241_i32_174 dim 1 : vector<32x256xf32>, i32 -> vector<32x256xf32>
    %298 = vector.broadcast %15 : vector<1x256xf32> to vector<32x256xf32>
    %299 = arith.mulf %297, %298 : vector<32x256xf32>
    %c512_175 = arith.constant 512 : index
    %c0_176 = arith.constant 0 : index
    %300 = vector.load %arg15[%c512_175, %c0_176] : memref<800x256xf32, #tpu.memory_space<vmem>>, vector<32x256xf32>
    tpu.vector_store %arg15[%c512_175, %c0_176], %299 {strides = array<i32>} : memref<800x256xf32, #tpu.memory_space<vmem>>, vector<32x256xf32>,
    %c240_i32_177 = arith.constant 240 : i32
    %301 = tpu.dynamic_rotate %235 by %c240_i32_177 dim 1 : vector<32x256xf32>, i32 -> vector<32x256xf32>
    %302 = vector.broadcast %16 : vector<1x256xf32> to vector<32x256xf32>
    %303 = arith.mulf %301, %302 : vector<32x256xf32>
    %c544_178 = arith.constant 544 : index
    %c0_179 = arith.constant 0 : index
    %304 = vector.load %arg15[%c544_178, %c0_179] : memref<800x256xf32, #tpu.memory_space<vmem>>, vector<32x256xf32>
    tpu.vector_store %arg15[%c544_178, %c0_179], %303 {strides = array<i32>} : memref<800x256xf32, #tpu.memory_space<vmem>>, vector<32x256xf32>,
    %c239_i32_180 = arith.constant 239 : i32
    %305 = tpu.dynamic_rotate %235 by %c239_i32_180 dim 1 : vector<32x256xf32>, i32 -> vector<32x256xf32>
    %306 = vector.broadcast %17 : vector<1x256xf32> to vector<32x256xf32>
    %307 = arith.mulf %305, %306 : vector<32x256xf32>
    %c576_181 = arith.constant 576 : index
    %c0_182 = arith.constant 0 : index
    %308 = vector.load %arg15[%c576_181, %c0_182] : memref<800x256xf32, #tpu.memory_space<vmem>>, vector<32x256xf32>
    tpu.vector_store %arg15[%c576_181, %c0_182], %307 {strides = array<i32>} : memref<800x256xf32, #tpu.memory_space<vmem>>, vector<32x256xf32>,
    %c238_i32_183 = arith.constant 238 : i32
    %309 = tpu.dynamic_rotate %235 by %c238_i32_183 dim 1 : vector<32x256xf32>, i32 -> vector<32x256xf32>
    %310 = vector.broadcast %18 : vector<1x256xf32> to vector<32x256xf32>
    %311 = arith.mulf %309, %310 : vector<32x256xf32>
    %c608_184 = arith.constant 608 : index
    %c0_185 = arith.constant 0 : index
    %312 = vector.load %arg15[%c608_184, %c0_185] : memref<800x256xf32, #tpu.memory_space<vmem>>, vector<32x256xf32>
    tpu.vector_store %arg15[%c608_184, %c0_185], %311 {strides = array<i32>} : memref<800x256xf32, #tpu.memory_space<vmem>>, vector<32x256xf32>,
    %c226_i32_186 = arith.constant 226 : i32
    %313 = tpu.dynamic_rotate %235 by %c226_i32_186 dim 1 : vector<32x256xf32>, i32 -> vector<32x256xf32>
    %314 = vector.broadcast %19 : vector<1x256xf32> to vector<32x256xf32>
    %315 = arith.mulf %313, %314 : vector<32x256xf32>
    %c640_187 = arith.constant 640 : index
    %c0_188 = arith.constant 0 : index
    %316 = vector.load %arg15[%c640_187, %c0_188] : memref<800x256xf32, #tpu.memory_space<vmem>>, vector<32x256xf32>
    tpu.vector_store %arg15[%c640_187, %c0_188], %315 {strides = array<i32>} : memref<800x256xf32, #tpu.memory_space<vmem>>, vector<32x256xf32>,
    %c225_i32_189 = arith.constant 225 : i32
    %317 = tpu.dynamic_rotate %235 by %c225_i32_189 dim 1 : vector<32x256xf32>, i32 -> vector<32x256xf32>
    %318 = vector.broadcast %20 : vector<1x256xf32> to vector<32x256xf32>
    %319 = arith.mulf %317, %318 : vector<32x256xf32>
    %c672_190 = arith.constant 672 : index
    %c0_191 = arith.constant 0 : index
    %320 = vector.load %arg15[%c672_190, %c0_191] : memref<800x256xf32, #tpu.memory_space<vmem>>, vector<32x256xf32>
    tpu.vector_store %arg15[%c672_190, %c0_191], %319 {strides = array<i32>} : memref<800x256xf32, #tpu.memory_space<vmem>>, vector<32x256xf32>,
    %c224_i32_192 = arith.constant 224 : i32
    %321 = tpu.dynamic_rotate %235 by %c224_i32_192 dim 1 : vector<32x256xf32>, i32 -> vector<32x256xf32>
    %322 = vector.broadcast %21 : vector<1x256xf32> to vector<32x256xf32>
    %323 = arith.mulf %321, %322 : vector<32x256xf32>
    %c704_193 = arith.constant 704 : index
    %c0_194 = arith.constant 0 : index
    %324 = vector.load %arg15[%c704_193, %c0_194] : memref<800x256xf32, #tpu.memory_space<vmem>>, vector<32x256xf32>
    tpu.vector_store %arg15[%c704_193, %c0_194], %323 {strides = array<i32>} : memref<800x256xf32, #tpu.memory_space<vmem>>, vector<32x256xf32>,
    %c223_i32_195 = arith.constant 223 : i32
    %325 = tpu.dynamic_rotate %235 by %c223_i32_195 dim 1 : vector<32x256xf32>, i32 -> vector<32x256xf32>
    %326 = vector.broadcast %22 : vector<1x256xf32> to vector<32x256xf32>
    %327 = arith.mulf %325, %326 : vector<32x256xf32>
    %c736_196 = arith.constant 736 : index
    %c0_197 = arith.constant 0 : index
    %328 = vector.load %arg15[%c736_196, %c0_197] : memref<800x256xf32, #tpu.memory_space<vmem>>, vector<32x256xf32>
    tpu.vector_store %arg15[%c736_196, %c0_197], %327 {strides = array<i32>} : memref<800x256xf32, #tpu.memory_space<vmem>>, vector<32x256xf32>,
    %c222_i32_198 = arith.constant 222 : i32
    %329 = tpu.dynamic_rotate %235 by %c222_i32_198 dim 1 : vector<32x256xf32>, i32 -> vector<32x256xf32>
    %330 = vector.broadcast %23 : vector<1x256xf32> to vector<32x256xf32>
    %331 = arith.mulf %329, %330 : vector<32x256xf32>
    %c768_199 = arith.constant 768 : index
    %c0_200 = arith.constant 0 : index
    %332 = vector.load %arg15[%c768_199, %c0_200] : memref<800x256xf32, #tpu.memory_space<vmem>>, vector<32x256xf32>
    tpu.vector_store %arg15[%c768_199, %c0_200], %331 {strides = array<i32>} : memref<800x256xf32, #tpu.memory_space<vmem>>, vector<32x256xf32>,
    %c0_201 = arith.constant 0 : index
    %c0_202 = arith.constant 0 : index
    %333 = vector.load %arg5[%c0_201, %c0_202] : memref<32x800xf32, #tpu.memory_space<vmem>>, vector<32x800xf32>
    %c0_203 = arith.constant 0 : index
    %c0_204 = arith.constant 0 : index
    %334 = vector.load %arg15[%c0_203, %c0_204] : memref<800x256xf32, #tpu.memory_space<vmem>>, vector<800x256xf32>
    %cst_205 = arith.constant dense<0.000000e+00> : vector<32x256xf32>
    %335 = tpu.matmul %333, %334, %cst_205 {dimension_numbers = #tpu.dot_dimension_numbers<[1], [0], [0], [1], [0, 0, 1, 1], [], []>} : vector<32x800xf32>, vector<800x256xf32>, vector<32x256xf32> -> vector<32x256xf32>
    %c0_206 = arith.constant 0 : index
    %c0_207 = arith.constant 0 : index
    %336 = vector.load %arg10[%c0_206, %c0_207] : memref<32x1xf32, #tpu.memory_space<vmem>>, vector<32x1xf32>
    %337 = vector.broadcast %336 : vector<32x1xf32> to vector<32x256xf32>
    %338 = arith.addf %335, %337 : vector<32x256xf32>
    %cst_208 = arith.constant 0.000000e+00 : f32
    %339 = vector.broadcast %cst_208 : f32 to vector<32x256xf32>
    %340 = arith.maximumf %338, %339 : vector<32x256xf32>
    %c34_i32_209 = arith.constant 34 : i32
    %341 = tpu.dynamic_rotate %340 by %c34_i32_209 dim 1 : vector<32x256xf32>, i32 -> vector<32x256xf32>
    %342 = vector.broadcast %0 : vector<1x256xf32> to vector<32x256xf32>
    %343 = arith.mulf %341, %342 : vector<32x256xf32>
    %c0_210 = arith.constant 0 : index
    %c0_211 = arith.constant 0 : index
    %344 = vector.load %arg15[%c0_210, %c0_211] : memref<800x256xf32, #tpu.memory_space<vmem>>, vector<32x256xf32>
    tpu.vector_store %arg15[%c0_210, %c0_211], %343 {strides = array<i32>} : memref<800x256xf32, #tpu.memory_space<vmem>>, vector<32x256xf32>,
    %c33_i32_212 = arith.constant 33 : i32
    %345 = tpu.dynamic_rotate %340 by %c33_i32_212 dim 1 : vector<32x256xf32>, i32 -> vector<32x256xf32>
    %346 = vector.broadcast %1 : vector<1x256xf32> to vector<32x256xf32>
    %347 = arith.mulf %345, %346 : vector<32x256xf32>
    %c32_213 = arith.constant 32 : index
    %c0_214 = arith.constant 0 : index
    %348 = vector.load %arg15[%c32_213, %c0_214] : memref<800x256xf32, #tpu.memory_space<vmem>>, vector<32x256xf32>
    tpu.vector_store %arg15[%c32_213, %c0_214], %347 {strides = array<i32>} : memref<800x256xf32, #tpu.memory_space<vmem>>, vector<32x256xf32>,
    %c32_i32_215 = arith.constant 32 : i32
    %349 = tpu.dynamic_rotate %340 by %c32_i32_215 dim 1 : vector<32x256xf32>, i32 -> vector<32x256xf32>
    %350 = vector.broadcast %2 : vector<1x256xf32> to vector<32x256xf32>
    %351 = arith.mulf %349, %350 : vector<32x256xf32>
    %c64_216 = arith.constant 64 : index
    %c0_217 = arith.constant 0 : index
    %352 = vector.load %arg15[%c64_216, %c0_217] : memref<800x256xf32, #tpu.memory_space<vmem>>, vector<32x256xf32>
    tpu.vector_store %arg15[%c64_216, %c0_217], %351 {strides = array<i32>} : memref<800x256xf32, #tpu.memory_space<vmem>>, vector<32x256xf32>,
    %c31_i32_218 = arith.constant 31 : i32
    %353 = tpu.dynamic_rotate %340 by %c31_i32_218 dim 1 : vector<32x256xf32>, i32 -> vector<32x256xf32>
    %354 = vector.broadcast %3 : vector<1x256xf32> to vector<32x256xf32>
    %355 = arith.mulf %353, %354 : vector<32x256xf32>
    %c96_219 = arith.constant 96 : index
    %c0_220 = arith.constant 0 : index
    %356 = vector.load %arg15[%c96_219, %c0_220] : memref<800x256xf32, #tpu.memory_space<vmem>>, vector<32x256xf32>
    tpu.vector_store %arg15[%c96_219, %c0_220], %355 {strides = array<i32>} : memref<800x256xf32, #tpu.memory_space<vmem>>, vector<32x256xf32>,
    %c30_i32_221 = arith.constant 30 : i32
    %357 = tpu.dynamic_rotate %340 by %c30_i32_221 dim 1 : vector<32x256xf32>, i32 -> vector<32x256xf32>
    %358 = vector.broadcast %4 : vector<1x256xf32> to vector<32x256xf32>
    %359 = arith.mulf %357, %358 : vector<32x256xf32>
    %c128_222 = arith.constant 128 : index
    %c0_223 = arith.constant 0 : index
    %360 = vector.load %arg15[%c128_222, %c0_223] : memref<800x256xf32, #tpu.memory_space<vmem>>, vector<32x256xf32>
    tpu.vector_store %arg15[%c128_222, %c0_223], %359 {strides = array<i32>} : memref<800x256xf32, #tpu.memory_space<vmem>>, vector<32x256xf32>,
    %c18_i32_224 = arith.constant 18 : i32
    %361 = tpu.dynamic_rotate %340 by %c18_i32_224 dim 1 : vector<32x256xf32>, i32 -> vector<32x256xf32>
    %362 = vector.broadcast %5 : vector<1x256xf32> to vector<32x256xf32>
    %363 = arith.mulf %361, %362 : vector<32x256xf32>
    %c160_225 = arith.constant 160 : index
    %c0_226 = arith.constant 0 : index
    %364 = vector.load %arg15[%c160_225, %c0_226] : memref<800x256xf32, #tpu.memory_space<vmem>>, vector<32x256xf32>
    tpu.vector_store %arg15[%c160_225, %c0_226], %363 {strides = array<i32>} : memref<800x256xf32, #tpu.memory_space<vmem>>, vector<32x256xf32>,
    %c17_i32_227 = arith.constant 17 : i32
    %365 = tpu.dynamic_rotate %340 by %c17_i32_227 dim 1 : vector<32x256xf32>, i32 -> vector<32x256xf32>
    %366 = vector.broadcast %6 : vector<1x256xf32> to vector<32x256xf32>
    %367 = arith.mulf %365, %366 : vector<32x256xf32>
    %c192_228 = arith.constant 192 : index
    %c0_229 = arith.constant 0 : index
    %368 = vector.load %arg15[%c192_228, %c0_229] : memref<800x256xf32, #tpu.memory_space<vmem>>, vector<32x256xf32>
    tpu.vector_store %arg15[%c192_228, %c0_229], %367 {strides = array<i32>} : memref<800x256xf32, #tpu.memory_space<vmem>>, vector<32x256xf32>,
    %c16_i32_230 = arith.constant 16 : i32
    %369 = tpu.dynamic_rotate %340 by %c16_i32_230 dim 1 : vector<32x256xf32>, i32 -> vector<32x256xf32>
    %370 = vector.broadcast %7 : vector<1x256xf32> to vector<32x256xf32>
    %371 = arith.mulf %369, %370 : vector<32x256xf32>
    %c224_231 = arith.constant 224 : index
    %c0_232 = arith.constant 0 : index
    %372 = vector.load %arg15[%c224_231, %c0_232] : memref<800x256xf32, #tpu.memory_space<vmem>>, vector<32x256xf32>
    tpu.vector_store %arg15[%c224_231, %c0_232], %371 {strides = array<i32>} : memref<800x256xf32, #tpu.memory_space<vmem>>, vector<32x256xf32>,
    %c15_i32_233 = arith.constant 15 : i32
    %373 = tpu.dynamic_rotate %340 by %c15_i32_233 dim 1 : vector<32x256xf32>, i32 -> vector<32x256xf32>
    %374 = vector.broadcast %8 : vector<1x256xf32> to vector<32x256xf32>
    %375 = arith.mulf %373, %374 : vector<32x256xf32>
    %c256_234 = arith.constant 256 : index
    %c0_235 = arith.constant 0 : index
    %376 = vector.load %arg15[%c256_234, %c0_235] : memref<800x256xf32, #tpu.memory_space<vmem>>, vector<32x256xf32>
    tpu.vector_store %arg15[%c256_234, %c0_235], %375 {strides = array<i32>} : memref<800x256xf32, #tpu.memory_space<vmem>>, vector<32x256xf32>,
    %c14_i32_236 = arith.constant 14 : i32
    %377 = tpu.dynamic_rotate %340 by %c14_i32_236 dim 1 : vector<32x256xf32>, i32 -> vector<32x256xf32>
    %378 = vector.broadcast %9 : vector<1x256xf32> to vector<32x256xf32>
    %379 = arith.mulf %377, %378 : vector<32x256xf32>
    %c288_237 = arith.constant 288 : index
    %c0_238 = arith.constant 0 : index
    %380 = vector.load %arg15[%c288_237, %c0_238] : memref<800x256xf32, #tpu.memory_space<vmem>>, vector<32x256xf32>
    tpu.vector_store %arg15[%c288_237, %c0_238], %379 {strides = array<i32>} : memref<800x256xf32, #tpu.memory_space<vmem>>, vector<32x256xf32>,
    %c2_i32_239 = arith.constant 2 : i32
    %381 = tpu.dynamic_rotate %340 by %c2_i32_239 dim 1 : vector<32x256xf32>, i32 -> vector<32x256xf32>
    %382 = vector.broadcast %10 : vector<1x256xf32> to vector<32x256xf32>
    %383 = arith.mulf %381, %382 : vector<32x256xf32>
    %c320_240 = arith.constant 320 : index
    %c0_241 = arith.constant 0 : index
    %384 = vector.load %arg15[%c320_240, %c0_241] : memref<800x256xf32, #tpu.memory_space<vmem>>, vector<32x256xf32>
    tpu.vector_store %arg15[%c320_240, %c0_241], %383 {strides = array<i32>} : memref<800x256xf32, #tpu.memory_space<vmem>>, vector<32x256xf32>,
    %c1_i32_242 = arith.constant 1 : i32
    %385 = tpu.dynamic_rotate %340 by %c1_i32_242 dim 1 : vector<32x256xf32>, i32 -> vector<32x256xf32>
    %386 = vector.broadcast %11 : vector<1x256xf32> to vector<32x256xf32>
    %387 = arith.mulf %385, %386 : vector<32x256xf32>
    %c352_243 = arith.constant 352 : index
    %c0_244 = arith.constant 0 : index
    %388 = vector.load %arg15[%c352_243, %c0_244] : memref<800x256xf32, #tpu.memory_space<vmem>>, vector<32x256xf32>
    tpu.vector_store %arg15[%c352_243, %c0_244], %387 {strides = array<i32>} : memref<800x256xf32, #tpu.memory_space<vmem>>, vector<32x256xf32>,
    %c384_245 = arith.constant 384 : index
    %c0_246 = arith.constant 0 : index
    %389 = vector.load %arg15[%c384_245, %c0_246] : memref<800x256xf32, #tpu.memory_space<vmem>>, vector<32x256xf32>
    tpu.vector_store %arg15[%c384_245, %c0_246], %340 {strides = array<i32>} : memref<800x256xf32, #tpu.memory_space<vmem>>, vector<32x256xf32>,
    %c255_i32_247 = arith.constant 255 : i32
    %390 = tpu.dynamic_rotate %340 by %c255_i32_247 dim 1 : vector<32x256xf32>, i32 -> vector<32x256xf32>
    %391 = vector.broadcast %12 : vector<1x256xf32> to vector<32x256xf32>
    %392 = arith.mulf %390, %391 : vector<32x256xf32>
    %c416_248 = arith.constant 416 : index
    %c0_249 = arith.constant 0 : index
    %393 = vector.load %arg15[%c416_248, %c0_249] : memref<800x256xf32, #tpu.memory_space<vmem>>, vector<32x256xf32>
    tpu.vector_store %arg15[%c416_248, %c0_249], %392 {strides = array<i32>} : memref<800x256xf32, #tpu.memory_space<vmem>>, vector<32x256xf32>,
    %c254_i32_250 = arith.constant 254 : i32
    %394 = tpu.dynamic_rotate %340 by %c254_i32_250 dim 1 : vector<32x256xf32>, i32 -> vector<32x256xf32>
    %395 = vector.broadcast %13 : vector<1x256xf32> to vector<32x256xf32>
    %396 = arith.mulf %394, %395 : vector<32x256xf32>
    %c448_251 = arith.constant 448 : index
    %c0_252 = arith.constant 0 : index
    %397 = vector.load %arg15[%c448_251, %c0_252] : memref<800x256xf32, #tpu.memory_space<vmem>>, vector<32x256xf32>
    tpu.vector_store %arg15[%c448_251, %c0_252], %396 {strides = array<i32>} : memref<800x256xf32, #tpu.memory_space<vmem>>, vector<32x256xf32>,
    %c242_i32_253 = arith.constant 242 : i32
    %398 = tpu.dynamic_rotate %340 by %c242_i32_253 dim 1 : vector<32x256xf32>, i32 -> vector<32x256xf32>
    %399 = vector.broadcast %14 : vector<1x256xf32> to vector<32x256xf32>
    %400 = arith.mulf %398, %399 : vector<32x256xf32>
    %c480_254 = arith.constant 480 : index
    %c0_255 = arith.constant 0 : index
    %401 = vector.load %arg15[%c480_254, %c0_255] : memref<800x256xf32, #tpu.memory_space<vmem>>, vector<32x256xf32>
    tpu.vector_store %arg15[%c480_254, %c0_255], %400 {strides = array<i32>} : memref<800x256xf32, #tpu.memory_space<vmem>>, vector<32x256xf32>,
    %c241_i32_256 = arith.constant 241 : i32
    %402 = tpu.dynamic_rotate %340 by %c241_i32_256 dim 1 : vector<32x256xf32>, i32 -> vector<32x256xf32>
    %403 = vector.broadcast %15 : vector<1x256xf32> to vector<32x256xf32>
    %404 = arith.mulf %402, %403 : vector<32x256xf32>
    %c512_257 = arith.constant 512 : index
    %c0_258 = arith.constant 0 : index
    %405 = vector.load %arg15[%c512_257, %c0_258] : memref<800x256xf32, #tpu.memory_space<vmem>>, vector<32x256xf32>
    tpu.vector_store %arg15[%c512_257, %c0_258], %404 {strides = array<i32>} : memref<800x256xf32, #tpu.memory_space<vmem>>, vector<32x256xf32>,
    %c240_i32_259 = arith.constant 240 : i32
    %406 = tpu.dynamic_rotate %340 by %c240_i32_259 dim 1 : vector<32x256xf32>, i32 -> vector<32x256xf32>
    %407 = vector.broadcast %16 : vector<1x256xf32> to vector<32x256xf32>
    %408 = arith.mulf %406, %407 : vector<32x256xf32>
    %c544_260 = arith.constant 544 : index
    %c0_261 = arith.constant 0 : index
    %409 = vector.load %arg15[%c544_260, %c0_261] : memref<800x256xf32, #tpu.memory_space<vmem>>, vector<32x256xf32>
    tpu.vector_store %arg15[%c544_260, %c0_261], %408 {strides = array<i32>} : memref<800x256xf32, #tpu.memory_space<vmem>>, vector<32x256xf32>,
    %c239_i32_262 = arith.constant 239 : i32
    %410 = tpu.dynamic_rotate %340 by %c239_i32_262 dim 1 : vector<32x256xf32>, i32 -> vector<32x256xf32>
    %411 = vector.broadcast %17 : vector<1x256xf32> to vector<32x256xf32>
    %412 = arith.mulf %410, %411 : vector<32x256xf32>
    %c576_263 = arith.constant 576 : index
    %c0_264 = arith.constant 0 : index
    %413 = vector.load %arg15[%c576_263, %c0_264] : memref<800x256xf32, #tpu.memory_space<vmem>>, vector<32x256xf32>
    tpu.vector_store %arg15[%c576_263, %c0_264], %412 {strides = array<i32>} : memref<800x256xf32, #tpu.memory_space<vmem>>, vector<32x256xf32>,
    %c238_i32_265 = arith.constant 238 : i32
    %414 = tpu.dynamic_rotate %340 by %c238_i32_265 dim 1 : vector<32x256xf32>, i32 -> vector<32x256xf32>
    %415 = vector.broadcast %18 : vector<1x256xf32> to vector<32x256xf32>
    %416 = arith.mulf %414, %415 : vector<32x256xf32>
    %c608_266 = arith.constant 608 : index
    %c0_267 = arith.constant 0 : index
    %417 = vector.load %arg15[%c608_266, %c0_267] : memref<800x256xf32, #tpu.memory_space<vmem>>, vector<32x256xf32>
    tpu.vector_store %arg15[%c608_266, %c0_267], %416 {strides = array<i32>} : memref<800x256xf32, #tpu.memory_space<vmem>>, vector<32x256xf32>,
    %c226_i32_268 = arith.constant 226 : i32
    %418 = tpu.dynamic_rotate %340 by %c226_i32_268 dim 1 : vector<32x256xf32>, i32 -> vector<32x256xf32>
    %419 = vector.broadcast %19 : vector<1x256xf32> to vector<32x256xf32>
    %420 = arith.mulf %418, %419 : vector<32x256xf32>
    %c640_269 = arith.constant 640 : index
    %c0_270 = arith.constant 0 : index
    %421 = vector.load %arg15[%c640_269, %c0_270] : memref<800x256xf32, #tpu.memory_space<vmem>>, vector<32x256xf32>
    tpu.vector_store %arg15[%c640_269, %c0_270], %420 {strides = array<i32>} : memref<800x256xf32, #tpu.memory_space<vmem>>, vector<32x256xf32>,
    %c225_i32_271 = arith.constant 225 : i32
    %422 = tpu.dynamic_rotate %340 by %c225_i32_271 dim 1 : vector<32x256xf32>, i32 -> vector<32x256xf32>
    %423 = vector.broadcast %20 : vector<1x256xf32> to vector<32x256xf32>
    %424 = arith.mulf %422, %423 : vector<32x256xf32>
    %c672_272 = arith.constant 672 : index
    %c0_273 = arith.constant 0 : index
    %425 = vector.load %arg15[%c672_272, %c0_273] : memref<800x256xf32, #tpu.memory_space<vmem>>, vector<32x256xf32>
    tpu.vector_store %arg15[%c672_272, %c0_273], %424 {strides = array<i32>} : memref<800x256xf32, #tpu.memory_space<vmem>>, vector<32x256xf32>,
    %c224_i32_274 = arith.constant 224 : i32
    %426 = tpu.dynamic_rotate %340 by %c224_i32_274 dim 1 : vector<32x256xf32>, i32 -> vector<32x256xf32>
    %427 = vector.broadcast %21 : vector<1x256xf32> to vector<32x256xf32>
    %428 = arith.mulf %426, %427 : vector<32x256xf32>
    %c704_275 = arith.constant 704 : index
    %c0_276 = arith.constant 0 : index
    %429 = vector.load %arg15[%c704_275, %c0_276] : memref<800x256xf32, #tpu.memory_space<vmem>>, vector<32x256xf32>
    tpu.vector_store %arg15[%c704_275, %c0_276], %428 {strides = array<i32>} : memref<800x256xf32, #tpu.memory_space<vmem>>, vector<32x256xf32>,
    %c223_i32_277 = arith.constant 223 : i32
    %430 = tpu.dynamic_rotate %340 by %c223_i32_277 dim 1 : vector<32x256xf32>, i32 -> vector<32x256xf32>
    %431 = vector.broadcast %22 : vector<1x256xf32> to vector<32x256xf32>
    %432 = arith.mulf %430, %431 : vector<32x256xf32>
    %c736_278 = arith.constant 736 : index
    %c0_279 = arith.constant 0 : index
    %433 = vector.load %arg15[%c736_278, %c0_279] : memref<800x256xf32, #tpu.memory_space<vmem>>, vector<32x256xf32>
    tpu.vector_store %arg15[%c736_278, %c0_279], %432 {strides = array<i32>} : memref<800x256xf32, #tpu.memory_space<vmem>>, vector<32x256xf32>,
    %c222_i32_280 = arith.constant 222 : i32
    %434 = tpu.dynamic_rotate %340 by %c222_i32_280 dim 1 : vector<32x256xf32>, i32 -> vector<32x256xf32>
    %435 = vector.broadcast %23 : vector<1x256xf32> to vector<32x256xf32>
    %436 = arith.mulf %434, %435 : vector<32x256xf32>
    %c768_281 = arith.constant 768 : index
    %c0_282 = arith.constant 0 : index
    %437 = vector.load %arg15[%c768_281, %c0_282] : memref<800x256xf32, #tpu.memory_space<vmem>>, vector<32x256xf32>
    tpu.vector_store %arg15[%c768_281, %c0_282], %436 {strides = array<i32>} : memref<800x256xf32, #tpu.memory_space<vmem>>, vector<32x256xf32>,
    %c0_283 = arith.constant 0 : index
    %c0_284 = arith.constant 0 : index
    %438 = vector.load %arg6[%c0_283, %c0_284] : memref<16x800xf32, #tpu.memory_space<vmem>>, vector<16x800xf32>
    %c0_285 = arith.constant 0 : index
    %c0_286 = arith.constant 0 : index
    %439 = vector.load %arg15[%c0_285, %c0_286] : memref<800x256xf32, #tpu.memory_space<vmem>>, vector<800x256xf32>
    %cst_287 = arith.constant dense<0.000000e+00> : vector<16x256xf32>
    %440 = tpu.matmul %438, %439, %cst_287 {dimension_numbers = #tpu.dot_dimension_numbers<[1], [0], [0], [1], [0, 0, 1, 1], [], []>} : vector<16x800xf32>, vector<800x256xf32>, vector<16x256xf32> -> vector<16x256xf32>
    %c0_288 = arith.constant 0 : index
    %c0_289 = arith.constant 0 : index
    %441 = vector.load %arg11[%c0_288, %c0_289] : memref<16x1xf32, #tpu.memory_space<vmem>>, vector<16x1xf32>
    %442 = vector.broadcast %441 : vector<16x1xf32> to vector<16x256xf32>
    %443 = arith.addf %440, %442 : vector<16x256xf32>
    %cst_290 = arith.constant 0.000000e+00 : f32
    %444 = vector.broadcast %cst_290 : f32 to vector<16x256xf32>
    %445 = arith.maximumf %443, %444 : vector<16x256xf32>
    %c34_i32_291 = arith.constant 34 : i32
    %446 = tpu.dynamic_rotate %445 by %c34_i32_291 dim 1 : vector<16x256xf32>, i32 -> vector<16x256xf32>
    %447 = vector.broadcast %0 : vector<1x256xf32> to vector<16x256xf32>
    %448 = arith.mulf %446, %447 : vector<16x256xf32>
    %c0_292 = arith.constant 0 : index
    %c0_293 = arith.constant 0 : index
    %449 = vector.load %arg15[%c0_292, %c0_293] : memref<800x256xf32, #tpu.memory_space<vmem>>, vector<16x256xf32>
    tpu.vector_store %arg15[%c0_292, %c0_293], %448 {strides = array<i32>} : memref<800x256xf32, #tpu.memory_space<vmem>>, vector<16x256xf32>,
    %c33_i32_294 = arith.constant 33 : i32
    %450 = tpu.dynamic_rotate %445 by %c33_i32_294 dim 1 : vector<16x256xf32>, i32 -> vector<16x256xf32>
    %451 = vector.broadcast %1 : vector<1x256xf32> to vector<16x256xf32>
    %452 = arith.mulf %450, %451 : vector<16x256xf32>
    %c16_295 = arith.constant 16 : index
    %c0_296 = arith.constant 0 : index
    %453 = vector.load %arg15[%c16_295, %c0_296] : memref<800x256xf32, #tpu.memory_space<vmem>>, vector<16x256xf32>
    tpu.vector_store %arg15[%c16_295, %c0_296], %452 {strides = array<i32>} : memref<800x256xf32, #tpu.memory_space<vmem>>, vector<16x256xf32>,
    %c32_i32_297 = arith.constant 32 : i32
    %454 = tpu.dynamic_rotate %445 by %c32_i32_297 dim 1 : vector<16x256xf32>, i32 -> vector<16x256xf32>
    %455 = vector.broadcast %2 : vector<1x256xf32> to vector<16x256xf32>
    %456 = arith.mulf %454, %455 : vector<16x256xf32>
    %c32_298 = arith.constant 32 : index
    %c0_299 = arith.constant 0 : index
    %457 = vector.load %arg15[%c32_298, %c0_299] : memref<800x256xf32, #tpu.memory_space<vmem>>, vector<16x256xf32>
    tpu.vector_store %arg15[%c32_298, %c0_299], %456 {strides = array<i32>} : memref<800x256xf32, #tpu.memory_space<vmem>>, vector<16x256xf32>,
    %c31_i32_300 = arith.constant 31 : i32
    %458 = tpu.dynamic_rotate %445 by %c31_i32_300 dim 1 : vector<16x256xf32>, i32 -> vector<16x256xf32>
    %459 = vector.broadcast %3 : vector<1x256xf32> to vector<16x256xf32>
    %460 = arith.mulf %458, %459 : vector<16x256xf32>
    %c48_301 = arith.constant 48 : index
    %c0_302 = arith.constant 0 : index
    %461 = vector.load %arg15[%c48_301, %c0_302] : memref<800x256xf32, #tpu.memory_space<vmem>>, vector<16x256xf32>
    tpu.vector_store %arg15[%c48_301, %c0_302], %460 {strides = array<i32>} : memref<800x256xf32, #tpu.memory_space<vmem>>, vector<16x256xf32>,
    %c30_i32_303 = arith.constant 30 : i32
    %462 = tpu.dynamic_rotate %445 by %c30_i32_303 dim 1 : vector<16x256xf32>, i32 -> vector<16x256xf32>
    %463 = vector.broadcast %4 : vector<1x256xf32> to vector<16x256xf32>
    %464 = arith.mulf %462, %463 : vector<16x256xf32>
    %c64_304 = arith.constant 64 : index
    %c0_305 = arith.constant 0 : index
    %465 = vector.load %arg15[%c64_304, %c0_305] : memref<800x256xf32, #tpu.memory_space<vmem>>, vector<16x256xf32>
    tpu.vector_store %arg15[%c64_304, %c0_305], %464 {strides = array<i32>} : memref<800x256xf32, #tpu.memory_space<vmem>>, vector<16x256xf32>,
    %c18_i32_306 = arith.constant 18 : i32
    %466 = tpu.dynamic_rotate %445 by %c18_i32_306 dim 1 : vector<16x256xf32>, i32 -> vector<16x256xf32>
    %467 = vector.broadcast %5 : vector<1x256xf32> to vector<16x256xf32>
    %468 = arith.mulf %466, %467 : vector<16x256xf32>
    %c80_307 = arith.constant 80 : index
    %c0_308 = arith.constant 0 : index
    %469 = vector.load %arg15[%c80_307, %c0_308] : memref<800x256xf32, #tpu.memory_space<vmem>>, vector<16x256xf32>
    tpu.vector_store %arg15[%c80_307, %c0_308], %468 {strides = array<i32>} : memref<800x256xf32, #tpu.memory_space<vmem>>, vector<16x256xf32>,
    %c17_i32_309 = arith.constant 17 : i32
    %470 = tpu.dynamic_rotate %445 by %c17_i32_309 dim 1 : vector<16x256xf32>, i32 -> vector<16x256xf32>
    %471 = vector.broadcast %6 : vector<1x256xf32> to vector<16x256xf32>
    %472 = arith.mulf %470, %471 : vector<16x256xf32>
    %c96_310 = arith.constant 96 : index
    %c0_311 = arith.constant 0 : index
    %473 = vector.load %arg15[%c96_310, %c0_311] : memref<800x256xf32, #tpu.memory_space<vmem>>, vector<16x256xf32>
    tpu.vector_store %arg15[%c96_310, %c0_311], %472 {strides = array<i32>} : memref<800x256xf32, #tpu.memory_space<vmem>>, vector<16x256xf32>,
    %c16_i32_312 = arith.constant 16 : i32
    %474 = tpu.dynamic_rotate %445 by %c16_i32_312 dim 1 : vector<16x256xf32>, i32 -> vector<16x256xf32>
    %475 = vector.broadcast %7 : vector<1x256xf32> to vector<16x256xf32>
    %476 = arith.mulf %474, %475 : vector<16x256xf32>
    %c112_313 = arith.constant 112 : index
    %c0_314 = arith.constant 0 : index
    %477 = vector.load %arg15[%c112_313, %c0_314] : memref<800x256xf32, #tpu.memory_space<vmem>>, vector<16x256xf32>
    tpu.vector_store %arg15[%c112_313, %c0_314], %476 {strides = array<i32>} : memref<800x256xf32, #tpu.memory_space<vmem>>, vector<16x256xf32>,
    %c15_i32_315 = arith.constant 15 : i32
    %478 = tpu.dynamic_rotate %445 by %c15_i32_315 dim 1 : vector<16x256xf32>, i32 -> vector<16x256xf32>
    %479 = vector.broadcast %8 : vector<1x256xf32> to vector<16x256xf32>
    %480 = arith.mulf %478, %479 : vector<16x256xf32>
    %c128_316 = arith.constant 128 : index
    %c0_317 = arith.constant 0 : index
    %481 = vector.load %arg15[%c128_316, %c0_317] : memref<800x256xf32, #tpu.memory_space<vmem>>, vector<16x256xf32>
    tpu.vector_store %arg15[%c128_316, %c0_317], %480 {strides = array<i32>} : memref<800x256xf32, #tpu.memory_space<vmem>>, vector<16x256xf32>,
    %c14_i32_318 = arith.constant 14 : i32
    %482 = tpu.dynamic_rotate %445 by %c14_i32_318 dim 1 : vector<16x256xf32>, i32 -> vector<16x256xf32>
    %483 = vector.broadcast %9 : vector<1x256xf32> to vector<16x256xf32>
    %484 = arith.mulf %482, %483 : vector<16x256xf32>
    %c144_319 = arith.constant 144 : index
    %c0_320 = arith.constant 0 : index
    %485 = vector.load %arg15[%c144_319, %c0_320] : memref<800x256xf32, #tpu.memory_space<vmem>>, vector<16x256xf32>
    tpu.vector_store %arg15[%c144_319, %c0_320], %484 {strides = array<i32>} : memref<800x256xf32, #tpu.memory_space<vmem>>, vector<16x256xf32>,
    %c2_i32_321 = arith.constant 2 : i32
    %486 = tpu.dynamic_rotate %445 by %c2_i32_321 dim 1 : vector<16x256xf32>, i32 -> vector<16x256xf32>
    %487 = vector.broadcast %10 : vector<1x256xf32> to vector<16x256xf32>
    %488 = arith.mulf %486, %487 : vector<16x256xf32>
    %c160_322 = arith.constant 160 : index
    %c0_323 = arith.constant 0 : index
    %489 = vector.load %arg15[%c160_322, %c0_323] : memref<800x256xf32, #tpu.memory_space<vmem>>, vector<16x256xf32>
    tpu.vector_store %arg15[%c160_322, %c0_323], %488 {strides = array<i32>} : memref<800x256xf32, #tpu.memory_space<vmem>>, vector<16x256xf32>,
    %c1_i32_324 = arith.constant 1 : i32
    %490 = tpu.dynamic_rotate %445 by %c1_i32_324 dim 1 : vector<16x256xf32>, i32 -> vector<16x256xf32>
    %491 = vector.broadcast %11 : vector<1x256xf32> to vector<16x256xf32>
    %492 = arith.mulf %490, %491 : vector<16x256xf32>
    %c176_325 = arith.constant 176 : index
    %c0_326 = arith.constant 0 : index
    %493 = vector.load %arg15[%c176_325, %c0_326] : memref<800x256xf32, #tpu.memory_space<vmem>>, vector<16x256xf32>
    tpu.vector_store %arg15[%c176_325, %c0_326], %492 {strides = array<i32>} : memref<800x256xf32, #tpu.memory_space<vmem>>, vector<16x256xf32>,
    %c192_327 = arith.constant 192 : index
    %c0_328 = arith.constant 0 : index
    %494 = vector.load %arg15[%c192_327, %c0_328] : memref<800x256xf32, #tpu.memory_space<vmem>>, vector<16x256xf32>
    tpu.vector_store %arg15[%c192_327, %c0_328], %445 {strides = array<i32>} : memref<800x256xf32, #tpu.memory_space<vmem>>, vector<16x256xf32>,
    %c255_i32_329 = arith.constant 255 : i32
    %495 = tpu.dynamic_rotate %445 by %c255_i32_329 dim 1 : vector<16x256xf32>, i32 -> vector<16x256xf32>
    %496 = vector.broadcast %12 : vector<1x256xf32> to vector<16x256xf32>
    %497 = arith.mulf %495, %496 : vector<16x256xf32>
    %c208 = arith.constant 208 : index
    %c0_330 = arith.constant 0 : index
    %498 = vector.load %arg15[%c208, %c0_330] : memref<800x256xf32, #tpu.memory_space<vmem>>, vector<16x256xf32>
    tpu.vector_store %arg15[%c208, %c0_330], %497 {strides = array<i32>} : memref<800x256xf32, #tpu.memory_space<vmem>>, vector<16x256xf32>,
    %c254_i32_331 = arith.constant 254 : i32
    %499 = tpu.dynamic_rotate %445 by %c254_i32_331 dim 1 : vector<16x256xf32>, i32 -> vector<16x256xf32>
    %500 = vector.broadcast %13 : vector<1x256xf32> to vector<16x256xf32>
    %501 = arith.mulf %499, %500 : vector<16x256xf32>
    %c224_332 = arith.constant 224 : index
    %c0_333 = arith.constant 0 : index
    %502 = vector.load %arg15[%c224_332, %c0_333] : memref<800x256xf32, #tpu.memory_space<vmem>>, vector<16x256xf32>
    tpu.vector_store %arg15[%c224_332, %c0_333], %501 {strides = array<i32>} : memref<800x256xf32, #tpu.memory_space<vmem>>, vector<16x256xf32>,
    %c242_i32_334 = arith.constant 242 : i32
    %503 = tpu.dynamic_rotate %445 by %c242_i32_334 dim 1 : vector<16x256xf32>, i32 -> vector<16x256xf32>
    %504 = vector.broadcast %14 : vector<1x256xf32> to vector<16x256xf32>
    %505 = arith.mulf %503, %504 : vector<16x256xf32>
    %c240 = arith.constant 240 : index
    %c0_335 = arith.constant 0 : index
    %506 = vector.load %arg15[%c240, %c0_335] : memref<800x256xf32, #tpu.memory_space<vmem>>, vector<16x256xf32>
    tpu.vector_store %arg15[%c240, %c0_335], %505 {strides = array<i32>} : memref<800x256xf32, #tpu.memory_space<vmem>>, vector<16x256xf32>,
    %c241_i32_336 = arith.constant 241 : i32
    %507 = tpu.dynamic_rotate %445 by %c241_i32_336 dim 1 : vector<16x256xf32>, i32 -> vector<16x256xf32>
    %508 = vector.broadcast %15 : vector<1x256xf32> to vector<16x256xf32>
    %509 = arith.mulf %507, %508 : vector<16x256xf32>
    %c256_337 = arith.constant 256 : index
    %c0_338 = arith.constant 0 : index
    %510 = vector.load %arg15[%c256_337, %c0_338] : memref<800x256xf32, #tpu.memory_space<vmem>>, vector<16x256xf32>
    tpu.vector_store %arg15[%c256_337, %c0_338], %509 {strides = array<i32>} : memref<800x256xf32, #tpu.memory_space<vmem>>, vector<16x256xf32>,
    %c240_i32_339 = arith.constant 240 : i32
    %511 = tpu.dynamic_rotate %445 by %c240_i32_339 dim 1 : vector<16x256xf32>, i32 -> vector<16x256xf32>
    %512 = vector.broadcast %16 : vector<1x256xf32> to vector<16x256xf32>
    %513 = arith.mulf %511, %512 : vector<16x256xf32>
    %c272 = arith.constant 272 : index
    %c0_340 = arith.constant 0 : index
    %514 = vector.load %arg15[%c272, %c0_340] : memref<800x256xf32, #tpu.memory_space<vmem>>, vector<16x256xf32>
    tpu.vector_store %arg15[%c272, %c0_340], %513 {strides = array<i32>} : memref<800x256xf32, #tpu.memory_space<vmem>>, vector<16x256xf32>,
    %c239_i32_341 = arith.constant 239 : i32
    %515 = tpu.dynamic_rotate %445 by %c239_i32_341 dim 1 : vector<16x256xf32>, i32 -> vector<16x256xf32>
    %516 = vector.broadcast %17 : vector<1x256xf32> to vector<16x256xf32>
    %517 = arith.mulf %515, %516 : vector<16x256xf32>
    %c288_342 = arith.constant 288 : index
    %c0_343 = arith.constant 0 : index
    %518 = vector.load %arg15[%c288_342, %c0_343] : memref<800x256xf32, #tpu.memory_space<vmem>>, vector<16x256xf32>
    tpu.vector_store %arg15[%c288_342, %c0_343], %517 {strides = array<i32>} : memref<800x256xf32, #tpu.memory_space<vmem>>, vector<16x256xf32>,
    %c238_i32_344 = arith.constant 238 : i32
    %519 = tpu.dynamic_rotate %445 by %c238_i32_344 dim 1 : vector<16x256xf32>, i32 -> vector<16x256xf32>
    %520 = vector.broadcast %18 : vector<1x256xf32> to vector<16x256xf32>
    %521 = arith.mulf %519, %520 : vector<16x256xf32>
    %c304 = arith.constant 304 : index
    %c0_345 = arith.constant 0 : index
    %522 = vector.load %arg15[%c304, %c0_345] : memref<800x256xf32, #tpu.memory_space<vmem>>, vector<16x256xf32>
    tpu.vector_store %arg15[%c304, %c0_345], %521 {strides = array<i32>} : memref<800x256xf32, #tpu.memory_space<vmem>>, vector<16x256xf32>,
    %c226_i32_346 = arith.constant 226 : i32
    %523 = tpu.dynamic_rotate %445 by %c226_i32_346 dim 1 : vector<16x256xf32>, i32 -> vector<16x256xf32>
    %524 = vector.broadcast %19 : vector<1x256xf32> to vector<16x256xf32>
    %525 = arith.mulf %523, %524 : vector<16x256xf32>
    %c320_347 = arith.constant 320 : index
    %c0_348 = arith.constant 0 : index
    %526 = vector.load %arg15[%c320_347, %c0_348] : memref<800x256xf32, #tpu.memory_space<vmem>>, vector<16x256xf32>
    tpu.vector_store %arg15[%c320_347, %c0_348], %525 {strides = array<i32>} : memref<800x256xf32, #tpu.memory_space<vmem>>, vector<16x256xf32>,
    %c225_i32_349 = arith.constant 225 : i32
    %527 = tpu.dynamic_rotate %445 by %c225_i32_349 dim 1 : vector<16x256xf32>, i32 -> vector<16x256xf32>
    %528 = vector.broadcast %20 : vector<1x256xf32> to vector<16x256xf32>
    %529 = arith.mulf %527, %528 : vector<16x256xf32>
    %c336 = arith.constant 336 : index
    %c0_350 = arith.constant 0 : index
    %530 = vector.load %arg15[%c336, %c0_350] : memref<800x256xf32, #tpu.memory_space<vmem>>, vector<16x256xf32>
    tpu.vector_store %arg15[%c336, %c0_350], %529 {strides = array<i32>} : memref<800x256xf32, #tpu.memory_space<vmem>>, vector<16x256xf32>,
    %c224_i32_351 = arith.constant 224 : i32
    %531 = tpu.dynamic_rotate %445 by %c224_i32_351 dim 1 : vector<16x256xf32>, i32 -> vector<16x256xf32>
    %532 = vector.broadcast %21 : vector<1x256xf32> to vector<16x256xf32>
    %533 = arith.mulf %531, %532 : vector<16x256xf32>
    %c352_352 = arith.constant 352 : index
    %c0_353 = arith.constant 0 : index
    %534 = vector.load %arg15[%c352_352, %c0_353] : memref<800x256xf32, #tpu.memory_space<vmem>>, vector<16x256xf32>
    tpu.vector_store %arg15[%c352_352, %c0_353], %533 {strides = array<i32>} : memref<800x256xf32, #tpu.memory_space<vmem>>, vector<16x256xf32>,
    %c223_i32_354 = arith.constant 223 : i32
    %535 = tpu.dynamic_rotate %445 by %c223_i32_354 dim 1 : vector<16x256xf32>, i32 -> vector<16x256xf32>
    %536 = vector.broadcast %22 : vector<1x256xf32> to vector<16x256xf32>
    %537 = arith.mulf %535, %536 : vector<16x256xf32>
    %c368 = arith.constant 368 : index
    %c0_355 = arith.constant 0 : index
    %538 = vector.load %arg15[%c368, %c0_355] : memref<800x256xf32, #tpu.memory_space<vmem>>, vector<16x256xf32>
    tpu.vector_store %arg15[%c368, %c0_355], %537 {strides = array<i32>} : memref<800x256xf32, #tpu.memory_space<vmem>>, vector<16x256xf32>,
    %c222_i32_356 = arith.constant 222 : i32
    %539 = tpu.dynamic_rotate %445 by %c222_i32_356 dim 1 : vector<16x256xf32>, i32 -> vector<16x256xf32>
    %540 = vector.broadcast %23 : vector<1x256xf32> to vector<16x256xf32>
    %541 = arith.mulf %539, %540 : vector<16x256xf32>
    %c384_357 = arith.constant 384 : index
    %c0_358 = arith.constant 0 : index
    %542 = vector.load %arg15[%c384_357, %c0_358] : memref<800x256xf32, #tpu.memory_space<vmem>>, vector<16x256xf32>
    tpu.vector_store %arg15[%c384_357, %c0_358], %541 {strides = array<i32>} : memref<800x256xf32, #tpu.memory_space<vmem>>, vector<16x256xf32>,
    %c0_359 = arith.constant 0 : index
    %c0_360 = arith.constant 0 : index
    %543 = vector.load %arg7[%c0_359, %c0_360] : memref<1x400xf32, #tpu.memory_space<vmem>>, vector<1x400xf32>
    %c0_361 = arith.constant 0 : index
    %c0_362 = arith.constant 0 : index
    %544 = vector.load %arg15[%c0_361, %c0_362] : memref<800x256xf32, #tpu.memory_space<vmem>>, vector<400x256xf32>
    %cst_363 = arith.constant dense<0.000000e+00> : vector<1x256xf32>
    %545 = tpu.matmul %543, %544, %cst_363 {dimension_numbers = #tpu.dot_dimension_numbers<[1], [0], [0], [1], [0, 0, 1, 1], [], []>} : vector<1x400xf32>, vector<400x256xf32>, vector<1x256xf32> -> vector<1x256xf32>
    %c0_364 = arith.constant 0 : index
    %c0_365 = arith.constant 0 : index
    %546 = vector.load %arg12[%c0_364, %c0_365] : memref<1x1xf32, #tpu.memory_space<vmem>>, vector<1x1xf32>
    %547 = vector.broadcast %546 : vector<1x1xf32> to vector<1x256xf32>
    %548 = arith.addf %545, %547 : vector<1x256xf32>
    %cst_366 = arith.constant 0.000000e+00 : f32
    %549 = vector.broadcast %cst_366 : f32 to vector<1x256xf32>
    %550 = arith.maximumf %548, %549 : vector<1x256xf32>
    %cst_367 = arith.constant 6.020600e-01 : f32
    %551 = vector.broadcast %cst_367 : f32 to vector<1x256xf32>
    %552 = arith.addf %550, %551 : vector<1x256xf32>
    %553 = vector.shape_cast %552 : vector<1x256xf32> to vector<1x1x256xf32>
    %c0_368 = arith.constant 0 : index
    %c0_369 = arith.constant 0 : index
    %c0_370 = arith.constant 0 : index
    %554 = vector.load %arg13[%c0_368, %c0_369, %c0_370] : memref<1x1x256xf32, #tpu.memory_space<vmem>>, vector<1x1x256xf32>
    tpu.vector_store %arg13[%c0_368, %c0_369, %c0_370], %553 {strides = array<i32>} : memref<1x1x256xf32, #tpu.memory_space<vmem>>, vector<1x1x256xf32>,
    %cst_371 = arith.constant 2.30258512 : f32
    %555 = vector.broadcast %cst_371 : f32 to vector<1x256xf32>
    %556 = arith.mulf %552, %555 : vector<1x256xf32>
    %557 = math.exp %556 : vector<1x256xf32>
    %cst_372 = arith.constant dense<0.000000e+00> : vector<1xf32>
    %558 = vector.multi_reduction <add>, %557, %cst_372 [1] : vector<1x256xf32> to vector<1xf32>
    %559 = vector.shape_cast %558 : vector<1xf32> to vector<1x1xf32>
    %cst_373 = arith.constant dense<0.000000e+00> : vector<1xf32>
    %560 = vector.multi_reduction <add>, %559, %cst_373 [0] : vector<1x1xf32> to vector<1xf32>
    %561 = vector.shape_cast %560 : vector<1xf32> to vector<1x1xf32>
    %562 = vector.shape_cast %561 : vector<1x1xf32> to vector<1x1x1xf32>
    %563 = vector.shape_cast %562 : vector<1x1x1xf32> to vector<1x1x1xf32>
    %564 = vector.broadcast %563 : vector<1x1x1xf32> to vector<1x1x128xf32>
    %c0_374 = arith.constant 0 : index
    %c0_375 = arith.constant 0 : index
    %c0_376 = arith.constant 0 : index
    %565 = vector.load %arg14[%c0_374, %c0_375, %c0_376] : memref<1x1x128xf32, #tpu.memory_space<vmem>>, vector<1x1x128xf32>
    tpu.vector_store %arg14[%c0_374, %c0_375, %c0_376], %564 {strides = array<i32>} : memref<1x1x128xf32, #tpu.memory_space<vmem>>, vector<1x1x128xf32>,
    return
  }
  func.func @transform_0(%arg0: i32) -> (i32, i32, i32) {
    %c0_i32 = arith.constant 0 : i32
    %c0_i32_0 = arith.constant 0 : i32
    %c0_i32_1 = arith.constant 0 : i32
    return %arg0, %c0_i32, %c0_i32_0 : i32, i32, i32
  }
  func.func @transform_1(%arg0: i32) -> (i32, i32) {
    %c0_i32 = arith.constant 0 : i32
    %c0_i32_0 = arith.constant 0 : i32
    %c0_i32_1 = arith.constant 0 : i32
    return %c0_i32, %c0_i32_0 : i32, i32
  }
  func.func @transform_2(%arg0: i32) -> (i32, i32) {
    %c0_i32 = arith.constant 0 : i32
    %c0_i32_0 = arith.constant 0 : i32
    %c0_i32_1 = arith.constant 0 : i32
    return %c0_i32, %c0_i32_0 : i32, i32
  }
  func.func @transform_3(%arg0: i32) -> (i32, i32) {
    %c0_i32 = arith.constant 0 : i32
    %c0_i32_0 = arith.constant 0 : i32
    %c0_i32_1 = arith.constant 0 : i32
    return %c0_i32, %c0_i32_0 : i32, i32
  }
  func.func @transform_4(%arg0: i32) -> (i32, i32) {
    %c0_i32 = arith.constant 0 : i32
    %c0_i32_0 = arith.constant 0 : i32
    %c0_i32_1 = arith.constant 0 : i32
    return %c0_i32, %c0_i32_0 : i32, i32
  }
  func.func @transform_5(%arg0: i32) -> (i32, i32) {
    %c0_i32 = arith.constant 0 : i32
    %c0_i32_0 = arith.constant 0 : i32
    %c0_i32_1 = arith.constant 0 : i32
    return %c0_i32, %c0_i32_0 : i32, i32
  }
  func.func @transform_6(%arg0: i32) -> (i32, i32) {
    %c0_i32 = arith.constant 0 : i32
    %c0_i32_0 = arith.constant 0 : i32
    %c0_i32_1 = arith.constant 0 : i32
    return %c0_i32, %c0_i32_0 : i32, i32
  }
  func.func @transform_7(%arg0: i32) -> (i32, i32) {
    %c0_i32 = arith.constant 0 : i32
    %c0_i32_0 = arith.constant 0 : i32
    %c0_i32_1 = arith.constant 0 : i32
    return %c0_i32, %c0_i32_0 : i32, i32
  }
  func.func @transform_8(%arg0: i32) -> (i32, i32) {
    %c0_i32 = arith.constant 0 : i32
    %c0_i32_0 = arith.constant 0 : i32
    %c0_i32_1 = arith.constant 0 : i32
    return %c0_i32, %c0_i32_0 : i32, i32
  }
  func.func @transform_9(%arg0: i32) -> (i32, i32) {
    %c0_i32 = arith.constant 0 : i32
    %c0_i32_0 = arith.constant 0 : i32
    %c0_i32_1 = arith.constant 0 : i32
    return %c0_i32, %c0_i32_0 : i32, i32
  }
  func.func @transform_10(%arg0: i32) -> (i32, i32) {
    %c0_i32 = arith.constant 0 : i32
    %c0_i32_0 = arith.constant 0 : i32
    %c0_i32_1 = arith.constant 0 : i32
    return %c0_i32, %c0_i32_0 : i32, i32
  }
  func.func @transform_11(%arg0: i32) -> (i32, i32) {
    %c0_i32 = arith.constant 0 : i32
    %c0_i32_0 = arith.constant 0 : i32
    %c0_i32_1 = arith.constant 0 : i32
    return %c0_i32, %c0_i32_0 : i32, i32
  }
  func.func @transform_12(%arg0: i32) -> (i32, i32, i32) {
    %c0_i32 = arith.constant 0 : i32
    %c0_i32_0 = arith.constant 0 : i32
    %c0_i32_1 = arith.constant 0 : i32
    return %arg0, %c0_i32, %c0_i32_0 : i32, i32, i32
  }
  func.func @transform_13(%arg0: i32) -> (i32, i32, i32) {
    %c0_i32 = arith.constant 0 : i32
    %c0_i32_0 = arith.constant 0 : i32
    %c0_i32_1 = arith.constant 0 : i32
    return %arg0, %c0_i32, %c0_i32_0 : i32, i32, i32
  }
}

</mosaic_0001>

<bundles_post_ra>
// kernel: cnn_novt_forward.1
= control target key start
LH: loop header
LB: loop body
LE: loop exit
PB: predicated region body
PF: predicated region fallthrough
CT: control target
= control target key end

     0   :  { %s7015_s27 = smov 0   ;;  %s13763_s0 = inlined_call_operand.vmem [shape: f32[2,8,256], index: 0, kind: input, shape index: {}]   ;;  %s13764_s1 = inlined_call_operand.vmem [shape: f32[25,256], index: 1, kind: input, shape index: {}]   ;;  %s13765_s2 = inlined_call_operand.vmem [shape: f32[32,200], index: 2, kind: input, shape index: {}]   ;;  %s13766_s3 = inlined_call_operand.vmem [shape: f32[32,800], index: 3, kind: input, shape index: {}]   ;;  %s13767_s4 = inlined_call_operand.vmem [shape: f32[32,800], index: 4, kind: input, shape index: {}]   ;;  %s13768_s5 = inlined_call_operand.vmem [shape: f32[16,800], index: 5, kind: input, shape index: {}]   ;;  %s13769_s6 = inlined_call_operand.vmem [shape: f32[1,400], index: 6, kind: input, shape index: {}]   ;;  %s13770_s7 = inlined_call_operand.vmem [shape: f32[32,1], index: 7, kind: input, shape index: {}]   ;;  %s13771_s8 = inlined_call_operand.vmem [shape: f32[32,1], index: 8, kind: input, shape index: {}]   ;;  %s13772_s9 = inlined_call_operand.vmem [shape: f32[32,1], index: 9, kind: input, shape index: {}]   ;;  %s13773_s10 = inlined_call_operand.vmem [shape: f32[16,1], index: 10, kind: input, shape index: {}]   ;;  %s13774_s11 = inlined_call_operand.<no memory space> [shape: f32[1,1], index: 11, kind: input, shape index: {}]   ;;  %s13775_s12 = inlined_call_operand.vmem [shape: f32[2,1,256], index: 12, kind: output, shape index: {0}]   ;;  %s13776_s13 = inlined_call_operand.vmem [shape: f32[2,1,128], index: 13, kind: output, shape index: {1}]  }
   0x1   :  { %14366 = sst [smem:[#allocation153_spill]] %s13763_s0  ;;  %v19_v0 = vstv %s13774_s11 }
   0x2   :  { %14367 = sst [smem:[#allocation154_spill]] %s13764_s1  ;;  %20 = vst [vmem:[#allocation3] sm:$0x1] %v19_v0 }
   0x3   :  { %14368 = sst [smem:[#allocation155_spill]] %s13765_s2 }
   0x4   :  { %14369 = sst [smem:[#allocation156_spill]] %s13766_s3 }
   0x5   :  { %14370 = sst [smem:[#allocation157_spill]] %s13767_s4 }
   0x6   :  { %14371 = sst [smem:[#allocation158_spill]] %s13768_s5 }
   0x7   :  { %14372 = sst [smem:[#allocation159_spill]] %s13769_s6 }
   0x8   :  { %14373 = sst [smem:[#allocation160_spill]] %s13770_s7 }
   0x9   :  { %14374 = sst [smem:[#allocation161_spill]] %s13771_s8 }
   0xa   :  { %14375 = sst [smem:[#allocation162_spill]] %s13773_s10 }
   0xb   :  { %14376 = sst [smem:[#allocation163_spill]] %s13775_s12 }
   0xc   :  { %14377 = sst [smem:[#allocation164_spill]] %s13776_s13 }
   0xd LB: > { %14378 = sst [smem:[#allocation4_spill]] %s6915_s27  ;;  %s6794_s28 = sadd.s32 4294967295, %s6915_s27   ;;  %s6915_s27 = sphi %s7015_s27, %s26_s27  }
   0xe   : > { %p6798_p0 = scmp.ge.s32.totalorder %s6915_s27, 1  ;;  %p392_p1 = scmp.lt.s32.totalorder %s6915_s27, 3 }
  0x10   : > { %p393_p2 = pnand %p6798_p0, %p392_p1 }
  0x12   : > { %396 = sbr.rel (%p393_p2) target bundleno = 3500 (0xdac), region = 68 }
  0x17   : > { %p438_p3 = scmp.lt.s32.totalorder %s6794_s28, 1  ;;  %s14380_s0 = sld [smem:[#allocation153_spill]]  ;;  %v13810_v31 = vlaneseq }
  0x18   : > { %s13999_s15 = smov 33   ;;  %s14013_s16 = smov 34  }
  0x19   : > { %s15593_s28 = smov (!%p438_p3, %s6794_s28), 1  ;;  %s13997_s17 = smov 32   ;;  %v7177_v34 = vand.u32 127, %v13810_v31 }
  0x1a   : > { %14379 = sst [smem:[#allocation5_spill]] %s15593_s28  ;;  %s6857_s11 = sshll.u32 %s15593_s28, 4 }
  0x1b   : > { %s13995_s18 = smov 31   ;;  %s13991_s19 = smov 30   ;;  %vm13809_vm0 = vcmp.lt.s32.totalorder %v7177_v34, 114  ;;  %vm13808_vm1 = vcmp.lt.s32.totalorder %v7177_v34, 126  ;;  %vm13807_vm2 = vcmp.lt.s32.totalorder %v7177_v34, 127  ;;  %vm681_vm3 = vcmp.lt.s32.totalorder %v7177_v34, 1 }
  0x1c   : > { %s13982_s20 = smov 18   ;;  %s13819_s21 = smov 17   ;;  %vm665_vm4 = vcmp.lt.s32.totalorder %v7177_v34, 2  ;;  %vm14010_vm5 = vcmp.lt.s32.totalorder %v7177_v34, 14  ;;  %vm14007_vm6 = vcmp.lt.s32.totalorder %v7177_v34, 15  ;;  %vm617_vm7 = vcmp.lt.s32.totalorder %v7177_v34, 16 }
  0x1d   : > { %s442_s14 = scalar_lea.vmem %s14380_s0, %s6857_s11  ;;  %s13962_s22 = smov 16   ;;  %vm601_vm8 = vcmp.lt.s32.totalorder %v7177_v34, 17  ;;  %vm585_vm9 = vcmp.lt.s32.totalorder %v7177_v34, 18  ;;  %vm569_vm10 = vcmp.lt.s32.totalorder %v7177_v34, 30  ;;  %vm553_vm11 = vcmp.lt.s32.totalorder %v7177_v34, 31 }
  0x1e   : > { %v7029_v1 = vld [vmem:[%s442_s14] sm:$0xff]  ;;  %v7037_v2 = vld [vmem:[%s442_s14 + $0x8] sm:$0xff]  ;;  %s13958_s23 = smov 15   ;;  %s13805_s24 = smov 14   ;;  %vm537_vm12 = vcmp.lt.s32.totalorder %v7177_v34, 32  ;;  %vm521_vm13 = vcmp.lt.s32.totalorder %v7177_v34, 33 }
  0x1f   : > { %517 = vrot.lane.b32.xlu1 %v7029_v1, %s13999_s15  ;;  %499 = vrot.lane.b32.xlu0 %v7029_v1, %s14013_s16  ;;  %s13803_s25 = smov 2   ;;  %s13779_s26 = smov 1   ;;  %vm505_vm14 = vcmp.lt.s32.totalorder %v7177_v34, 34  ;;  %vm13813_vm15 = vcmp.lt.s32.totalorder %v7177_v34, 94 }
  0x20   : > { %533 = vrot.lane.b32.xlu2 %v7029_v1, %s13997_s17  ;;  %s13777_s11 = smov 127   ;;  %s13785_s29 = smov 126  }
  0x21   : > { %s13781_s30 = smov 114   ;;  %s13783_s14 = smov 113  }
  0x22   : > { %s14381_s1 = sld [smem:[#allocation154_spill]]  ;;  %s14579_s0 = smov 96  }
  0x23   : > { %s14412_s2 = sld [smem:[#allocation155_spill]]  ;;  %s14780_s12 = smov 33  }
  0x24   : > { %s14413_s7 = sld [smem:[#allocation160_spill]]  ;;  %s14784_s13 = smov 30  }
  0x25   : > { %s14564_s3 = sld [smem:[#allocation156_spill]]  ;;  %s14788_s27 = smov 18  }
  0x26   : > { %s14604_s8 = sld [smem:[#allocation161_spill]] }
  0x27   : > { %519 = vrot.lane.b32.xlu1 %v7037_v2, %s13999_s15  ;;  %501 = vrot.lane.b32.xlu0 %v7037_v2, %s14013_s16  ;;  %s14908_s4 = sld [smem:[#allocation157_spill]] }
  0x28   : > { %535 = vrot.lane.b32.xlu2 %v7037_v2, %s13997_s17  ;;  %v6815_v32 = vld [vmem:[%s14381_s1 + $0x17] ss:$8 sm:$0x3]  ;;  %v6814_v35 = vld [vmem:[%s14381_s1 + $0x16] ss:$8 sm:$0x3] }
  0x29   : > { %v7183_v36 = vperm.slane %v6815_v32, 0  ;;  %v7185_v37 = vperm.slane %v6815_v32, 1  ;;  %v6813_v38 = vld [vmem:[%s14381_s1 + $0x15] ss:$8 sm:$0x3]  ;;  %v7191_v41 = vperm.slane %v6814_v35, 0 }
  0x2a   : > { %v7193_v42 = vperm.slane %v6814_v35, 1  ;;  %v7206_v49 = vperm.slane %v6813_v38, 0  ;;  %v7208_v50 = vperm.slane %v6813_v38, 1  ;;  %v6812_v51 = vld [vmem:[%s14381_s1 + $0x13] ss:$8 sm:$0x3] }
  0x2b   : > { %14382 = vst [vmem:[#allocation6_spill] sm:$0xff] %v7183_v36  ;;  %v7220_v56 = vperm.slane %v6812_v51, 0  ;;  %v6811_v57 = vld [vmem:[%s14381_s1 + $0x12] ss:$8 sm:$0x3]  ;;  %v7229_v61 = vperm.slane %v6812_v51, 1 }
  0x2c   : > { %14383 = vst [vmem:[#allocation7_spill] sm:$0xff] %v7185_v37  ;;  %v6810_v0 = vld [vmem:[%s14381_s1 + $0x11] ss:$8 sm:$0x3]  ;;  %s15275_s6 = sld [smem:[#allocation158_spill]] }
  0x2d   : > { %14384 = vst [vmem:[#allocation8_spill] sm:$0xff] %v7191_v41  ;;  %s15338_s28 = sld [smem:[#allocation162_spill]] }
  0x2e   : > { %14385 = vst [vmem:[#allocation9_spill] sm:$0xff] %v7193_v42 }
  0x2f   : > { %551 = vrot.lane.b32.xlu1 %v7037_v2, %s13995_s18  ;;  %549 = vrot.lane.b32.xlu0 %v7029_v1, %s13995_s18  ;;  %14386 = vst [vmem:[#allocation10_spill] sm:$0xff] %v7206_v49 }
  0x30   : > { %565 = vrot.lane.b32.xlu2 %v7029_v1, %s13991_s19  ;;  %14387 = vst [vmem:[#allocation11_spill] sm:$0xff] %v7208_v50 }
  0x31   : > { %14388 = vst [vmem:[#allocation12_spill] sm:$0xff] %v7220_v56 }
  0x32   : > { %14389 = vst [vmem:[#allocation13_spill] sm:$0xff] %v7229_v61 }
  0x37   : > { %581 = vrot.lane.b32.xlu1 %v7029_v1, %s13982_s20  ;;  %567 = vrot.lane.b32.xlu0 %v7037_v2, %s13991_s19 }
  0x38   : > { %583 = vrot.lane.b32.xlu2 %v7037_v2, %s13982_s20 }
  0x3f   : > { %599 = vrot.lane.b32.xlu1 %v7037_v2, %s13819_s21  ;;  %597 = vrot.lane.b32.xlu0 %v7029_v1, %s13819_s21  ;;  %s14432_s21 = smov 17  }
  0x40   : > { %613 = vrot.lane.b32.xlu2 %v7029_v1, %s13962_s22 }
  0x47   : > { %629 = vrot.lane.b32.xlu1 %v7029_v1, %s13958_s23  ;;  %615 = vrot.lane.b32.xlu0 %v7037_v2, %s13962_s22 }
  0x48   : > { %631 = vrot.lane.b32.xlu2 %v7037_v2, %s13958_s23 }
  0x4f   : > { %647 = vrot.lane.b32.xlu1 %v7037_v2, %s13805_s24  ;;  %645 = vrot.lane.b32.xlu0 %v7029_v1, %s13805_s24  ;;  %s14464_s24 = smov 2  }
  0x50   : > { %661 = vrot.lane.b32.xlu2 %v7029_v1, %s13803_s25 }
  0x57   : > { %677 = vrot.lane.b32.xlu1 %v7029_v1, %s13779_s26  ;;  %663 = vrot.lane.b32.xlu0 %v7037_v2, %s13803_s25  ;;  %s14485_s25 = smov 126  }
  0x58   : > { %679 = vrot.lane.b32.xlu2 %v7037_v2, %s13779_s26  ;;  %s13787_s26 = smov 111  }
  0x5f   : > { %697 = vrot.lane.b32.xlu1 %v7037_v2, %s13777_s11  ;;  %695 = vrot.lane.b32.xlu0 %v7029_v1, %s13777_s11  ;;  %s13801_s11 = smov 112  }
  0x60   : > { %711 = vrot.lane.b32.xlu2 %v7029_v1, %s13785_s29 }
  0x67   : > { %727 = vrot.lane.b32.xlu1 %v7029_v1, %s13781_s30  ;;  %713 = vrot.lane.b32.xlu0 %v7037_v2, %s13785_s29  ;;  %s13791_s29 = smov 97  }
  0x68   : > { %729 = vrot.lane.b32.xlu2 %v7037_v2, %s13781_s30  ;;  %s13789_s30 = smov 110  }
  0x6f   : > { %745 = vrot.lane.b32.xlu1 %v7037_v2, %s13783_s14  ;;  %743 = vrot.lane.b32.xlu0 %v7029_v1, %s13783_s14  ;;  %s13799_s14 = smov 98  }
  0x70   : > { %759 = vrot.lane.b32.xlu2 %v7029_v1, %s13801_s11 }
  0x77   : > { %775 = vrot.lane.b32.xlu1 %v7029_v1, %s13787_s26  ;;  %761 = vrot.lane.b32.xlu0 %v7037_v2, %s13801_s11  ;;  %s14478_s11 = smov 127  }
  0x78   : > { %777 = vrot.lane.b32.xlu2 %v7037_v2, %s13787_s26  ;;  %s13797_s26 = smov 96  }
  0x7a   : > { %v7105_v3 = vpop.permute.xlu2 %533 }
  0x7f   : > { %793 = vrot.lane.b32.xlu1 %v7037_v2, %s13789_s30  ;;  %791 = vrot.lane.b32.xlu0 %v7029_v1, %s13789_s30  ;;  %s13795_s30 = smov 95  }
  0x80   : > { %807 = vrot.lane.b32.xlu2 %v7029_v1, %s13799_s14 }
  0x82   : > { %v7113_v4 = vpop.permute.xlu2 %535 }
  0x87   : > { %823 = vrot.lane.b32.xlu1 %v7029_v1, %s13791_s29  ;;  %809 = vrot.lane.b32.xlu0 %v7037_v2, %s13799_s14  ;;  %s14521_s14 = smov 113  }
  0x88   : > { %825 = vrot.lane.b32.xlu2 %v7037_v2, %s13791_s29  ;;  %s13793_s29 = smov 94  }
  0x8a   : > { %v7121_v5 = vpop.permute.xlu2 %565 }
  0x8f   : > { %841 = vrot.lane.b32.xlu1 %v7037_v2, %s13797_s26  ;;  %839 = vrot.lane.b32.xlu0 %v7029_v1, %s13797_s26  ;;  %s14472_s26 = smov 1  }
  0x90   : > { %855 = vrot.lane.b32.xlu2 %v7029_v1, %s13795_s30 }
  0x91   : > { %v7129_v6 = vpop.permute.xlu1 %517  ;;  %v7131_v7 = vpop.permute.xlu0 %499 }
  0x92   : > { %v7133_v8 = vpop.permute.xlu2 %583 }
  0x97   : > { %871 = vrot.lane.b32.xlu1 %v7029_v1, %s13793_s29  ;;  %857 = vrot.lane.b32.xlu0 %v7037_v2, %s13795_s30  ;;  %s14493_s30 = smov 114  }
  0x98   : > { %873 = vrot.lane.b32.xlu2 %v7037_v2, %s13793_s29  ;;  %s14457_s29 = smov 14  }
  0x99   : > { %v7141_v9 = vpop.permute.xlu1 %519  ;;  %v7143_v10 = vpop.permute.xlu0 %501 }
  0x9a   : > { %v7145_v11 = vpop.permute.xlu2 %613 }
  0xa1   : > { %v7147_v12 = vpop.permute.xlu1 %551  ;;  %v7149_v13 = vpop.permute.xlu0 %549 }
  0xa2   : > { %v7151_v14 = vpop.permute.xlu2 %631 }
  0xa9   : > { %v7153_v15 = vpop.permute.xlu1 %581  ;;  %v7155_v16 = vpop.permute.xlu0 %567 }
  0xaa   : > { %v7157_v17 = vpop.permute.xlu2 %661 }
  0xb1   : > { %v7159_v18 = vpop.permute.xlu1 %599  ;;  %v7161_v19 = vpop.permute.xlu0 %597 }
  0xb2   : > { %v680_v20 = vpop.permute.xlu2 %679 }
  0xb9   : > { %v7163_v21 = vpop.permute.xlu1 %629  ;;  %v7165_v22 = vpop.permute.xlu0 %615 }
  0xba   : > { %v712_v23 = vpop.permute.xlu2 %711 }
  0xc1   : > { %v7167_v24 = vpop.permute.xlu1 %647  ;;  %v7169_v25 = vpop.permute.xlu0 %645 }
  0xc2   : > { %v730_v28 = vpop.permute.xlu2 %729 }
  0xc9   : > { %v678_v26 = vpop.permute.xlu1 %677  ;;  %v664_v27 = vpop.permute.xlu0 %663 }
  0xca   : > { %v7174_v33 = vpop.permute.xlu2 %759  ;;  %v683_v62 = vsel %vm681_vm3, %v680_v20, %v678_v26  ;;  %v682_v63 = vsel %vm681_vm3, %v678_v26, %v680_v20  ;;  %v6809_v20 = vld [vmem:[%s14381_s1 + $0x10] ss:$8 sm:$0x3]  ;;  %v667_v26 = vsel %vm665_vm4, %v664_v27, %v7157_v17  ;;  %v666_v32 = vsel %vm665_vm4, %v7157_v17, %v664_v27 }
  0xcb   : > { %v689_v35 = vmul.f32 %v7220_v56, %v683_v62  ;;  %v690_v38 = vmul.f32 %v7229_v61, %v682_v63  ;;  %v7274_v17 = vperm.slane %v6809_v20, 0 }
  0xcd   : > { %14394 = vst [vmem:[#allocation18_spill] sm:$0xff] %v7274_v17 }
  0xd1   : > { %v698_v29 = vpop.permute.xlu1 %697  ;;  %v696_v30 = vpop.permute.xlu0 %695 }
  0xd2   : > { %v700_v52 = vsel %vm13807_vm2, %v696_v30, %v698_v29  ;;  %v701_v53 = vsel %vm13807_vm2, %v698_v29, %v696_v30  ;;  %v7225_v58 = vpop.permute.xlu2 %777  ;;  %v7243_v29 = vperm.slane %v6811_v57, 0  ;;  %v7245_v30 = vperm.slane %v6811_v57, 1 }
  0xd3   : > { %v707_v59 = vmul.f32 %v7206_v49, %v700_v52  ;;  %v708_v60 = vmul.f32 %v7208_v50, %v701_v53  ;;  %v618_v53 = vsel %vm617_vm7, %v7145_v11, %v7165_v22  ;;  %vm13817_vm2 = vcmp.lt.s32.totalorder %v7177_v34, 95 }
  0xd4   : > { %14390 = vst [vmem:[#allocation14_spill] sm:$0xff] %v7243_v29  ;;  %v673_v27 = vmul.f32 %v7243_v29, %v667_v26 }
  0xd5   : > { %14391 = vst [vmem:[#allocation15_spill] sm:$0xff] %v7245_v30 }
  0xd9   : > { %v728_v39 = vpop.permute.xlu1 %727  ;;  %v714_v40 = vpop.permute.xlu0 %713 }
  0xda   : > { %v732_v43 = vsel %vm13809_vm0, %v728_v39, %v730_v28  ;;  %v733_v44 = vsel %vm13809_vm0, %v730_v28, %v728_v39  ;;  %v716_v45 = vsel %vm13808_vm1, %v712_v23, %v714_v40  ;;  %v717_v46 = vsel %vm13808_vm1, %v714_v40, %v712_v23 }
  0xdb   : > { %v739_v47 = vmul.f32 %v7183_v36, %v732_v43  ;;  %v740_v48 = vmul.f32 %v7185_v37, %v733_v44  ;;  %v723_v54 = vmul.f32 %v7191_v41, %v716_v45  ;;  %v724_v55 = vmul.f32 %v7193_v42, %v717_v46  ;;  %v6807_v46 = vld [vmem:[%s14381_s1 + $0x6] ss:$8 sm:$0x3] }
  0xdc   : > { %v7262_v39 = vperm.slane %v6810_v0, 0  ;;  %v7264_v40 = vperm.slane %v6810_v0, 1  ;;  %v651_v43 = vsel %vm14010_vm5, %v7167_v24, %v7169_v25  ;;  %v674_v44 = vmul.f32 %v7245_v30, %v666_v32 }
  0xdd   : > { %982 = vmatpush.msra.mxu0 %v739_v47  ;;  %1040 = vmatpush.msra.mxu2 %v740_v48  ;;  %v7281_v45 = vperm.slane %v6809_v20, 1  ;;  %v7322_v62 = vperm.slane %v6807_v46, 0  ;;  %v7324_v63 = vperm.slane %v6807_v46, 1  ;;  %v6805_v20 = vld [vmem:[%s14381_s1 + $0x4] ss:$8 sm:$0x3] }
  0xde   : > { %14392 = vst [vmem:[#allocation16_spill] sm:$0xff] %v7262_v39  ;;  %v657_v47 = vmul.f32 %v7262_v39, %v651_v43  ;;  %vm13814_vm1 = vcmp.lt.s32.totalorder %v7177_v34, 96  ;;  %vm13815_vm0 = vcmp.lt.s32.totalorder %v7177_v34, 97 }
  0xdf   : > { %983 = vmatpush.msra.mxu0 %v723_v54  ;;  %1041 = vmatpush.msra.mxu2 %v724_v55  ;;  %14393 = vst [vmem:[#allocation17_spill] sm:$0xff] %v7264_v40  ;;  %v7313_v54 = vpop.permute.xlu2 %807 }
  0xe0   : > { %14395 = vst [vmem:[#allocation19_spill] sm:$0xff] %v7281_v45 }
  0xe1   : > { %v7239_v23 = vpop.permute.xlu1 %745  ;;  %984 = vmatpush.msra.mxu0 %v707_v59  ;;  %1042 = vmatpush.msra.mxu2 %v708_v60  ;;  %v7241_v28 = vpop.permute.xlu0 %743  ;;  %14398 = vst [vmem:[#allocation22_spill] sm:$0xff] %v7322_v62 }
  0xe2   : > { %14399 = vst [vmem:[#allocation23_spill] sm:$0xff] %v7324_v63 }
  0xe3   : > { %985 = vmatpush.msra.mxu0 %v7029_v1  ;;  %1043 = vmatpush.msra.mxu2 %v7037_v2  ;;  %v650_v1 = vsel %vm14010_vm5, %v7169_v25, %v7167_v24  ;;  %v6808_v2 = vld [vmem:[%s14381_s1 + $0x7] ss:$8 sm:$0x3]  ;;  %v635_v24 = vsel %vm14007_vm6, %v7151_v14, %v7163_v21  ;;  %v634_v25 = vsel %vm14007_vm6, %v7163_v21, %v7151_v14  ;;  %v6806_v14 = vld [vmem:[%s14381_s1 + $0x5] ss:$8 sm:$0x3] }
  0xe4   : > { %v658_v48 = vmul.f32 %v7264_v40, %v650_v1  ;;  %v7298_v51 = vperm.slane %v6808_v2, 0  ;;  %v7300_v52 = vperm.slane %v6808_v2, 1  ;;  %v619_v21 = vsel %vm617_vm7, %v7165_v22, %v7145_v11 }
  0xe5   : > { %986 = vmatpush.msra.mxu0 %v689_v35  ;;  %1044 = vmatpush.msra.mxu2 %v690_v38  ;;  %v641_v59 = vmul.f32 %v7274_v17, %v635_v24  ;;  %v642_v60 = vmul.f32 %v7281_v45, %v634_v25  ;;  %v603_v11 = vsel %vm601_vm8, %v7159_v18, %v7161_v19  ;;  %v7334_v0 = vperm.slane %v6806_v14, 0  ;;  %v6804_v38 = vld [vmem:[%s14381_s1 + $0x3] ss:$8 sm:$0x3] }
  0xe6   : > { %14396 = vst [vmem:[#allocation20_spill] sm:$0xff] %v7298_v51  ;;  %v602_v22 = vsel %vm601_vm8, %v7161_v19, %v7159_v18  ;;  %v625_v26 = vmul.f32 %v7298_v51, %v619_v21  ;;  %v626_v32 = vmul.f32 %v7300_v52, %v618_v53  ;;  %v7341_v35 = vperm.slane %v6806_v14, 1 }
  0xe7   : > { %987 = vmatpush.msra.mxu0 %v673_v27  ;;  %1045 = vmatpush.msra.mxu2 %v674_v44  ;;  %14397 = vst [vmem:[#allocation21_spill] sm:$0xff] %v7300_v52  ;;  %v587_v18 = vsel %vm585_vm9, %v7133_v8, %v7153_v15  ;;  %v586_v19 = vsel %vm585_vm9, %v7153_v15, %v7133_v8  ;;  %v7358_v2 = vperm.slane %v6805_v20, 0  ;;  %v7360_v27 = vperm.slane %v6805_v20, 1  ;;  %v6803_v8 = vld [vmem:[%s14381_s1 + $0x2] ss:$8 sm:$0x3] }
  0xe8   : > { %14400 = vst [vmem:[#allocation24_spill] sm:$0xff] %v7334_v0  ;;  %v609_v43 = vmul.f32 %v7322_v62, %v603_v11  ;;  %v610_v1 = vmul.f32 %v7324_v63, %v602_v22  ;;  %v571_v15 = vsel %vm569_vm10, %v7155_v16, %v7121_v5  ;;  %v570_v44 = vsel %vm569_vm10, %v7121_v5, %v7155_v16  ;;  %v450_v20 = vld [vmem:[%s14381_s1] ss:$8 sm:$0x3] }
  0xe9   : > { %v7316_v55 = vpop.permute.xlu1 %775  ;;  %988 = vmatpush.msra.mxu0 %v657_v47  ;;  %1046 = vmatpush.msra.mxu2 %v658_v48  ;;  %v7318_v57 = vpop.permute.xlu0 %761  ;;  %14401 = vst [vmem:[#allocation25_spill] sm:$0xff] %v7341_v35  ;;  %v593_v24 = vmul.f32 %v7334_v0, %v587_v18  ;;  %v594_v25 = vmul.f32 %v7341_v35, %v586_v19  ;;  %v7376_v46 = vperm.slane %v6804_v38, 0  ;;  %v7378_v47 = vperm.slane %v6804_v38, 1  ;;  %v6802_v48 = vld [vmem:[%s14381_s1 + $0x1] ss:$8 sm:$0x3] }
  0xea   : > { %14402 = vst [vmem:[#allocation26_spill] sm:$0xff] %v7358_v2  ;;  %v555_v5 = vsel %vm553_vm11, %v7147_v12, %v7149_v13  ;;  %v554_v16 = vsel %vm553_vm11, %v7149_v13, %v7147_v12  ;;  %v7391_v14 = vperm.slane %v6803_v8, 0  ;;  %v7399_v11 = vperm.slane %v6803_v8, 1  ;;  %v7417_v18 = vpop.permute.xlu2 %825 }
  0xeb   : > { %989 = vmatpush.msra.mxu0 %v641_v59  ;;  %1047 = vmatpush.msra.mxu2 %v642_v60  ;;  %14403 = vst [vmem:[#allocation27_spill] sm:$0xff] %v7360_v27  ;;  %v577_v59 = vmul.f32 %v7358_v2, %v571_v15  ;;  %v578_v60 = vmul.f32 %v7360_v27, %v570_v44  ;;  %v7410_v22 = vperm.slane %v6802_v48, 0  ;;  %v7419_v19 = vperm.slane %v6802_v48, 1 }
  0xec   : > { %14404 = vst [vmem:[#allocation28_spill] sm:$0xff] %v7376_v46  ;;  %v539_v12 = vsel %vm537_vm12, %v7113_v4, %v7105_v3  ;;  %v538_v13 = vsel %vm537_vm12, %v7105_v3, %v7113_v4  ;;  %v523_v3 = vsel %vm521_vm13, %v7141_v9, %v7129_v6  ;;  %v522_v4 = vsel %vm521_vm13, %v7129_v6, %v7141_v9 }
  0xed   : > { %990 = vmatpush.msra.mxu0 %v625_v26  ;;  %1048 = vmatpush.msra.mxu2 %v626_v32  ;;  %14405 = vst [vmem:[#allocation29_spill] sm:$0xff] %v7378_v47  ;;  %v561_v26 = vmul.f32 %v7376_v46, %v555_v5  ;;  %v562_v32 = vmul.f32 %v7378_v47, %v554_v16  ;;  %v7434_v8 = vperm.slane %v450_v20, 1  ;;  %v887_v16 = vld [vmem:[%s14412_s2] sm:$0xff] }
  0xee   : > { %14406 = vst [vmem:[#allocation30_spill] sm:$0xff] %v7391_v14  ;;  %v545_v38 = vmul.f32 %v7391_v14, %v539_v12  ;;  %v507_v15 = vsel %vm505_vm14, %v7143_v10, %v7131_v7  ;;  %v506_v6 = vsel %vm505_vm14, %v7131_v7, %v7143_v10  ;;  %v529_v9 = vmul.f32 %v7410_v22, %v523_v3  ;;  %v945_v10 = vld [vmem:[%s14413_s7] sm:$0xff] }
  0xef   : > { %991 = vmatpush.msra.mxu0 %v609_v43  ;;  %1049 = vmatpush.msra.mxu2 %v610_v1  ;;  %14407 = vst [vmem:[#allocation31_spill] sm:$0xff] %v7399_v11  ;;  %v546_v43 = vmul.f32 %v7399_v11, %v538_v13  ;;  %v7432_v1 = vperm.slane %v450_v20, 0  ;;  %v530_v44 = vmul.f32 %v7419_v19, %v522_v4  ;;  %v889_v13 = vld [vmem:[%s14412_s2 + $0x10] sm:$0xff] }
  0xf0   : > { %14408 = vst [vmem:[#allocation32_spill] sm:$0xff] %v7410_v22  ;;  %v514_v5 = vmul.f32 %v7434_v8, %v506_v6  ;;  %v6824_v20 = vld [vmem:[%s14381_s1 + $0x30] ss:$8 sm:$0x3] }
  0xf1   : > { %v7393_v21 = vpop.permute.xlu1 %793  ;;  %992 = vmatpush.msra.mxu0 %v593_v24  ;;  %1050 = vmatpush.msra.mxu2 %v594_v25  ;;  %v7395_v53 = vpop.permute.xlu0 %791  ;;  %14409 = vst [vmem:[#allocation33_spill] sm:$0xff] %v7419_v19  ;;  %v513_v48 = vmul.f32 %v7432_v1, %v507_v15  ;;  %v7466_v3 = vperm.slane %v6824_v20, 0  ;;  %v7468_v4 = vperm.slane %v6824_v20, 1 }
  0xf2   : > { %14410 = vst [vmem:[#allocation34_spill] sm:$0xff] %v7432_v1  ;;  %v856_v7 = vpop.permute.xlu2 %855 }
  0xf3   : > { %993 = vmatpush.msra.mxu0 %v577_v59  ;;  %1051 = vmatpush.msra.mxu2 %v578_v60  ;;  %14411 = vst [vmem:[#allocation35_spill] sm:$0xff] %v7434_v8  ;;  %v6941_v59 = vmov 0  }
  0xf4   : > { %6891 = vset.pattern.permute.xlu0 %v6941_v59  ;;  %6892 = vset.pattern.permute.xlu1 %v6941_v59  ;;  %14414 = vst [vmem:[#allocation36_spill] sm:$0xff] %v7466_v3 }
  0xf5   : > { %994 = vmatpush.msra.mxu0 %v561_v26  ;;  %1052 = vmatpush.msra.mxu2 %v562_v32  ;;  %v6823_v26 = vld [vmem:[%s14381_s1 + $0x27] ss:$8 sm:$0x3]  ;;  %14415 = vst [vmem:[#allocation37_spill] sm:$0xff] %v7468_v4 }
  0xf6   : > { %951 = vperm.xlu0 %6891, %v945_v10   ;;  %6893 = vset.pattern.permute.xlu2 %v6941_v59 }
  0xf7   : > { %995 = vmatpush.msra.mxu0 %v545_v38  ;;  %1053 = vmatpush.msra.mxu2 %v546_v43  ;;  %v6822_v38 = vld [vmem:[%s14381_s1 + $0x26] ss:$8 sm:$0x3]  ;;  %v6821_v43 = vld [vmem:[%s14381_s1 + $0x25] ss:$8 sm:$0x3] }
  0xf8   : > { %v7498_v31 = vperm.slane %v6822_v38, 1 }
  0xf9   : > { %v824_v24 = vpop.permute.xlu1 %823  ;;  %996 = vmatpush.msra.mxu0 %v529_v9  ;;  %1054 = vmatpush.msra.mxu2 %v530_v44  ;;  %v7446_v25 = vpop.permute.xlu0 %809  ;;  %v7477_v9 = vperm.slane %v6823_v26, 0  ;;  %v7479_v44 = vperm.slane %v6823_v26, 1  ;;  %v7496_v26 = vperm.slane %v6822_v38, 0 }
  0xfa   : > { %v874_v32 = vpop.permute.xlu2 %873  ;;  %14419 = vst [vmem:[#allocation41_spill] sm:$0xff] %v7498_v31 }
  0xfb   : > { %997 = vmatpush.msra.mxu0 %v513_v48  ;;  %1055 = vmatpush.msra.mxu2 %v514_v5  ;;  %14416 = vst [vmem:[#allocation38_spill] sm:$0xff] %v7477_v9  ;;  %v891_v48 = vld [vmem:[%s14412_s2 + $0x20] sm:$0xff] }
  0xfc   : > { %1056 = vmatmul.f32.vlgmr.msra.gmra.mxu2 %v887_v16  ;;  %998 = vmatmul.f32.vlgmr.msra.gmra.mxu0 %v887_v16  ;;  %14417 = vst [vmem:[#allocation39_spill] sm:$0xff] %v7479_v44 }
  0xfd   : > { %14418 = vst [vmem:[#allocation40_spill] sm:$0xff] %v7496_v26 }
 0x101   : > { %v842_v60 = vpop.permute.xlu1 %841  ;;  %v840_v12 = vpop.permute.xlu0 %839 }
 0x102   : > { %v844_v45 = vsel %vm13814_vm1, %v840_v12, %v842_v60 }
 0x104   : > { %1059 = vmatmul.f32.gmra.mxu2 %v889_v13  ;;  %1001 = vmatmul.f32.gmra.mxu0 %v889_v13 }
 0x109   : > { %v872_v15 = vpop.permute.xlu1 %871  ;;  %v858_v6 = vpop.permute.xlu0 %857 }
 0x10a   : > { %v876_v5 = vsel %vm13813_vm15, %v872_v15, %v874_v32  ;;  %v877_v16 = vsel %vm13813_vm15, %v874_v32, %v872_v15  ;;  %v860_v10 = vsel %vm13817_vm2, %v856_v7, %v858_v6  ;;  %v861_v59 = vsel %vm13817_vm2, %v858_v6, %v856_v7  ;;  %v6820_v7 = vld [vmem:[%s14381_s1 + $0x24] ss:$8 sm:$0x3] }
 0x10b   : > { %v883_v13 = vmul.f32 %v7466_v3, %v876_v5  ;;  %v884_v20 = vmul.f32 %v7468_v4, %v877_v16  ;;  %v845_v32 = vsel %vm13814_vm1, %v842_v60, %v840_v12  ;;  %v7504_v15 = vperm.slane %v6821_v43, 0 }
 0x10c   : > { %1062 = vmatmul.f32.gmra.mxu2 %v891_v48  ;;  %1004 = vmatmul.f32.gmra.mxu0 %v891_v48  ;;  %v867_v6 = vmul.f32 %v7477_v9, %v860_v10  ;;  %v868_v38 = vmul.f32 %v7479_v44, %v861_v59  ;;  %v7511_v5 = vperm.slane %v6821_v43, 1  ;;  %vm13816_vm15 = vcmp.lt.s32.totalorder %v7177_v34, 98  ;;  %v6819_v48 = vld [vmem:[%s14381_s1 + $0x23] ss:$8 sm:$0x3] }
 0x10d   : > { %14420 = vst [vmem:[#allocation42_spill] sm:$0xff] %v7504_v15  ;;  %1018 = vmatpush.msra.mxu1 %v883_v13  ;;  %1076 = vmatpush.msra.mxu3 %v884_v20  ;;  %v828_v60 = vsel %vm13815_vm0, %v824_v24, %v7417_v18  ;;  %v829_v12 = vsel %vm13815_vm0, %v7417_v18, %v824_v24  ;;  %vm14051_vm1 = vcmp.lt.s32.totalorder %v7177_v34, 110  ;;  %v7526_v10 = vperm.slane %v6820_v7, 0  ;;  %v6818_v18 = vld [vmem:[%s14381_s1 + $0x22] ss:$8 sm:$0x3] }
 0x10e   : > { %14421 = vst [vmem:[#allocation43_spill] sm:$0xff] %v7511_v5  ;;  %v851_v43 = vmul.f32 %v7496_v26, %v844_v45  ;;  %v852_v16 = vmul.f32 %v7498_v31, %v845_v32  ;;  %v7528_v59 = vperm.slane %v6820_v7, 1  ;;  %v812_v24 = vsel %vm13816_vm15, %v7313_v54, %v7446_v25 }
 0x10f   : > { %1019 = vmatpush.msra.mxu1 %v867_v6  ;;  %1077 = vmatpush.msra.mxu3 %v868_v38  ;;  %14422 = vst [vmem:[#allocation44_spill] sm:$0xff] %v7526_v10  ;;  %v813_v45 = vsel %vm13816_vm15, %v7446_v25, %v7313_v54  ;;  %vm14050_vm0 = vcmp.lt.s32.totalorder %v7177_v34, 111  ;;  %v835_v13 = vmul.f32 %v7504_v15, %v828_v60  ;;  %v7544_v32 = vperm.slane %v6819_v48, 0  ;;  %v893_v6 = vld [vmem:[%s14412_s2 + $0x30] sm:$0xff] }
 0x110   : > { %14423 = vst [vmem:[#allocation45_spill] sm:$0xff] %v7528_v59  ;;  %v836_v20 = vmul.f32 %v7511_v5, %v829_v12  ;;  %v7546_v7 = vperm.slane %v6819_v48, 1  ;;  %v796_v54 = vsel %vm14051_vm1, %v7395_v53, %v7393_v21  ;;  %v797_v25 = vsel %vm14051_vm1, %v7393_v21, %v7395_v53  ;;  %v6817_v60 = vld [vmem:[%s14381_s1 + $0x21] ss:$8 sm:$0x3] }
 0x111   : > { %1020 = vmatpush.msra.mxu1 %v851_v43  ;;  %1078 = vmatpush.msra.mxu3 %v852_v16  ;;  %14424 = vst [vmem:[#allocation46_spill] sm:$0xff] %v7544_v32  ;;  %v7559_v38 = vperm.slane %v6818_v18, 0  ;;  %v819_v12 = vmul.f32 %v7526_v10, %v812_v24  ;;  %v820_v48 = vmul.f32 %v7528_v59, %v813_v45  ;;  %v7566_v43 = vperm.slane %v6818_v18, 1  ;;  %v6816_v16 = vld [vmem:[%s14381_s1 + $0x20] ss:$8 sm:$0x3] }
 0x112   : > { %14425 = vst [vmem:[#allocation47_spill] sm:$0xff] %v7546_v7  ;;  %vm13818_vm15 = vcmp.lt.s32.totalorder %v7177_v34, 112  ;;  %v780_v21 = vsel %vm14050_vm0, %v7316_v55, %v7225_v58  ;;  %v781_v53 = vsel %vm14050_vm0, %v7225_v58, %v7316_v55  ;;  %vm14048_vm2 = vcmp.lt.s32.totalorder %v7177_v34, 113  ;;  %s14582_s1 = smov 95  }
 0x113   : > { %14426 = vst [vmem:[#allocation48_spill] sm:$0xff] %v7559_v38  ;;  %1021 = vmatpush.msra.mxu1 %v835_v13  ;;  %1079 = vmatpush.msra.mxu3 %v836_v20  ;;  %v803_v18 = vmul.f32 %v7544_v32, %v796_v54  ;;  %v804_v24 = vmul.f32 %v7546_v7, %v797_v25  ;;  %v7583_v45 = vperm.slane %v6817_v60, 0  ;;  %v7585_v13 = vperm.slane %v6817_v60, 1  ;;  %v946_v20 = vld [vmem:[%s14413_s7 + $0x8] sm:$0xff] }
 0x114   : > { %14427 = vst [vmem:[#allocation49_spill] sm:$0xff] %v7566_v43  ;;  %1065 = vmatmul.f32.gmra.mxu2 %v893_v6  ;;  %1007 = vmatmul.f32.gmra.mxu0 %v893_v6  ;;  %v764_v58 = vsel %vm13818_vm15, %v7174_v33, %v7318_v57  ;;  %v765_v55 = vsel %vm13818_vm15, %v7318_v57, %v7174_v33  ;;  %v947_v6 = vld [vmem:[%s14413_s7 + $0x10] sm:$0xff]  ;;  %v7603_v60 = vperm.slane %v6816_v16, 0  ;;  %vm969_vm15 = vcmask 588800  }
 0x115   : > { %1022 = vmatpush.msra.mxu1 %v819_v12  ;;  %1080 = vmatpush.msra.mxu3 %v820_v48  ;;  %14428 = vst [vmem:[#allocation50_spill] sm:$0xff] %v7583_v45  ;;  %v787_v54 = vmul.f32 %v7559_v38, %v780_v21  ;;  %v788_v25 = vmul.f32 %v7566_v43, %v781_v53  ;;  %v7605_v12 = vperm.slane %v6816_v16, 1 }
 0x116   : > { %14429 = vst [vmem:[#allocation51_spill] sm:$0xff] %v7585_v13  ;;  %v748_v33 = vsel %vm14048_vm2, %v7241_v28, %v7239_v23  ;;  %v749_v57 = vsel %vm14048_vm2, %v7239_v23, %v7241_v28  ;;  %956 = vperm.xlu1 %6892, %v946_v20   ;;  %961 = vperm.xlu2 %6893, %v947_v6   ;;  %v948_v23 = vld [vmem:[%s14413_s7 + $0x18] sm:$0xff]  ;;  %s14783_s7 = smov 31  }
 0x117   : > { %1023 = vmatpush.msra.mxu1 %v803_v18  ;;  %1081 = vmatpush.msra.mxu3 %v804_v24  ;;  %14430 = vst [vmem:[#allocation52_spill] sm:$0xff] %v7603_v60  ;;  %v771_v48 = vmul.f32 %v7583_v45, %v764_v58  ;;  %v772_v21 = vmul.f32 %v7585_v13, %v765_v55  ;;  %v888_v18 = vld [vmem:[%s14412_s2 + $0x8] sm:$0xff]  ;;  %v890_v28 = vld [vmem:[%s14412_s2 + $0x18] sm:$0xff] }
 0x118   : > { %14431 = vst [vmem:[#allocation53_spill] sm:$0xff] %v7605_v12  ;;  %v755_v53 = vmul.f32 %v7603_v60, %v748_v33  ;;  %v756_v16 = vmul.f32 %v7605_v12, %v749_v57  ;;  %v892_v24 = vld [vmem:[%s14412_s2 + $0x28] sm:$0xff]  ;;  %v894_v58 = vld [vmem:[%s14412_s2 + $0x38] sm:$0xff]  ;;  %s14781_s2 = smov 32  }
 0x119   : > { %1024 = vmatpush.msra.mxu1 %v787_v54  ;;  %1082 = vmatpush.msra.mxu3 %v788_v25 }
 0x11b   : > { %1025 = vmatpush.msra.mxu1 %v771_v48  ;;  %1083 = vmatpush.msra.mxu3 %v772_v21 }
 0x11d   : > { %1026 = vmatpush.msra.mxu1 %v755_v53  ;;  %1084 = vmatpush.msra.mxu3 %v756_v16 }
 0x11e   : > { %6825 = vmatmul.msk.f32.vlgmr.msra.gmra.mxu1 %vm969_vm15, %v888_v18  ;;  %6829 = vmatmul.msk.f32.vlgmr.msra.gmra.mxu3 %vm969_vm15, %v888_v18 }
 0x11f   : > { %966 = vperm.xlu1 %6892, %v948_v23  }
 0x126   : > { %6830 = vmatmul.msk.f32.gmra.mxu3 %vm969_vm15, %v890_v28  ;;  %6826 = vmatmul.msk.f32.gmra.mxu1 %vm969_vm15, %v890_v28 }
 0x12e   : > { %6831 = vmatmul.msk.f32.gmra.mxu3 %vm969_vm15, %v892_v24  ;;  %6827 = vmatmul.msk.f32.gmra.mxu1 %vm969_vm15, %v892_v24 }
 0x136   : > { %6832 = vmatmul.msk.f32.gmra.mxu3 %vm969_vm15, %v894_v58  ;;  %6828 = vmatmul.msk.f32.gmra.mxu1 %vm969_vm15, %v894_v58  ;;  %vm14566_vm15 = vcmp.lt.s32.totalorder %v7177_v34, 114 }
 0x168   : > { %v952_v20 = vpop.permute.xlu0 %951 }
 0x179   : > { %v999_v55 = vpop.f32.mrf.mxu0 }
 0x17a   : > { %v1000_v6 = vadd.f32 %v999_v55, %v952_v20 }
 0x17f   : > { %v1057_v57 = vpop.f32.mrf.mxu2 }
 0x180   : > { %v1058_v21 = vadd.f32 %v1057_v57, %v952_v20 }
 0x181   : > { %v1002_v18 = vpop.f32.mrf.mxu0 }
 0x187   : > { %v1060_v20 = vpop.f32.mrf.mxu2 }
 0x188   : > { %v957_v23 = vpop.permute.xlu1 %956 }
 0x189   : > { %v1003_v28 = vadd.f32 %v1002_v18, %v957_v23 }
 0x19b   : > { %v1028_v54 = vpop.f32.mrf.mxu1 }
 0x19c   : > { %v1029_v25 = vadd.f32 %v1028_v54, %v1000_v6  ;;  %v1061_v6 = vadd.f32 %v1060_v20, %v957_v23  ;;  %v1063_v20 = vpop.f32.mrf.mxu2 }
 0x19e   : > { %v7634_v33 = vmax.f32 %v1029_v25, 0.0 }
 0x1a0   : > { %1186 = vrot.lane.b32.xlu0 %v7634_v33, %s13997_s17  ;;  %1146 = vrot.lane.b32.xlu1 %v7634_v33, %s13999_s15 }
 0x1a1   : > { %1106 = vrot.lane.b32.xlu2 %v7634_v33, %s14013_s16  ;;  %v1086_v48 = vpop.f32.mrf.mxu3 }
 0x1a2   : > { %v1087_v53 = vadd.f32 %v1086_v48, %v1058_v21  ;;  %v962_v48 = vpop.permute.xlu2 %961  ;;  %v1005_v21 = vpop.f32.mrf.mxu0 }
 0x1a3   : > { %v1031_v24 = vpop.f32.mrf.mxu1 }
 0x1a4   : > { %v7654_v16 = vmax.f32 %v1087_v53, 0.0  ;;  %v1032_v58 = vadd.f32 %v1031_v24, %v1003_v28  ;;  %v1006_v53 = vadd.f32 %v1005_v21, %v962_v48 }
 0x1a6   : > { %v7668_v55 = vmax.f32 %v1032_v58, 0.0 }
 0x1a8   : > { %1306 = vrot.lane.b32.xlu0 %v7634_v33, %s13982_s20  ;;  %1266 = vrot.lane.b32.xlu1 %v7634_v33, %s13991_s19 }
 0x1a9   : > { %1226 = vrot.lane.b32.xlu2 %v7634_v33, %s13995_s18  ;;  %v1089_v54 = vpop.f32.mrf.mxu3 }
 0x1aa   : > { %v1090_v25 = vadd.f32 %v1089_v54, %v1061_v6  ;;  %v1064_v6 = vadd.f32 %v1063_v20, %v962_v48 }
 0x1ab   : > { %v1034_v18 = vpop.f32.mrf.mxu1 }
 0x1ac   : > { %v7688_v57 = vmax.f32 %v1090_v25, 0.0  ;;  %v1035_v23 = vadd.f32 %v1034_v18, %v1006_v53  ;;  %v967_v25 = vpop.permute.xlu1 %966 }
 0x1ae   : > { %v7708_v28 = vmax.f32 %v1035_v23, 0.0 }
 0x1b0   : > { %1426 = vrot.lane.b32.xlu0 %v7634_v33, %s13958_s23  ;;  %1386 = vrot.lane.b32.xlu1 %v7634_v33, %s13962_s22 }
 0x1b1   : > { %1346 = vrot.lane.b32.xlu2 %v7634_v33, %s14432_s21  ;;  %v1092_v54 = vpop.f32.mrf.mxu3 }
 0x1b2   : > { %v1093_v21 = vadd.f32 %v1092_v54, %v1064_v6 }
 0x1b3   : > { %v1037_v40 = vpop.f32.mrf.mxu1 }
 0x1b4   : > { %v7734_v18 = vmax.f32 %v1093_v21, 0.0  ;;  %v1008_v21 = vpop.f32.mrf.mxu0 }
 0x1b5   : > { %v1009_v50 = vadd.f32 %v1008_v21, %v967_v25 }
 0x1b7   : > { %v1038_v42 = vadd.f32 %v1037_v40, %v1009_v50  ;;  %v1066_v40 = vpop.f32.mrf.mxu2 }
 0x1b8   : > { %1114 = vrot.lane.b32.xlu0 %v7654_v16, %s14013_s16  ;;  %1194 = vrot.lane.b32.xlu1 %v7654_v16, %s13997_s17  ;;  %v1067_v10 = vadd.f32 %v1066_v40, %v967_v25 }
 0x1b9   : > { %1154 = vrot.lane.b32.xlu2 %v7654_v16, %s13999_s15  ;;  %v7772_v3 = vmax.f32 %v1038_v42, 0.0  ;;  %v1095_v5 = vpop.f32.mrf.mxu3 }
 0x1ba   : > { %v1096_v42 = vadd.f32 %v1095_v5, %v1067_v10 }
 0x1bc   : > { %v7798_v44 = vmax.f32 %v1096_v42, 0.0 }
 0x1c0   : > { %1234 = vrot.lane.b32.xlu0 %v7654_v16, %s13995_s18  ;;  %1314 = vrot.lane.b32.xlu1 %v7654_v16, %s13982_s20 }
 0x1c1   : > { %1274 = vrot.lane.b32.xlu2 %v7654_v16, %s13991_s19 }
 0x1c8   : > { %1354 = vrot.lane.b32.xlu0 %v7654_v16, %s14432_s21  ;;  %1188 = vrot.lane.b32.xlu1 %v7668_v55, %s13997_s17 }
 0x1c9   : > { %1394 = vrot.lane.b32.xlu2 %v7654_v16, %s13962_s22 }
 0x1d0   : > { %1108 = vrot.lane.b32.xlu0 %v7668_v55, %s14013_s16  ;;  %1308 = vrot.lane.b32.xlu1 %v7668_v55, %s13982_s20 }
 0x1d1   : > { %1148 = vrot.lane.b32.xlu2 %v7668_v55, %s13999_s15 }
 0x1d8   : > { %1228 = vrot.lane.b32.xlu0 %v7668_v55, %s13995_s18  ;;  %1428 = vrot.lane.b32.xlu1 %v7668_v55, %s13958_s23 }
 0x1d9   : > { %1268 = vrot.lane.b32.xlu2 %v7668_v55, %s13991_s19 }
 0x1e0   : > { %1348 = vrot.lane.b32.xlu0 %v7668_v55, %s14432_s21  ;;  %1116 = vrot.lane.b32.xlu1 %v7688_v57, %s14013_s16 }
 0x1e1   : > { %1388 = vrot.lane.b32.xlu2 %v7668_v55, %s13962_s22 }
 0x1e8   : > { %1156 = vrot.lane.b32.xlu0 %v7688_v57, %s13999_s15  ;;  %1236 = vrot.lane.b32.xlu1 %v7688_v57, %s13995_s18 }
 0x1e9   : > { %1196 = vrot.lane.b32.xlu2 %v7688_v57, %s13997_s17 }
 0x1f0   : > { %1276 = vrot.lane.b32.xlu0 %v7688_v57, %s13991_s19  ;;  %1356 = vrot.lane.b32.xlu1 %v7688_v57, %s14432_s21 }
 0x1f1   : > { %1316 = vrot.lane.b32.xlu2 %v7688_v57, %s13982_s20 }
 0x1f8   : > { %1396 = vrot.lane.b32.xlu0 %v7688_v57, %s13962_s22  ;;  %1110 = vrot.lane.b32.xlu1 %v7708_v28, %s14013_s16 }
 0x1f9   : > { %1190 = vrot.lane.b32.xlu2 %v7708_v28, %s13997_s17 }
 0x1fb   : > { %v7716_v24 = vpop.permute.xlu2 %1106 }
 0x1fc   : > { %14433 = vst [vmem:[#allocation54_spill] sm:$0xff] %v7716_v24 }
 0x200   : > { %1150 = vrot.lane.b32.xlu0 %v7708_v28, %s13999_s15  ;;  %1230 = vrot.lane.b32.xlu1 %v7708_v28, %s13995_s18 }
 0x201   : > { %1310 = vrot.lane.b32.xlu2 %v7708_v28, %s13982_s20 }
 0x203   : > { %v7724_v58 = vpop.permute.xlu2 %1226 }
 0x208   : > { %1270 = vrot.lane.b32.xlu0 %v7708_v28, %s13991_s19  ;;  %1350 = vrot.lane.b32.xlu1 %v7708_v28, %s14432_s21 }
 0x209   : > { %1430 = vrot.lane.b32.xlu2 %v7708_v28, %s13958_s23 }
 0x20b   : > { %v7732_v53 = vpop.permute.xlu2 %1346 }
 0x20c   : > { %14434 = vst [vmem:[#allocation55_spill] sm:$0xff] %v7732_v53 }
 0x210   : > { %1390 = vrot.lane.b32.xlu0 %v7708_v28, %s13962_s22  ;;  %1158 = vrot.lane.b32.xlu1 %v7734_v18, %s13999_s15 }
 0x211   : > { %1118 = vrot.lane.b32.xlu2 %v7734_v18, %s14013_s16 }
 0x212   : > { %v7742_v48 = vpop.permute.xlu0 %1186  ;;  %v7744_v23 = vpop.permute.xlu1 %1146 }
 0x213   : > { %14435 = vst [vmem:[#allocation56_spill] sm:$0xff] %v7744_v23  ;;  %v7746_v20 = vpop.permute.xlu2 %1154 }
 0x214   : > { %14436 = vst [vmem:[#allocation57_spill] sm:$0xff] %v7746_v20 }
 0x218   : > { %1198 = vrot.lane.b32.xlu0 %v7734_v18, %s13997_s17  ;;  %1278 = vrot.lane.b32.xlu1 %v7734_v18, %s13991_s19 }
 0x219   : > { %1238 = vrot.lane.b32.xlu2 %v7734_v18, %s13995_s18 }
 0x21a   : > { %v7754_v6 = vpop.permute.xlu0 %1306  ;;  %v7756_v54 = vpop.permute.xlu1 %1266 }
 0x21b   : > { %14437 = vst [vmem:[#allocation58_spill] sm:$0xff] %v7754_v6  ;;  %v7758_v4 = vpop.permute.xlu2 %1274 }
 0x21c   : > { %14438 = vst [vmem:[#allocation59_spill] sm:$0xff] %v7756_v54 }
 0x21d   : > { %14439 = vst [vmem:[#allocation60_spill] sm:$0xff] %v7758_v4 }
 0x220   : > { %1318 = vrot.lane.b32.xlu0 %v7734_v18, %s13982_s20  ;;  %1398 = vrot.lane.b32.xlu1 %v7734_v18, %s13962_s22 }
 0x221   : > { %1358 = vrot.lane.b32.xlu2 %v7734_v18, %s14432_s21 }
 0x222   : > { %v7766_v30 = vpop.permute.xlu0 %1426  ;;  %v7768_v37 = vpop.permute.xlu1 %1386 }
 0x223   : > { %14440 = vst [vmem:[#allocation61_spill] sm:$0xff] %v7766_v30  ;;  %v7770_v61 = vpop.permute.xlu2 %1394 }
 0x224   : > { %14441 = vst [vmem:[#allocation62_spill] sm:$0xff] %v7768_v37 }
 0x225   : > { %14442 = vst [vmem:[#allocation63_spill] sm:$0xff] %v7770_v61 }
 0x228   : > { %1192 = vrot.lane.b32.xlu0 %v7772_v3, %s13997_s17  ;;  %1152 = vrot.lane.b32.xlu1 %v7772_v3, %s13999_s15 }
 0x229   : > { %1112 = vrot.lane.b32.xlu2 %v7772_v3, %s14013_s16 }
 0x22a   : > { %v7780_v21 = vpop.permute.xlu0 %1114  ;;  %v7782_v50 = vpop.permute.xlu1 %1194 }
 0x22b   : > { %14443 = vst [vmem:[#allocation64_spill] sm:$0xff] %v7780_v21  ;;  %v7784_v59 = vpop.permute.xlu2 %1148 }
 0x22c   : > { %14444 = vst [vmem:[#allocation65_spill] sm:$0xff] %v7784_v59 }
 0x230   : > { %1312 = vrot.lane.b32.xlu0 %v7772_v3, %s13982_s20  ;;  %1272 = vrot.lane.b32.xlu1 %v7772_v3, %s13991_s19 }
 0x231   : > { %1232 = vrot.lane.b32.xlu2 %v7772_v3, %s13995_s18 }
 0x232   : > { %v7792_v15 = vpop.permute.xlu0 %1234  ;;  %v7794_v31 = vpop.permute.xlu1 %1314 }
 0x233   : > { %14445 = vst [vmem:[#allocation66_spill] sm:$0xff] %v7794_v31  ;;  %v7796_v26 = vpop.permute.xlu2 %1268 }
 0x234   : > { %14446 = vst [vmem:[#allocation67_spill] sm:$0xff] %v7796_v26 }
 0x238   : > { %1120 = vrot.lane.b32.xlu0 %v7798_v44, %s14013_s16  ;;  %1392 = vrot.lane.b32.xlu1 %v7772_v3, %s13962_s22  ;;  %s14799_s16 = smov 16  }
 0x239   : > { %1352 = vrot.lane.b32.xlu2 %v7772_v3, %s14432_s21 }
 0x23a   : > { %v7806_v25 = vpop.permute.xlu0 %1354  ;;  %v7808_v5 = vpop.permute.xlu1 %1188 }
 0x23b   : > { %14447 = vst [vmem:[#allocation68_spill] sm:$0xff] %v7806_v25  ;;  %v7810_v10 = vpop.permute.xlu2 %1388 }
 0x23c   : > { %14448 = vst [vmem:[#allocation69_spill] sm:$0xff] %v7810_v10 }
 0x240   : > { %1240 = vrot.lane.b32.xlu0 %v7798_v44, %s13995_s18  ;;  %1200 = vrot.lane.b32.xlu1 %v7798_v44, %s13997_s17  ;;  %s14563_s18 = smov 97   ;;  %s14603_s17 = smov 94  }
 0x241   : > { %1160 = vrot.lane.b32.xlu2 %v7798_v44, %s13999_s15  ;;  %s14805_s15 = smov 15  }
 0x242   : > { %v7818_v40 = vpop.permute.xlu0 %1108  ;;  %v7820_v42 = vpop.permute.xlu1 %1308 }
 0x243   : > { %14449 = vst [vmem:[#allocation70_spill] sm:$0xff] %v7818_v40  ;;  %v7822_v9 = vpop.permute.xlu2 %1196 }
 0x244   : > { %14450 = vst [vmem:[#allocation71_spill] sm:$0xff] %v7820_v42 }
 0x248   : > { %1360 = vrot.lane.b32.xlu0 %v7798_v44, %s14432_s21  ;;  %1320 = vrot.lane.b32.xlu1 %v7798_v44, %s13982_s20  ;;  %s14548_s20 = smov 110  }
 0x249   : > { %1280 = vrot.lane.b32.xlu2 %v7798_v44, %s13991_s19  ;;  %s14557_s19 = smov 98  }
 0x24a   : > { %v7830_v27 = vpop.permute.xlu0 %1228  ;;  %v7832_v35 = vpop.permute.xlu1 %1428 }
 0x24b   : > { %14451 = vst [vmem:[#allocation72_spill] sm:$0xff] %v7832_v35  ;;  %v7834_v63 = vpop.permute.xlu2 %1316 }
 0x24c   : > { %14452 = vst [vmem:[#allocation73_spill] sm:$0xff] %v7834_v63 }
 0x250   : > { %1432 = vrot.lane.b32.xlu0 %v7772_v3, %s13958_s23  ;;  %1434 = vrot.lane.b32.xlu1 %v7654_v16, %s13958_s23 }
 0x251   : > { %1400 = vrot.lane.b32.xlu2 %v7798_v44, %s13962_s22  ;;  %s14536_s22 = smov 111  }
 0x252   : > { %v7842_v52 = vpop.permute.xlu0 %1348  ;;  %v7844_v12 = vpop.permute.xlu1 %1116 }
 0x253   : > { %14453 = vst [vmem:[#allocation74_spill] sm:$0xff] %v7842_v52  ;;  %v7846_v60 = vpop.permute.xlu2 %1190 }
 0x254   : > { %14454 = vst [vmem:[#allocation75_spill] sm:$0xff] %v7844_v12 }
 0x258   : > { %1438 = vrot.lane.b32.xlu0 %v7734_v18, %s13958_s23  ;;  %1440 = vrot.lane.b32.xlu1 %v7798_v44, %s13958_s23 }
 0x259   : > { %1436 = vrot.lane.b32.xlu2 %v7688_v57, %s13958_s23  ;;  %s14527_s23 = smov 112  }
 0x25a   : > { %v7854_v13 = vpop.permute.xlu0 %1156  ;;  %v7856_v45 = vpop.permute.xlu1 %1236 }
 0x25b   : > { %14455 = vst [vmem:[#allocation76_spill] sm:$0xff] %v7854_v13  ;;  %v7858_v43 = vpop.permute.xlu2 %1310 }
 0x25c   : > { %14456 = vst [vmem:[#allocation77_spill] sm:$0xff] %v7858_v43 }
 0x260   : > { %1468 = vrot.lane.b32.xlu0 %v7668_v55, %s14457_s29  ;;  %1470 = vrot.lane.b32.xlu1 %v7708_v28, %s14457_s29 }
 0x261   : > { %1466 = vrot.lane.b32.xlu2 %v7634_v33, %s14457_s29 }
 0x262   : > { %v7866_v38 = vpop.permute.xlu0 %1276  ;;  %v7868_v7 = vpop.permute.xlu1 %1356 }
 0x263   : > { %14458 = vst [vmem:[#allocation78_spill] sm:$0xff] %v7866_v38  ;;  %v7870_v32 = vpop.permute.xlu2 %1430 }
 0x264   : > { %14459 = vst [vmem:[#allocation79_spill] sm:$0xff] %v7868_v7 }
 0x265   : > { %14460 = vst [vmem:[#allocation80_spill] sm:$0xff] %v7870_v32 }
 0x268   : > { %1474 = vrot.lane.b32.xlu0 %v7654_v16, %s14457_s29  ;;  %1476 = vrot.lane.b32.xlu1 %v7688_v57, %s14457_s29 }
 0x269   : > { %1472 = vrot.lane.b32.xlu2 %v7772_v3, %s14457_s29 }
 0x26a   : > { %v7878_v8 = vpop.permute.xlu0 %1396  ;;  %v7880_v19 = vpop.permute.xlu1 %1110 }
 0x26b   : > { %14461 = vst [vmem:[#allocation81_spill] sm:$0xff] %v7878_v8  ;;  %v7882_v11 = vpop.permute.xlu2 %1118 }
 0x26c   : > { %14462 = vst [vmem:[#allocation82_spill] sm:$0xff] %v7880_v19 }
 0x26d   : > { %14463 = vst [vmem:[#allocation83_spill] sm:$0xff] %v7882_v11 }
 0x270   : > { %1480 = vrot.lane.b32.xlu0 %v7798_v44, %s14457_s29  ;;  %1506 = vrot.lane.b32.xlu1 %v7634_v33, %s14464_s24 }
 0x271   : > { %1478 = vrot.lane.b32.xlu2 %v7734_v18, %s14457_s29 }
 0x272   : > { %v7890_v47 = vpop.permute.xlu0 %1150  ;;  %v7892_v49 = vpop.permute.xlu1 %1230 }
 0x273   : > { %14465 = vst [vmem:[#allocation84_spill] sm:$0xff] %v7890_v47  ;;  %v7894_v41 = vpop.permute.xlu2 %1238 }
 0x278   : > { %1510 = vrot.lane.b32.xlu0 %v7708_v28, %s14464_s24  ;;  %1512 = vrot.lane.b32.xlu1 %v7772_v3, %s14464_s24 }
 0x279   : > { %1508 = vrot.lane.b32.xlu2 %v7668_v55, %s14464_s24 }
 0x27a   : > { %v7902_v36 = vpop.permute.xlu0 %1270  ;;  %v7904_v30 = vpop.permute.xlu1 %1350 }
 0x27b   : > { %14466 = vst [vmem:[#allocation85_spill] sm:$0xff] %v7902_v36  ;;  %v7906_v35 = vpop.permute.xlu2 %1358 }
 0x27c   : > { %14467 = vst [vmem:[#allocation86_spill] sm:$0xff] %v7904_v30 }
 0x27d   : > { %14468 = vst [vmem:[#allocation87_spill] sm:$0xff] %v7906_v35 }
 0x280   : > { %1516 = vrot.lane.b32.xlu0 %v7688_v57, %s14464_s24  ;;  %1518 = vrot.lane.b32.xlu1 %v7734_v18, %s14464_s24 }
 0x281   : > { %1514 = vrot.lane.b32.xlu2 %v7654_v16, %s14464_s24 }
 0x282   : > { %v7914_v17 = vpop.permute.xlu0 %1390  ;;  %v7916_v32 = vpop.permute.xlu1 %1158 }
 0x283   : > { %14469 = vst [vmem:[#allocation88_spill] sm:$0xff] %v7914_v17  ;;  %v7918_v39 = vpop.permute.xlu2 %1112 }
 0x284   : > { %14470 = vst [vmem:[#allocation89_spill] sm:$0xff] %v7916_v32 }
 0x285   : > { %14471 = vst [vmem:[#allocation90_spill] sm:$0xff] %v7918_v39 }
 0x288   : > { %1546 = vrot.lane.b32.xlu0 %v7634_v33, %s14472_s26  ;;  %1548 = vrot.lane.b32.xlu1 %v7668_v55, %s14472_s26 }
 0x289   : > { %1520 = vrot.lane.b32.xlu2 %v7798_v44, %s14464_s24 }
 0x28a   : > { %v7926_v29 = vpop.permute.xlu0 %1198  ;;  %v7928_v56 = vpop.permute.xlu1 %1278 }
 0x28b   : > { %14473 = vst [vmem:[#allocation91_spill] sm:$0xff] %v7928_v56  ;;  %v7930_v4 = vpop.permute.xlu2 %1232 }
 0x290   : > { %1552 = vrot.lane.b32.xlu0 %v7772_v3, %s14472_s26  ;;  %1554 = vrot.lane.b32.xlu1 %v7654_v16, %s14472_s26 }
 0x291   : > { %1550 = vrot.lane.b32.xlu2 %v7708_v28, %s14472_s26 }
 0x292   : > { %v7938_v54 = vpop.permute.xlu0 %1318  ;;  %v7940_v21 = vpop.permute.xlu1 %1398 }
 0x293   : > { %14474 = vst [vmem:[#allocation92_spill] sm:$0xff] %v7938_v54  ;;  %v7942_v24 = vpop.permute.xlu2 %1352 }
 0x294   : > { %14475 = vst [vmem:[#allocation93_spill] sm:$0xff] %v7940_v21 }
 0x295   : > { %14476 = vst [vmem:[#allocation94_spill] sm:$0xff] %v7942_v24 }
 0x298   : > { %1558 = vrot.lane.b32.xlu0 %v7734_v18, %s14472_s26  ;;  %1560 = vrot.lane.b32.xlu1 %v7798_v44, %s14472_s26 }
 0x299   : > { %1556 = vrot.lane.b32.xlu2 %v7688_v57, %s14472_s26 }
 0x29a   : > { %v7950_v38 = vpop.permute.xlu0 %1192  ;;  %v7952_v26 = vpop.permute.xlu1 %1152 }
 0x29b   : > { %14477 = vst [vmem:[#allocation95_spill] sm:$0xff] %v7952_v26  ;;  %v7954_v12 = vpop.permute.xlu2 %1160 }
 0x2a0   : > { %1596 = vrot.lane.b32.xlu0 %v7668_v55, %s14478_s11  ;;  %1598 = vrot.lane.b32.xlu1 %v7708_v28, %s14478_s11 }
 0x2a1   : > { %1594 = vrot.lane.b32.xlu2 %v7634_v33, %s14478_s11 }
 0x2a2   : > { %v7962_v40 = vpop.permute.xlu0 %1312  ;;  %v7964_v56 = vpop.permute.xlu1 %1272 }
 0x2a3   : > { %14479 = vst [vmem:[#allocation96_spill] sm:$0xff] %v7962_v40  ;;  %v7966_v36 = vpop.permute.xlu2 %1280 }
 0x2a4   : > { %14480 = vst [vmem:[#allocation97_spill] sm:$0xff] %v7964_v56 }
 0x2a5   : > { %14481 = vst [vmem:[#allocation98_spill] sm:$0xff] %v7966_v36  ;;  %v1408_v36 = vsel %vm617_vm7, %v7940_v21, %v7914_v17  ;;  %v1406_v17 = vsel %vm617_vm7, %v7770_v61, %v7768_v37 }
 0x2a6   : > { %v1414_v39 = vmul.f32 %v1408_v36, %v7298_v51 }
 0x2a8   : > { %1602 = vrot.lane.b32.xlu0 %v7654_v16, %s14478_s11  ;;  %1604 = vrot.lane.b32.xlu1 %v7688_v57, %s14478_s11 }
 0x2a9   : > { %1600 = vrot.lane.b32.xlu2 %v7772_v3, %s14478_s11 }
 0x2aa   : > { %v7974_v2 = vpop.permute.xlu0 %1120  ;;  %v7976_v1 = vpop.permute.xlu1 %1392 }
 0x2ab   : > { %14482 = vst [vmem:[#allocation99_spill] sm:$0xff] %v7974_v2  ;;  %v7978_v11 = vpop.permute.xlu2 %1400  ;;  %v1407_v2 = vsel %vm617_vm7, %v7878_v8, %v7810_v10  ;;  %v1410_v8 = vmul.f32 %v1406_v17, %v7298_v51 }
 0x2ac   : > { %14483 = vst [vmem:[#allocation100_spill] sm:$0xff] %v7976_v1  ;;  %v1409_v19 = vsel %vm617_vm7, %v7978_v11, %v7976_v1  ;;  %v1208_v1 = vsel %vm537_vm12, %v7926_v29, %v7846_v60 }
 0x2ad   : > { %14484 = vst [vmem:[#allocation101_spill] sm:$0xff] %v7978_v11  ;;  %v1416_v56 = vmul.f32 %v1409_v19, %v7298_v51  ;;  %v1412_v19 = vmul.f32 %v1407_v2, %v7298_v51  ;;  %v1247_v2 = vsel %vm553_vm11, %v7856_v45, %v7830_v27 }
 0x2af   : > { %2368 = vmatpush.msrb.mxu3 %v1416_v56 }
 0x2b0   : > { %1608 = vrot.lane.b32.xlu0 %v7798_v44, %s14478_s11  ;;  %1634 = vrot.lane.b32.xlu1 %v7634_v33, %s14485_s25 }
 0x2b1   : > { %1606 = vrot.lane.b32.xlu2 %v7734_v18, %s14478_s11  ;;  %2369 = vmatpush.msrb.mxu3 %v1414_v39  ;;  %v1248_v39 = vsel %vm553_vm11, %v7894_v41, %v7892_v49 }
 0x2b2   : > { %v8005_v56 = vpop.permute.xlu0 %1240  ;;  %v8007_v36 = vpop.permute.xlu1 %1200  ;;  %v1254_v17 = vmul.f32 %v1248_v39, %v7376_v46 }
 0x2b3   : > { %2370 = vmatpush.msrb.mxu3 %v1412_v19  ;;  %v8009_v10 = vpop.permute.xlu2 %1436  ;;  %v1249_v37 = vsel %vm553_vm11, %v8005_v56, %v7930_v4  ;;  %v1209_v39 = vsel %vm537_vm12, %v8007_v36, %v7950_v38 }
 0x2b4   : > { %14486 = vst [vmem:[#allocation102_spill] sm:$0xff] %v8009_v10  ;;  %v1256_v61 = vmul.f32 %v1249_v37, %v7376_v46  ;;  %v1246_v37 = vsel %vm553_vm11, %v7792_v15, %v7724_v58  ;;  %v1216_v11 = vmul.f32 %v1209_v39, %v7391_v14 }
 0x2b5   : > { %2371 = vmatpush.msrb.mxu3 %v1410_v8  ;;  %v1250_v21 = vmul.f32 %v1246_v37, %v7376_v46  ;;  %v1368_v37 = vsel %vm601_vm8, %v7906_v35, %v7904_v30  ;;  %v14504_v30 = vld [vmem:[#allocation26_spill] sm:$0xff] }
 0x2b6   : > { %2339 = vmatpush.msrb.mxu1 %v1256_v61  ;;  %v1252_v61 = vmul.f32 %v1247_v2, %v7376_v46  ;;  %v1374_v39 = vmul.f32 %v1368_v37, %v7322_v62 }
 0x2b8   : > { %1638 = vrot.lane.b32.xlu0 %v7708_v28, %s14485_s25  ;;  %1640 = vrot.lane.b32.xlu1 %v7772_v3, %s14485_s25 }
 0x2b9   : > { %1636 = vrot.lane.b32.xlu2 %v7668_v55, %s14485_s25  ;;  %2340 = vmatpush.msrb.mxu1 %v1254_v17 }
 0x2ba   : > { %v8037_v8 = vpop.permute.xlu0 %1360  ;;  %v8039_v19 = vpop.permute.xlu1 %1320 }
 0x2bb   : > { %14487 = vst [vmem:[#allocation103_spill] sm:$0xff] %v8037_v8  ;;  %2341 = vmatpush.msrb.mxu1 %v1252_v61  ;;  %v8045_v51 = vpop.permute.xlu2 %1466  ;;  %v1369_v17 = vsel %vm601_vm8, %v8037_v8, %v7942_v24  ;;  %v1207_v61 = vsel %vm537_vm12, %v7822_v9, %v7808_v5  ;;  %v14505_v24 = vld [vmem:[#allocation85_spill] sm:$0xff]  ;;  %v14506_v8 = vld [vmem:[#allocation91_spill] sm:$0xff] }
 0x2bc   : > { %14488 = vst [vmem:[#allocation104_spill] sm:$0xff] %v8039_v19  ;;  %v1376_v2 = vmul.f32 %v1369_v17, %v7322_v62  ;;  %v1214_v17 = vmul.f32 %v1208_v1, %v7391_v14  ;;  %v1212_v1 = vmul.f32 %v1207_v61, %v7391_v14 }
 0x2bd   : > { %14489 = vst [vmem:[#allocation105_spill] sm:$0xff] %v8045_v51  ;;  %2342 = vmatpush.msrb.mxu1 %v1250_v21  ;;  %v1367_v21 = vsel %vm601_vm8, %v7868_v7, %v7842_v52  ;;  %v1169_v7 = vsel %vm521_vm13, %v7954_v12, %v7952_v26 }
 0x2be   : > { %2372 = vmatpush.msrb.mxu3 %v1376_v2  ;;  %v1366_v2 = vsel %vm601_vm8, %v7806_v25, %v7732_v53  ;;  %v1372_v52 = vmul.f32 %v1367_v21, %v7322_v62  ;;  %v1176_v21 = vmul.f32 %v1169_v7, %v7410_v22  ;;  %v1327_v7 = vsel %vm585_vm9, %v7834_v63, %v7820_v42  ;;  %v14497_v42 = vld [vmem:[#allocation90_spill] sm:$0xff]  ;;  %v14498_v63 = vld [vmem:[#allocation99_spill] sm:$0xff] }
 0x2bf   : > { %2343 = vmatpush.msrb.mxu1 %v1216_v11  ;;  %v1206_v11 = vsel %vm537_vm12, %v7782_v50, %v7742_v48  ;;  %v1370_v53 = vmul.f32 %v1366_v2, %v7322_v62 }
 0x2c0   : > { %1644 = vrot.lane.b32.xlu0 %v7688_v57, %s14485_s25  ;;  %1646 = vrot.lane.b32.xlu1 %v7734_v18, %s14485_s25  ;;  %v1210_v61 = vmul.f32 %v1206_v11, %v7391_v14  ;;  %v1328_v11 = vsel %vm585_vm9, %v7938_v54, %v7858_v43  ;;  %v1129_v43 = vsel %vm505_vm14, %v14498_v63, %v14497_v42  ;;  %v14499_v54 = vld [vmem:[#allocation97_spill] sm:$0xff] }
 0x2c1   : > { %1642 = vrot.lane.b32.xlu2 %v7654_v16, %s14485_s25  ;;  %2344 = vmatpush.msrb.mxu1 %v1214_v17 }
 0x2c2   : > { %2373 = vmatpush.msrb.mxu3 %v1374_v39  ;;  %v8087_v46 = vpop.permute.xlu0 %1432  ;;  %v8089_v37 = vpop.permute.xlu1 %1434  ;;  %v1329_v39 = vsel %vm585_vm9, %v8039_v19, %v7962_v40  ;;  %v14500_v40 = vld [vmem:[#allocation98_spill] sm:$0xff] }
 0x2c3   : > { %14490 = vst [vmem:[#allocation106_spill] sm:$0xff] %v8087_v46  ;;  %2345 = vmatpush.msrb.mxu1 %v1212_v1  ;;  %v8096_v17 = vpop.permute.xlu2 %1472  ;;  %v1168_v1 = vsel %vm521_vm13, %v7916_v32, %v7890_v47  ;;  %v1336_v14 = vmul.f32 %v1329_v39, %v7334_v0  ;;  %v14503_v19 = vld [vmem:[#allocation34_spill] sm:$0xff] }
 0x2c4   : > { %14491 = vst [vmem:[#allocation107_spill] sm:$0xff] %v8089_v37  ;;  %2374 = vmatpush.msrb.mxu3 %v1372_v52  ;;  %v1167_v52 = vsel %vm521_vm13, %v7854_v13, %v7784_v59  ;;  %v1174_v2 = vmul.f32 %v1168_v1, %v7410_v22  ;;  %v1136_v25 = vmul.f32 %v1129_v43, %v14503_v19  ;;  %v14539_v13 = vld [vmem:[#allocation12_spill] sm:$0xff] }
 0x2c5   : > { %14492 = vst [vmem:[#allocation108_spill] sm:$0xff] %v8096_v17  ;;  %2346 = vmatpush.msrb.mxu1 %v1210_v61  ;;  %v1166_v61 = vsel %vm521_vm13, %v7746_v20, %v7744_v23  ;;  %v1172_v1 = vmul.f32 %v1167_v52, %v7410_v22 }
 0x2c6   : > { %2375 = vmatpush.msrb.mxu3 %v1370_v53  ;;  %v1334_v53 = vmul.f32 %v1328_v11, %v7334_v0  ;;  %v1332_v11 = vmul.f32 %v1327_v7, %v7334_v0  ;;  %v14502_v7 = vld [vmem:[#allocation83_spill] sm:$0xff] }
 0x2c7   : > { %2347 = vmatpush.msrb.mxu1 %v1176_v21 }
 0x2c8   : > { %2376 = vmatpush.msrb.mxu3 %v1336_v14  ;;  %1674 = vrot.lane.b32.xlu0 %v7634_v33, %s14493_s30  ;;  %v1326_v14 = vsel %vm585_vm9, %v7794_v31, %v7754_v6  ;;  %v14501_v6 = vld [vmem:[#allocation82_spill] sm:$0xff] }
 0x2c9   : > { %1676 = vrot.lane.b32.xlu1 %v7668_v55, %s14493_s30  ;;  %1648 = vrot.lane.b32.xlu2 %v7798_v44, %s14485_s25  ;;  %v1330_v52 = vmul.f32 %v1326_v14, %v7334_v0  ;;  %v1128_v31 = vsel %vm505_vm14, %v14502_v7, %v14501_v6 }
 0x2ca   : > { %2348 = vmatpush.msrb.mxu1 %v1174_v2  ;;  %2377 = vmatpush.msrb.mxu3 %v1334_v53  ;;  %v8138_v39 = vpop.permute.xlu0 %1438  ;;  %v8140_v21 = vpop.permute.xlu1 %1440  ;;  %v1289_v2 = vsel %vm569_vm10, %v14500_v40, %v14499_v54  ;;  %v1170_v53 = vmul.f32 %v1166_v61, %v7410_v22  ;;  %v14508_v61 = vld [vmem:[#allocation75_spill] sm:$0xff]  ;;  %v1134_v0 = vmul.f32 %v1128_v31, %v14503_v19  ;;  %v14511_v22 = vld [vmem:[#allocation54_spill] sm:$0xff] }
 0x2cb   : > { %14494 = vst [vmem:[#allocation109_spill] sm:$0xff] %v8138_v39  ;;  %v8144_v62 = vpop.permute.xlu2 %1478  ;;  %v1296_v35 = vmul.f32 %v1289_v2, %v14504_v30 }
 0x2cc   : > { %14495 = vst [vmem:[#allocation110_spill] sm:$0xff] %v8140_v21  ;;  %2349 = vmatpush.msrb.mxu1 %v1172_v1  ;;  %2378 = vmatpush.msrb.mxu3 %v1332_v11  ;;  %v1288_v1 = vsel %vm569_vm10, %v14506_v8, %v14505_v24  ;;  %v14507_v11 = vld [vmem:[#allocation70_spill] sm:$0xff]  ;;  %v14512_v24 = vld [vmem:[#allocation64_spill] sm:$0xff] }
 0x2cd   : > { %14496 = vst [vmem:[#allocation111_spill] sm:$0xff] %v8144_v62  ;;  %v1127_v14 = vsel %vm505_vm14, %v14508_v61, %v14507_v11  ;;  %v1294_v2 = vmul.f32 %v1288_v1, %v14504_v30  ;;  %v14516_v8 = vld [vmem:[#allocation60_spill] sm:$0xff] }
 0x2ce   : > { %2350 = vmatpush.msrb.mxu1 %v1170_v53  ;;  %2379 = vmatpush.msrb.mxu3 %v1330_v52  ;;  %v14509_v53 = vld [vmem:[#allocation67_spill] sm:$0xff]  ;;  %v14510_v52 = vld [vmem:[#allocation78_spill] sm:$0xff] }
 0x2cf   : > { %v1287_v43 = vsel %vm569_vm10, %v14510_v52, %v14509_v53  ;;  %v1132_v53 = vmul.f32 %v1127_v14, %v14503_v19  ;;  %v14515_v52 = vld [vmem:[#allocation59_spill] sm:$0xff] }
 0x2d0   : > { %2351 = vmatpush.msrb.mxu1 %v1136_v25  ;;  %2380 = vmatpush.msrb.mxu3 %v1296_v35  ;;  %v1126_v35 = vsel %vm505_vm14, %v14512_v24, %v14511_v22  ;;  %v1286_v1 = vsel %vm569_vm10, %v14516_v8, %v14515_v52  ;;  %v1292_v54 = vmul.f32 %v1287_v43, %v14504_v30 }
 0x2d1   : > { %1680 = vrot.lane.b32.xlu0 %v7772_v3, %s14493_s30  ;;  %1682 = vrot.lane.b32.xlu1 %v7654_v16, %s14493_s30  ;;  %v1130_v22 = vmul.f32 %v1126_v35, %v14503_v19 }
 0x2d2   : > { %1678 = vrot.lane.b32.xlu2 %v7708_v28, %s14493_s30  ;;  %2352 = vmatpush.msrb.mxu1 %v1134_v0  ;;  %v8186_v31 = vpop.permute.xlu0 %1468  ;;  %v8188_v25 = vpop.permute.xlu1 %1470  ;;  %v1290_v0 = vmul.f32 %v1286_v1, %v14504_v30 }
 0x2d3   : > { %14513 = vst [vmem:[#allocation112_spill] sm:$0xff] %v8186_v31  ;;  %2381 = vmatpush.msrb.mxu3 %v1294_v2  ;;  %v8196_v40 = vpop.permute.xlu2 %1508 }
 0x2d4   : > { %14514 = vst [vmem:[#allocation113_spill] sm:$0xff] %v8188_v25  ;;  %2353 = vmatpush.msrb.mxu1 %v1132_v53 }
 0x2d5   : > { %14517 = vst [vmem:[#allocation114_spill] sm:$0xff] %v8196_v40  ;;  %2382 = vmatpush.msrb.mxu3 %v1292_v54 }
 0x2d6   : > { %2354 = vmatpush.msrb.mxu1 %v1130_v22 }
 0x2d7   : > { %2383 = vmatpush.msrb.mxu3 %v1290_v0 }
 0x2d9   : > { %1686 = vrot.lane.b32.xlu0 %v7734_v18, %s14493_s30  ;;  %1688 = vrot.lane.b32.xlu1 %v7798_v44, %s14493_s30 }
 0x2da   : > { %1684 = vrot.lane.b32.xlu2 %v7688_v57, %s14493_s30  ;;  %v8206_v14 = vpop.permute.xlu0 %1474  ;;  %v8208_v43 = vpop.permute.xlu1 %1476 }
 0x2db   : > { %14518 = vst [vmem:[#allocation115_spill] sm:$0xff] %v8206_v14  ;;  %v8210_v53 = vpop.permute.xlu2 %1514 }
 0x2dc   : > { %14519 = vst [vmem:[#allocation116_spill] sm:$0xff] %v8208_v43 }
 0x2dd   : > { %14520 = vst [vmem:[#allocation117_spill] sm:$0xff] %v8210_v53 }
 0x2e1   : > { %1716 = vrot.lane.b32.xlu0 %v7668_v55, %s14521_s14  ;;  %1718 = vrot.lane.b32.xlu1 %v7708_v28, %s14521_s14 }
 0x2e2   : > { %1714 = vrot.lane.b32.xlu2 %v7634_v33, %s14521_s14  ;;  %v8218_v22 = vpop.permute.xlu0 %1480  ;;  %v8220_v54 = vpop.permute.xlu1 %1506 }
 0x2e3   : > { %14522 = vst [vmem:[#allocation118_spill] sm:$0xff] %v8218_v22  ;;  %v8222_v2 = vpop.permute.xlu2 %1520 }
 0x2e4   : > { %14523 = vst [vmem:[#allocation119_spill] sm:$0xff] %v8220_v54 }
 0x2e5   : > { %14524 = vst [vmem:[#allocation120_spill] sm:$0xff] %v8222_v2 }
 0x2e9   : > { %1722 = vrot.lane.b32.xlu0 %v7654_v16, %s14521_s14  ;;  %1724 = vrot.lane.b32.xlu1 %v7688_v57, %s14521_s14 }
 0x2ea   : > { %1720 = vrot.lane.b32.xlu2 %v7772_v3, %s14521_s14  ;;  %v8230_v35 = vpop.permute.xlu0 %1510  ;;  %v8232_v1 = vpop.permute.xlu1 %1512 }
 0x2eb   : > { %14525 = vst [vmem:[#allocation121_spill] sm:$0xff] %v8230_v35  ;;  %v8234_v0 = vpop.permute.xlu2 %1550 }
 0x2ec   : > { %14526 = vst [vmem:[#allocation122_spill] sm:$0xff] %v8232_v1 }
 0x2f1   : > { %1728 = vrot.lane.b32.xlu0 %v7798_v44, %s14521_s14  ;;  %1754 = vrot.lane.b32.xlu1 %v7634_v33, %s14527_s23 }
 0x2f2   : > { %1726 = vrot.lane.b32.xlu2 %v7734_v18, %s14521_s14  ;;  %v8242_v30 = vpop.permute.xlu0 %1516  ;;  %v8244_v19 = vpop.permute.xlu1 %1518 }
 0x2f3   : > { %14528 = vst [vmem:[#allocation123_spill] sm:$0xff] %v8242_v30  ;;  %v8246_v52 = vpop.permute.xlu2 %1556 }
 0x2f4   : > { %14529 = vst [vmem:[#allocation124_spill] sm:$0xff] %v8244_v19 }
 0x2f5   : > { %14530 = vst [vmem:[#allocation125_spill] sm:$0xff] %v8246_v52 }
 0x2f9   : > { %1758 = vrot.lane.b32.xlu0 %v7708_v28, %s14527_s23  ;;  %1760 = vrot.lane.b32.xlu1 %v7772_v3, %s14527_s23 }
 0x2fa   : > { %1756 = vrot.lane.b32.xlu2 %v7668_v55, %s14527_s23  ;;  %v8254_v8 = vpop.permute.xlu0 %1546  ;;  %v8256_v24 = vpop.permute.xlu1 %1548 }
 0x2fb   : > { %14531 = vst [vmem:[#allocation126_spill] sm:$0xff] %v8254_v8  ;;  %v8258_v11 = vpop.permute.xlu2 %1594  ;;  %v1567_v32 = vsel %vm681_vm3, %v8246_v52, %v8256_v24 }
 0x2fc   : > { %14532 = vst [vmem:[#allocation127_spill] sm:$0xff] %v8256_v24 }
 0x2fd   : > { %14533 = vst [vmem:[#allocation128_spill] sm:$0xff] %v8258_v11 }
 0x301   : > { %1764 = vrot.lane.b32.xlu0 %v7688_v57, %s14527_s23  ;;  %1766 = vrot.lane.b32.xlu1 %v7734_v18, %s14527_s23 }
 0x302   : > { %1762 = vrot.lane.b32.xlu2 %v7654_v16, %s14527_s23  ;;  %v8266_v61 = vpop.permute.xlu0 %1552  ;;  %v8268_v6 = vpop.permute.xlu1 %1554 }
 0x303   : > { %14534 = vst [vmem:[#allocation129_spill] sm:$0xff] %v8266_v61  ;;  %v8270_v7 = vpop.permute.xlu2 %1600 }
 0x304   : > { %14535 = vst [vmem:[#allocation130_spill] sm:$0xff] %v8268_v6 }
 0x309   : > { %1794 = vrot.lane.b32.xlu0 %v7634_v33, %s14536_s22  ;;  %1796 = vrot.lane.b32.xlu1 %v7668_v55, %s14536_s22 }
 0x30a   : > { %1768 = vrot.lane.b32.xlu2 %v7798_v44, %s14527_s23  ;;  %v8278_v42 = vpop.permute.xlu0 %1558  ;;  %v8280_v63 = vpop.permute.xlu1 %1560 }
 0x30b   : > { %14537 = vst [vmem:[#allocation131_spill] sm:$0xff] %v8280_v63  ;;  %v8282_v23 = vpop.permute.xlu2 %1606  ;;  %v1569_v20 = vsel %vm681_vm3, %v8280_v63, %v8266_v61  ;;  %v1568_v59 = vsel %vm681_vm3, %v8278_v42, %v8234_v0  ;;  %v1566_v61 = vsel %vm681_vm3, %v8268_v6, %v8254_v8  ;;  %v1572_v63 = vmul.f32 %v1567_v32, %v14539_v13  ;;  %v14543_v6 = vld [vmem:[#allocation14_spill] sm:$0xff] }
 0x30c   : > { %14538 = vst [vmem:[#allocation132_spill] sm:$0xff] %v8282_v23  ;;  %v1576_v47 = vmul.f32 %v1569_v20, %v14539_v13  ;;  %v1574_v26 = vmul.f32 %v1568_v59, %v14539_v13  ;;  %v1528_v8 = vsel %vm665_vm4, %v8244_v19, %v8230_v35  ;;  %v8478_v35 = vld [vmem:[%s14564_s3] sm:$0xff] }
 0x30d   : > { %2355 = vmatmul.f32.vlgmr.msrb.gmra.mxu1 %v8478_v35 }
 0x30e   : > { %2397 = vmatpush.msrb.mxu0 %v1576_v47  ;;  %v1529_v47 = vsel %vm665_vm4, %v8222_v2, %v8232_v1  ;;  %v1527_v2 = vsel %vm665_vm4, %v8242_v30, %v8196_v40 }
 0x30f   : > { %v1536_v1 = vmul.f32 %v1529_v47, %v14543_v6 }
 0x310   : > { %2398 = vmatpush.msrb.mxu0 %v1574_v26  ;;  %v1570_v26 = vmul.f32 %v1566_v61, %v14539_v13  ;;  %v1526_v61 = vsel %vm665_vm4, %v8210_v53, %v8220_v54  ;;  %v1532_v13 = vmul.f32 %v1527_v2, %v14543_v6  ;;  %v14547_v54 = vld [vmem:[#allocation16_spill] sm:$0xff]  ;;  %v14567_v53 = vld [vmem:[#allocation6_spill] sm:$0xff] }
 0x311   : > { %1800 = vrot.lane.b32.xlu0 %v7772_v3, %s14536_s22  ;;  %1802 = vrot.lane.b32.xlu1 %v7654_v16, %s14536_s22  ;;  %v1530_v2 = vmul.f32 %v1526_v61, %v14543_v6  ;;  %v1486_v61 = vsel %vm14010_vm5, %v8206_v14, %v8045_v51  ;;  %v14553_v14 = vld [vmem:[#allocation18_spill] sm:$0xff] }
 0x312   : > { %1798 = vrot.lane.b32.xlu2 %v7708_v28, %s14536_s22  ;;  %v8313_v59 = vpop.permute.xlu0 %1596  ;;  %v8315_v20 = vpop.permute.xlu1 %1598  ;;  %2399 = vmatpush.msrb.mxu0 %v1572_v63  ;;  %v1534_v63 = vmul.f32 %v1528_v8, %v14543_v6 }
 0x313   : > { %14540 = vst [vmem:[#allocation133_spill] sm:$0xff] %v8313_v59  ;;  %v8318_v32 = vpop.permute.xlu2 %1636 }
 0x314   : > { %14541 = vst [vmem:[#allocation134_spill] sm:$0xff] %v8315_v20  ;;  %2400 = vmatpush.msrb.mxu0 %v1570_v26 }
 0x315   : > { %14542 = vst [vmem:[#allocation135_spill] sm:$0xff] %v8318_v32 }
 0x316   : > { %2401 = vmatpush.msrb.mxu0 %v1536_v1  ;;  %v1489_v1 = vsel %vm14010_vm5, %v8218_v22, %v8096_v17  ;;  %v1487_v22 = vsel %vm14010_vm5, %v8208_v43, %v8186_v31  ;;  %v14555_v43 = vld [vmem:[#allocation61_spill] sm:$0xff] }
 0x317   : > { %v1496_v17 = vmul.f32 %v1489_v1, %v14547_v54  ;;  %v1492_v6 = vmul.f32 %v1487_v22, %v14547_v54  ;;  %v1490_v22 = vmul.f32 %v1486_v61, %v14547_v54  ;;  %v1446_v61 = vsel %vm14007_vm6, %v8089_v37, %v14555_v43 }
 0x318   : > { %2402 = vmatpush.msrb.mxu0 %v1534_v63  ;;  %v1488_v63 = vsel %vm14010_vm5, %v8144_v62, %v8188_v25 }
 0x319   : > { %1806 = vrot.lane.b32.xlu0 %v7734_v18, %s14536_s22  ;;  %1808 = vrot.lane.b32.xlu1 %v7798_v44, %s14536_s22 }
 0x31a   : > { %1804 = vrot.lane.b32.xlu2 %v7688_v57, %s14536_s22  ;;  %v8345_v8 = vpop.permute.xlu0 %1602  ;;  %v8347_v47 = vpop.permute.xlu1 %1604  ;;  %2403 = vmatpush.msrb.mxu0 %v1532_v13  ;;  %v1494_v13 = vmul.f32 %v1488_v63, %v14547_v54 }
 0x31b   : > { %14544 = vst [vmem:[#allocation136_spill] sm:$0xff] %v8345_v8  ;;  %v8350_v26 = vpop.permute.xlu2 %1642 }
 0x31c   : > { %14545 = vst [vmem:[#allocation137_spill] sm:$0xff] %v8347_v47  ;;  %2404 = vmatpush.msrb.mxu0 %v1530_v2 }
 0x31d   : > { %14546 = vst [vmem:[#allocation138_spill] sm:$0xff] %v8350_v26 }
 0x31e   : > { %2405 = vmatpush.msrb.mxu0 %v1496_v17  ;;  %v1449_v17 = vsel %vm14007_vm6, %v8140_v21, %v8087_v46  ;;  %v14554_v21 = vld [vmem:[#allocation72_spill] sm:$0xff] }
 0x31f   : > { %v1456_v46 = vmul.f32 %v1449_v17, %v14553_v14  ;;  %v1447_v31 = vsel %vm14007_vm6, %v8009_v10, %v14554_v21  ;;  %v1450_v17 = vmul.f32 %v1446_v61, %v14553_v14  ;;  %v8457_v10 = vld [vmem:[%s14564_s3 + $0x8] sm:$0xff] }
 0x320   : > { %2406 = vmatpush.msrb.mxu0 %v1494_v13  ;;  %v14552_v13 = vld [vmem:[#allocation80_spill] sm:$0xff]  ;;  %v1452_v54 = vmul.f32 %v1447_v31, %v14553_v14  ;;  %2384 = vmatmul.f32.vlgmr.msrb.gmra.mxu3 %v8457_v10 }
 0x321   : > { %1836 = vrot.lane.b32.xlu0 %v7668_v55, %s14548_s20  ;;  %1838 = vrot.lane.b32.xlu1 %v7708_v28, %s14548_s20  ;;  %v1448_v51 = vsel %vm14007_vm6, %v8138_v39, %v14552_v13  ;;  %vm14568_vm6 = vmmov %vm14566_vm15 }
 0x322   : > { %1834 = vrot.lane.b32.xlu2 %v7634_v33, %s14548_s20  ;;  %v8377_v1 = vpop.permute.xlu0 %1608  ;;  %v8379_v2 = vpop.permute.xlu1 %1634  ;;  %2407 = vmatpush.msrb.mxu0 %v1492_v6  ;;  %v1454_v6 = vmul.f32 %v1448_v51, %v14553_v14  ;;  %vm14569_vm5 = vmmov %vm14568_vm6 }
 0x323   : > { %14549 = vst [vmem:[#allocation139_spill] sm:$0xff] %v8377_v1  ;;  %v8382_v63 = vpop.permute.xlu2 %1648 }
 0x324   : > { %14550 = vst [vmem:[#allocation140_spill] sm:$0xff] %v8379_v2  ;;  %2408 = vmatpush.msrb.mxu0 %v1490_v22 }
 0x325   : > { %14551 = vst [vmem:[#allocation141_spill] sm:$0xff] %v8382_v63 }
 0x326   : > { %2409 = vmatpush.msrb.mxu0 %v1456_v46 }
 0x328   : > { %2410 = vmatpush.msrb.mxu0 %v1454_v6 }
 0x329   : > { %1842 = vrot.lane.b32.xlu0 %v7654_v16, %s14548_s20  ;;  %1844 = vrot.lane.b32.xlu1 %v7688_v57, %s14548_s20 }
 0x32a   : > { %1840 = vrot.lane.b32.xlu2 %v7772_v3, %s14548_s20  ;;  %v8405_v46 = vpop.permute.xlu0 %1638  ;;  %v8407_v51 = vpop.permute.xlu1 %1640  ;;  %2411 = vmatpush.msrb.mxu0 %v1452_v54 }
 0x32c   : > { %v8410_v22 = vpop.permute.xlu2 %1678  ;;  %2412 = vmatpush.msrb.mxu0 %v1450_v17 }
 0x32d   : > { %14556 = vst [vmem:[#allocation142_spill] sm:$0xff] %v8410_v22 }
 0x331   : > { %1848 = vrot.lane.b32.xlu0 %v7798_v44, %s14548_s20  ;;  %1874 = vrot.lane.b32.xlu1 %v7634_v33, %s14557_s19 }
 0x332   : > { %1846 = vrot.lane.b32.xlu2 %v7734_v18, %s14548_s20  ;;  %v8418_v31 = vpop.permute.xlu0 %1644  ;;  %v8420_v6 = vpop.permute.xlu1 %1646 }
 0x333   : > { %14558 = vst [vmem:[#allocation143_spill] sm:$0xff] %v8418_v31 }
 0x334   : > { %v8422_v43 = vpop.permute.xlu2 %1684 }
 0x335   : > { %14559 = vst [vmem:[#allocation144_spill] sm:$0xff] %v8422_v43 }
 0x339   : > { %1878 = vrot.lane.b32.xlu0 %v7708_v28, %s14557_s19  ;;  %1880 = vrot.lane.b32.xlu1 %v7772_v3, %s14557_s19 }
 0x33a   : > { %1876 = vrot.lane.b32.xlu2 %v7668_v55, %s14557_s19  ;;  %v8430_v54 = vpop.permute.xlu0 %1674 }
 0x33b   : > { %14560 = vst [vmem:[#allocation145_spill] sm:$0xff] %v8430_v54  ;;  %v8432_v61 = vpop.permute.xlu1 %1676 }
 0x33c   : > { %14561 = vst [vmem:[#allocation146_spill] sm:$0xff] %v8432_v61  ;;  %v8434_v17 = vpop.permute.xlu2 %1714  ;;  %v1691_v19 = vsel %vm14569_vm5, %v8432_v61, %v8422_v43  ;;  %v2076_v61 = vld [vmem:[%s14564_s3 + $0x10] sm:$0xff] }
 0x33d   : > { %v1700_v43 = vmul.f32 %v1691_v19, %v14567_v53  ;;  %2413 = vmatmul.f32.vlgmr.msrb.gmra.mxu0 %v2076_v61 }
 0x341   : > { %1884 = vrot.lane.b32.xlu0 %v7688_v57, %s14557_s19  ;;  %1886 = vrot.lane.b32.xlu1 %v7734_v18, %s14557_s19 }
 0x342   : > { %1882 = vrot.lane.b32.xlu2 %v7654_v16, %s14557_s19 }
 0x343   : > { %v8442_v14 = vpop.permute.xlu0 %1680  ;;  %v8444_v37 = vpop.permute.xlu1 %1682 }
 0x344   : > { %14562 = vst [vmem:[#allocation147_spill] sm:$0xff] %v8444_v37  ;;  %v8446_v21 = vpop.permute.xlu2 %1720 }
 0x349   : > { %1914 = vrot.lane.b32.xlu0 %v7634_v33, %s14563_s18  ;;  %1916 = vrot.lane.b32.xlu1 %v7668_v55, %s14563_s18 }
 0x34a   : > { %1888 = vrot.lane.b32.xlu2 %v7798_v44, %s14557_s19 }
 0x34b   : > { %v8459_v13 = vpop.permute.xlu0 %1686  ;;  %v8461_v39 = vpop.permute.xlu1 %1688 }
 0x34c   : > { %14565 = vst [vmem:[#allocation148_spill] sm:$0xff] %v8459_v13  ;;  %v8464_v25 = vpop.permute.xlu2 %1726  ;;  %v1693_v62 = vsel %vm14566_vm15, %v8442_v14, %v8461_v39  ;;  %v1692_v30 = vsel %vm14568_vm6, %v8410_v22, %v8459_v13  ;;  %vm14570_vm6 = vmmov %vm14569_vm5  ;;  %vm14571_vm5 = vcmp.lt.s32.totalorder %v7177_v34, 126  ;;  %v14573_v13 = vld [vmem:[#allocation8_spill] sm:$0xff] }
 0x34d   : > { %v1704_v40 = vmul.f32 %v1693_v62, %v14567_v53  ;;  %v1702_v62 = vmul.f32 %v1692_v30, %v14567_v53  ;;  %v8500_v30 = vld [vmem:[%s14564_s3 + $0x40] sm:$0xff]  ;;  %vm14572_vm15 = vmmov %vm14571_vm5 }
 0x34e   : > { %2387 = vmatmul.f32.gmra.mxu3 %v8500_v30 }
 0x34f   : > { %2426 = vmatpush.msrb.mxu2 %v1704_v40  ;;  %v1690_v40 = vsel %vm14570_vm6, %v8430_v54, %v8444_v37  ;;  %v1652_v54 = vsel %vm14572_vm15, %v8405_v46, %v8420_v6  ;;  %vm14574_vm6 = vmmov %vm14571_vm5  ;;  %vm14575_vm15 = vcmp.lt.s32.totalorder %v7177_v34, 127 }
 0x350   : > { %v1698_v37 = vmul.f32 %v1690_v40, %v14567_v53  ;;  %v1662_v61 = vmul.f32 %v1652_v54, %v14573_v13  ;;  %v2083_v54 = vld [vmem:[%s14564_s3 + $0x48] sm:$0xff] }
 0x351   : > { %1920 = vrot.lane.b32.xlu0 %v7772_v3, %s14563_s18  ;;  %1922 = vrot.lane.b32.xlu1 %v7654_v16, %s14563_s18 }
 0x352   : > { %1918 = vrot.lane.b32.xlu2 %v7708_v28, %s14563_s18  ;;  %2427 = vmatpush.msrb.mxu2 %v1702_v62  ;;  %v1653_v62 = vsel %vm14571_vm5, %v8407_v51, %v8382_v63  ;;  %v8525_v63 = vld [vmem:[%s14564_s3 + $0x38] sm:$0xff] }
 0x353   : > { %v8505_v24 = vpop.permute.xlu0 %1716  ;;  %v8507_v52 = vpop.permute.xlu1 %1718  ;;  %v1664_v22 = vmul.f32 %v1653_v62, %v14573_v13  ;;  %2358 = vmatmul.f32.gmra.mxu1 %v8525_v63  ;;  %2416 = vmatmul.f32.gmra.mxu0 %v2083_v54 }
 0x354   : > { %2428 = vmatpush.msrb.mxu2 %v1700_v43  ;;  %v8514_v19 = vpop.permute.xlu2 %1756  ;;  %v1651_v43 = vsel %vm14574_vm6, %v8318_v32, %v8418_v31  ;;  %vm14576_vm6 = vmmov %vm14575_vm15  ;;  %v14577_v31 = vld [vmem:[#allocation10_spill] sm:$0xff] }
 0x355   : > { %v1660_v40 = vmul.f32 %v1651_v43, %v14573_v13 }
 0x356   : > { %2429 = vmatpush.msrb.mxu2 %v1698_v37  ;;  %v1650_v37 = vsel %vm14571_vm5, %v8379_v2, %v8350_v26  ;;  %v1612_v2 = vsel %vm14576_vm6, %v8315_v20, %v8282_v23  ;;  %vm14578_vm5 = vmmov %vm14576_vm6  ;;  %v1242_v23 = vsel %vm553_vm11, %v7724_v58, %v7792_v15  ;;  %vm14609_vm6 = vcmp.lt.s32.totalorder %v7177_v34, 112 }
 0x357   : > { %v1658_v26 = vmul.f32 %v1650_v37, %v14573_v13  ;;  %v1622_v37 = vmul.f32 %v1612_v2, %v14577_v31  ;;  %v2090_v2 = vld [vmem:[%s14564_s3 + $0x80] sm:$0xff] }
 0x358   : > { %2430 = vmatpush.msrb.mxu2 %v1664_v22  ;;  %v8547_v22 = vld [vmem:[%s14564_s3 + $0x78] sm:$0xff] }
 0x359   : > { %1926 = vrot.lane.b32.xlu0 %v7734_v18, %s14563_s18  ;;  %1928 = vrot.lane.b32.xlu1 %v7798_v44, %s14563_s18 }
 0x35a   : > { %1924 = vrot.lane.b32.xlu2 %v7688_v57, %s14563_s18  ;;  %2431 = vmatpush.msrb.mxu2 %v1662_v61  ;;  %v1613_v61 = vsel %vm14575_vm15, %v8270_v7, %v8377_v1  ;;  %v8572_v1 = vld [vmem:[%s14564_s3 + $0x70] sm:$0xff]  ;;  %vm14580_vm15 = vmmov %vm14578_vm5 }
 0x35b   : > { %v8552_v62 = vpop.permute.xlu0 %1722  ;;  %v8554_v53 = vpop.permute.xlu1 %1724  ;;  %2390 = vmatmul.f32.gmra.mxu3 %v8547_v22  ;;  %v1624_v32 = vmul.f32 %v1613_v61, %v14577_v31  ;;  %2361 = vmatmul.f32.gmra.mxu1 %v8572_v1 }
 0x35c   : > { %2432 = vmatpush.msrb.mxu2 %v1660_v40  ;;  %v8561_v43 = vpop.permute.xlu2 %1762  ;;  %v1611_v40 = vsel %vm14578_vm5, %v8313_v59, %v8347_v47  ;;  %2419 = vmatmul.f32.gmra.mxu0 %v2090_v2  ;;  %v1244_v47 = vsel %vm553_vm11, %v7892_v49, %v7894_v41  ;;  %v14581_v59 = vld [vmem:[#allocation29_spill] sm:$0xff]  ;;  %v1205_v49 = vsel %vm537_vm12, %v7950_v38, %v8007_v36  ;;  %v14583_v38 = vld [vmem:[#allocation31_spill] sm:$0xff]  ;;  %vm14610_vm5 = vmmov %vm14609_vm6 }
 0x35d   : > { %v1620_v54 = vmul.f32 %v1611_v40, %v14577_v31  ;;  %v1251_v58 = vmul.f32 %v1242_v23, %v14581_v59  ;;  %v1217_v36 = vmul.f32 %v1205_v49, %v14583_v38  ;;  %v14587_v49 = vld [vmem:[#allocation84_spill] sm:$0xff] }
 0x35e   : > { %2433 = vmatpush.msrb.mxu2 %v1658_v26  ;;  %v1610_v26 = vsel %vm14580_vm15, %v8258_v11, %v8345_v8  ;;  %v8610_v8 = vld [vmem:[%s14564_s3 + $0xa8] sm:$0xff]  ;;  %v2077_v11 = vld [vmem:[%s14564_s3 + $0x18] sm:$0xff]  ;;  %vm14611_vm15 = vmmov %vm14610_vm5 }
 0x35f   : > { %v1618_v40 = vmul.f32 %v1610_v26, %v14577_v31  ;;  %v2097_v26 = vld [vmem:[%s14564_s3 + $0xb8] sm:$0xff] }
 0x360   : > { %2434 = vmatpush.msrb.mxu2 %v1624_v32  ;;  %v8594_v32 = vld [vmem:[%s14564_s3 + $0xb0] sm:$0xff] }
 0x361   : > { %1956 = vrot.lane.b32.xlu0 %v7668_v55, %s14579_s0  ;;  %1958 = vrot.lane.b32.xlu1 %v7708_v28, %s14579_s0 }
 0x362   : > { %1954 = vrot.lane.b32.xlu2 %v7634_v33, %s14579_s0  ;;  %2435 = vmatpush.msrb.mxu2 %v1622_v37 }
 0x363   : > { %v8599_v61 = vpop.permute.xlu0 %1728  ;;  %v8601_v13 = vpop.permute.xlu1 %1754  ;;  %2393 = vmatmul.f32.gmra.mxu3 %v8594_v32  ;;  %2364 = vmatmul.f32.gmra.mxu1 %v8610_v8 }
 0x364   : > { %2436 = vmatpush.msrb.mxu2 %v1620_v54  ;;  %v8604_v37 = vpop.permute.xlu2 %1768  ;;  %v1245_v54 = vsel %vm553_vm11, %v7930_v4, %v8005_v56  ;;  %2422 = vmatmul.f32.gmra.mxu0 %v2097_v26  ;;  %v1243_v56 = vsel %vm553_vm11, %v7830_v27, %v7856_v45  ;;  %v1255_v26 = vmul.f32 %v1244_v47, %v14581_v59 }
 0x365   : > { %v1257_v4 = vmul.f32 %v1245_v54, %v14581_v59  ;;  %v1253_v41 = vmul.f32 %v1243_v56, %v14581_v59  ;;  %v1204_v47 = vsel %vm537_vm12, %v7846_v60, %v7926_v29  ;;  %v1203_v54 = vsel %vm537_vm12, %v7808_v5, %v7822_v9  ;;  %v14584_v9 = vld [vmem:[#allocation95_spill] sm:$0xff]  ;;  %v14600_v59 = vld [vmem:[#allocation70_spill] sm:$0xff] }
 0x366   : > { %2437 = vmatpush.msrb.mxu2 %v1618_v40  ;;  %v1215_v23 = vmul.f32 %v1204_v47, %v14583_v38  ;;  %v1213_v29 = vmul.f32 %v1203_v54, %v14583_v38  ;;  %v1165_v60 = vsel %vm521_vm13, %v14584_v9, %v7954_v12  ;;  %v14588_v12 = vld [vmem:[#allocation33_spill] sm:$0xff]  ;;  %v14589_v47 = vld [vmem:[#allocation76_spill] sm:$0xff] }
 0x368   : > { %2438 = vmatpush.msrb.mxu2 %v7772_v3 }
 0x369   : > { %1962 = vrot.lane.b32.xlu0 %v7654_v16, %s14579_s0  ;;  %1964 = vrot.lane.b32.xlu1 %v7688_v57, %s14579_s0 }
 0x36a   : > { %1960 = vrot.lane.b32.xlu2 %v7772_v3, %s14579_s0  ;;  %2439 = vmatpush.msrb.mxu2 %v7708_v28 }
 0x36b   : > { %v8628_v2 = vpop.permute.xlu0 %1758  ;;  %v8630_v40 = vpop.permute.xlu1 %1760 }
 0x36c   : > { %2440 = vmatpush.msrb.mxu2 %v7668_v55  ;;  %v8633_v31 = vpop.permute.xlu2 %1798 }
 0x36e   : > { %2441 = vmatpush.msrb.mxu2 %v7634_v33 }
 0x36f   : > { %2442 = vmatmul.f32.vlgmr.msrb.gmra.mxu2 %v2077_v11  ;;  %v2084_v11 = vld [vmem:[%s14564_s3 + $0x50] sm:$0xff] }
 0x370   : > { %2542 = vmatpush.msra.mxu2 %v1257_v4  ;;  %v1202_v4 = vsel %vm537_vm12, %v7742_v48, %v7782_v50 }
 0x371   : > { %1968 = vrot.lane.b32.xlu0 %v7798_v44, %s14579_s0  ;;  %1994 = vrot.lane.b32.xlu1 %v7634_v33, %s14582_s1  ;;  %v1211_v56 = vmul.f32 %v1202_v4, %v14583_v38  ;;  %v14591_v4 = vld [vmem:[#allocation57_spill] sm:$0xff]  ;;  %v14599_v38 = vld [vmem:[#allocation75_spill] sm:$0xff] }
 0x372   : > { %2543 = vmatpush.msra.mxu2 %v1255_v26  ;;  %1966 = vrot.lane.b32.xlu2 %v7734_v18, %s14579_s0  ;;  %v8709_v26 = vld [vmem:[%s14564_s3 + $0x88] sm:$0xff] }
 0x373   : > { %v8664_v27 = vpop.permute.xlu0 %1764  ;;  %v8666_v15 = vpop.permute.xlu1 %1766  ;;  %14585 = vst [vmem:[#allocation95_spill] sm:$0xff] %v8709_v26 }
 0x374   : > { %2544 = vmatpush.msra.mxu2 %v1253_v41  ;;  %v8668_v45 = vpop.permute.xlu2 %1804  ;;  %v14586_v41 = vld [vmem:[#allocation89_spill] sm:$0xff] }
 0x376   : > { %2545 = vmatpush.msra.mxu2 %v1251_v58  ;;  %v1164_v58 = vsel %vm521_vm13, %v14587_v49, %v14586_v41  ;;  %v14594_v41 = vld [vmem:[#allocation90_spill] sm:$0xff] }
 0x377   : > { %2445 = vmatmul.f32.gmra.mxu2 %v2084_v11  ;;  %v1177_v11 = vmul.f32 %v1165_v60, %v14588_v12 }
 0x378   : > { %2546 = vmatpush.msra.mxu2 %v1217_v36  ;;  %v14590_v36 = vld [vmem:[#allocation65_spill] sm:$0xff] }
 0x379   : > { %1998 = vrot.lane.b32.xlu0 %v7708_v28, %s14582_s1  ;;  %2000 = vrot.lane.b32.xlu1 %v7772_v3, %s14582_s1  ;;  %v1163_v54 = vsel %vm521_vm13, %v14590_v36, %v14589_v47 }
 0x37a   : > { %2547 = vmatpush.msra.mxu2 %v1215_v23  ;;  %1996 = vrot.lane.b32.xlu2 %v7668_v55, %s14582_s1  ;;  %v1175_v23 = vmul.f32 %v1164_v58, %v14588_v12  ;;  %v1173_v60 = vmul.f32 %v1163_v54, %v14588_v12  ;;  %v14597_v54 = vld [vmem:[#allocation82_spill] sm:$0xff] }
 0x37b   : > { %v8699_v5 = vpop.permute.xlu0 %1794  ;;  %v8701_v48 = vpop.permute.xlu1 %1796 }
 0x37c   : > { %2548 = vmatpush.msra.mxu2 %v1213_v29  ;;  %v8703_v50 = vpop.permute.xlu2 %1834  ;;  %v14592_v29 = vld [vmem:[#allocation56_spill] sm:$0xff] }
 0x37d   : > { %v1162_v9 = vsel %vm521_vm13, %v14592_v29, %v14591_v4  ;;  %v14596_v4 = vld [vmem:[#allocation83_spill] sm:$0xff] }
 0x37e   : > { %2549 = vmatpush.msra.mxu2 %v1211_v56  ;;  %v14593_v56 = vld [vmem:[#allocation99_spill] sm:$0xff]  ;;  %v1171_v36 = vmul.f32 %v1162_v9, %v14588_v12  ;;  %v1124_v29 = vsel %vm505_vm14, %v14597_v54, %v14596_v4  ;;  %v14601_v12 = vld [vmem:[#allocation64_spill] sm:$0xff] }
 0x37f   : > { %2448 = vmatmul.f32.gmra.mxu2 %v8709_v26  ;;  %v1125_v49 = vsel %vm505_vm14, %v14594_v41, %v14593_v56  ;;  %v14598_v56 = vld [vmem:[#allocation35_spill] sm:$0xff]  ;;  %v14602_v26 = vld [vmem:[#allocation54_spill] sm:$0xff] }
 0x380   : > { %2550 = vmatpush.msra.mxu2 %v1177_v11  ;;  %v1137_v41 = vmul.f32 %v1125_v49, %v14598_v56  ;;  %v1135_v9 = vmul.f32 %v1124_v29, %v14598_v56  ;;  %v1122_v20 = vsel %vm505_vm14, %v14602_v26, %v14601_v12  ;;  %v2302_v12 = vld [vmem:[%s14604_s8] sm:$0xff] }
 0x381   : > { %2004 = vrot.lane.b32.xlu0 %v7688_v57, %s14582_s1  ;;  %2006 = vrot.lane.b32.xlu1 %v7734_v18, %s14582_s1  ;;  %v1131_v4 = vmul.f32 %v1122_v20, %v14598_v56 }
 0x382   : > { %2551 = vmatpush.msra.mxu2 %v1175_v23  ;;  %2002 = vrot.lane.b32.xlu2 %v7654_v16, %s14582_s1  ;;  %v8745_v23 = vld [vmem:[%s14564_s3 + $0xc0] sm:$0xff] }
 0x383   : > { %v8737_v58 = vpop.permute.xlu0 %1800  ;;  %v8739_v11 = vpop.permute.xlu1 %1802  ;;  %14595 = vst [vmem:[#allocation89_spill] sm:$0xff] %v8745_v23 }
 0x384   : > { %2552 = vmatpush.msra.mxu2 %v1173_v60  ;;  %v1841_v47 = vpop.permute.xlu2 %1840  ;;  %v1123_v60 = vsel %vm505_vm14, %v14600_v59, %v14599_v38 }
 0x385   : > { %v1133_v59 = vmul.f32 %v1123_v60, %v14598_v56 }
 0x386   : > { %2553 = vmatpush.msra.mxu2 %v1171_v36 }
 0x387   : > { %2451 = vmatmul.f32.gmra.mxu2 %v8745_v23 }
 0x388   : > { %2554 = vmatpush.msra.mxu2 %v1137_v41 }
 0x389   : > { %2034 = vrot.lane.b32.xlu0 %v7634_v33, %s14603_s17  ;;  %2036 = vrot.lane.b32.xlu1 %v7668_v55, %s14603_s17 }
 0x38a   : > { %2555 = vmatpush.msra.mxu2 %v1135_v9  ;;  %2008 = vrot.lane.b32.xlu2 %v7798_v44, %s14582_s1 }
 0x38b   : > { %v1807_v38 = vpop.permute.xlu0 %1806  ;;  %v1809_v49 = vpop.permute.xlu1 %1808 }
 0x38c   : > { %2556 = vmatpush.msra.mxu2 %v1133_v59  ;;  %v1847_v36 = vpop.permute.xlu2 %1846 }
 0x38e   : > { %2557 = vmatpush.msra.mxu2 %v1131_v4  ;;  %v14605_v4 = vld [vmem:[#allocation46_spill] sm:$0xff] }
 0x38f   : > { %2558 = vmatmul.f32.vlgmr.msra.gmra.mxu2 %v8478_v35 }
 0x391   : > { %2040 = vrot.lane.b32.xlu0 %v7772_v3, %s14603_s17  ;;  %2042 = vrot.lane.b32.xlu1 %v7654_v16, %s14603_s17 }
 0x392   : > { %2038 = vrot.lane.b32.xlu2 %v7708_v28, %s14603_s17  ;;  %v2303_v28 = vld [vmem:[%s14604_s8 + $0x8] sm:$0xff] }
 0x393   : > { %v1837_v33 = vpop.permute.xlu0 %1836  ;;  %v1839_v55 = vpop.permute.xlu1 %1838 }
 0x394   : > { %v8777_v26 = vpop.permute.xlu2 %1876  ;;  %v1852_v41 = vsel %vm14051_vm1, %v1839_v55, %v1847_v36  ;;  %v1856_v59 = vsel %vm14051_vm1, %v1847_v36, %v1839_v55 }
 0x397   : > { %2561 = vmatmul.f32.gmra.mxu2 %v8525_v63  ;;  %v2304_v63 = vld [vmem:[%s14604_s8 + $0x10] sm:$0xff] }
 0x399   : > { %2046 = vrot.lane.b32.xlu0 %v7734_v18, %s14603_s17  ;;  %2048 = vrot.lane.b32.xlu1 %v7798_v44, %s14603_s17 }
 0x39a   : > { %2044 = vrot.lane.b32.xlu2 %v7688_v57, %s14603_s17 }
 0x39b   : > { %v1843_v3 = vpop.permute.xlu0 %1842  ;;  %v1845_v35 = vpop.permute.xlu1 %1844 }
 0x39c   : > { %v8786_v20 = vpop.permute.xlu2 %1882  ;;  %v1851_v56 = vsel %vm14051_vm1, %v1837_v33, %v1845_v35  ;;  %v1855_v23 = vsel %vm14051_vm1, %v1845_v35, %v1837_v33  ;;  %v1850_v36 = vsel %vm14051_vm1, %v8703_v50, %v1843_v3  ;;  %v1854_v33 = vsel %vm14051_vm1, %v1843_v3, %v8703_v50 }
 0x39d   : > { %v1813_v35 = vsel %vm14050_vm0, %v8737_v58, %v1809_v49  ;;  %v1858_v50 = vmul.f32 %v1850_v36, %v14605_v4  ;;  %v1815_v36 = vsel %vm14050_vm0, %v8668_v45, %v8701_v48 }
 0x39f   : > { %2564 = vmatmul.f32.gmra.mxu2 %v8572_v1 }
 0x3a1   : > { %2313 = vperm.xlu0 %6891, %v2303_v28   ;;  %2318 = vperm.xlu1 %6892, %v2304_v63   ;;  %v14606_v63 = vld [vmem:[#allocation47_spill] sm:$0xff] }
 0x3a2   : > { %2308 = vperm.xlu2 %6893, %v2302_v12   ;;  %v1863_v55 = vmul.f32 %v1856_v59, %v14606_v63 }
 0x3a3   : > { %v1849_v54 = vpop.permute.xlu0 %1848  ;;  %v8798_v29 = vpop.permute.xlu1 %1874 }
 0x3a4   : > { %v1853_v60 = vsel %vm14051_vm1, %v1841_v47, %v1849_v54  ;;  %v1857_v9 = vsel %vm14051_vm1, %v1849_v54, %v1841_v47  ;;  %v8806_v1 = vpop.permute.xlu2 %1888  ;;  %v2305_v47 = vld [vmem:[%s14604_s8 + $0x18] sm:$0xff]  ;;  %v1862_v54 = vmul.f32 %v1852_v41, %v14605_v4  ;;  %v1861_v41 = vmul.f32 %v1855_v23, %v14606_v63  ;;  %s14779_s8 = smov 34  }
 0x3a5   : > { %v1864_v28 = vmul.f32 %v1853_v60, %v14605_v4  ;;  %v1865_v12 = vmul.f32 %v1857_v9, %v14606_v63  ;;  %v1817_v60 = vsel %vm14050_vm0, %v1809_v49, %v8737_v58  ;;  %v1859_v23 = vmul.f32 %v1854_v33, %v14606_v63  ;;  %v14607_v49 = vld [vmem:[#allocation48_spill] sm:$0xff] }
 0x3a6   : > { %v1816_v58 = vsel %vm14050_vm0, %v1807_v38, %v8633_v31  ;;  %v1814_v33 = vsel %vm14050_vm0, %v8739_v11, %v8699_v5 }
 0x3a7   : > { %2567 = vmatmul.f32.gmra.mxu2 %v8610_v8  ;;  %2455 = vmatpush.msra.mxu1 %v1864_v28  ;;  %v1860_v8 = vmul.f32 %v1851_v56, %v14605_v4  ;;  %v1812_v56 = vsel %vm14050_vm0, %v8633_v31, %v1807_v38  ;;  %v1824_v28 = vmul.f32 %v1813_v35, %v14607_v49 }
 0x3a8   : > { %2658 = vmatpush.msrb.mxu2 %v1865_v12  ;;  %v1811_v12 = vsel %vm14050_vm0, %v8701_v48, %v8668_v45  ;;  %v1810_v31 = vsel %vm14050_vm0, %v8699_v5, %v8739_v11  ;;  %v1773_v45 = vsel %vm14609_vm6, %v8630_v40, %v8604_v37  ;;  %v1777_v35 = vsel %vm14610_vm5, %v8604_v37, %v8630_v40  ;;  %vm14612_vm6 = vmmov %vm14610_vm5  ;;  %v14613_v40 = vld [vmem:[#allocation50_spill] sm:$0xff] }
 0x3a9   : > { %2456 = vmatpush.msra.mxu1 %v1862_v54  ;;  %v1818_v5 = vmul.f32 %v1810_v31, %v14607_v49  ;;  %v1772_v11 = vsel %vm14611_vm15, %v8628_v2, %v8666_v15  ;;  %v1776_v37 = vsel %vm14612_vm6, %v8666_v15, %v8628_v2  ;;  %vm14615_vm15 = vmmov %vm14610_vm5 }
 0x3aa   : > { %2323 = vperm.xlu2 %6893, %v2305_v47   ;;  %2659 = vmatpush.msrb.mxu2 %v1863_v55  ;;  %v14608_v47 = vld [vmem:[#allocation49_spill] sm:$0xff]  ;;  %v1822_v55 = vmul.f32 %v1812_v56, %v14607_v49  ;;  %vm14616_vm6 = vmmov %vm14610_vm5 }
 0x3ab   : > { %v8836_v9 = vpop.permute.xlu0 %1878  ;;  %v8838_v59 = vpop.permute.xlu1 %1880  ;;  %2457 = vmatpush.msra.mxu1 %v1860_v8  ;;  %v1825_v54 = vmul.f32 %v1817_v60, %v14608_v47  ;;  %v1823_v38 = vmul.f32 %v1816_v58, %v14608_v47  ;;  %v1820_v8 = vmul.f32 %v1811_v12, %v14607_v49  ;;  %v1821_v48 = vmul.f32 %v1815_v36, %v14608_v47 }
 0x3ac   : > { %2660 = vmatpush.msrb.mxu2 %v1861_v41  ;;  %v8844_v3 = vpop.permute.xlu2 %1918  ;;  %v1819_v56 = vmul.f32 %v1814_v33, %v14608_v47  ;;  %v1771_v58 = vsel %vm14610_vm5, %v8514_v19, %v8664_v27  ;;  %v1782_v36 = vmul.f32 %v1772_v11, %v14613_v40  ;;  %v1770_v2 = vsel %vm14616_vm6, %v8601_v13, %v8561_v43  ;;  %v14618_v11 = vld [vmem:[#allocation53_spill] sm:$0xff] }
 0x3ad   : > { %2458 = vmatpush.msra.mxu1 %v1858_v50  ;;  %v1780_v31 = vmul.f32 %v1771_v58, %v14613_v40  ;;  %v1734_v58 = vsel %vm14048_vm2, %v8552_v62, %v8434_v17 }
 0x3ae   : > { %2661 = vmatpush.msrb.mxu2 %v1859_v23  ;;  %v1784_v23 = vmul.f32 %v1773_v45, %v14613_v40 }
 0x3af   : > { %2459 = vmatpush.msra.mxu1 %v1824_v28  ;;  %v14614_v28 = vld [vmem:[#allocation51_spill] sm:$0xff] }
 0x3b0   : > { %2662 = vmatpush.msrb.mxu2 %v1825_v54  ;;  %v1785_v12 = vmul.f32 %v1777_v35, %v14614_v28  ;;  %v1775_v54 = vsel %vm14615_vm15, %v8664_v27, %v8514_v19  ;;  %v1783_v15 = vmul.f32 %v1776_v37, %v14614_v28  ;;  %v1733_v19 = vsel %vm14048_vm2, %v8446_v21, %v8599_v61 }
 0x3b1   : > { %2460 = vmatpush.msra.mxu1 %v1822_v55  ;;  %v1774_v55 = vsel %vm14610_vm5, %v8561_v43, %v8601_v13  ;;  %v1781_v27 = vmul.f32 %v1775_v54, %v14614_v28  ;;  %v1778_v13 = vmul.f32 %v1770_v2, %v14613_v40  ;;  %v1732_v43 = vsel %vm14048_vm2, %v8507_v52, %v8464_v25 }
 0x3b2   : > { %2663 = vmatpush.msrb.mxu2 %v1823_v38  ;;  %v1737_v38 = vsel %vm14048_vm2, %v8599_v61, %v8446_v21  ;;  %v1736_v21 = vsel %vm14048_vm2, %v8464_v25, %v8507_v52  ;;  %v14617_v61 = vld [vmem:[#allocation52_spill] sm:$0xff]  ;;  %v1735_v37 = vsel %vm14048_vm2, %v8554_v53, %v8505_v24  ;;  %v1730_v52 = vsel %vm14048_vm2, %v8434_v17, %v8552_v62  ;;  %v2078_v17 = vld [vmem:[%s14564_s3 + $0x20] sm:$0xff] }
 0x3b3   : > { %v8880_v41 = vpop.permute.xlu0 %1884  ;;  %v8882_v60 = vpop.permute.xlu1 %1886  ;;  %2461 = vmatpush.msra.mxu1 %v1820_v8  ;;  %v1744_v35 = vmul.f32 %v1733_v19, %v14617_v61  ;;  %v1743_v25 = vmul.f32 %v1736_v21, %v14618_v11  ;;  %v14621_v62 = vld [vmem:[#allocation93_spill] sm:$0xff]  ;;  %vm14655_vm15 = vcmp.lt.s32.totalorder %v7177_v34, 95 }
 0x3b4   : > { %2664 = vmatpush.msrb.mxu2 %v1821_v48  ;;  %v8889_v50 = vpop.permute.xlu2 %1924  ;;  %v1779_v48 = vmul.f32 %v1774_v55, %v14614_v28  ;;  %v1738_v55 = vmul.f32 %v1730_v52, %v14617_v61  ;;  %v14625_v21 = vld [vmem:[#allocation69_spill] sm:$0xff]  ;;  %vm14656_vm6 = vmmov %vm14655_vm15 }
 0x3b5   : > { %2462 = vmatpush.msra.mxu1 %v1818_v5  ;;  %v1731_v5 = vsel %vm14048_vm2, %v8505_v24, %v8554_v53  ;;  %v14619_v24 = vld [vmem:[#allocation101_spill] sm:$0xff]  ;;  %v14620_v53 = vld [vmem:[#allocation100_spill] sm:$0xff]  ;;  %vm14659_vm5 = vmmov %vm14656_vm6 }
 0x3b6   : > { %2665 = vmatpush.msrb.mxu2 %v1819_v56  ;;  %v1745_v56 = vmul.f32 %v1737_v38, %v14618_v11  ;;  %v1405_v54 = vsel %vm617_vm7, %v14620_v53, %v14619_v24  ;;  %v1739_v38 = vmul.f32 %v1734_v58, %v14618_v11  ;;  %v14629_v58 = vld [vmem:[#allocation94_spill] sm:$0xff]  ;;  %vm14660_vm2 = vmmov %vm14659_vm5 }
 0x3b7   : > { %2463 = vmatpush.msra.mxu1 %v1784_v23  ;;  %v1742_v23 = vmul.f32 %v1732_v43, %v14617_v61  ;;  %vm14663_vm0 = vmmov %vm14660_vm2 }
 0x3b8   : > { %2666 = vmatpush.msrb.mxu2 %v1785_v12  ;;  %v1740_v12 = vmul.f32 %v1731_v5, %v14617_v61  ;;  %vm14664_vm1 = vmmov %vm14663_vm0 }
 0x3b9   : > { %2464 = vmatpush.msra.mxu1 %v1782_v36  ;;  %v1741_v36 = vmul.f32 %v1735_v37, %v14618_v11  ;;  %v14627_v37 = vld [vmem:[#allocation62_spill] sm:$0xff] }
 0x3ba   : > { %2667 = vmatpush.msrb.mxu2 %v1783_v15 }
 0x3bb   : > { %v8926_v33 = vpop.permute.xlu0 %1914  ;;  %v8928_v8 = vpop.permute.xlu1 %1916  ;;  %2465 = vmatpush.msra.mxu1 %v1780_v31  ;;  %v14622_v31 = vld [vmem:[#allocation88_spill] sm:$0xff] }
 0x3bc   : > { %2668 = vmatpush.msrb.mxu2 %v1781_v27  ;;  %v8935_v45 = vpop.permute.xlu2 %1954  ;;  %v1404_v19 = vsel %vm617_vm7, %v14622_v31, %v14621_v62 }
 0x3bd   : > { %2466 = vmatpush.msra.mxu1 %v1778_v13  ;;  %v14623_v13 = vld [vmem:[#allocation21_spill] sm:$0xff] }
 0x3be   : > { %2669 = vmatpush.msrb.mxu2 %v1779_v48  ;;  %v1417_v43 = vmul.f32 %v1405_v54, %v14623_v13  ;;  %v14624_v48 = vld [vmem:[#allocation81_spill] sm:$0xff]  ;;  %v1415_v5 = vmul.f32 %v1404_v19, %v14623_v13  ;;  %v14632_v19 = vld [vmem:[#allocation23_spill] sm:$0xff] }
 0x3bf   : > { %2467 = vmatpush.msra.mxu1 %v1744_v35  ;;  %v1403_v35 = vsel %vm617_vm7, %v14625_v21, %v14624_v48  ;;  %v14634_v48 = vld [vmem:[#allocation74_spill] sm:$0xff] }
 0x3c0   : > { %2670 = vmatpush.msrb.mxu2 %v1745_v56  ;;  %v14626_v56 = vld [vmem:[#allocation63_spill] sm:$0xff]  ;;  %v1413_v52 = vmul.f32 %v1403_v35, %v14623_v13 }
 0x3c1   : > { %2468 = vmatpush.msra.mxu1 %v1742_v23  ;;  %v1402_v23 = vsel %vm617_vm7, %v14627_v37, %v14626_v56  ;;  %v14636_v56 = vld [vmem:[#allocation55_spill] sm:$0xff] }
 0x3c2   : > { %2671 = vmatpush.msrb.mxu2 %v1743_v25  ;;  %v14628_v25 = vld [vmem:[#allocation103_spill] sm:$0xff]  ;;  %v1411_v54 = vmul.f32 %v1402_v23, %v14623_v13 }
 0x3c3   : > { %v8968_v2 = vpop.permute.xlu0 %1920  ;;  %v8970_v15 = vpop.permute.xlu1 %1922  ;;  %2469 = vmatpush.msra.mxu1 %v1740_v12  ;;  %v1365_v12 = vsel %vm601_vm8, %v14629_v58, %v14628_v25  ;;  %v14638_v25 = vld [vmem:[#allocation96_spill] sm:$0xff] }
 0x3c4   : > { %2672 = vmatpush.msrb.mxu2 %v1741_v36  ;;  %v8980_v27 = vpop.permute.xlu2 %1960  ;;  %v2085_v36 = vld [vmem:[%s14564_s3 + $0x58] sm:$0xff] }
 0x3c5   : > { %2470 = vmatpush.msra.mxu1 %v1738_v55  ;;  %v14630_v55 = vld [vmem:[#allocation87_spill] sm:$0xff] }
 0x3c6   : > { %2673 = vmatpush.msrb.mxu2 %v1739_v38  ;;  %2471 = vmatmul.f32.vlgmr.msra.gmra.mxu1 %v2078_v17  ;;  %v1377_v38 = vmul.f32 %v1365_v12, %v14632_v19 }
 0x3c7   : > { %2571 = vmatpush.msrb.mxu1 %v1417_v43  ;;  %2674 = vmatmul.f32.vlgmr.msrb.gmra.mxu2 %v2078_v17  ;;  %v14631_v17 = vld [vmem:[#allocation86_spill] sm:$0xff]  ;;  %v14633_v43 = vld [vmem:[#allocation79_spill] sm:$0xff] }
 0x3c8   : > { %v1364_v62 = vsel %vm601_vm8, %v14631_v17, %v14630_v55  ;;  %v1363_v21 = vsel %vm601_vm8, %v14634_v48, %v14633_v43  ;;  %v2092_v55 = vld [vmem:[%s14564_s3 + $0x90] sm:$0xff]  ;;  %v14641_v43 = vld [vmem:[#allocation25_spill] sm:$0xff] }
 0x3c9   : > { %2572 = vmatpush.msrb.mxu1 %v1415_v5  ;;  %v1375_v35 = vmul.f32 %v1364_v62, %v14632_v19  ;;  %v14635_v5 = vld [vmem:[#allocation68_spill] sm:$0xff]  ;;  %v1373_v23 = vmul.f32 %v1363_v21, %v14632_v19  ;;  %v14640_v62 = vld [vmem:[#allocation77_spill] sm:$0xff] }
 0x3ca   : > { %v1362_v37 = vsel %vm601_vm8, %v14636_v56, %v14635_v5  ;;  %v14639_v17 = vld [vmem:[#allocation92_spill] sm:$0xff]  ;;  %v14642_v21 = vld [vmem:[#allocation73_spill] sm:$0xff] }
 0x3cb   : > { %2573 = vmatpush.msrb.mxu1 %v1413_v52  ;;  %v8998_v24 = vpop.permute.xlu0 %1926  ;;  %v9000_v53 = vpop.permute.xlu1 %1928  ;;  %v14637_v52 = vld [vmem:[#allocation104_spill] sm:$0xff] }
 0x3cc   : > { %v9010_v31 = vpop.permute.xlu2 %1966  ;;  %v1325_v58 = vsel %vm585_vm9, %v14638_v25, %v14637_v52  ;;  %v14645_v52 = vld [vmem:[#allocation58_spill] sm:$0xff] }
 0x3cd   : > { %2574 = vmatpush.msrb.mxu1 %v1411_v54  ;;  %v1337_v48 = vmul.f32 %v1325_v58, %v14641_v43  ;;  %v14646_v58 = vld [vmem:[#allocation98_spill] sm:$0xff] }
 0x3ce   : > { %2474 = vmatmul.f32.gmra.mxu1 %v2085_v36 }
 0x3cf   : > { %2575 = vmatpush.msrb.mxu1 %v1377_v38  ;;  %2677 = vmatmul.f32.gmra.mxu2 %v2085_v36  ;;  %v1371_v36 = vmul.f32 %v1362_v37, %v14632_v19  ;;  %v1324_v38 = vsel %vm585_vm9, %v14640_v62, %v14639_v17  ;;  %v14647_v17 = vld [vmem:[#allocation97_spill] sm:$0xff]  ;;  %v14651_v19 = vld [vmem:[#allocation78_spill] sm:$0xff] }
 0x3d0   : > { %v1335_v37 = vmul.f32 %v1324_v38, %v14641_v43  ;;  %v1285_v62 = vsel %vm569_vm10, %v14647_v17, %v14646_v58  ;;  %v14652_v58 = vld [vmem:[#allocation67_spill] sm:$0xff]  ;;  %v14653_v17 = vld [vmem:[#allocation60_spill] sm:$0xff] }
 0x3d1   : > { %2576 = vmatpush.msrb.mxu1 %v1375_v35  ;;  %v14643_v35 = vld [vmem:[#allocation71_spill] sm:$0xff] }
 0x3d2   : > { %v1323_v5 = vsel %vm585_vm9, %v14643_v35, %v14642_v21  ;;  %v14648_v35 = vld [vmem:[#allocation91_spill] sm:$0xff] }
 0x3d3   : > { %2577 = vmatpush.msrb.mxu1 %v1373_v23  ;;  %v9027_v12 = vpop.permute.xlu0 %1956  ;;  %v9029_v54 = vpop.permute.xlu1 %1958  ;;  %v14644_v23 = vld [vmem:[#allocation66_spill] sm:$0xff] }
 0x3d4   : > { %v1997_v56 = vpop.permute.xlu2 %1996  ;;  %v1322_v25 = vsel %vm585_vm9, %v14645_v52, %v14644_v23  ;;  %v14649_v23 = vld [vmem:[#allocation85_spill] sm:$0xff] }
 0x3d5   : > { %2578 = vmatpush.msrb.mxu1 %v1371_v36  ;;  %v1333_v36 = vmul.f32 %v1323_v5, %v14641_v43  ;;  %v1331_v38 = vmul.f32 %v1322_v25, %v14641_v43  ;;  %v1284_v5 = vsel %vm569_vm10, %v14649_v23, %v14648_v35  ;;  %v14654_v43 = vld [vmem:[#allocation59_spill] sm:$0xff] }
 0x3d6   : > { %2477 = vmatmul.f32.gmra.mxu1 %v2092_v55  ;;  %v1282_v13 = vsel %vm569_vm10, %v14654_v43, %v14653_v17 }
 0x3d7   : > { %2579 = vmatpush.msrb.mxu1 %v1337_v48  ;;  %2680 = vmatmul.f32.gmra.mxu2 %v2092_v55  ;;  %v2099_v55 = vld [vmem:[%s14564_s3 + $0xc8] sm:$0xff] }
 0x3d9   : > { %2580 = vmatpush.msrb.mxu1 %v1335_v37  ;;  %v14650_v37 = vld [vmem:[#allocation27_spill] sm:$0xff] }
 0x3da   : > { %v1297_v52 = vmul.f32 %v1285_v62, %v14650_v37  ;;  %v1295_v25 = vmul.f32 %v1284_v5, %v14650_v37  ;;  %v1291_v23 = vmul.f32 %v1282_v13, %v14650_v37 }
 0x3db   : > { %2581 = vmatpush.msrb.mxu1 %v1333_v36  ;;  %v9054_v21 = vpop.permute.xlu0 %1962  ;;  %v1965_v48 = vpop.permute.xlu1 %1964  ;;  %v1283_v36 = vsel %vm569_vm10, %v14652_v58, %v14651_v19  ;;  %v14657_v58 = vld [vmem:[#allocation38_spill] sm:$0xff] }
 0x3dc   : > { %v2003_v11 = vpop.permute.xlu2 %2002 }
 0x3dd   : > { %2582 = vmatpush.msrb.mxu1 %v1331_v38  ;;  %v1293_v38 = vmul.f32 %v1283_v36, %v14650_v37  ;;  %v14658_v36 = vld [vmem:[#allocation39_spill] sm:$0xff] }
 0x3de   : > { %2480 = vmatmul.f32.gmra.mxu1 %v2099_v55 }
 0x3df   : > { %2583 = vmatpush.msrb.mxu1 %v1297_v52  ;;  %2683 = vmatmul.f32.gmra.mxu2 %v2099_v55 }
 0x3e1   : > { %2584 = vmatpush.msrb.mxu1 %v1295_v25 }
 0x3e3   : > { %2585 = vmatpush.msrb.mxu1 %v1293_v38  ;;  %v1969_v62 = vpop.permute.xlu0 %1968  ;;  %v1995_v35 = vpop.permute.xlu1 %1994 }
 0x3e4   : > { %v2009_v19 = vpop.permute.xlu2 %2008 }
 0x3e5   : > { %2586 = vmatpush.msrb.mxu1 %v1291_v23 }
 0x3e6   : > { %2587 = vmatmul.f32.vlgmr.msrb.gmra.mxu1 %v8457_v10 }
 0x3eb   : > { %v1999_v5 = vpop.permute.xlu0 %1998  ;;  %v2001_v55 = vpop.permute.xlu1 %2000 }
 0x3ec   : > { %v2013_v52 = vsel %vm14655_vm15, %v2001_v55, %v2009_v19  ;;  %v2017_v43 = vsel %vm14656_vm6, %v2009_v19, %v2001_v55  ;;  %vm14661_vm15 = vmmov %vm14660_vm2 }
 0x3ed   : > { %v2024_v25 = vmul.f32 %v2013_v52, %v14657_v58  ;;  %v2025_v17 = vmul.f32 %v2017_v43, %v14658_v36  ;;  %vm14662_vm6 = vmmov %vm14660_vm2  ;;  %v2010_v52 = vsel %vm14663_vm0, %v1995_v35, %v2003_v11  ;;  %v2014_v43 = vsel %vm14664_vm1, %v2003_v11, %v1995_v35 }
 0x3ee   : > { %2590 = vmatmul.f32.gmra.mxu1 %v8500_v30  ;;  %v2018_v11 = vmul.f32 %v2010_v52, %v14657_v58 }
 0x3ef   : > { %2484 = vmatpush.msra.mxu3 %v2024_v25  ;;  %2687 = vmatpush.msra.mxu1 %v2025_v17 }
 0x3f3   : > { %v2005_v13 = vpop.permute.xlu0 %2004  ;;  %v2007_v38 = vpop.permute.xlu1 %2006 }
 0x3f4   : > { %v2011_v10 = vsel %vm14659_vm5, %v1997_v56, %v2005_v13  ;;  %v2015_v23 = vsel %vm14660_vm2, %v2005_v13, %v1997_v56  ;;  %v2012_v37 = vsel %vm14661_vm15, %v1999_v5, %v2007_v38  ;;  %v2016_v19 = vsel %vm14662_vm6, %v2007_v38, %v1999_v5 }
 0x3f5   : > { %v2022_v55 = vmul.f32 %v2012_v37, %v14657_v58  ;;  %v2023_v30 = vmul.f32 %v2016_v19, %v14658_v36  ;;  %v2020_v56 = vmul.f32 %v2011_v10, %v14657_v58  ;;  %v2021_v25 = vmul.f32 %v2015_v23, %v14658_v36  ;;  %v14670_v10 = vld [vmem:[#allocation41_spill] sm:$0xff] }
 0x3f6   : > { %2593 = vmatmul.f32.gmra.mxu1 %v8547_v22  ;;  %vm14665_vm2 = vcmp.lt.s32.totalorder %v7177_v34, 96  ;;  %v2019_v22 = vmul.f32 %v2014_v43, %v14658_v36 }
 0x3f7   : > { %2485 = vmatpush.msra.mxu3 %v2022_v55  ;;  %2688 = vmatpush.msra.mxu1 %v2023_v30  ;;  %v1973_v37 = vsel %vm14665_vm2, %v8980_v27, %v1969_v62  ;;  %vm14666_vm5 = vmmov %vm14665_vm2 }
 0x3f8   : > { %v1977_v5 = vsel %vm14666_vm5, %v1969_v62, %v8980_v27  ;;  %vm14667_vm0 = vmmov %vm14665_vm2  ;;  %v14669_v27 = vld [vmem:[#allocation40_spill] sm:$0xff] }
 0x3f9   : > { %2486 = vmatpush.msra.mxu3 %v2020_v56  ;;  %2689 = vmatpush.msra.mxu1 %v2021_v25  ;;  %v1972_v35 = vsel %vm14667_vm0, %v9029_v54, %v9010_v31  ;;  %vm14668_vm1 = vmmov %vm14667_vm0  ;;  %v1984_v62 = vmul.f32 %v1973_v37, %v14669_v27  ;;  %v1985_v23 = vmul.f32 %v1977_v5, %v14670_v10  ;;  %v9160_v37 = vpop.permute.xlu2 %2038 }
 0x3fa   : > { %v1976_v17 = vsel %vm14668_vm1, %v9010_v31, %v9029_v54  ;;  %vm14671_vm15 = vmmov %vm14667_vm0  ;;  %v1982_v31 = vmul.f32 %v1972_v35, %v14669_v27 }
 0x3fb   : > { %v9117_v13 = vpop.permute.xlu0 %2034  ;;  %v9119_v38 = vpop.permute.xlu1 %2036  ;;  %2487 = vmatpush.msra.mxu3 %v2018_v11  ;;  %2690 = vmatpush.msra.mxu1 %v2019_v22  ;;  %v1971_v19 = vsel %vm14671_vm15, %v9027_v12, %v1965_v48  ;;  %vm14672_vm6 = vmmov %vm14667_vm0  ;;  %v1983_v54 = vmul.f32 %v1976_v17, %v14670_v10  ;;  %v14680_v22 = vld [vmem:[#allocation43_spill] sm:$0xff] }
 0x3fc   : > { %v1975_v55 = vsel %vm14672_vm6, %v1965_v48, %v9027_v12  ;;  %vm14673_vm2 = vmmov %vm14667_vm0  ;;  %v1980_v12 = vmul.f32 %v1971_v19, %v14669_v27 }
 0x3fd   : > { %2488 = vmatpush.msra.mxu3 %v1984_v62  ;;  %2691 = vmatpush.msra.mxu1 %v1985_v23  ;;  %v1970_v30 = vsel %vm14673_vm2, %v8935_v45, %v9054_v21  ;;  %vm14674_vm5 = vmmov %vm14667_vm0  ;;  %v1981_v48 = vmul.f32 %v1975_v55, %v14670_v10  ;;  %vm14675_vm0 = vcmp.lt.s32.totalorder %v7177_v34, 97 }
 0x3fe   : > { %v1974_v52 = vsel %vm14674_vm5, %v9054_v21, %v8935_v45  ;;  %2596 = vmatmul.f32.gmra.mxu1 %v8594_v32  ;;  %v1933_v43 = vsel %vm14675_vm0, %v8968_v2, %v9000_v53  ;;  %vm14676_vm1 = vmmov %vm14675_vm0  ;;  %v1978_v32 = vmul.f32 %v1970_v30, %v14669_v27  ;;  %v1930_v23 = vsel %vm14675_vm0, %v8926_v33, %v8970_v15 }
 0x3ff   : > { %2489 = vmatpush.msra.mxu3 %v1982_v31  ;;  %2692 = vmatpush.msra.mxu1 %v1983_v54  ;;  %v1937_v56 = vsel %vm14676_vm1, %v9000_v53, %v8968_v2  ;;  %v1979_v45 = vmul.f32 %v1974_v52, %v14670_v10  ;;  %vm14677_vm15 = vmmov %vm14675_vm0  ;;  %v14679_v53 = vld [vmem:[#allocation42_spill] sm:$0xff] }
 0x400   : > { %v1932_v21 = vsel %vm14677_vm15, %v8844_v3, %v8998_v24  ;;  %vm14678_vm6 = vmmov %vm14675_vm0  ;;  %v1944_v11 = vmul.f32 %v1933_v43, %v14679_v53  ;;  %v1945_v35 = vmul.f32 %v1937_v56, %v14680_v22  ;;  %vm14684_vm15 = vcmp.lt.s32.totalorder %v7177_v34, 98 }
 0x401   : > { %2490 = vmatpush.msra.mxu3 %v1980_v12  ;;  %2693 = vmatpush.msra.mxu1 %v1981_v48  ;;  %v1936_v25 = vsel %vm14678_vm6, %v8998_v24, %v8844_v3  ;;  %vm14681_vm2 = vmmov %vm14675_vm0  ;;  %v1942_v24 = vmul.f32 %v1932_v21, %v14679_v53  ;;  %v1893_v55 = vsel %vm14684_vm15, %v8838_v59, %v8806_v1  ;;  %v14689_v48 = vld [vmem:[#allocation45_spill] sm:$0xff]  ;;  %v14694_v21 = vld [vmem:[#allocation36_spill] sm:$0xff] }
 0x402   : > { %v1931_v17 = vsel %vm14681_vm2, %v8928_v8, %v8889_v50  ;;  %vm14682_vm5 = vmmov %vm14675_vm0  ;;  %v1943_v62 = vmul.f32 %v1936_v25, %v14680_v22 }
 0x403   : > { %v9162_v5 = vpop.permute.xlu0 %2040  ;;  %v9164_v2 = vpop.permute.xlu1 %2042  ;;  %2491 = vmatpush.msra.mxu3 %v1978_v32  ;;  %2694 = vmatpush.msra.mxu1 %v1979_v45  ;;  %v1935_v3 = vsel %vm14682_vm5, %v8889_v50, %v8928_v8  ;;  %vm14683_vm1 = vmmov %vm14675_vm0  ;;  %v1940_v50 = vmul.f32 %v1931_v17, %v14679_v53 }
 0x404   : > { %v1934_v19 = vsel %vm14683_vm1, %v8970_v15, %v8926_v33  ;;  %v1941_v8 = vmul.f32 %v1935_v3, %v14680_v22  ;;  %vm14685_vm6 = vmmov %vm14684_vm15  ;;  %v1938_v33 = vmul.f32 %v1930_v23, %v14679_v53  ;;  %vm14691_vm1 = vcmp.lt.s32.totalorder %v7177_v34, 94  ;;  %v9228_v45 = vpop.permute.xlu2 %2044  ;;  %v14698_v23 = vld [vmem:[#allocation129_spill] sm:$0xff] }
 0x405   : > { %2492 = vmatpush.msra.mxu3 %v1944_v11  ;;  %2695 = vmatpush.msra.mxu1 %v1945_v35  ;;  %v1897_v31 = vsel %vm14685_vm6, %v8806_v1, %v8838_v59  ;;  %v1939_v15 = vmul.f32 %v1934_v19, %v14680_v22  ;;  %vm14686_vm2 = vmmov %vm14685_vm6  ;;  %v14688_v1 = vld [vmem:[#allocation44_spill] sm:$0xff] }
 0x406   : > { %v1892_v54 = vsel %vm14686_vm2, %v8836_v9, %v8882_v60  ;;  %vm14687_vm5 = vmmov %vm14686_vm2  ;;  %v1904_v59 = vmul.f32 %v1893_v55, %v14688_v1  ;;  %v1905_v43 = vmul.f32 %v1897_v31, %v14689_v48  ;;  %v2079_v31 = vld [vmem:[%s14564_s3 + $0x28] sm:$0xff] }
 0x407   : > { %2493 = vmatpush.msra.mxu3 %v1942_v24  ;;  %2696 = vmatpush.msra.mxu1 %v1943_v62  ;;  %v1896_v30 = vsel %vm14687_vm5, %v8882_v60, %v8836_v9  ;;  %vm14690_vm0 = vmmov %vm14686_vm2  ;;  %v1902_v11 = vmul.f32 %v1892_v54, %v14688_v1  ;;  %v14697_v62 = vld [vmem:[#allocation131_spill] sm:$0xff]  ;;  %v14700_v54 = vld [vmem:[#allocation13_spill] sm:$0xff] }
 0x408   : > { %v1891_v56 = vsel %vm14690_vm0, %v8777_v26, %v8880_v41  ;;  %vm14692_vm15 = vmmov %vm14691_vm1  ;;  %v1565_v19 = vsel %vm681_vm3, %v14698_v23, %v14697_v62  ;;  %v14712_v62 = vld [vmem:[#allocation145_spill] sm:$0xff]  ;;  %v14713_v23 = vld [vmem:[#allocation147_spill] sm:$0xff] }
 0x409   : > { %2494 = vmatpush.msra.mxu3 %v1940_v50  ;;  %2697 = vmatpush.msra.mxu1 %v1941_v8  ;;  %vm14693_vm6 = vmmov %vm14690_vm0  ;;  %v1900_v3 = vmul.f32 %v1891_v56, %v14688_v1  ;;  %v2050_v50 = vsel %vm14691_vm1, %v9117_v13, %v9164_v2  ;;  %v14704_v56 = vld [vmem:[#allocation125_spill] sm:$0xff] }
 0x40a   : > { %v1895_v32 = vsel %vm14693_vm6, %v8880_v41, %v8777_v26  ;;  %vm14695_vm2 = vmmov %vm14690_vm0  ;;  %v1903_v26 = vmul.f32 %v1896_v30, %v14689_v48  ;;  %v1894_v41 = vsel %vm14690_vm0, %v8786_v20, %v8798_v29  ;;  %v14702_v30 = vld [vmem:[#allocation148_spill] sm:$0xff] }
 0x40b   : > { %v9206_v52 = vpop.permute.xlu0 %2046  ;;  %v9208_v12 = vpop.permute.xlu1 %2048  ;;  %2495 = vmatpush.msra.mxu3 %v1938_v33  ;;  %2698 = vmatpush.msra.mxu1 %v1939_v15  ;;  %v1890_v35 = vsel %vm14695_vm2, %v8798_v29, %v8786_v20  ;;  %vm14696_vm5 = vmmov %vm14691_vm1  ;;  %v1901_v8 = vmul.f32 %v1895_v32, %v14689_v48  ;;  %v1564_v33 = vsel %vm681_vm3, %v8234_v0, %v8278_v42  ;;  %v14706_v42 = vld [vmem:[#allocation7_spill] sm:$0xff]  ;;  %vm2326_vm2 = vcmask 261120  }
 0x40c   : > { %v2052_v9 = vsel %vm14691_vm1, %v9160_v37, %v9206_v52  ;;  %v2053_v60 = vsel %vm14692_vm15, %v9162_v5, %v9208_v12  ;;  %v2051_v17 = vsel %vm14696_vm5, %v9119_v38, %v9228_v45  ;;  %vm14699_vm15 = vcmp.lt.s32.totalorder %v7177_v34, 114  ;;  %v9284_v32 = vld [vmem:[%s14564_s3 + $0x30] sm:$0xff] }
 0x40d   : > { %v2064_v25 = vmul.f32 %v2053_v60, %v14694_v21  ;;  %2496 = vmatpush.msra.mxu3 %v1904_v59  ;;  %2699 = vmatpush.msra.mxu1 %v1905_v43  ;;  %v2062_v24 = vmul.f32 %v2052_v9, %v14694_v21  ;;  %v1697_v20 = vsel %vm14699_vm15, %v8461_v39, %v8442_v14  ;;  %v14701_v14 = vld [vmem:[#allocation142_spill] sm:$0xff]  ;;  %vm14703_vm6 = vmmov %vm14699_vm15  ;;  %v14705_v9 = vld [vmem:[#allocation127_spill] sm:$0xff]  ;;  %vm14718_vm1 = vcmp.lt.s32.totalorder %v7177_v34, 126 }
 0x40e   : > { %v1898_v29 = vmul.f32 %v1890_v35, %v14688_v1  ;;  %v2060_v55 = vmul.f32 %v2051_v17, %v14694_v21  ;;  %v1899_v15 = vmul.f32 %v1894_v41, %v14689_v48  ;;  %v1577_v39 = vmul.f32 %v1565_v19, %v14700_v54  ;;  %vm14709_vm5 = vmmov %vm14703_vm6  ;;  %v14711_v41 = vld [vmem:[#allocation126_spill] sm:$0xff] }
 0x40f   : > { %2497 = vmatpush.msra.mxu3 %v1902_v11  ;;  %2525 = vmatpush.msra.mxu0 %v2064_v25  ;;  %v1696_v59 = vsel %vm14703_vm6, %v14702_v30, %v14701_v14  ;;  %v2058_v43 = vmul.f32 %v2050_v50, %v14694_v21  ;;  %v1563_v60 = vsel %vm681_vm3, %v14705_v9, %v14704_v56  ;;  %v14707_v25 = vld [vmem:[#allocation146_spill] sm:$0xff]  ;;  %v14708_v11 = vld [vmem:[#allocation144_spill] sm:$0xff]  ;;  %vm14714_vm0 = vmmov %vm14709_vm5 }
 0x410   : > { %2700 = vmatpush.msra.mxu1 %v1903_v26  ;;  %v1705_v0 = vmul.f32 %v1697_v20, %v14706_v42  ;;  %v1695_v35 = vsel %vm14709_vm5, %v14708_v11, %v14707_v25  ;;  %v1575_v17 = vmul.f32 %v1564_v33, %v14700_v54  ;;  %v14710_v26 = vld [vmem:[#allocation130_spill] sm:$0xff]  ;;  %v1694_v19 = vsel %vm14714_vm0, %v14713_v23, %v14712_v62  ;;  %v14719_v14 = vld [vmem:[#allocation124_spill] sm:$0xff]  ;;  %v14720_v30 = vld [vmem:[#allocation121_spill] sm:$0xff] }
 0x411   : > { %2498 = vmatpush.msra.mxu3 %v1900_v3  ;;  %2526 = vmatpush.msra.mxu0 %v2062_v24  ;;  %v1562_v3 = vsel %vm681_vm3, %v14711_v41, %v14710_v26  ;;  %v1703_v24 = vmul.f32 %v1696_v59, %v14706_v42  ;;  %v1573_v50 = vmul.f32 %v1563_v60, %v14700_v54  ;;  %v14716_v20 = vld [vmem:[#allocation122_spill] sm:$0xff]  ;;  %vm14721_vm15 = vmmov %vm14718_vm1  ;;  %v14722_v56 = vld [vmem:[#allocation15_spill] sm:$0xff]  ;;  %vm14736_vm0 = vcmp.lt.s32.totalorder %v7177_v34, 14 }
 0x412   : > { %2701 = vmatpush.msra.mxu1 %v1901_v8  ;;  %v14715_v8 = vld [vmem:[#allocation120_spill] sm:$0xff]  ;;  %v1524_v59 = vsel %vm665_vm4, %v14720_v30, %v14719_v14  ;;  %v14723_v60 = vld [vmem:[#allocation123_spill] sm:$0xff]  ;;  %v14725_v11 = vld [vmem:[#allocation9_spill] sm:$0xff] }
 0x413   : > { %2499 = vmatpush.msra.mxu3 %v1898_v29  ;;  %2527 = vmatpush.msra.mxu0 %v2060_v55  ;;  %v1525_v29 = vsel %vm665_vm4, %v14716_v20, %v14715_v8  ;;  %v1701_v55 = vmul.f32 %v1695_v35, %v14706_v42  ;;  %v14726_v26 = vld [vmem:[#allocation135_spill] sm:$0xff]  ;;  %vm14728_vm6 = vmmov %vm14718_vm1  ;;  %v2093_v30 = vld [vmem:[%s14564_s3 + $0x98] sm:$0xff] }
 0x414   : > { %2702 = vmatpush.msra.mxu1 %v1899_v15  ;;  %2500 = vmatmul.f32.vlgmr.msra.gmra.mxu3 %v2079_v31  ;;  %v1571_v15 = vmul.f32 %v1562_v3, %v14700_v54  ;;  %v1537_v9 = vmul.f32 %v1525_v29, %v14722_v56  ;;  %v14727_v41 = vld [vmem:[#allocation143_spill] sm:$0xff]  ;;  %v14729_v3 = vld [vmem:[#allocation117_spill] sm:$0xff]  ;;  %vm14733_vm5 = vmmov %vm14718_vm1 }
 0x415   : > { %2600 = vmatpush.msrb.mxu3 %v1577_v39  ;;  %2528 = vmatpush.msra.mxu0 %v2058_v43  ;;  %v2086_v39 = vld [vmem:[%s14564_s3 + $0x60] sm:$0xff]  ;;  %v1699_v43 = vmul.f32 %v1694_v19, %v14706_v42  ;;  %v14731_v19 = vld [vmem:[#allocation140_spill] sm:$0xff] }
 0x416   : > { %2703 = vmatmul.f32.vlgmr.msra.gmra.mxu1 %v2079_v31  ;;  %6833 = vmatmul.msk.f32.vlgmr.msra.gmra.mxu0 %vm2326_vm2, %v9284_v32  ;;  %v14717_v31 = vld [vmem:[#allocation141_spill] sm:$0xff]  ;;  %v14734_v29 = vld [vmem:[#allocation118_spill] sm:$0xff] }
 0x417   : > { %2629 = vmatpush.msrb.mxu0 %v1705_v0  ;;  %2601 = vmatpush.msrb.mxu3 %v1575_v17  ;;  %v1657_v33 = vsel %vm14718_vm1, %v14717_v31, %v8407_v51  ;;  %v1656_v51 = vsel %vm14721_vm15, %v8420_v6, %v8405_v46  ;;  %v14724_v0 = vld [vmem:[#allocation114_spill] sm:$0xff]  ;;  %v1655_v46 = vsel %vm14728_vm6, %v14727_v41, %v14726_v26  ;;  %vm14738_vm1 = vcmp.lt.s32.totalorder %v7177_v34, 127  ;;  %vm14741_vm15 = vmmov %vm14736_vm0  ;;  %v14746_v26 = vld [vmem:[#allocation116_spill] sm:$0xff] }
 0x418   : > { %v1523_v25 = vsel %vm665_vm4, %v14724_v0, %v14723_v60  ;;  %v1665_v35 = vmul.f32 %v1657_v33, %v14725_v11  ;;  %v9334_v17 = vld [vmem:[%s14564_s3 + $0x68] sm:$0xff]  ;;  %v1535_v6 = vmul.f32 %v1524_v59, %v14722_v56  ;;  %v1663_v23 = vmul.f32 %v1656_v51, %v14725_v11  ;;  %v14743_v0 = vld [vmem:[#allocation132_spill] sm:$0xff]  ;;  %vm14744_vm6 = vmmov %vm14738_vm1 }
 0x419   : > { %2630 = vmatpush.msrb.mxu0 %v1703_v24  ;;  %2602 = vmatpush.msrb.mxu3 %v1573_v50  ;;  %v14730_v24 = vld [vmem:[#allocation119_spill] sm:$0xff]  ;;  %v14732_v50 = vld [vmem:[#allocation138_spill] sm:$0xff]  ;;  %v1533_v20 = vmul.f32 %v1523_v25, %v14722_v56  ;;  %v1661_v33 = vmul.f32 %v1655_v46, %v14725_v11  ;;  %v14745_v25 = vld [vmem:[#allocation17_spill] sm:$0xff] }
 0x41a   : > { %v1522_v62 = vsel %vm665_vm4, %v14730_v24, %v14729_v3  ;;  %v1654_v8 = vsel %vm14733_vm5, %v14732_v50, %v14731_v19  ;;  %v14739_v59 = vld [vmem:[#allocation111_spill] sm:$0xff]  ;;  %v14742_v60 = vld [vmem:[#allocation134_spill] sm:$0xff]  ;;  %v14747_v41 = vld [vmem:[#allocation112_spill] sm:$0xff] }
 0x41b   : > { %2631 = vmatpush.msrb.mxu0 %v1701_v55  ;;  %2603 = vmatpush.msrb.mxu3 %v1571_v15  ;;  %v14735_v55 = vld [vmem:[#allocation108_spill] sm:$0xff]  ;;  %v14737_v15 = vld [vmem:[#allocation139_spill] sm:$0xff]  ;;  %v1531_v14 = vmul.f32 %v1522_v62, %v14722_v56  ;;  %vm14748_vm5 = vmmov %vm14736_vm0 }
 0x41c   : > { %2503 = vmatmul.f32.gmra.mxu3 %v2086_v39  ;;  %v1485_v31 = vsel %vm14736_vm0, %v14735_v55, %v14734_v29  ;;  %v1483_v46 = vsel %vm14748_vm5, %v14747_v41, %v14746_v26  ;;  %v9384_v24 = vld [vmem:[%s14564_s3 + $0xa0] sm:$0xff]  ;;  %vm14752_vm0 = vmmov %vm14738_vm1  ;;  %v14765_v26 = vld [vmem:[#allocation19_spill] sm:$0xff] }
 0x41d   : > { %2632 = vmatpush.msrb.mxu0 %v1699_v43  ;;  %2604 = vmatpush.msrb.mxu3 %v1537_v9  ;;  %v14740_v43 = vld [vmem:[#allocation113_spill] sm:$0xff]  ;;  %v1659_v9 = vmul.f32 %v1654_v8, %v14725_v11  ;;  %v14753_v8 = vld [vmem:[#allocation115_spill] sm:$0xff]  ;;  %v14812_v11 = vld [vmem:[#allocation28_spill] sm:$0xff] }
 0x41e   : > { %2706 = vmatmul.f32.gmra.mxu1 %v2086_v39  ;;  %6834 = vmatmul.msk.f32.gmra.mxu0 %vm2326_vm2, %v9334_v17  ;;  %v1617_v39 = vsel %vm14738_vm1, %v14737_v15, %v8270_v7  ;;  %v1484_v51 = vsel %vm14741_vm15, %v14740_v43, %v14739_v59  ;;  %v1616_v7 = vsel %vm14744_vm6, %v14743_v0, %v14742_v60  ;;  %v14750_v62 = vld [vmem:[#allocation133_spill] sm:$0xff]  ;;  %vm14755_vm1 = vmmov %vm14748_vm5  ;;  %v14760_v59 = vld [vmem:[#allocation106_spill] sm:$0xff]  ;;  %vm14761_vm6 = vcmp.lt.s32.totalorder %v7177_v34, 15 }
 0x41f   : > { %2633 = vmatpush.msrb.mxu0 %v1665_v35  ;;  %2605 = vmatpush.msrb.mxu3 %v1535_v6  ;;  %v1497_v35 = vmul.f32 %v1485_v31, %v14745_v25  ;;  %v14749_v6 = vld [vmem:[#allocation11_spill] sm:$0xff]  ;;  %v1495_v50 = vmul.f32 %v1484_v51, %v14745_v25  ;;  %v14756_v31 = vld [vmem:[#allocation128_spill] sm:$0xff]  ;;  %vm14758_vm15 = vmmov %vm14752_vm0 }
 0x420   : > { %v1625_v3 = vmul.f32 %v1617_v39, %v14749_v6  ;;  %v1623_v55 = vmul.f32 %v1616_v7, %v14749_v6  ;;  %v1493_v39 = vmul.f32 %v1483_v46, %v14745_v25  ;;  %v14762_v60 = vld [vmem:[#allocation109_spill] sm:$0xff]  ;;  %v14763_v0 = vld [vmem:[#allocation80_spill] sm:$0xff]  ;;  %vm14764_vm5 = vmmov %vm14761_vm6 }
 0x421   : > { %2634 = vmatpush.msrb.mxu0 %v1663_v23  ;;  %2606 = vmatpush.msrb.mxu3 %v1533_v20  ;;  %v14751_v23 = vld [vmem:[#allocation137_spill] sm:$0xff]  ;;  %v1444_v7 = vsel %vm14764_vm5, %v14763_v0, %v14762_v60  ;;  %v14766_v46 = vld [vmem:[#allocation102_spill] sm:$0xff] }
 0x422   : > { %v1615_v19 = vsel %vm14752_vm0, %v14751_v23, %v14750_v62  ;;  %v14754_v20 = vld [vmem:[#allocation105_spill] sm:$0xff]  ;;  %vm14768_vm0 = vmmov %vm14764_vm5 }
 0x423   : > { %2635 = vmatpush.msrb.mxu0 %v1661_v33  ;;  %2607 = vmatpush.msrb.mxu3 %v1531_v14  ;;  %v1482_v29 = vsel %vm14755_vm1, %v14754_v20, %v14753_v8  ;;  %v14757_v33 = vld [vmem:[#allocation136_spill] sm:$0xff]  ;;  %v14759_v14 = vld [vmem:[#allocation110_spill] sm:$0xff]  ;;  %v1621_v51 = vmul.f32 %v1615_v19, %v14749_v6  ;;  %v1455_v19 = vmul.f32 %v1444_v7, %v14765_v26  ;;  %v14770_v8 = vld [vmem:[#allocation61_spill] sm:$0xff] }
 0x424   : > { %2506 = vmatmul.f32.gmra.mxu3 %v2093_v30  ;;  %v1614_v15 = vsel %vm14758_vm15, %v14757_v33, %v14756_v31  ;;  %v1445_v43 = vsel %vm14761_vm6, %v14760_v59, %v14759_v14  ;;  %v2101_v23 = vld [vmem:[%s14564_s3 + $0xd8] sm:$0xff]  ;;  %vm14771_vm1 = vmmov %vm14768_vm0  ;;  %vm14772_vm15 = vcmp.lt.s32.totalorder %v7177_v34, 94  ;;  %v2356_v59 = vpop.f32.mrf.mxu1 }
 0x425   : > { %2636 = vmatpush.msrb.mxu0 %v1659_v9  ;;  %2608 = vmatpush.msrb.mxu3 %v1497_v35  ;;  %v2100_v9 = vld [vmem:[%s14564_s3 + $0xd0] sm:$0xff]  ;;  %v1619_v35 = vmul.f32 %v1614_v15, %v14749_v6  ;;  %v1457_v41 = vmul.f32 %v1445_v43, %v14765_v26  ;;  %vm14773_vm6 = vmmov %vm14772_vm15  ;;  %v14774_v33 = vld [vmem:[#allocation37_spill] sm:$0xff] }
 0x426   : > { %2709 = vmatmul.f32.gmra.mxu1 %v2093_v30  ;;  %6835 = vmatmul.msk.f32.gmra.mxu0 %vm2326_vm2, %v9384_v24  ;;  %v1491_v30 = vmul.f32 %v1482_v29, %v14745_v25  ;;  %v2057_v29 = vsel %vm14772_vm15, %v9208_v12, %v9162_v5  ;;  %v2056_v31 = vsel %vm14773_vm6, %v9206_v52, %v9160_v37  ;;  %vm14775_vm5 = vmmov %vm14773_vm6  ;;  %v6902_v12 = vld [vmem:[%s14564_s3 + $0x80] sm:$0xff] }
 0x427   : > { %2637 = vmatpush.msrb.mxu0 %v1625_v3  ;;  %2609 = vmatpush.msrb.mxu3 %v1495_v50  ;;  %v14767_v3 = vld [vmem:[#allocation72_spill] sm:$0xff]  ;;  %v14769_v50 = vld [vmem:[#allocation107_spill] sm:$0xff]  ;;  %v2065_v15 = vmul.f32 %v2057_v29, %v14774_v33  ;;  %v2055_v5 = vsel %vm14775_vm5, %v9228_v45, %v9119_v38  ;;  %v14778_v14 = vld [vmem:[#allocation89_spill] sm:$0xff] }
 0x428   : > { %v1443_v62 = vsel %vm14768_vm0, %v14767_v3, %v14766_v46  ;;  %v1442_v20 = vsel %vm14771_vm1, %v14770_v8, %v14769_v50  ;;  %vm14776_vm0 = vmmov %vm14775_vm5  ;;  %v2061_v52 = vmul.f32 %v2055_v5, %v14774_v33  ;;  %v6899_v38 = vld [vmem:[%s14564_s3 + $0x18] sm:$0xff]  ;;  %v14777_v45 = vld [vmem:[#allocation95_spill] sm:$0xff]  ;;  %v9487_v8 = vpop.permute.xlu0 %2313  ;;  %vm14884_vm1 = vcmp.lt.s32.totalorder %v7177_v34, 14 }
 0x429   : > { %2638 = vmatpush.msrb.mxu0 %v1623_v55  ;;  %2610 = vmatpush.msrb.mxu3 %v1493_v39  ;;  %v1453_v55 = vmul.f32 %v1443_v62, %v14765_v26  ;;  %v2054_v37 = vsel %vm14776_vm0, %v9164_v2, %v9117_v13  ;;  %v6900_v13 = vld [vmem:[%s14564_s3 + $0x48] sm:$0xff]  ;;  %v6901_v2 = vld [vmem:[%s14564_s3 + $0x50] sm:$0xff]  ;;  %v6903_v39 = vld [vmem:[%s14564_s3 + $0xb8] sm:$0xff]  ;;  %vm14892_vm0 = vcmp.lt.s32.totalorder %v7177_v34, 15 }
 0x42a   : > { %vm14885_vm15 = vmmov %vm14884_vm1 }
 0x42b   : > { %2639 = vmatpush.msrb.mxu0 %v1621_v51  ;;  %2611 = vmatpush.msrb.mxu3 %v1491_v30  ;;  %v2414_v51 = vpop.f32.mrf.mxu0  ;;  %vm14890_vm6 = vmmov %vm14884_vm1 }
 0x42c   : > { %2509 = vmatmul.f32.gmra.mxu3 %v2100_v9  ;;  %v2359_v43 = vpop.f32.mrf.mxu1  ;;  %vm14891_vm5 = vmmov %vm14884_vm1 }
 0x42d   : > { %2640 = vmatpush.msrb.mxu0 %v1619_v35  ;;  %2612 = vmatpush.msrb.mxu3 %v1457_v41  ;;  %v2443_v35 = vpop.f32.mrf.mxu2  ;;  %v2360_v29 = vadd.f32 %v2359_v43, %v9487_v8 }
 0x42e   : > { %2712 = vmatmul.f32.gmra.mxu1 %v2100_v9  ;;  %6836 = vmatmul.msk.f32.gmra.mxu0 %vm2326_vm2, %v2101_v23  ;;  %v2385_v9 = vpop.f32.mrf.mxu3 }
 0x42f   : > { %2641 = vmatpush.msrb.mxu0 %v7798_v44  ;;  %2613 = vmatpush.msrb.mxu3 %v1455_v19  ;;  %v1451_v44 = vmul.f32 %v1442_v20, %v14765_v26 }
 0x431   : > { %2642 = vmatpush.msrb.mxu0 %v7734_v18  ;;  %2614 = vmatpush.msrb.mxu3 %v1453_v55  ;;  %v2063_v18 = vmul.f32 %v2056_v31, %v14774_v33 }
 0x433   : > { %2643 = vmatpush.msrb.mxu0 %v7688_v57  ;;  %2615 = vmatpush.msrb.mxu3 %v1451_v44  ;;  %v6898_v57 = vld [vmem:[%s14564_s3 + $0x10] sm:$0xff]  ;;  %v2417_v60 = vpop.f32.mrf.mxu0 }
 0x434   : > { %2616 = vmatmul.f32.vlgmr.msrb.gmra.mxu3 %v6898_v57  ;;  %v2362_v30 = vpop.f32.mrf.mxu1 }
 0x435   : > { %2728 = vmatpush.msra.mxu3 %v2065_v15  ;;  %2644 = vmatpush.msrb.mxu0 %v7654_v16  ;;  %v2059_v16 = vmul.f32 %v2054_v37, %v14774_v33  ;;  %v2446_v62 = vpop.f32.mrf.mxu2 }
 0x436   : > { %2645 = vmatmul.f32.vlgmr.msrb.gmra.mxu0 %v6899_v38  ;;  %v2388_v7 = vpop.f32.mrf.mxu3 }
 0x437   : > { %2729 = vmatpush.msra.mxu3 %v2063_v18  ;;  %v2389_v31 = vadd.f32 %v2388_v7, %v2360_v29  ;;  %v9490_v18 = vpop.permute.xlu1 %2318 }
 0x439   : > { %2730 = vmatpush.msra.mxu3 %v2061_v52  ;;  %v2363_v52 = vadd.f32 %v2362_v30, %v9490_v18  ;;  %v2418_v38 = vadd.f32 %v2417_v60, %v2389_v31 }
 0x43b   : > { %2731 = vmatpush.msra.mxu3 %v2059_v16  ;;  %v2420_v46 = vpop.f32.mrf.mxu0 }
 0x43c   : > { %2619 = vmatmul.f32.gmra.mxu3 %v6900_v13  ;;  %v2365_v0 = vpop.f32.mrf.mxu1 }
 0x43d   : > { %v2449_v20 = vpop.f32.mrf.mxu2 }
 0x43e   : > { %2648 = vmatmul.f32.gmra.mxu0 %v6901_v2  ;;  %v2391_v3 = vpop.f32.mrf.mxu3 }
 0x444   : > { %2622 = vmatmul.f32.gmra.mxu3 %v6902_v12  ;;  %v2472_v41 = vpop.f32.mrf.mxu1  ;;  %v2392_v12 = vadd.f32 %v2391_v3, %v2363_v52 }
 0x445   : > { %v2452_v13 = vpop.f32.mrf.mxu2 }
 0x446   : > { %2651 = vmatmul.f32.gmra.mxu0 %v14777_v45  ;;  %v2447_v45 = vadd.f32 %v2446_v62, %v2418_v38  ;;  %v2421_v30 = vadd.f32 %v2420_v46, %v2392_v12 }
 0x448   : > { %v2450_v3 = vadd.f32 %v2449_v20, %v2421_v30 }
 0x44c   : > { %2625 = vmatmul.f32.gmra.mxu3 %v6903_v39  ;;  %v2475_v19 = vpop.f32.mrf.mxu1 }
 0x44d   : > { %v2476_v43 = vadd.f32 %v2475_v19, %v2447_v45 }
 0x44e   : > { %2654 = vmatmul.f32.gmra.mxu0 %v14778_v14 }
 0x454   : > { %6837 = vmatmul.msk.f32.vlgmr.msra.gmra.mxu3 %vm2326_vm2, %v9284_v32  ;;  %v9484_v32 = vpop.permute.xlu2 %2308  ;;  %v2478_v15 = vpop.f32.mrf.mxu1 }
 0x455   : > { %v2479_v29 = vadd.f32 %v2478_v15, %v2450_v3 }
 0x45c   : > { %6838 = vmatmul.msk.f32.gmra.mxu3 %vm2326_vm2, %v9334_v17  ;;  %v2357_v17 = vadd.f32 %v2356_v59, %v9484_v32  ;;  %v9495_v59 = vpop.permute.xlu2 %2323 }
 0x45d   : > { %v2366_v7 = vadd.f32 %v2365_v0, %v9495_v59 }
 0x45e   : > { %v2386_v50 = vadd.f32 %v2385_v9, %v2357_v17  ;;  %v2559_v17 = vpop.f32.mrf.mxu2 }
 0x460   : > { %v2415_v55 = vadd.f32 %v2414_v51, %v2386_v50  ;;  %v2481_v51 = vpop.f32.mrf.mxu1 }
 0x462   : > { %v2444_v44 = vadd.f32 %v2443_v35, %v2415_v55 }
 0x464   : > { %6839 = vmatmul.msk.f32.gmra.mxu3 %vm2326_vm2, %v9384_v24  ;;  %v2423_v24 = vpop.f32.mrf.mxu0  ;;  %v2473_v37 = vadd.f32 %v2472_v41, %v2444_v44 }
 0x466   : > { %v2562_v46 = vpop.f32.mrf.mxu2 }
 0x468   : > { %v2588_v31 = vpop.f32.mrf.mxu1 }
 0x46c   : > { %6840 = vmatmul.msk.f32.gmra.mxu3 %vm2326_vm2, %v2101_v23  ;;  %v2394_v23 = vpop.f32.mrf.mxu3 }
 0x46d   : > { %v2395_v41 = vadd.f32 %v2394_v23, %v2366_v7 }
 0x46f   : > { %v2424_v55 = vadd.f32 %v2423_v24, %v2395_v41  ;;  %v2563_v41 = vadd.f32 %v2562_v46, %v9487_v8 }
 0x470   : > { %v2591_v52 = vpop.f32.mrf.mxu1 }
 0x493   : > { %v2530_v5 = vpop.f32.mrf.mxu0 }
 0x497   : > { %v2501_v57 = vpop.f32.mrf.mxu3 }
 0x498   : > { %v2502_v16 = vadd.f32 %v2501_v57, %v2473_v37  ;;  %v2453_v37 = vadd.f32 %v2452_v13, %v2424_v55 }
 0x49a   : > { %v2531_v2 = vadd.f32 %v2530_v5, %v2502_v16  ;;  %v2482_v57 = vadd.f32 %v2481_v51, %v2453_v37  ;;  %v2565_v16 = vpop.f32.mrf.mxu2  ;;  %v2560_v51 = vadd.f32 %v2559_v17, %v9484_v32 }
 0x49b   : > { %v2533_v14 = vpop.f32.mrf.mxu0  ;;  %v2566_v37 = vadd.f32 %v2565_v16, %v9490_v18 }
 0x49c   : > { %v9493_v39 = vmax.f32 %v2531_v2, 0.0  ;;  %v2594_v2 = vpop.f32.mrf.mxu1  ;;  %v2589_v7 = vadd.f32 %v2588_v31, %v2560_v51 }
 0x49e   : > { %2753 = vrot.lane.b32.xlu0 %v9493_v39, %s14779_s8 }
 0x49f   : > { %v2504_v9 = vpop.f32.mrf.mxu3 }
 0x4a0   : > { %v2505_v60 = vadd.f32 %v2504_v9, %v2476_v43 }
 0x4a2   : > { %v2534_v35 = vadd.f32 %v2533_v14, %v2505_v60  ;;  %v2568_v45 = vpop.f32.mrf.mxu2 }
 0x4a3   : > { %v2536_v50 = vpop.f32.mrf.mxu0  ;;  %v2569_v18 = vadd.f32 %v2568_v45, %v9495_v59 }
 0x4a4   : > { %v9500_v62 = vmax.f32 %v2534_v35, 0.0  ;;  %v2597_v14 = vpop.f32.mrf.mxu1 }
 0x4a6   : > { %2755 = vrot.lane.b32.xlu1 %v9500_v62, %s14779_s8 }
 0x4a7   : > { %v2507_v19 = vpop.f32.mrf.mxu3 }
 0x4a8   : > { %v2508_v44 = vadd.f32 %v2507_v19, %v2479_v29  ;;  %v2592_v19 = vadd.f32 %v2591_v52, %v2563_v41 }
 0x4aa   : > { %v2537_v5 = vadd.f32 %v2536_v50, %v2508_v44  ;;  %v2675_v30 = vpop.f32.mrf.mxu2 }
 0x4ab   : > { %v2539_v20 = vpop.f32.mrf.mxu0 }
 0x4ac   : > { %v9504_v0 = vmax.f32 %v2537_v5, 0.0  ;;  %v2704_v35 = vpop.f32.mrf.mxu1 }
 0x4ae   : > { %2757 = vrot.lane.b32.xlu2 %v9504_v0, %s14779_s8  ;;  %2797 = vrot.lane.b32.xlu1 %v9504_v0, %s14780_s12 }
 0x4af   : > { %v2510_v23 = vpop.f32.mrf.mxu3 }
 0x4b0   : > { %v2511_v15 = vadd.f32 %v2510_v23, %v2482_v57 }
 0x4b2   : > { %v2540_v38 = vadd.f32 %v2539_v20, %v2511_v15  ;;  %v2678_v5 = vpop.f32.mrf.mxu2  ;;  %v2595_v20 = vadd.f32 %v2594_v2, %v2566_v37  ;;  %v2598_v2 = vadd.f32 %v2597_v14, %v2569_v18 }
 0x4b3   : > { %v2646_v43 = vpop.f32.mrf.mxu0 }
 0x4b4   : > { %v9510_v24 = vmax.f32 %v2540_v38, 0.0  ;;  %v2707_v57 = vpop.f32.mrf.mxu1 }
 0x4b6   : > { %2833 = vrot.lane.b32.xlu1 %v9493_v39, %s14781_s2  ;;  %2793 = vrot.lane.b32.xlu2 %v9493_v39, %s14780_s12 }
 0x4b7   : > { %2759 = vrot.lane.b32.xlu0 %v9510_v24, %s14779_s8  ;;  %v2617_v13 = vpop.f32.mrf.mxu3 }
 0x4b8   : > { %v2618_v60 = vadd.f32 %v2617_v13, %v2589_v7 }
 0x4ba   : > { %v2647_v3 = vadd.f32 %v2646_v43, %v2618_v60  ;;  %v2681_v8 = vpop.f32.mrf.mxu2 }
 0x4bb   : > { %v2649_v50 = vpop.f32.mrf.mxu0 }
 0x4bc   : > { %v2676_v55 = vadd.f32 %v2675_v30, %v2647_v3  ;;  %v2710_v43 = vpop.f32.mrf.mxu1 }
 0x4be   : > { %2839 = vrot.lane.b32.xlu1 %v9510_v24, %s14781_s2  ;;  %2799 = vrot.lane.b32.xlu2 %v9510_v24, %s14780_s12  ;;  %v2705_v32 = vadd.f32 %v2704_v35, %v2676_v55 }
 0x4bf   : > { %2795 = vrot.lane.b32.xlu0 %v9500_v62, %s14780_s12  ;;  %v2620_v12 = vpop.f32.mrf.mxu3 }
 0x4c0   : > { %v2621_v44 = vadd.f32 %v2620_v12, %v2592_v19 }
 0x4c2   : > { %v2650_v17 = vadd.f32 %v2649_v50, %v2621_v44  ;;  %v2684_v35 = vpop.f32.mrf.mxu2 }
 0x4c3   : > { %v2652_v15 = vpop.f32.mrf.mxu0 }
 0x4c4   : > { %v2679_v38 = vadd.f32 %v2678_v5, %v2650_v17 }
 0x4c6   : > { %2835 = vrot.lane.b32.xlu2 %v9500_v62, %s14781_s2  ;;  %v2708_v46 = vadd.f32 %v2707_v57, %v2679_v38 }
 0x4c7   : > { %2837 = vrot.lane.b32.xlu0 %v9504_v0, %s14781_s2  ;;  %v2623_v9 = vpop.f32.mrf.mxu3 }
 0x4c8   : > { %v2624_v13 = vadd.f32 %v2623_v9, %v2595_v20 }
 0x4ca   : > { %v2653_v52 = vadd.f32 %v2652_v15, %v2624_v13 }
 0x4cb   : > { %v2655_v60 = vpop.f32.mrf.mxu0 }
 0x4cc   : > { %v2682_v9 = vadd.f32 %v2681_v8, %v2653_v52 }
 0x4ce   : > { %v2711_v59 = vadd.f32 %v2710_v43, %v2682_v9 }
 0x4cf   : > { %v2626_v29 = vpop.f32.mrf.mxu3 }
 0x4d0   : > { %v2627_v7 = vadd.f32 %v2626_v29, %v2598_v2  ;;  %v2713_v29 = vpop.f32.mrf.mxu1 }
 0x4d2   : > { %v2656_v45 = vadd.f32 %v2655_v60, %v2627_v7 }
 0x4d4   : > { %v2685_v3 = vadd.f32 %v2684_v35, %v2656_v45 }
 0x4d6   : > { %v2714_v19 = vadd.f32 %v2713_v29, %v2685_v3 }
 0x4d7   : > { %v2733_v23 = vpop.f32.mrf.mxu3 }
 0x4d8   : > { %v2734_v31 = vadd.f32 %v2733_v23, %v2705_v32 }
 0x4da   : > { %v9531_v51 = vmax.f32 %v2734_v31, 0.0 }
 0x4dc   : > { %14782 = vst [vmem:[#allocation84_spill] sm:$0xff] %v9531_v51  ;;  %2761 = vrot.lane.b32.xlu1 %v9531_v51, %s14779_s8  ;;  %2841 = vrot.lane.b32.xlu2 %v9531_v51, %s14781_s2 }
 0x4dd   : > { %2801 = vrot.lane.b32.xlu0 %v9531_v51, %s14780_s12 }
 0x4df   : > { %v2736_v16 = vpop.f32.mrf.mxu3 }
 0x4e0   : > { %v2737_v12 = vadd.f32 %v2736_v16, %v2708_v46 }
 0x4e2   : > { %v9540_v30 = vmax.f32 %v2737_v12, 0.0 }
 0x4e4   : > { %2803 = vrot.lane.b32.xlu1 %v9540_v30, %s14780_s12  ;;  %2763 = vrot.lane.b32.xlu2 %v9540_v30, %s14779_s8 }
 0x4e5   : > { %2843 = vrot.lane.b32.xlu0 %v9540_v30, %s14781_s2 }
 0x4e7   : > { %v2739_v14 = vpop.f32.mrf.mxu3 }
 0x4e8   : > { %v2740_v41 = vadd.f32 %v2739_v14, %v2711_v59 }
 0x4ea   : > { %v9548_v50 = vmax.f32 %v2740_v41, 0.0 }
 0x4ec   : > { %2845 = vrot.lane.b32.xlu1 %v9548_v50, %s14781_s2  ;;  %2805 = vrot.lane.b32.xlu2 %v9548_v50, %s14780_s12 }
 0x4ed   : > { %2765 = vrot.lane.b32.xlu0 %v9548_v50, %s14779_s8 }
 0x4ef   : > { %v2742_v55 = vpop.f32.mrf.mxu3 }
 0x4f0   : > { %v2743_v44 = vadd.f32 %v2742_v55, %v2714_v19 }
 0x4f2   : > { %v9556_v5 = vmax.f32 %v2743_v44, 0.0 }
 0x4f4   : > { %2767 = vrot.lane.b32.xlu1 %v9556_v5, %s14779_s8  ;;  %2847 = vrot.lane.b32.xlu2 %v9556_v5, %s14781_s2 }
 0x4f5   : > { %2807 = vrot.lane.b32.xlu0 %v9556_v5, %s14780_s12 }
 0x4fc   : > { %2875 = vrot.lane.b32.xlu1 %v9500_v62, %s14783_s7  ;;  %2877 = vrot.lane.b32.xlu2 %v9504_v0, %s14783_s7 }
 0x4fd   : > { %2873 = vrot.lane.b32.xlu0 %v9493_v39, %s14783_s7 }
 0x504   : > { %2881 = vrot.lane.b32.xlu1 %v9531_v51, %s14783_s7  ;;  %2883 = vrot.lane.b32.xlu2 %v9540_v30, %s14783_s7 }
 0x505   : > { %2879 = vrot.lane.b32.xlu0 %v9510_v24, %s14783_s7 }
 0x508   : > { %v9582_v37 = vpop.permute.xlu2 %2757 }
 0x509   : > { %14785 = vst [vmem:[#allocation76_spill] sm:$0xff] %v9582_v37 }
 0x50c   : > { %2887 = vrot.lane.b32.xlu1 %v9556_v5, %s14783_s7  ;;  %2913 = vrot.lane.b32.xlu2 %v9493_v39, %s14784_s13 }
 0x50d   : > { %2885 = vrot.lane.b32.xlu0 %v9548_v50, %s14783_s7 }
 0x510   : > { %v9590_v32 = vpop.permute.xlu2 %2793  ;;  %v9608_v23 = vpop.permute.xlu0 %2753 }
 0x511   : > { %14786 = vst [vmem:[#allocation65_spill] sm:$0xff] %v9590_v32 }
 0x512   : > { %14790 = vst [vmem:[#allocation99_spill] sm:$0xff] %v9608_v23 }
 0x514   : > { %2917 = vrot.lane.b32.xlu1 %v9504_v0, %s14784_s13  ;;  %2919 = vrot.lane.b32.xlu2 %v9510_v24, %s14784_s13 }
 0x515   : > { %2915 = vrot.lane.b32.xlu0 %v9500_v62, %s14784_s13 }
 0x518   : > { %v9598_v17 = vpop.permute.xlu2 %2799  ;;  %v9606_v57 = vpop.permute.xlu1 %2755 }
 0x519   : > { %14787 = vst [vmem:[#allocation57_spill] sm:$0xff] %v9598_v17 }
 0x51a   : > { %14789 = vst [vmem:[#allocation56_spill] sm:$0xff] %v9606_v57 }
 0x51c   : > { %2923 = vrot.lane.b32.xlu1 %v9540_v30, %s14784_s13  ;;  %2925 = vrot.lane.b32.xlu2 %v9548_v50, %s14784_s13 }
 0x51d   : > { %2921 = vrot.lane.b32.xlu0 %v9531_v51, %s14784_s13 }
 0x520   : > { %v9616_v20 = vpop.permute.xlu2 %2835  ;;  %v9618_v31 = vpop.permute.xlu1 %2797 }
 0x521   : > { %14791 = vst [vmem:[#allocation90_spill] sm:$0xff] %v9616_v20 }
 0x522   : > { %14792 = vst [vmem:[#allocation83_spill] sm:$0xff] %v9618_v31 }
 0x524   : > { %2953 = vrot.lane.b32.xlu1 %v9493_v39, %s14788_s27  ;;  %2955 = vrot.lane.b32.xlu2 %v9500_v62, %s14788_s27 }
 0x525   : > { %2927 = vrot.lane.b32.xlu0 %v9556_v5, %s14784_s13 }
 0x528   : > { %v9630_v13 = vpop.permute.xlu1 %2833 }
 0x529   : > { %v9620_v15 = vpop.permute.xlu0 %2759  ;;  %14795 = vst [vmem:[#allocation70_spill] sm:$0xff] %v9630_v13 }
 0x52a   : > { %14793 = vst [vmem:[#allocation82_spill] sm:$0xff] %v9620_v15 }
 0x52c   : > { %2959 = vrot.lane.b32.xlu1 %v9510_v24, %s14788_s27  ;;  %2961 = vrot.lane.b32.xlu2 %v9531_v51, %s14788_s27 }
 0x52d   : > { %2957 = vrot.lane.b32.xlu0 %v9504_v0, %s14788_s27 }
 0x530   : > { %v9648_v46 = vpop.permute.xlu1 %2839 }
 0x531   : > { %v9636_v8 = vpop.permute.xlu0 %2795 }
 0x532   : > { %14796 = vst [vmem:[#allocation64_spill] sm:$0xff] %v9636_v8 }
 0x534   : > { %2965 = vrot.lane.b32.xlu1 %v9548_v50, %s14788_s27  ;;  %2967 = vrot.lane.b32.xlu2 %v9556_v5, %s14788_s27 }
 0x535   : > { %2963 = vrot.lane.b32.xlu0 %v9540_v30, %s14788_s27 }
 0x536   : > { %v9628_v38 = vpop.permute.xlu2 %2841 }
 0x537   : > { %14794 = vst [vmem:[#allocation75_spill] sm:$0xff] %v9628_v38 }
 0x539   : > { %v9652_v16 = vpop.permute.xlu0 %2837 }
 0x53c   : > { %2995 = vrot.lane.b32.xlu1 %v9500_v62, %s14432_s21  ;;  %2997 = vrot.lane.b32.xlu2 %v9504_v0, %s14432_s21 }
 0x53d   : > { %2993 = vrot.lane.b32.xlu0 %v9493_v39, %s14432_s21 }
 0x53e   : > { %v9640_v18 = vpop.permute.xlu2 %2763 }
 0x53f   : > { %14797 = vst [vmem:[#allocation54_spill] sm:$0xff] %v9640_v18  ;;  %v2774_v63 = vsel %vm505_vm14, %v9640_v18, %v9606_v57 }
 0x544   : > { %3001 = vrot.lane.b32.xlu1 %v9531_v51, %s14432_s21  ;;  %3003 = vrot.lane.b32.xlu2 %v9540_v30, %s14432_s21 }
 0x545   : > { %2999 = vrot.lane.b32.xlu0 %v9510_v24, %s14432_s21 }
 0x546   : > { %v9650_v52 = vpop.permute.xlu2 %2805 }
 0x547   : > { %14798 = vst [vmem:[#allocation101_spill] sm:$0xff] %v9650_v52 }
 0x54c   : > { %3007 = vrot.lane.b32.xlu1 %v9556_v5, %s14432_s21  ;;  %3033 = vrot.lane.b32.xlu2 %v9493_v39, %s14799_s16 }
 0x54d   : > { %3005 = vrot.lane.b32.xlu0 %v9548_v50, %s14432_s21 }
 0x54e   : > { %v9660_v2 = vpop.permute.xlu1 %2761  ;;  %v9662_v12 = vpop.permute.xlu2 %2847 }
 0x54f   : > { %14800 = vst [vmem:[#allocation100_spill] sm:$0xff] %v9660_v2  ;;  %v9664_v43 = vpop.permute.xlu0 %2801 }
 0x550   : > { %14801 = vst [vmem:[#allocation93_spill] sm:$0xff] %v9664_v43 }
 0x554   : > { %3037 = vrot.lane.b32.xlu1 %v9504_v0, %s14799_s16  ;;  %3039 = vrot.lane.b32.xlu2 %v9510_v24, %s14799_s16 }
 0x555   : > { %3035 = vrot.lane.b32.xlu0 %v9500_v62, %s14799_s16 }
 0x556   : > { %v9672_v9 = vpop.permute.xlu1 %2803  ;;  %v9674_v7 = vpop.permute.xlu2 %2877 }
 0x557   : > { %14802 = vst [vmem:[#allocation88_spill] sm:$0xff] %v9672_v9  ;;  %v9676_v60 = vpop.permute.xlu0 %2843  ;;  %v2814_v40 = vsel %vm521_vm13, %v9672_v9, %v9636_v8 }
 0x558   : > { %14803 = vst [vmem:[#allocation81_spill] sm:$0xff] %v9676_v60  ;;  %v2854_v58 = vsel %vm537_vm12, %v9676_v60, %v9616_v20 }
 0x55c   : > { %3043 = vrot.lane.b32.xlu1 %v9540_v30, %s14799_s16  ;;  %3045 = vrot.lane.b32.xlu2 %v9548_v50, %s14799_s16 }
 0x55d   : > { %3041 = vrot.lane.b32.xlu0 %v9531_v51, %s14799_s16 }
 0x55e   : > { %v9684_v59 = vpop.permute.xlu1 %2845  ;;  %v9686_v45 = vpop.permute.xlu2 %2883 }
 0x55f   : > { %v9688_v35 = vpop.permute.xlu0 %2765 }
 0x560   : > { %14804 = vst [vmem:[#allocation69_spill] sm:$0xff] %v9688_v35 }
 0x564   : > { %3073 = vrot.lane.b32.xlu1 %v9493_v39, %s14805_s15  ;;  %3075 = vrot.lane.b32.xlu2 %v9500_v62, %s14805_s15 }
 0x565   : > { %3047 = vrot.lane.b32.xlu0 %v9556_v5, %s14799_s16 }
 0x566   : > { %v9696_v14 = vpop.permute.xlu1 %2767  ;;  %v9698_v41 = vpop.permute.xlu2 %2913 }
 0x567   : > { %14806 = vst [vmem:[#allocation63_spill] sm:$0xff] %v9696_v14  ;;  %v9700_v3 = vpop.permute.xlu0 %2807 }
 0x568   : > { %14807 = vst [vmem:[#allocation62_spill] sm:$0xff] %v9698_v41 }
 0x569   : > { %14808 = vst [vmem:[#allocation103_spill] sm:$0xff] %v9700_v3 }
 0x56c   : > { %3079 = vrot.lane.b32.xlu1 %v9510_v24, %s14805_s15  ;;  %3081 = vrot.lane.b32.xlu2 %v9531_v51, %s14805_s15 }
 0x56d   : > { %3077 = vrot.lane.b32.xlu0 %v9504_v0, %s14805_s15 }
 0x56e   : > { %v9708_v29 = vpop.permute.xlu1 %2875  ;;  %v9710_v19 = vpop.permute.xlu2 %2919 }
 0x56f   : > { %14809 = vst [vmem:[#allocation94_spill] sm:$0xff] %v9710_v19  ;;  %v9712_v55 = vpop.permute.xlu0 %2873  ;;  %v2894_v42 = vsel %vm553_vm11, %v9686_v45, %v9708_v29 }
 0x574   : > { %3085 = vrot.lane.b32.xlu1 %v9548_v50, %s14805_s15  ;;  %3087 = vrot.lane.b32.xlu2 %v9556_v5, %s14805_s15 }
 0x575   : > { %3083 = vrot.lane.b32.xlu0 %v9540_v30, %s14805_s15 }
 0x576   : > { %v9720_v44 = vpop.permute.xlu1 %2881  ;;  %v9722_v33 = vpop.permute.xlu2 %2925 }
 0x577   : > { %14810 = vst [vmem:[#allocation87_spill] sm:$0xff] %v9722_v33  ;;  %v9724_v26 = vpop.permute.xlu0 %2879  ;;  %v2893_v53 = vsel %vm553_vm11, %v9720_v44, %v9712_v55 }
 0x578   : > { %v2897_v21 = vmul.f32 %v2893_v53, %v14812_v11  ;;  %v2853_v53 = vsel %vm537_vm12, %v9628_v38, %v9630_v13  ;;  %v14845_v13 = vld [vmem:[#allocation20_spill] sm:$0xff] }
 0x57c   : > { %3115 = vrot.lane.b32.xlu1 %v9500_v62, %s14457_s29  ;;  %3117 = vrot.lane.b32.xlu2 %v9504_v0, %s14457_s29 }
 0x57d   : > { %3113 = vrot.lane.b32.xlu0 %v9493_v39, %s14457_s29 }
 0x57e   : > { %v9732_v25 = vpop.permute.xlu1 %2887  ;;  %v9734_v56 = vpop.permute.xlu2 %2955 }
 0x57f   : > { %14811 = vst [vmem:[#allocation86_spill] sm:$0xff] %v9734_v56  ;;  %v2896_v6 = vsel %vm553_vm11, %v9732_v25, %v9724_v26  ;;  %v9740_v54 = vpop.permute.xlu0 %2885 }
 0x580   : > { %v2903_v48 = vmul.f32 %v2896_v6, %v14812_v11  ;;  %v2895_v1 = vsel %vm553_vm11, %v9740_v54, %v9674_v7  ;;  %v2899_v6 = vmul.f32 %v2894_v42, %v14812_v11  ;;  %v14816_v42 = vld [vmem:[#allocation30_spill] sm:$0xff] }
 0x581   : > { %v2901_v22 = vmul.f32 %v2895_v1, %v14812_v11  ;;  %v2856_v1 = vsel %vm537_vm12, %v9662_v12, %v9648_v46  ;;  %v2857_v11 = vmul.f32 %v2853_v53, %v14816_v42  ;;  %v2813_v53 = vsel %vm521_vm13, %v9664_v43, %v9590_v32 }
 0x582   : > { %3985 = vmatpush.msra.mxu0 %v2903_v48  ;;  %v2863_v36 = vmul.f32 %v2856_v1, %v14816_v42 }
 0x584   : > { %3121 = vrot.lane.b32.xlu1 %v9531_v51, %s14457_s29  ;;  %3123 = vrot.lane.b32.xlu2 %v9540_v30, %s14457_s29 }
 0x585   : > { %3119 = vrot.lane.b32.xlu0 %v9510_v24, %s14457_s29  ;;  %3986 = vmatpush.msra.mxu0 %v2901_v22  ;;  %v2855_v22 = vsel %vm537_vm12, %v9684_v59, %v9652_v16 }
 0x586   : > { %v9767_v48 = vpop.permute.xlu1 %2917  ;;  %v9769_v10 = vpop.permute.xlu2 %2961  ;;  %v2861_v61 = vmul.f32 %v2855_v22, %v14816_v42 }
 0x587   : > { %14813 = vst [vmem:[#allocation79_spill] sm:$0xff] %v9767_v48  ;;  %v9771_v27 = vpop.permute.xlu0 %2915  ;;  %3987 = vmatpush.msra.mxu0 %v2899_v6 }
 0x588   : > { %14814 = vst [vmem:[#allocation74_spill] sm:$0xff] %v9769_v10 }
 0x589   : > { %14815 = vst [vmem:[#allocation68_spill] sm:$0xff] %v9771_v27  ;;  %3988 = vmatpush.msra.mxu0 %v2897_v21  ;;  %v2859_v21 = vmul.f32 %v2854_v58, %v14816_v42  ;;  %v14820_v58 = vld [vmem:[#allocation32_spill] sm:$0xff] }
 0x58a   : > { %v2817_v42 = vmul.f32 %v2813_v53, %v14820_v58  ;;  %v2773_v53 = vsel %vm505_vm14, %v9660_v2, %v9608_v23 }
 0x58b   : > { %3989 = vmatpush.msra.mxu0 %v2863_v36  ;;  %v2816_v36 = vsel %vm521_vm13, %v9700_v3, %v9598_v17 }
 0x58c   : > { %3127 = vrot.lane.b32.xlu1 %v9556_v5, %s14457_s29  ;;  %3153 = vrot.lane.b32.xlu2 %v9493_v39, %s14464_s24  ;;  %v2823_v28 = vmul.f32 %v2816_v36, %v14820_v58 }
 0x58d   : > { %3125 = vrot.lane.b32.xlu0 %v9548_v50, %s14457_s29  ;;  %3990 = vmatpush.msra.mxu0 %v2861_v61  ;;  %v2815_v61 = vsel %vm521_vm13, %v9650_v52, %v9618_v31 }
 0x58e   : > { %v9799_v6 = vpop.permute.xlu1 %2923  ;;  %v9801_v1 = vpop.permute.xlu2 %2967  ;;  %v2821_v47 = vmul.f32 %v2815_v61, %v14820_v58 }
 0x58f   : > { %14817 = vst [vmem:[#allocation55_spill] sm:$0xff] %v9799_v6  ;;  %v9803_v22 = vpop.permute.xlu0 %2921  ;;  %3991 = vmatpush.msra.mxu0 %v2859_v21 }
 0x590   : > { %14818 = vst [vmem:[#allocation104_spill] sm:$0xff] %v9801_v1 }
 0x591   : > { %14819 = vst [vmem:[#allocation96_spill] sm:$0xff] %v9803_v22  ;;  %3992 = vmatpush.msra.mxu0 %v2857_v11  ;;  %v2819_v11 = vmul.f32 %v2814_v40, %v14820_v58  ;;  %v14824_v40 = vld [vmem:[#allocation34_spill] sm:$0xff] }
 0x593   : > { %3993 = vmatpush.msra.mxu0 %v2823_v28  ;;  %v2776_v28 = vsel %vm505_vm14, %v9696_v14, %v9620_v15 }
 0x594   : > { %3157 = vrot.lane.b32.xlu1 %v9504_v0, %s14464_s24  ;;  %3159 = vrot.lane.b32.xlu2 %v9510_v24, %s14464_s24  ;;  %v2783_v49 = vmul.f32 %v2776_v28, %v14824_v40 }
 0x595   : > { %3155 = vrot.lane.b32.xlu0 %v9500_v62, %s14464_s24  ;;  %3994 = vmatpush.msra.mxu0 %v2821_v47  ;;  %v2775_v47 = vsel %vm505_vm14, %v9688_v35, %v9582_v37 }
 0x596   : > { %v9831_v21 = vpop.permute.xlu1 %2953  ;;  %v9833_v36 = vpop.permute.xlu2 %2997  ;;  %v2781_v4 = vmul.f32 %v2775_v47, %v14824_v40  ;;  %v2777_v47 = vmul.f32 %v2773_v53, %v14824_v40 }
 0x597   : > { %14821 = vst [vmem:[#allocation92_spill] sm:$0xff] %v9831_v21  ;;  %v9835_v61 = vpop.permute.xlu0 %2927  ;;  %3995 = vmatpush.msra.mxu0 %v2819_v11 }
 0x598   : > { %14822 = vst [vmem:[#allocation77_spill] sm:$0xff] %v9833_v36 }
 0x599   : > { %14823 = vst [vmem:[#allocation73_spill] sm:$0xff] %v9835_v61  ;;  %3996 = vmatpush.msra.mxu0 %v2817_v42  ;;  %v2779_v42 = vmul.f32 %v2774_v63, %v14824_v40 }
 0x59b   : > { %3997 = vmatpush.msra.mxu0 %v2783_v49 }
 0x59c   : > { %3163 = vrot.lane.b32.xlu1 %v9540_v30, %s14464_s24  ;;  %3165 = vrot.lane.b32.xlu2 %v9548_v50, %s14464_s24 }
 0x59d   : > { %3161 = vrot.lane.b32.xlu0 %v9531_v51, %s14464_s24  ;;  %3998 = vmatpush.msra.mxu0 %v2781_v4 }
 0x59e   : > { %v9859_v49 = vpop.permute.xlu1 %2959  ;;  %v9861_v11 = vpop.permute.xlu2 %3003 }
 0x59f   : > { %14825 = vst [vmem:[#allocation71_spill] sm:$0xff] %v9859_v49  ;;  %v9863_v28 = vpop.permute.xlu0 %2957  ;;  %3999 = vmatpush.msra.mxu0 %v2779_v42 }
 0x5a0   : > { %14826 = vst [vmem:[#allocation66_spill] sm:$0xff] %v9861_v11 }
 0x5a1   : > { %14827 = vst [vmem:[#allocation58_spill] sm:$0xff] %v9863_v28  ;;  %4000 = vmatpush.msra.mxu0 %v2777_v47 }
 0x5a4   : > { %3193 = vrot.lane.b32.xlu1 %v9493_v39, %s14472_s26  ;;  %3195 = vrot.lane.b32.xlu2 %v9500_v62, %s14472_s26 }
 0x5a5   : > { %3167 = vrot.lane.b32.xlu0 %v9556_v5, %s14464_s24 }
 0x5a6   : > { %v9872_v4 = vpop.permute.xlu1 %2965  ;;  %v9874_v63 = vpop.permute.xlu2 %3033 }
 0x5a7   : > { %14828 = vst [vmem:[#allocation98_spill] sm:$0xff] %v9872_v4  ;;  %v9876_v58 = vpop.permute.xlu0 %2963 }
 0x5a8   : > { %14829 = vst [vmem:[#allocation97_spill] sm:$0xff] %v9874_v63 }
 0x5a9   : > { %14830 = vst [vmem:[#allocation91_spill] sm:$0xff] %v9876_v58 }
 0x5ac   : > { %3199 = vrot.lane.b32.xlu1 %v9510_v24, %s14472_s26  ;;  %3201 = vrot.lane.b32.xlu2 %v9531_v51, %s14472_s26 }
 0x5ad   : > { %3197 = vrot.lane.b32.xlu0 %v9504_v0, %s14472_s26 }
 0x5ae   : > { %v9884_v53 = vpop.permute.xlu1 %2995  ;;  %v9886_v42 = vpop.permute.xlu2 %3039 }
 0x5af   : > { %14831 = vst [vmem:[#allocation85_spill] sm:$0xff] %v9884_v53  ;;  %v9888_v47 = vpop.permute.xlu0 %2993 }
 0x5b0   : > { %14832 = vst [vmem:[#allocation78_spill] sm:$0xff] %v9888_v47 }
 0x5b4   : > { %3205 = vrot.lane.b32.xlu1 %v9548_v50, %s14472_s26  ;;  %3207 = vrot.lane.b32.xlu2 %v9556_v5, %s14472_s26 }
 0x5b5   : > { %3203 = vrot.lane.b32.xlu0 %v9540_v30, %s14472_s26 }
 0x5b6   : > { %v9896_v40 = vpop.permute.xlu1 %3001  ;;  %v9898_v23 = vpop.permute.xlu2 %3045 }
 0x5b7   : > { %14833 = vst [vmem:[#allocation67_spill] sm:$0xff] %v9896_v40  ;;  %v9900_v2 = vpop.permute.xlu0 %2999 }
 0x5b8   : > { %14834 = vst [vmem:[#allocation60_spill] sm:$0xff] %v9900_v2 }
 0x5bc   : > { %3243 = vrot.lane.b32.xlu1 %v9500_v62, %s14478_s11  ;;  %3245 = vrot.lane.b32.xlu2 %v9504_v0, %s14478_s11 }
 0x5bd   : > { %3241 = vrot.lane.b32.xlu0 %v9493_v39, %s14478_s11 }
 0x5be   : > { %v9908_v57 = vpop.permute.xlu1 %3007  ;;  %v9910_v18 = vpop.permute.xlu2 %3075 }
 0x5bf   : > { %14835 = vst [vmem:[#allocation59_spill] sm:$0xff] %v9908_v57  ;;  %v9912_v37 = vpop.permute.xlu0 %3005 }
 0x5c0   : > { %14836 = vst [vmem:[#allocation131_spill] sm:$0xff] %v9910_v18 }
 0x5c4   : > { %3249 = vrot.lane.b32.xlu1 %v9531_v51, %s14478_s11  ;;  %3251 = vrot.lane.b32.xlu2 %v9540_v30, %s14478_s11 }
 0x5c5   : > { %3247 = vrot.lane.b32.xlu0 %v9510_v24, %s14478_s11 }
 0x5c6   : > { %v9920_v35 = vpop.permute.xlu1 %3037  ;;  %v9922_v15 = vpop.permute.xlu2 %3081 }
 0x5c7   : > { %14837 = vst [vmem:[#allocation129_spill] sm:$0xff] %v9920_v35  ;;  %v9924_v14 = vpop.permute.xlu0 %3035  ;;  %v3055_v17 = vsel %vm617_vm7, %v9898_v23, %v9920_v35 }
 0x5c8   : > { %14838 = vst [vmem:[#allocation142_spill] sm:$0xff] %v9922_v15  ;;  %v3061_v60 = vmul.f32 %v3055_v17, %v14845_v13  ;;  %v3016_v17 = vsel %vm601_vm8, %v9908_v57, %v9900_v2  ;;  %v3014_v2 = vsel %vm601_vm8, %v9861_v11, %v9884_v53 }
 0x5c9   : > { %14839 = vst [vmem:[#allocation148_spill] sm:$0xff] %v9924_v14 }
 0x5cc   : > { %3255 = vrot.lane.b32.xlu1 %v9556_v5, %s14478_s11  ;;  %3281 = vrot.lane.b32.xlu2 %v9493_v39, %s14485_s25 }
 0x5cd   : > { %3253 = vrot.lane.b32.xlu0 %v9548_v50, %s14478_s11 }
 0x5ce   : > { %v9932_v32 = vpop.permute.xlu1 %3043  ;;  %v9934_v43 = vpop.permute.xlu2 %3087 }
 0x5cf   : > { %14840 = vst [vmem:[#allocation125_spill] sm:$0xff] %v9932_v32  ;;  %v9936_v8 = vpop.permute.xlu0 %3041  ;;  %v3054_v20 = vsel %vm617_vm7, %v9932_v32, %v9924_v14 }
 0x5d0   : > { %14841 = vst [vmem:[#allocation127_spill] sm:$0xff] %v9934_v43  ;;  %v3053_v35 = vsel %vm617_vm7, %v9936_v8, %v9874_v63 }
 0x5d1   : > { %14842 = vst [vmem:[#allocation146_spill] sm:$0xff] %v9936_v8  ;;  %v3057_v14 = vmul.f32 %v3053_v35, %v14845_v13  ;;  %v3013_v35 = vsel %vm601_vm8, %v9896_v40, %v9888_v47 }
 0x5d4   : > { %3285 = vrot.lane.b32.xlu1 %v9504_v0, %s14485_s25  ;;  %3287 = vrot.lane.b32.xlu2 %v9510_v24, %s14485_s25 }
 0x5d5   : > { %3283 = vrot.lane.b32.xlu0 %v9500_v62, %s14485_s25 }
 0x5d6   : > { %v9944_v9 = vpop.permute.xlu1 %3073  ;;  %v9946_v31 = vpop.permute.xlu2 %3117 }
 0x5d7   : > { %14843 = vst [vmem:[#allocation144_spill] sm:$0xff] %v9944_v9  ;;  %v9948_v52 = vpop.permute.xlu0 %3047 }
 0x5d8   : > { %14844 = vst [vmem:[#allocation130_spill] sm:$0xff] %v9946_v31  ;;  %v3056_v3 = vsel %vm617_vm7, %v9948_v52, %v9886_v42 }
 0x5d9   : > { %v3063_v38 = vmul.f32 %v3056_v3, %v14845_v13  ;;  %v3059_v3 = vmul.f32 %v3054_v20, %v14845_v13  ;;  %v14849_v20 = vld [vmem:[#allocation22_spill] sm:$0xff] }
 0x5da   : > { %v3023_v32 = vmul.f32 %v3016_v17, %v14849_v20  ;;  %v3017_v13 = vmul.f32 %v3013_v35, %v14849_v20  ;;  %v2973_v35 = vsel %vm585_vm9, %v9769_v10, %v9831_v21 }
 0x5db   : > { %4014 = vmatpush.msra.mxu2 %v3063_v38 }
 0x5dc   : > { %3291 = vrot.lane.b32.xlu1 %v9540_v30, %s14485_s25  ;;  %3293 = vrot.lane.b32.xlu2 %v9548_v50, %s14485_s25 }
 0x5dd   : > { %3289 = vrot.lane.b32.xlu0 %v9531_v51, %s14485_s25  ;;  %4015 = vmatpush.msra.mxu2 %v3061_v60  ;;  %v3015_v60 = vsel %vm601_vm8, %v9912_v37, %v9833_v36 }
 0x5de   : > { %v9979_v38 = vpop.permute.xlu1 %3079  ;;  %v9981_v63 = vpop.permute.xlu2 %3123  ;;  %v3021_v57 = vmul.f32 %v3015_v60, %v14849_v20 }
 0x5df   : > { %14846 = vst [vmem:[#allocation126_spill] sm:$0xff] %v9979_v38  ;;  %v9983_v8 = vpop.permute.xlu0 %3077  ;;  %4016 = vmatpush.msra.mxu2 %v3059_v3 }
 0x5e0   : > { %14847 = vst [vmem:[#allocation145_spill] sm:$0xff] %v9981_v63 }
 0x5e1   : > { %14848 = vst [vmem:[#allocation147_spill] sm:$0xff] %v9983_v8  ;;  %4017 = vmatpush.msra.mxu2 %v3057_v14  ;;  %v3019_v14 = vmul.f32 %v3014_v2, %v14849_v20  ;;  %v14853_v2 = vld [vmem:[#allocation24_spill] sm:$0xff] }
 0x5e2   : > { %v2977_v20 = vmul.f32 %v2973_v35, %v14853_v2  ;;  %v2933_v35 = vsel %vm569_vm10, %v9803_v22, %v9698_v41 }
 0x5e3   : > { %4018 = vmatpush.msra.mxu2 %v3023_v32  ;;  %v2976_v32 = vsel %vm585_vm9, %v9801_v1, %v9859_v49  ;;  %v2974_v49 = vsel %vm585_vm9, %v9876_v58, %v9734_v56 }
 0x5e4   : > { %3321 = vrot.lane.b32.xlu1 %v9493_v39, %s14493_s30  ;;  %3323 = vrot.lane.b32.xlu2 %v9500_v62, %s14493_s30  ;;  %v2983_v47 = vmul.f32 %v2976_v32, %v14853_v2 }
 0x5e5   : > { %3295 = vrot.lane.b32.xlu0 %v9556_v5, %s14485_s25  ;;  %4019 = vmatpush.msra.mxu2 %v3021_v57  ;;  %v2975_v57 = vsel %vm585_vm9, %v9872_v4, %v9863_v28  ;;  %v14876_v28 = vld [vmem:[#allocation12_spill] sm:$0xff] }
 0x5e6   : > { %v10011_v3 = vpop.permute.xlu1 %3085  ;;  %v10013_v17 = vpop.permute.xlu2 %3153  ;;  %v2981_v1 = vmul.f32 %v2975_v57, %v14853_v2 }
 0x5e7   : > { %14850 = vst [vmem:[#allocation120_spill] sm:$0xff] %v10011_v3  ;;  %v10015_v60 = vpop.permute.xlu0 %3083  ;;  %4020 = vmatpush.msra.mxu2 %v3019_v14 }
 0x5e8   : > { %14851 = vst [vmem:[#allocation122_spill] sm:$0xff] %v10013_v17 }
 0x5e9   : > { %14852 = vst [vmem:[#allocation141_spill] sm:$0xff] %v10015_v60  ;;  %4021 = vmatpush.msra.mxu2 %v3017_v13  ;;  %v2979_v13 = vmul.f32 %v2974_v49, %v14853_v2  ;;  %v14857_v49 = vld [vmem:[#allocation26_spill] sm:$0xff] }
 0x5eb   : > { %4022 = vmatpush.msra.mxu2 %v2983_v47  ;;  %v2936_v47 = vsel %vm569_vm10, %v9835_v61, %v9710_v19  ;;  %v2934_v19 = vsel %vm569_vm10, %v9799_v6, %v9771_v27 }
 0x5ec   : > { %3327 = vrot.lane.b32.xlu1 %v9510_v24, %s14493_s30  ;;  %3329 = vrot.lane.b32.xlu2 %v9531_v51, %s14493_s30  ;;  %v2943_v21 = vmul.f32 %v2936_v47, %v14857_v49 }
 0x5ed   : > { %3325 = vrot.lane.b32.xlu0 %v9504_v0, %s14493_s30  ;;  %4023 = vmatpush.msra.mxu2 %v2981_v1  ;;  %v2935_v1 = vsel %vm569_vm10, %v9722_v33, %v9767_v48 }
 0x5ee   : > { %v10043_v14 = vpop.permute.xlu1 %3115  ;;  %v10045_v32 = vpop.permute.xlu2 %3159  ;;  %v2941_v61 = vmul.f32 %v2935_v1, %v14857_v49  ;;  %v2937_v1 = vmul.f32 %v2933_v35, %v14857_v49 }
 0x5ef   : > { %14854 = vst [vmem:[#allocation124_spill] sm:$0xff] %v10043_v14  ;;  %v10047_v57 = vpop.permute.xlu0 %3113  ;;  %4024 = vmatpush.msra.mxu2 %v2979_v13 }
 0x5f0   : > { %14855 = vst [vmem:[#allocation121_spill] sm:$0xff] %v10045_v32 }
 0x5f1   : > { %14856 = vst [vmem:[#allocation123_spill] sm:$0xff] %v10047_v57  ;;  %4025 = vmatpush.msra.mxu2 %v2977_v20  ;;  %v2939_v20 = vmul.f32 %v2934_v19, %v14857_v49 }
 0x5f3   : > { %4026 = vmatpush.msra.mxu2 %v2943_v21 }
 0x5f4   : > { %3333 = vrot.lane.b32.xlu1 %v9548_v50, %s14493_s30  ;;  %3335 = vrot.lane.b32.xlu2 %v9556_v5, %s14493_s30 }
 0x5f5   : > { %3331 = vrot.lane.b32.xlu0 %v9540_v30, %s14493_s30  ;;  %4027 = vmatpush.msra.mxu2 %v2941_v61 }
 0x5f6   : > { %v10071_v21 = vpop.permute.xlu1 %3121  ;;  %v10073_v13 = vpop.permute.xlu2 %3165 }
 0x5f7   : > { %14858 = vst [vmem:[#allocation114_spill] sm:$0xff] %v10071_v21  ;;  %v10075_v47 = vpop.permute.xlu0 %3119  ;;  %4028 = vmatpush.msra.mxu2 %v2939_v20 }
 0x5f8   : > { %14859 = vst [vmem:[#allocation135_spill] sm:$0xff] %v10073_v13 }
 0x5f9   : > { %14860 = vst [vmem:[#allocation143_spill] sm:$0xff] %v10075_v47  ;;  %4029 = vmatpush.msra.mxu2 %v2937_v1 }
 0x5fc   : > { %3363 = vrot.lane.b32.xlu1 %v9500_v62, %s14521_s14  ;;  %3365 = vrot.lane.b32.xlu2 %v9504_v0, %s14521_s14 }
 0x5fd   : > { %3361 = vrot.lane.b32.xlu0 %v9493_v39, %s14521_s14 }
 0x5fe   : > { %v10084_v19 = vpop.permute.xlu1 %3127  ;;  %v10086_v61 = vpop.permute.xlu2 %3195 }
 0x5ff   : > { %14861 = vst [vmem:[#allocation117_spill] sm:$0xff] %v10084_v19  ;;  %v10088_v2 = vpop.permute.xlu0 %3125 }
 0x600   : > { %14862 = vst [vmem:[#allocation119_spill] sm:$0xff] %v10086_v61 }
 0x601   : > { %14863 = vst [vmem:[#allocation140_spill] sm:$0xff] %v10088_v2 }
 0x604   : > { %3369 = vrot.lane.b32.xlu1 %v9531_v51, %s14521_s14  ;;  %3371 = vrot.lane.b32.xlu2 %v9540_v30, %s14521_s14 }
 0x605   : > { %3367 = vrot.lane.b32.xlu0 %v9510_v24, %s14521_s14 }
 0x606   : > { %v10096_v35 = vpop.permute.xlu1 %3157  ;;  %v10098_v20 = vpop.permute.xlu2 %3201 }
 0x607   : > { %14864 = vst [vmem:[#allocation138_spill] sm:$0xff] %v10096_v35  ;;  %v10100_v1 = vpop.permute.xlu0 %3155 }
 0x608   : > { %14865 = vst [vmem:[#allocation118_spill] sm:$0xff] %v10098_v20 }
 0x609   : > { %14866 = vst [vmem:[#allocation108_spill] sm:$0xff] %v10100_v1 }
 0x60c   : > { %3375 = vrot.lane.b32.xlu1 %v9556_v5, %s14521_s14  ;;  %3401 = vrot.lane.b32.xlu2 %v9493_v39, %s14527_s23 }
 0x60d   : > { %3373 = vrot.lane.b32.xlu0 %v9548_v50, %s14521_s14 }
 0x60e   : > { %v10108_v49 = vpop.permute.xlu1 %3163  ;;  %v10110_v41 = vpop.permute.xlu2 %3207 }
 0x60f   : > { %14867 = vst [vmem:[#allocation139_spill] sm:$0xff] %v10108_v49  ;;  %v10112_v22 = vpop.permute.xlu0 %3161 }
 0x610   : > { %14868 = vst [vmem:[#allocation111_spill] sm:$0xff] %v10110_v41 }
 0x611   : > { %14869 = vst [vmem:[#allocation113_spill] sm:$0xff] %v10112_v22 }
 0x614   : > { %3405 = vrot.lane.b32.xlu1 %v9504_v0, %s14527_s23  ;;  %3407 = vrot.lane.b32.xlu2 %v9510_v24, %s14527_s23 }
 0x615   : > { %3403 = vrot.lane.b32.xlu0 %v9500_v62, %s14527_s23 }
 0x616   : > { %v10120_v27 = vpop.permute.xlu1 %3193  ;;  %v10122_v6 = vpop.permute.xlu2 %3245 }
 0x617   : > { %14870 = vst [vmem:[#allocation134_spill] sm:$0xff] %v10120_v27  ;;  %v10124_v48 = vpop.permute.xlu0 %3167  ;;  %v3213_v11 = vsel %vm681_vm3, %v10098_v20, %v10120_v27  ;;  %v14883_v27 = vld [vmem:[#allocation14_spill] sm:$0xff] }
 0x618   : > { %14871 = vst [vmem:[#allocation132_spill] sm:$0xff] %v10122_v6 }
 0x619   : > { %14872 = vst [vmem:[#allocation116_spill] sm:$0xff] %v10124_v48 }
 0x61c   : > { %3411 = vrot.lane.b32.xlu1 %v9540_v30, %s14527_s23  ;;  %3413 = vrot.lane.b32.xlu2 %v9548_v50, %s14527_s23 }
 0x61d   : > { %3409 = vrot.lane.b32.xlu0 %v9531_v51, %s14527_s23 }
 0x61e   : > { %v10132_v33 = vpop.permute.xlu1 %3199  ;;  %v10134_v10 = vpop.permute.xlu2 %3251 }
 0x61f   : > { %14873 = vst [vmem:[#allocation112_spill] sm:$0xff] %v10132_v33  ;;  %v3216_v56 = vsel %vm681_vm3, %v10110_v41, %v10132_v33  ;;  %v10140_v58 = vpop.permute.xlu0 %3197 }
 0x620   : > { %14874 = vst [vmem:[#allocation133_spill] sm:$0xff] %v10134_v10  ;;  %v3223_v4 = vmul.f32 %v3216_v56, %v14876_v28 }
 0x621   : > { %14875 = vst [vmem:[#allocation137_spill] sm:$0xff] %v10140_v58 }
 0x622   : > { %4043 = vmatpush.msrb.mxu1 %v3223_v4 }
 0x624   : > { %3441 = vrot.lane.b32.xlu1 %v9493_v39, %s14536_s22  ;;  %3443 = vrot.lane.b32.xlu2 %v9500_v62, %s14536_s22 }
 0x625   : > { %3415 = vrot.lane.b32.xlu0 %v9556_v5, %s14527_s23 }
 0x626   : > { %v10149_v40 = vpop.permute.xlu1 %3205  ;;  %v10151_v53 = vpop.permute.xlu2 %3281 }
 0x627   : > { %14877 = vst [vmem:[#allocation115_spill] sm:$0xff] %v10149_v40  ;;  %v3215_v33 = vsel %vm681_vm3, %v10149_v40, %v10140_v58  ;;  %v10157_v56 = vpop.permute.xlu0 %3203  ;;  %v3176_v58 = vsel %vm665_vm4, %v10124_v48, %v10045_v32 }
 0x628   : > { %14878 = vst [vmem:[#allocation105_spill] sm:$0xff] %v10151_v53  ;;  %v3214_v4 = vsel %vm681_vm3, %v10157_v56, %v10086_v61  ;;  %v3221_v41 = vmul.f32 %v3215_v33, %v14876_v28  ;;  %v3217_v33 = vmul.f32 %v3213_v11, %v14876_v28  ;;  %v3183_v20 = vmul.f32 %v3176_v58, %v14883_v27 }
 0x629   : > { %14879 = vst [vmem:[#allocation128_spill] sm:$0xff] %v10157_v56  ;;  %v3219_v36 = vmul.f32 %v3214_v4, %v14876_v28  ;;  %v3173_v28 = vsel %vm665_vm4, %v10112_v22, %v10013_v17  ;;  %v3136_v58 = vsel %vm14884_vm1, %v10084_v19, %v10075_v47  ;;  %v14889_v47 = vld [vmem:[#allocation16_spill] sm:$0xff]  ;;  %vm14893_vm1 = vmmov %vm14892_vm0  ;;  %v10349_v22 = vld [vmem:[%s14908_s4] sm:$0xff] }
 0x62a   : > { %4044 = vmatpush.msrb.mxu1 %v3221_v41  ;;  %v3175_v41 = vsel %vm665_vm4, %v10073_v13, %v10096_v35  ;;  %v3143_v19 = vmul.f32 %v3136_v58, %v14889_v47  ;;  %v3096_v58 = vsel %vm14892_vm0, %v9934_v43, %v9979_v38  ;;  %v14896_v38 = vld [vmem:[#allocation18_spill] sm:$0xff]  ;;  %4001 = vmatmul.f32.vlgmr.msra.gmra.mxu0 %v10349_v22  ;;  %v3723_v13 = vld [vmem:[%s14908_s4 + $0x10] sm:$0xff] }
 0x62b   : > { %v3181_v11 = vmul.f32 %v3175_v41, %v14883_v27  ;;  %v3103_v43 = vmul.f32 %v3096_v58, %v14896_v38 }
 0x62c   : > { %3447 = vrot.lane.b32.xlu1 %v9510_v24, %s14536_s22  ;;  %3449 = vrot.lane.b32.xlu2 %v9531_v51, %s14536_s22 }
 0x62d   : > { %3445 = vrot.lane.b32.xlu0 %v9504_v0, %s14536_s22  ;;  %4045 = vmatpush.msrb.mxu1 %v3219_v36  ;;  %v3174_v36 = vsel %vm665_vm4, %v10108_v49, %v10100_v1 }
 0x62e   : > { %v10184_v4 = vpop.permute.xlu1 %3243  ;;  %v10186_v32 = vpop.permute.xlu2 %3287  ;;  %v3179_v35 = vmul.f32 %v3174_v36, %v14883_v27 }
 0x62f   : > { %14880 = vst [vmem:[#allocation136_spill] sm:$0xff] %v10184_v4  ;;  %v10188_v48 = vpop.permute.xlu0 %3241  ;;  %4046 = vmatpush.msrb.mxu1 %v3217_v33  ;;  %v3135_v33 = vsel %vm14885_vm15, %v10088_v2, %v9946_v31  ;;  %vm14897_vm15 = vmmov %vm14892_vm0 }
 0x630   : > { %14881 = vst [vmem:[#allocation110_spill] sm:$0xff] %v10186_v32 }
 0x631   : > { %14882 = vst [vmem:[#allocation106_spill] sm:$0xff] %v10188_v48  ;;  %4047 = vmatpush.msrb.mxu1 %v3183_v20  ;;  %v3177_v20 = vmul.f32 %v3173_v28, %v14883_v27  ;;  %v3141_v28 = vmul.f32 %v3135_v33, %v14889_v47  ;;  %v3133_v27 = vsel %vm14891_vm5, %v10071_v21, %v10047_v57  ;;  %vm14906_vm5 = vcmp.lt.s32.totalorder %v7177_v34, 114  ;;  %v10328_v21 = vld [vmem:[%s14908_s4 + $0x8] sm:$0xff] }
 0x632   : > { %4030 = vmatmul.f32.vlgmr.msra.gmra.mxu2 %v10328_v21 }
 0x633   : > { %4048 = vmatpush.msrb.mxu1 %v3181_v11 }
 0x634   : > { %3453 = vrot.lane.b32.xlu1 %v9548_v50, %s14536_s22  ;;  %3455 = vrot.lane.b32.xlu2 %v9556_v5, %s14536_s22 }
 0x635   : > { %3451 = vrot.lane.b32.xlu0 %v9540_v30, %s14536_s22  ;;  %4049 = vmatpush.msrb.mxu1 %v3179_v35  ;;  %v3134_v35 = vsel %vm14890_vm6, %v9981_v63, %v10043_v14  ;;  %vm14898_vm6 = vmmov %vm14892_vm0 }
 0x636   : > { %v10216_v41 = vpop.permute.xlu1 %3249  ;;  %v10218_v36 = vpop.permute.xlu2 %3293  ;;  %v3139_v31 = vmul.f32 %v3134_v35, %v14889_v47  ;;  %vm14909_vm0 = vmmov %vm14906_vm5 }
 0x637   : > { %14886 = vst [vmem:[#allocation109_spill] sm:$0xff] %v10216_v41  ;;  %v10220_v11 = vpop.permute.xlu0 %3247  ;;  %4050 = vmatpush.msrb.mxu1 %v3177_v20  ;;  %v3095_v20 = vsel %vm14893_vm1, %v10011_v3, %v9983_v8  ;;  %v14907_v3 = vld [vmem:[#allocation6_spill] sm:$0xff]  ;;  %vm14910_vm1 = vmmov %vm14909_vm0 }
 0x638   : > { %14887 = vst [vmem:[#allocation80_spill] sm:$0xff] %v10218_v36 }
 0x639   : > { %14888 = vst [vmem:[#allocation102_spill] sm:$0xff] %v10220_v11  ;;  %4051 = vmatpush.msrb.mxu1 %v3143_v19  ;;  %v3137_v19 = vmul.f32 %v3133_v27, %v14889_v47  ;;  %v3101_v27 = vmul.f32 %v3095_v20, %v14896_v38  ;;  %v3093_v47 = vsel %vm14898_vm6, %v9922_v15, %v9944_v9  ;;  %vm14912_vm6 = vcmp.lt.s32.totalorder %v7177_v34, 126 }
 0x63b   : > { %4052 = vmatpush.msrb.mxu1 %v3141_v28 }
 0x63c   : > { %3483 = vrot.lane.b32.xlu1 %v9500_v62, %s14548_s20  ;;  %3485 = vrot.lane.b32.xlu2 %v9504_v0, %s14548_s20 }
 0x63d   : > { %3481 = vrot.lane.b32.xlu0 %v9493_v39, %s14548_s20  ;;  %4053 = vmatpush.msrb.mxu1 %v3139_v31  ;;  %v3094_v31 = vsel %vm14897_vm15, %v10015_v60, %v9910_v18  ;;  %vm14911_vm15 = vmmov %vm14909_vm0 }
 0x63e   : > { %v10248_v33 = vpop.permute.xlu1 %3255  ;;  %v10250_v35 = vpop.permute.xlu2 %3323  ;;  %v3099_v8 = vmul.f32 %v3094_v31, %v14896_v38 }
 0x63f   : > { %14894 = vst [vmem:[#allocation72_spill] sm:$0xff] %v10248_v33  ;;  %v10252_v28 = vpop.permute.xlu0 %3253  ;;  %4054 = vmatpush.msrb.mxu1 %v3137_v19 }
 0x640   : > { %14895 = vst [vmem:[#allocation107_spill] sm:$0xff] %v10252_v28 }
 0x641   : > { %4055 = vmatpush.msrb.mxu1 %v3103_v43  ;;  %v3097_v43 = vmul.f32 %v3093_v47, %v14896_v38 }
 0x643   : > { %4056 = vmatpush.msrb.mxu1 %v3101_v27 }
 0x644   : > { %3489 = vrot.lane.b32.xlu1 %v9531_v51, %s14548_s20  ;;  %3491 = vrot.lane.b32.xlu2 %v9540_v30, %s14548_s20 }
 0x645   : > { %3487 = vrot.lane.b32.xlu0 %v9510_v24, %s14548_s20  ;;  %4057 = vmatpush.msrb.mxu1 %v3099_v8 }
 0x646   : > { %v10272_v58 = vpop.permute.xlu1 %3285  ;;  %v10274_v19 = vpop.permute.xlu2 %3329 }
 0x647   : > { %14899 = vst [vmem:[#allocation61_spill] sm:$0xff] %v10272_v58  ;;  %v10276_v20 = vpop.permute.xlu0 %3283  ;;  %4058 = vmatpush.msrb.mxu1 %v3097_v43 }
 0x648   : > { %14900 = vst [vmem:[#allocation95_spill] sm:$0xff] %v10274_v19  ;;  %4059 = vmatmul.f32.vlgmr.msrb.gmra.mxu1 %v3723_v13 }
 0x649   : > { %14901 = vst [vmem:[#allocation89_spill] sm:$0xff] %v10276_v20 }
 0x64c   : > { %3495 = vrot.lane.b32.xlu1 %v9556_v5, %s14548_s20  ;;  %3521 = vrot.lane.b32.xlu2 %v9493_v39, %s14557_s19 }
 0x64d   : > { %3493 = vrot.lane.b32.xlu0 %v9548_v50, %s14548_s20 }
 0x64e   : > { %v10284_v31 = vpop.permute.xlu1 %3291  ;;  %v10286_v8 = vpop.permute.xlu2 %3335 }
 0x64f   : > { %14902 = vst [vmem:[#allocation149_spill] sm:$0xff] %v10284_v31  ;;  %v10288_v47 = vpop.permute.xlu0 %3289 }
 0x650   : > { %14903 = vst [vmem:[#allocation150_spill] sm:$0xff] %v10288_v47 }
 0x654   : > { %3525 = vrot.lane.b32.xlu1 %v9504_v0, %s14557_s19  ;;  %3527 = vrot.lane.b32.xlu2 %v9510_v24, %s14557_s19 }
 0x655   : > { %3523 = vrot.lane.b32.xlu0 %v9500_v62, %s14557_s19 }
 0x656   : > { %v10296_v27 = vpop.permute.xlu1 %3321  ;;  %v10298_v43 = vpop.permute.xlu2 %3365 }
 0x657   : > { %14904 = vst [vmem:[#allocation151_spill] sm:$0xff] %v10296_v27  ;;  %v10300_v38 = vpop.permute.xlu0 %3295  ;;  %v3337_v1 = vsel %vm14911_vm15, %v10296_v27, %v10274_v19  ;;  %vm14917_vm15 = vcmp.lt.s32.totalorder %v7177_v34, 127  ;;  %v14948_v27 = vld [vmem:[#allocation99_spill] sm:$0xff] }
 0x658   : > { %14905 = vst [vmem:[#allocation152_spill] sm:$0xff] %v10300_v38 }
 0x65c   : > { %3531 = vrot.lane.b32.xlu1 %v9540_v30, %s14557_s19  ;;  %3533 = vrot.lane.b32.xlu2 %v9548_v50, %s14557_s19 }
 0x65d   : > { %3529 = vrot.lane.b32.xlu0 %v9531_v51, %s14557_s19 }
 0x65e   : > { %v10308_v9 = vpop.permute.xlu1 %3327  ;;  %v10310_v15 = vpop.permute.xlu2 %3371 }
 0x65f   : > { %v3340_v18 = vsel %vm14906_vm5, %v10308_v9, %v10286_v8  ;;  %v10316_v60 = vpop.permute.xlu0 %3325  ;;  %vm14913_vm5 = vmmov %vm14912_vm6 }
 0x660   : > { %v3351_v57 = vmul.f32 %v3340_v18, %v14907_v3  ;;  %v3299_v61 = vsel %vm14913_vm5, %v10272_v58, %v10218_v36  ;;  %v10396_v58 = vld [vmem:[%s14908_s4 + $0x38] sm:$0xff] }
 0x661   : > { %4004 = vmatmul.f32.gmra.mxu0 %v10396_v58 }
 0x662   : > { %4072 = vmatpush.msrb.mxu3 %v3351_v57 }
 0x664   : > { %3561 = vrot.lane.b32.xlu1 %v9493_v39, %s14563_s18  ;;  %3563 = vrot.lane.b32.xlu2 %v9500_v62, %s14563_s18 }
 0x665   : > { %3535 = vrot.lane.b32.xlu0 %v9556_v5, %s14557_s19  ;;  %s15310_s19 = smov 98  }
 0x666   : > { %v10330_v14 = vpop.permute.xlu1 %3333  ;;  %v10332_v63 = vpop.permute.xlu2 %3401 }
 0x667   : > { %v3339_v18 = vsel %vm14909_vm0, %v10316_v60, %v10330_v14  ;;  %v10339_v57 = vpop.permute.xlu0 %3331  ;;  %vm14915_vm0 = vmmov %vm14913_vm5 }
 0x668   : > { %v3338_v2 = vsel %vm14910_vm1, %v10250_v35, %v10339_v57  ;;  %v3349_v17 = vmul.f32 %v3339_v18, %v14907_v3  ;;  %v3300_v18 = vsel %vm14912_vm6, %v10186_v32, %v10300_v38  ;;  %v3298_v38 = vsel %vm14915_vm0, %v10276_v20, %v10284_v31  ;;  %vm14916_vm1 = vmmov %vm14915_vm0  ;;  %v14945_v20 = vld [vmem:[#allocation54_spill] sm:$0xff]  ;;  %v14946_v32 = vld [vmem:[#allocation56_spill] sm:$0xff] }
 0x669   : > { %v3347_v49 = vmul.f32 %v3338_v2, %v14907_v3  ;;  %v10371_v2 = vld [vmem:[%s14908_s4 + $0x40] sm:$0xff]  ;;  %v3297_v13 = vsel %vm14916_vm1, %v10151_v53, %v10288_v47  ;;  %vm14918_vm6 = vmmov %vm14917_vm15  ;;  %v2770_v19 = vsel %vm505_vm14, %v14946_v32, %v14945_v20  ;;  %vm14949_vm1 = vcmp.lt.s32.totalorder %v7177_v34, 110 }
 0x66a   : > { %4073 = vmatpush.msrb.mxu3 %v3349_v17  ;;  %v3345_v17 = vmul.f32 %v3337_v1, %v14907_v3  ;;  %4033 = vmatmul.f32.gmra.mxu2 %v10371_v2  ;;  %v14914_v1 = vld [vmem:[#allocation8_spill] sm:$0xff]  ;;  %vm14920_vm5 = vmmov %vm14918_vm6  ;;  %v14937_v53 = vld [vmem:[#allocation65_spill] sm:$0xff] }
 0x66b   : > { %v3311_v3 = vmul.f32 %v3300_v18, %v14914_v1  ;;  %v3309_v36 = vmul.f32 %v3299_v61, %v14914_v1  ;;  %v3307_v18 = vmul.f32 %v3298_v38, %v14914_v1  ;;  %v3305_v61 = vmul.f32 %v3297_v13, %v14914_v1  ;;  %v10418_v38 = vld [vmem:[%s14908_s4 + $0x78] sm:$0xff]  ;;  %vm14921_vm0 = vmmov %vm14920_vm5 }
 0x66c   : > { %3567 = vrot.lane.b32.xlu1 %v9510_v24, %s14563_s18  ;;  %3569 = vrot.lane.b32.xlu2 %v9531_v51, %s14563_s18  ;;  %v3258_v47 = vsel %vm14920_vm5, %v10184_v4, %v10134_v10  ;;  %v14929_v4 = vld [vmem:[#allocation57_spill] sm:$0xff]  ;;  %vm14954_vm5 = vmmov %vm14949_vm1 }
 0x66d   : > { %3565 = vrot.lane.b32.xlu0 %v9504_v0, %s14563_s18  ;;  %4074 = vmatpush.msrb.mxu3 %v3347_v49 }
 0x66e   : > { %v10380_v56 = vpop.permute.xlu1 %3363  ;;  %v10382_v40 = vpop.permute.xlu2 %3407 }
 0x66f   : > { %v10385_v49 = vpop.permute.xlu0 %3361  ;;  %4075 = vmatpush.msrb.mxu3 %v3345_v17  ;;  %v3259_v17 = vsel %vm14918_vm6, %v10122_v6, %v10252_v28  ;;  %v10443_v6 = vld [vmem:[%s14908_s4 + $0x70] sm:$0xff]  ;;  %vm14953_vm6 = vmmov %vm14949_vm1 }
 0x670   : > { %4007 = vmatmul.f32.gmra.mxu0 %v10443_v6 }
 0x671   : > { %4076 = vmatpush.msrb.mxu3 %v3311_v3  ;;  %v3260_v3 = vsel %vm14917_vm15, %v10220_v11, %v10248_v33  ;;  %vm14950_vm15 = vmmov %vm14949_vm1 }
 0x672   : > { %4036 = vmatmul.f32.gmra.mxu2 %v10418_v38 }
 0x673   : > { %4077 = vmatpush.msrb.mxu3 %v3309_v36  ;;  %v3730_v36 = vld [vmem:[%s14908_s4 + $0x48] sm:$0xff] }
 0x674   : > { %3573 = vrot.lane.b32.xlu1 %v9548_v50, %s14563_s18  ;;  %3575 = vrot.lane.b32.xlu2 %v9556_v5, %s14563_s18 }
 0x675   : > { %3571 = vrot.lane.b32.xlu0 %v9540_v30, %s14563_s18  ;;  %4078 = vmatpush.msrb.mxu3 %v3307_v18  ;;  %v14919_v18 = vld [vmem:[#allocation10_spill] sm:$0xff] }
 0x676   : > { %v10427_v33 = vpop.permute.xlu1 %3369  ;;  %v10429_v11 = vpop.permute.xlu2 %3413  ;;  %4062 = vmatmul.f32.gmra.mxu1 %v3730_v36  ;;  %v3271_v1 = vmul.f32 %v3260_v3, %v14919_v18  ;;  %v3269_v28 = vmul.f32 %v3259_v17, %v14919_v18  ;;  %v3267_v3 = vmul.f32 %v3258_v47, %v14919_v18  ;;  %v3737_v36 = vld [vmem:[%s14908_s4 + $0x80] sm:$0xff] }
 0x677   : > { %v10432_v13 = vpop.permute.xlu0 %3367  ;;  %4079 = vmatpush.msrb.mxu3 %v3305_v61  ;;  %v3257_v61 = vsel %vm14921_vm0, %v10188_v48, %v10216_v41  ;;  %v2890_v48 = vsel %vm553_vm11, %v9708_v29, %v9686_v45  ;;  %vm14955_vm0 = vmmov %vm14949_vm1 }
 0x679   : > { %4080 = vmatpush.msrb.mxu3 %v3271_v1  ;;  %v3265_v1 = vmul.f32 %v3257_v61, %v14919_v18  ;;  %v2892_v61 = vsel %vm553_vm11, %v9724_v26, %v9732_v25  ;;  %v2891_v25 = vsel %vm553_vm11, %v9674_v7, %v9740_v54  ;;  %v2889_v54 = vsel %vm553_vm11, %v9712_v55, %v9720_v44  ;;  %v14923_v44 = vld [vmem:[#allocation31_spill] sm:$0xff] }
 0x67b   : > { %4081 = vmatpush.msrb.mxu3 %v3269_v28 }
 0x67c   : > { %3603 = vrot.lane.b32.xlu1 %v9500_v62, %s14579_s0  ;;  %3605 = vrot.lane.b32.xlu2 %v9504_v0, %s14579_s0 }
 0x67d   : > { %3601 = vrot.lane.b32.xlu0 %v9493_v39, %s14579_s0  ;;  %4082 = vmatpush.msrb.mxu3 %v3267_v3  ;;  %v3724_v3 = vld [vmem:[%s14908_s4 + $0x18] sm:$0xff] }
 0x67e   : > { %v10461_v17 = vpop.permute.xlu1 %3375  ;;  %v10463_v28 = vpop.permute.xlu2 %3443  ;;  %4065 = vmatmul.f32.gmra.mxu1 %v3737_v36  ;;  %v14922_v36 = vld [vmem:[#allocation29_spill] sm:$0xff] }
 0x67f   : > { %v10465_v47 = vpop.permute.xlu0 %3373  ;;  %4083 = vmatpush.msrb.mxu3 %v3265_v1  ;;  %v2904_v18 = vmul.f32 %v2892_v61, %v14922_v36  ;;  %v2902_v10 = vmul.f32 %v2891_v25, %v14922_v36  ;;  %v2900_v7 = vmul.f32 %v2890_v48, %v14922_v36  ;;  %v2852_v61 = vsel %vm537_vm12, %v9648_v46, %v9662_v12 }
 0x680   : > { %v2898_v45 = vmul.f32 %v2889_v54, %v14922_v36  ;;  %v2851_v46 = vsel %vm537_vm12, %v9652_v16, %v9684_v59  ;;  %v2864_v48 = vmul.f32 %v2852_v61, %v14923_v44  ;;  %v14927_v16 = vld [vmem:[#allocation70_spill] sm:$0xff]  ;;  %v14928_v36 = vld [vmem:[#allocation103_spill] sm:$0xff] }
 0x681   : > { %4084 = vmatpush.msrb.mxu3 %v9510_v24  ;;  %v2862_v54 = vmul.f32 %v2851_v46, %v14923_v44  ;;  %v2812_v61 = vsel %vm521_vm13, %v14929_v4, %v14928_v36  ;;  %v10554_v46 = vld [vmem:[%s14908_s4 + $0x88] sm:$0xff]  ;;  %v10559_v4 = vld [vmem:[%s14908_s4 + $0xb0] sm:$0xff]  ;;  %v14931_v36 = vld [vmem:[#allocation101_spill] sm:$0xff] }
 0x682   : > { %4039 = vmatmul.f32.gmra.mxu2 %v10559_v4 }
 0x683   : > { %4085 = vmatpush.msrb.mxu3 %v9504_v0 }
 0x684   : > { %3609 = vrot.lane.b32.xlu1 %v9531_v51, %s14579_s0  ;;  %3611 = vrot.lane.b32.xlu2 %v9540_v30, %s14579_s0 }
 0x685   : > { %3607 = vrot.lane.b32.xlu0 %v9510_v24, %s14579_s0  ;;  %4086 = vmatpush.msrb.mxu3 %v9500_v62 }
 0x686   : > { %v10487_v26 = vpop.permute.xlu1 %3405  ;;  %v10489_v1 = vpop.permute.xlu2 %3449 }
 0x687   : > { %v10492_v41 = vpop.permute.xlu0 %3403  ;;  %4087 = vmatpush.msrb.mxu3 %v9493_v39 }
 0x688   : > { %4088 = vmatmul.f32.vlgmr.msrb.gmra.mxu3 %v3724_v3  ;;  %v14925_v3 = vld [vmem:[#allocation90_spill] sm:$0xff] }
 0x689   : > { %4188 = vmatpush.msra.mxu3 %v2904_v18  ;;  %v14924_v18 = vld [vmem:[#allocation81_spill] sm:$0xff] }
 0x68a   : > { %v2850_v25 = vsel %vm537_vm12, %v14925_v3, %v14924_v18  ;;  %14930 = vst [vmem:[#allocation81_spill] sm:$0xff] %v10554_v46 }
 0x68b   : > { %4189 = vmatpush.msra.mxu3 %v2902_v10  ;;  %v3731_v10 = vld [vmem:[%s14908_s4 + $0x50] sm:$0xff] }
 0x68c   : > { %3615 = vrot.lane.b32.xlu1 %v9556_v5, %s14579_s0  ;;  %3641 = vrot.lane.b32.xlu2 %v9493_v39, %s14582_s1 }
 0x68d   : > { %4190 = vmatpush.msra.mxu3 %v2900_v7  ;;  %3613 = vrot.lane.b32.xlu0 %v9548_v50, %s14579_s0  ;;  %v14926_v7 = vld [vmem:[#allocation75_spill] sm:$0xff] }
 0x68e   : > { %v10523_v12 = vpop.permute.xlu1 %3411  ;;  %v10525_v29 = vpop.permute.xlu2 %3455  ;;  %v2849_v59 = vsel %vm537_vm12, %v14927_v16, %v14926_v7  ;;  %v14933_v7 = vld [vmem:[#allocation33_spill] sm:$0xff] }
 0x68f   : > { %4191 = vmatpush.msra.mxu3 %v2898_v45  ;;  %v10527_v55 = vpop.permute.xlu0 %3409  ;;  %v2860_v45 = vmul.f32 %v2850_v25, %v14923_v44  ;;  %v2824_v16 = vmul.f32 %v2812_v61, %v14933_v7 }
 0x690   : > { %4091 = vmatmul.f32.gmra.mxu3 %v3731_v10  ;;  %v2858_v10 = vmul.f32 %v2849_v59, %v14923_v44  ;;  %v14934_v59 = vld [vmem:[#allocation88_spill] sm:$0xff] }
 0x691   : > { %4192 = vmatpush.msra.mxu3 %v2864_v48  ;;  %v14932_v48 = vld [vmem:[#allocation83_spill] sm:$0xff] }
 0x692   : > { %v2811_v18 = vsel %vm521_vm13, %v14932_v48, %v14931_v36  ;;  %v10581_v36 = vld [vmem:[%s14908_s4 + $0xa8] sm:$0xff] }
 0x693   : > { %4193 = vmatpush.msra.mxu3 %v2862_v54  ;;  %v2822_v48 = vmul.f32 %v2811_v18, %v14933_v7  ;;  %4010 = vmatmul.f32.gmra.mxu0 %v10581_v36  ;;  %v14942_v18 = vld [vmem:[#allocation69_spill] sm:$0xff] }
 0x694   : > { %3645 = vrot.lane.b32.xlu1 %v9504_v0, %s14582_s1  ;;  %3647 = vrot.lane.b32.xlu2 %v9510_v24, %s14582_s1 }
 0x695   : > { %4194 = vmatpush.msra.mxu3 %v2860_v45  ;;  %3643 = vrot.lane.b32.xlu0 %v9500_v62, %s14582_s1  ;;  %v14935_v45 = vld [vmem:[#allocation64_spill] sm:$0xff] }
 0x696   : > { %v10565_v3 = vpop.permute.xlu1 %3441  ;;  %v10567_v25 = vpop.permute.xlu2 %3485  ;;  %v2810_v44 = vsel %vm521_vm13, %v14935_v45, %v14934_v59  ;;  %v14938_v45 = vld [vmem:[#allocation63_spill] sm:$0xff] }
 0x697   : > { %4195 = vmatpush.msra.mxu3 %v2858_v10  ;;  %v10570_v54 = vpop.permute.xlu0 %3415  ;;  %v14936_v10 = vld [vmem:[#allocation93_spill] sm:$0xff]  ;;  %v2820_v59 = vmul.f32 %v2810_v44, %v14933_v7 }
 0x698   : > { %4094 = vmatmul.f32.gmra.mxu3 %v10554_v46  ;;  %v2809_v61 = vsel %vm521_vm13, %v14937_v53, %v14936_v10  ;;  %v14939_v46 = vld [vmem:[#allocation82_spill] sm:$0xff] }
 0x699   : > { %4196 = vmatpush.msra.mxu3 %v2824_v16  ;;  %v2772_v31 = vsel %vm505_vm14, %v14939_v46, %v14938_v45  ;;  %v2818_v53 = vmul.f32 %v2809_v61, %v14933_v7  ;;  %v10604_v44 = vld [vmem:[%s14908_s4 + $0xc0] sm:$0xff]  ;;  %v10609_v46 = vld [vmem:[%s14908_s4 + $0xb8] sm:$0xff]  ;;  %v14944_v45 = vld [vmem:[#allocation35_spill] sm:$0xff] }
 0x69a   : > { %14940 = vst [vmem:[#allocation90_spill] sm:$0xff] %v10604_v44  ;;  %v14943_v16 = vld [vmem:[#allocation76_spill] sm:$0xff]  ;;  %4068 = vmatmul.f32.gmra.mxu1 %v10609_v46  ;;  %v2784_v7 = vmul.f32 %v2772_v31, %v14944_v45 }
 0x69b   : > { %4197 = vmatpush.msra.mxu3 %v2822_v48  ;;  %14941 = vst [vmem:[#allocation75_spill] sm:$0xff] %v10609_v46  ;;  %v2771_v48 = vsel %vm505_vm14, %v14943_v16, %v14942_v18  ;;  %v14947_v16 = vld [vmem:[#allocation100_spill] sm:$0xff] }
 0x69c   : > { %3651 = vrot.lane.b32.xlu1 %v9540_v30, %s14582_s1  ;;  %3653 = vrot.lane.b32.xlu2 %v9548_v50, %s14582_s1  ;;  %v2782_v18 = vmul.f32 %v2771_v48, %v14944_v45  ;;  %v2769_v46 = vsel %vm505_vm14, %v14948_v27, %v14947_v16 }
 0x69d   : > { %4198 = vmatpush.msra.mxu3 %v2820_v59  ;;  %3649 = vrot.lane.b32.xlu0 %v9531_v51, %s14582_s1  ;;  %v2778_v32 = vmul.f32 %v2769_v46, %v14944_v45  ;;  %v3949_v46 = vld [vmem:[%s13772_s9] sm:$0xff] }
 0x69e   : > { %v10615_v10 = vpop.permute.xlu1 %3447  ;;  %v3492_v59 = vpop.permute.xlu2 %3491 }
 0x69f   : > { %4199 = vmatpush.msra.mxu3 %v2818_v53  ;;  %v10618_v61 = vpop.permute.xlu0 %3445  ;;  %v2780_v53 = vmul.f32 %v2770_v19, %v14944_v45 }
 0x6a0   : > { %4097 = vmatmul.f32.gmra.mxu3 %v10604_v44  ;;  %v14952_v44 = vld [vmem:[#allocation47_spill] sm:$0xff] }
 0x6a1   : > { %4200 = vmatpush.msra.mxu3 %v2784_v7 }
 0x6a3   : > { %4201 = vmatpush.msra.mxu3 %v2782_v18 }
 0x6a4   : > { %3681 = vrot.lane.b32.xlu1 %v9493_v39, %s14603_s17  ;;  %3683 = vrot.lane.b32.xlu2 %v9500_v62, %s14603_s17 }
 0x6a5   : > { %4202 = vmatpush.msra.mxu3 %v2780_v53  ;;  %3655 = vrot.lane.b32.xlu0 %v9556_v5, %s14582_s1 }
 0x6a6   : > { %v3454_v20 = vpop.permute.xlu1 %3453  ;;  %v10639_v31 = vpop.permute.xlu2 %3521 }
 0x6a7   : > { %4203 = vmatpush.msra.mxu3 %v2778_v32  ;;  %v10641_v27 = vpop.permute.xlu0 %3451  ;;  %v14951_v32 = vld [vmem:[#allocation46_spill] sm:$0xff] }
 0x6a8   : > { %4204 = vmatmul.f32.vlgmr.msra.gmra.mxu3 %v10349_v22 }
 0x6ac   : > { %3687 = vrot.lane.b32.xlu1 %v9510_v24, %s14603_s17  ;;  %3689 = vrot.lane.b32.xlu2 %v9531_v51, %s14603_s17 }
 0x6ad   : > { %3685 = vrot.lane.b32.xlu0 %v9504_v0, %s14603_s17  ;;  %v3950_v0 = vld [vmem:[%s13772_s9 + $0x8] sm:$0xff] }
 0x6ae   : > { %v3484_v39 = vpop.permute.xlu1 %3483  ;;  %v10650_v62 = vpop.permute.xlu2 %3527 }
 0x6af   : > { %v3482_v19 = vpop.permute.xlu0 %3481 }
 0x6b0   : > { %4207 = vmatmul.f32.gmra.mxu3 %v10396_v58  ;;  %v3951_v58 = vld [vmem:[%s13772_s9 + $0x10] sm:$0xff] }
 0x6b4   : > { %3693 = vrot.lane.b32.xlu1 %v9548_v50, %s14603_s17  ;;  %3695 = vrot.lane.b32.xlu2 %v9556_v5, %s14603_s17 }
 0x6b5   : > { %3691 = vrot.lane.b32.xlu0 %v9540_v30, %s14603_s17 }
 0x6b6   : > { %v3490_v24 = vpop.permute.xlu1 %3489  ;;  %v10659_v22 = vpop.permute.xlu2 %3533 }
 0x6b7   : > { %v3488_v7 = vpop.permute.xlu0 %3487 }
 0x6b8   : > { %4210 = vmatmul.f32.gmra.mxu3 %v10443_v6 }
 0x6bc   : > { %3960 = vperm.xlu1 %6892, %v3950_v0   ;;  %3965 = vperm.xlu2 %6893, %v3951_v58  }
 0x6bd   : > { %3955 = vperm.xlu0 %6891, %v3949_v46   ;;  %v3498_v46 = vsel %vm14955_vm0, %v3484_v39, %v3492_v59 }
 0x6be   : > { %v3496_v48 = vpop.permute.xlu1 %3495  ;;  %v10671_v18 = vpop.permute.xlu2 %3563 }
 0x6bf   : > { %v3500_v6 = vsel %vm14949_vm1, %v3488_v7, %v3496_v48  ;;  %v3504_v16 = vsel %vm14950_vm15, %v3496_v48, %v3488_v7  ;;  %v3494_v53 = vpop.permute.xlu0 %3493  ;;  %vm14956_vm1 = vmmov %vm14955_vm0  ;;  %v3952_v48 = vld [vmem:[%s13772_s9 + $0x18] sm:$0xff] }
 0x6c0   : > { %v3511_v45 = vmul.f32 %v3500_v6, %v14951_v32  ;;  %v3512_v51 = vmul.f32 %v3504_v16, %v14952_v44  ;;  %v3499_v0 = vsel %vm14953_vm6, %v10567_v25, %v3494_v53  ;;  %v3503_v58 = vsel %vm14954_vm5, %v3494_v53, %v10567_v25  ;;  %4213 = vmatmul.f32.gmra.mxu3 %v10581_v36  ;;  %vm14957_vm15 = vmmov %vm14955_vm0 }
 0x6c1   : > { %v3502_v7 = vsel %vm14956_vm1, %v3492_v59, %v3484_v39  ;;  %v3509_v6 = vmul.f32 %v3499_v0, %v14951_v32  ;;  %v3510_v16 = vmul.f32 %v3503_v58, %v14952_v44  ;;  %v3497_v25 = vsel %vm14957_vm15, %v3482_v19, %v3490_v24  ;;  %vm14958_vm6 = vmmov %vm14955_vm0 }
 0x6c2   : > { %4101 = vmatpush.msrb.mxu0 %v3511_v45  ;;  %4304 = vmatpush.msrb.mxu3 %v3512_v51  ;;  %v3501_v36 = vsel %vm14958_vm6, %v3490_v24, %v3482_v19  ;;  %v3507_v59 = vmul.f32 %v3498_v46, %v14951_v32  ;;  %v3508_v51 = vmul.f32 %v3502_v7, %v14952_v44  ;;  %vm14959_vm5 = vcmp.lt.s32.totalorder %v7177_v34, 111 }
 0x6c3   : > { %v3460_v45 = vsel %vm14959_vm5, %v10615_v10, %v10525_v29  ;;  %vm14960_vm0 = vmmov %vm14959_vm5  ;;  %v3505_v24 = vmul.f32 %v3497_v25, %v14951_v32  ;;  %v3506_v0 = vmul.f32 %v3501_v36, %v14952_v44 }
 0x6c4   : > { %4102 = vmatpush.msrb.mxu0 %v3509_v6  ;;  %4305 = vmatpush.msrb.mxu3 %v3510_v16  ;;  %v3464_v39 = vsel %vm14960_vm0, %v10525_v29, %v10615_v10  ;;  %vm14961_vm1 = vmmov %vm14960_vm0  ;;  %v14963_v10 = vld [vmem:[#allocation48_spill] sm:$0xff]  ;;  %v3457_v36 = vsel %vm14960_vm0, %v10565_v3, %v10489_v1 }
 0x6c5   : > { %3970 = vperm.xlu0 %6891, %v3952_v48   ;;  %v3459_v58 = vsel %vm14961_vm1, %v10618_v61, %v3454_v20  ;;  %vm14962_vm15 = vmmov %vm14960_vm0  ;;  %v3471_v7 = vmul.f32 %v3460_v45, %v14963_v10  ;;  %v14964_v48 = vld [vmem:[#allocation49_spill] sm:$0xff] }
 0x6c6   : > { %v10709_v53 = vpop.permute.xlu1 %3525  ;;  %4103 = vmatpush.msrb.mxu0 %v3507_v59  ;;  %4306 = vmatpush.msrb.mxu3 %v3508_v51  ;;  %v10711_v19 = vpop.permute.xlu2 %3569  ;;  %v3463_v46 = vsel %vm14962_vm15, %v3454_v20, %v10618_v61  ;;  %v3472_v6 = vmul.f32 %v3464_v39, %v14964_v48  ;;  %vm14965_vm6 = vmmov %vm14960_vm0  ;;  %v3469_v61 = vmul.f32 %v3459_v58, %v14963_v10  ;;  %vm14968_vm15 = vcmp.lt.s32.totalorder %v7177_v34, 112  ;;  %v14972_v58 = vld [vmem:[#allocation50_spill] sm:$0xff] }
 0x6c7   : > { %v10721_v29 = vpop.permute.xlu0 %3523  ;;  %v3458_v16 = vsel %vm14965_vm6, %v10463_v28, %v10641_v27  ;;  %vm14966_vm5 = vmmov %vm14960_vm0  ;;  %v3470_v20 = vmul.f32 %v3463_v46, %v14964_v48  ;;  %v3420_v51 = vsel %vm14968_vm15, %v10382_v40, %v10570_v54 }
 0x6c8   : > { %4104 = vmatpush.msrb.mxu0 %v3505_v24  ;;  %4307 = vmatpush.msrb.mxu3 %v3506_v0  ;;  %v3462_v25 = vsel %vm14966_vm5, %v10641_v27, %v10463_v28  ;;  %vm14967_vm1 = vmmov %vm14960_vm0  ;;  %v3467_v28 = vmul.f32 %v3458_v16, %v14963_v10  ;;  %v3431_v46 = vmul.f32 %v3420_v51, %v14972_v58 }
 0x6c9   : > { %v3461_v59 = vsel %vm14967_vm1, %v10489_v1, %v10565_v3  ;;  %v3468_v27 = vmul.f32 %v3462_v25, %v14964_v48  ;;  %vm14969_vm6 = vmmov %vm14968_vm15  ;;  %v3465_v3 = vmul.f32 %v3457_v36, %v14963_v10  ;;  %v15208_v10 = vld [vmem:[#allocation20_spill] sm:$0xff] }
 0x6ca   : > { %4105 = vmatpush.msrb.mxu0 %v3471_v7  ;;  %4308 = vmatpush.msrb.mxu3 %v3472_v6  ;;  %v3424_v45 = vsel %vm14969_vm6, %v10570_v54, %v10382_v40  ;;  %v3466_v24 = vmul.f32 %v3461_v59, %v14964_v48  ;;  %vm14970_vm5 = vmmov %vm14969_vm6  ;;  %v14973_v7 = vld [vmem:[#allocation51_spill] sm:$0xff] }
 0x6cb   : > { %v3419_v0 = vsel %vm14970_vm5, %v10487_v26, %v10429_v11  ;;  %vm14971_vm0 = vmmov %vm14970_vm5  ;;  %v3432_v6 = vmul.f32 %v3424_v45, %v14973_v7 }
 0x6cc   : > { %4106 = vmatpush.msrb.mxu0 %v3469_v61  ;;  %4309 = vmatpush.msrb.mxu3 %v3470_v20  ;;  %v3423_v40 = vsel %vm14971_vm0, %v10429_v11, %v10487_v26  ;;  %vm14974_vm1 = vmmov %vm14971_vm0  ;;  %v3429_v11 = vmul.f32 %v3419_v0, %v14972_v58 }
 0x6cd   : > { %v3418_v16 = vsel %vm14974_vm1, %v10492_v41, %v10523_v12  ;;  %vm14975_vm15 = vmmov %vm14971_vm0  ;;  %v3430_v26 = vmul.f32 %v3423_v40, %v14973_v7 }
 0x6ce   : > { %v10753_v39 = vpop.permute.xlu1 %3531  ;;  %4107 = vmatpush.msrb.mxu0 %v3467_v28  ;;  %4310 = vmatpush.msrb.mxu3 %v3468_v27  ;;  %v10755_v1 = vpop.permute.xlu2 %3575  ;;  %v3422_v25 = vsel %vm14975_vm15, %v10523_v12, %v10492_v41  ;;  %vm14976_vm6 = vmmov %vm14971_vm0  ;;  %v3427_v41 = vmul.f32 %v3418_v16, %v14972_v58 }
 0x6cf   : > { %v10767_v54 = vpop.permute.xlu0 %3529  ;;  %v3417_v61 = vsel %vm14976_vm6, %v10332_v63, %v10527_v55  ;;  %vm14977_vm5 = vmmov %vm14971_vm0  ;;  %v3428_v12 = vmul.f32 %v3422_v25, %v14973_v7  ;;  %vm14978_vm0 = vcmp.lt.s32.totalorder %v7177_v34, 113  ;;  %v3052_v25 = vsel %vm617_vm7, %v9886_v42, %v9948_v52  ;;  %v14988_v52 = vld [vmem:[#allocation21_spill] sm:$0xff] }
 0x6d0   : > { %4108 = vmatpush.msrb.mxu0 %v3465_v3  ;;  %4311 = vmatpush.msrb.mxu3 %v3466_v24  ;;  %v3421_v20 = vsel %vm14977_vm5, %v10527_v55, %v10332_v63  ;;  %v3380_v36 = vsel %vm14978_vm0, %v10432_v13, %v10461_v17  ;;  %vm14979_vm1 = vmmov %vm14978_vm0  ;;  %v3425_v63 = vmul.f32 %v3417_v61, %v14972_v58  ;;  %v14983_v24 = vld [vmem:[#allocation53_spill] sm:$0xff] }
 0x6d1   : > { %v3384_v59 = vsel %vm14979_vm1, %v10461_v17, %v10432_v13  ;;  %v3426_v55 = vmul.f32 %v3421_v20, %v14973_v7  ;;  %vm14980_vm15 = vmmov %vm14978_vm0  ;;  %v14982_v17 = vld [vmem:[#allocation52_spill] sm:$0xff]  ;;  %v3064_v42 = vmul.f32 %v3052_v25, %v14988_v52  ;;  %v14996_v25 = vld [vmem:[#allocation23_spill] sm:$0xff] }
 0x6d2   : > { %4109 = vmatpush.msrb.mxu0 %v3431_v46  ;;  %4312 = vmatpush.msrb.mxu3 %v3432_v6  ;;  %v3379_v27 = vsel %vm14980_vm15, %v10298_v43, %v10465_v47  ;;  %vm14981_vm6 = vmmov %vm14978_vm0  ;;  %v3391_v3 = vmul.f32 %v3380_v36, %v14982_v17  ;;  %v3392_v0 = vmul.f32 %v3384_v59, %v14983_v24  ;;  %v14990_v36 = vld [vmem:[#allocation148_spill] sm:$0xff] }
 0x6d3   : > { %v3383_v51 = vsel %vm14981_vm6, %v10465_v47, %v10298_v43  ;;  %vm14984_vm5 = vmmov %vm14978_vm0  ;;  %v3382_v43 = vsel %vm14978_vm0, %v10310_v15, %v10380_v56  ;;  %v3389_v47 = vmul.f32 %v3379_v27, %v14982_v17  ;;  %v14991_v27 = vld [vmem:[#allocation146_spill] sm:$0xff]  ;;  %vm15019_vm6 = vcmp.lt.s32.totalorder %v7177_v34, 95  ;;  %v15181_v7 = vld [vmem:[#allocation32_spill] sm:$0xff] }
 0x6d4   : > { %4110 = vmatpush.msrb.mxu0 %v3429_v11  ;;  %4313 = vmatpush.msrb.mxu3 %v3430_v26  ;;  %v3378_v40 = vsel %vm14984_vm5, %v10380_v56, %v10310_v15  ;;  %v3390_v46 = vmul.f32 %v3383_v51, %v14983_v24  ;;  %vm14985_vm1 = vmmov %vm14978_vm0  ;;  %v3388_v56 = vmul.f32 %v3382_v43, %v14983_v24 }
 0x6d5   : > { %v3377_v6 = vsel %vm14985_vm1, %v10385_v49, %v10427_v33  ;;  %vm14986_vm15 = vmmov %vm14978_vm0  ;;  %v3387_v15 = vmul.f32 %v3378_v40, %v14982_v17  ;;  %v14994_v40 = vld [vmem:[#allocation60_spill] sm:$0xff] }
 0x6d6   : > { %v10799_v28 = vpop.permute.xlu1 %3561  ;;  %4111 = vmatpush.msrb.mxu0 %v3427_v41  ;;  %4314 = vmatpush.msrb.mxu3 %v3428_v12  ;;  %v10813_v13 = vpop.permute.xlu2 %3605  ;;  %v3381_v16 = vsel %vm14986_vm15, %v10427_v33, %v10385_v49  ;;  %v3385_v26 = vmul.f32 %v3377_v6, %v14982_v17  ;;  %v3725_v33 = vld [vmem:[%s14908_s4 + $0x20] sm:$0xff]  ;;  %v3732_v6 = vld [vmem:[%s14908_s4 + $0x58] sm:$0xff]  ;;  %vm15020_vm5 = vmmov %vm15019_vm6 }
 0x6d7   : > { %v10811_v45 = vpop.permute.xlu0 %3535  ;;  %v3386_v61 = vmul.f32 %v3381_v16, %v14983_v24  ;;  %v14987_v49 = vld [vmem:[#allocation129_spill] sm:$0xff]  ;;  %vm15021_vm0 = vmmov %vm15020_vm5  ;;  %v15177_v17 = vld [vmem:[#allocation30_spill] sm:$0xff] }
 0x6d8   : > { %4112 = vmatpush.msrb.mxu0 %v3425_v63  ;;  %4315 = vmatpush.msrb.mxu3 %v3426_v55  ;;  %v3051_v20 = vsel %vm617_vm7, %v14987_v49, %v9898_v23  ;;  %v14989_v12 = vld [vmem:[#allocation125_spill] sm:$0xff]  ;;  %vm15022_vm1 = vmmov %vm15021_vm0 }
 0x6d9   : > { %v3050_v59 = vsel %vm617_vm7, %v14990_v36, %v14989_v12  ;;  %v3062_v55 = vmul.f32 %v3051_v20, %v14988_v52  ;;  %v14992_v23 = vld [vmem:[#allocation97_spill] sm:$0xff]  ;;  %v15000_v12 = vld [vmem:[#allocation78_spill] sm:$0xff]  ;;  %vm15025_vm15 = vmmov %vm15021_vm0 }
 0x6da   : > { %4113 = vmatpush.msrb.mxu0 %v3391_v3  ;;  %4316 = vmatpush.msrb.mxu3 %v3392_v0  ;;  %v3049_v51 = vsel %vm617_vm7, %v14992_v23, %v14991_v27  ;;  %v3060_v3 = vmul.f32 %v3050_v59, %v14988_v52  ;;  %v14993_v0 = vld [vmem:[#allocation59_spill] sm:$0xff]  ;;  %v14995_v16 = vld [vmem:[#allocation77_spill] sm:$0xff] }
 0x6db   : > { %v3012_v43 = vsel %vm601_vm8, %v14994_v40, %v14993_v0  ;;  %v15002_v27 = vld [vmem:[#allocation71_spill] sm:$0xff]  ;;  %v15003_v40 = vld [vmem:[#allocation98_spill] sm:$0xff] }
 0x6dc   : > { %4114 = vmatpush.msrb.mxu0 %v3389_v47  ;;  %4317 = vmatpush.msrb.mxu3 %v3390_v46  ;;  %v3058_v46 = vmul.f32 %v3049_v51, %v14988_v52  ;;  %v3739_v0 = vld [vmem:[%s14908_s4 + $0x90] sm:$0xff] }
 0x6de   : > { %v10841_v11 = vpop.permute.xlu1 %3567  ;;  %4115 = vmatpush.msrb.mxu0 %v3387_v15  ;;  %4318 = vmatpush.msrb.mxu3 %v3388_v56  ;;  %v10859_v63 = vpop.permute.xlu2 %3611  ;;  %v3011_v15 = vsel %vm601_vm8, %v14995_v16, %v9912_v37  ;;  %v15005_v16 = vld [vmem:[#allocation25_spill] sm:$0xff] }
 0x6df   : > { %v10852_v41 = vpop.permute.xlu0 %3565  ;;  %v3022_v20 = vmul.f32 %v3011_v15, %v14996_v25 }
 0x6e0   : > { %4116 = vmatpush.msrb.mxu0 %v3385_v26  ;;  %4319 = vmatpush.msrb.mxu3 %v3386_v61  ;;  %v3024_v26 = vmul.f32 %v3012_v43, %v14996_v25  ;;  %v14997_v61 = vld [vmem:[#allocation66_spill] sm:$0xff] }
 0x6e1   : > { %4117 = vmatmul.f32.vlgmr.msrb.gmra.mxu0 %v3725_v33  ;;  %4320 = vmatmul.f32.vlgmr.msrb.gmra.mxu3 %v3725_v33  ;;  %v14998_v33 = vld [vmem:[#allocation85_spill] sm:$0xff]  ;;  %v15004_v43 = vld [vmem:[#allocation58_spill] sm:$0xff] }
 0x6e2   : > { %4217 = vmatpush.msra.mxu0 %v3064_v42  ;;  %v3010_v49 = vsel %vm601_vm8, %v14998_v33, %v14997_v61  ;;  %v14999_v42 = vld [vmem:[#allocation67_spill] sm:$0xff]  ;;  %v15007_v61 = vld [vmem:[#allocation86_spill] sm:$0xff] }
 0x6e3   : > { %v3009_v37 = vsel %vm601_vm8, %v15000_v12, %v14999_v42  ;;  %v3020_v59 = vmul.f32 %v3010_v49, %v14996_v25  ;;  %v15009_v42 = vld [vmem:[#allocation92_spill] sm:$0xff] }
 0x6e4   : > { %4218 = vmatpush.msra.mxu0 %v3062_v55  ;;  %v15001_v55 = vld [vmem:[#allocation104_spill] sm:$0xff] }
 0x6e5   : > { %v2972_v23 = vsel %vm585_vm9, %v15002_v27, %v15001_v55  ;;  %v15011_v55 = vld [vmem:[#allocation94_spill] sm:$0xff] }
 0x6e6   : > { %4219 = vmatpush.msra.mxu0 %v3060_v3  ;;  %v10871_v47 = vpop.permute.xlu1 %3573  ;;  %v10893_v36 = vpop.permute.xlu2 %3641  ;;  %v3018_v3 = vmul.f32 %v3009_v37, %v14996_v25  ;;  %v2984_v15 = vmul.f32 %v2972_v23, %v15005_v16 }
 0x6e7   : > { %v10881_v56 = vpop.permute.xlu0 %3571 }
 0x6e8   : > { %4220 = vmatpush.msra.mxu0 %v3058_v46  ;;  %v2971_v46 = vsel %vm585_vm9, %v15004_v43, %v15003_v40  ;;  %v3746_v40 = vld [vmem:[%s14908_s4 + $0xc8] sm:$0xff] }
 0x6e9   : > { %4120 = vmatmul.f32.gmra.mxu0 %v3732_v6  ;;  %4323 = vmatmul.f32.gmra.mxu3 %v3732_v6  ;;  %v2982_v49 = vmul.f32 %v2971_v46, %v15005_v16  ;;  %v15012_v43 = vld [vmem:[#allocation87_spill] sm:$0xff] }
 0x6ea   : > { %4221 = vmatpush.msra.mxu0 %v3024_v26  ;;  %v15006_v26 = vld [vmem:[#allocation91_spill] sm:$0xff] }
 0x6eb   : > { %v2970_v33 = vsel %vm585_vm9, %v15007_v61, %v15006_v26  ;;  %v15013_v46 = vld [vmem:[#allocation79_spill] sm:$0xff] }
 0x6ec   : > { %4222 = vmatpush.msra.mxu0 %v3022_v20  ;;  %v15008_v20 = vld [vmem:[#allocation74_spill] sm:$0xff]  ;;  %v2980_v37 = vmul.f32 %v2970_v33, %v15005_v16  ;;  %v15014_v61 = vld [vmem:[#allocation27_spill] sm:$0xff] }
 0x6ed   : > { %v2969_v12 = vsel %vm585_vm9, %v15009_v42, %v15008_v20  ;;  %v15016_v20 = vld [vmem:[#allocation68_spill] sm:$0xff] }
 0x6ee   : > { %4223 = vmatpush.msra.mxu0 %v3020_v59  ;;  %v10900_v51 = vpop.permute.xlu1 %3603  ;;  %v15010_v59 = vld [vmem:[#allocation73_spill] sm:$0xff]  ;;  %v3648_v23 = vpop.permute.xlu2 %3647 }
 0x6ef   : > { %v10910_v6 = vpop.permute.xlu0 %3601  ;;  %v2932_v27 = vsel %vm569_vm10, %v15011_v55, %v15010_v59  ;;  %v15018_v59 = vld [vmem:[#allocation62_spill] sm:$0xff] }
 0x6f0   : > { %4224 = vmatpush.msra.mxu0 %v3018_v3  ;;  %v2944_v33 = vmul.f32 %v2932_v27, %v15014_v61 }
 0x6f1   : > { %4123 = vmatmul.f32.gmra.mxu0 %v3739_v0  ;;  %4326 = vmatmul.f32.gmra.mxu3 %v3739_v0  ;;  %v2978_v0 = vmul.f32 %v2969_v12, %v15005_v16 }
 0x6f2   : > { %4225 = vmatpush.msra.mxu0 %v2984_v15  ;;  %v2931_v15 = vsel %vm569_vm10, %v15013_v46, %v15012_v43 }
 0x6f3   : > { %v2942_v12 = vmul.f32 %v2931_v15, %v15014_v61 }
 0x6f4   : > { %4226 = vmatpush.msra.mxu0 %v2982_v49  ;;  %v15015_v49 = vld [vmem:[#allocation55_spill] sm:$0xff] }
 0x6f5   : > { %v2930_v42 = vsel %vm569_vm10, %v15016_v20, %v15015_v49 }
 0x6f6   : > { %4227 = vmatpush.msra.mxu0 %v2980_v37  ;;  %v10927_v3 = vpop.permute.xlu1 %3609  ;;  %v15017_v37 = vld [vmem:[#allocation96_spill] sm:$0xff]  ;;  %v3654_v16 = vpop.permute.xlu2 %3653 }
 0x6f7   : > { %v3608_v26 = vpop.permute.xlu0 %3607  ;;  %v2929_v55 = vsel %vm569_vm10, %v15018_v59, %v15017_v37 }
 0x6f8   : > { %4228 = vmatpush.msra.mxu0 %v2978_v0  ;;  %v2940_v0 = vmul.f32 %v2930_v42, %v15014_v61  ;;  %v2938_v43 = vmul.f32 %v2929_v55, %v15014_v61 }
 0x6f9   : > { %4126 = vmatmul.f32.gmra.mxu0 %v3746_v40  ;;  %4329 = vmatmul.f32.gmra.mxu3 %v3746_v40 }
 0x6fa   : > { %4229 = vmatpush.msra.mxu0 %v2944_v33 }
 0x6fc   : > { %4230 = vmatpush.msra.mxu0 %v2942_v12 }
 0x6fe   : > { %4231 = vmatpush.msra.mxu0 %v2940_v0  ;;  %v3616_v27 = vpop.permute.xlu1 %3615  ;;  %v10951_v15 = vpop.permute.xlu2 %3683  ;;  %v15023_v0 = vld [vmem:[#allocation38_spill] sm:$0xff] }
 0x6ff   : > { %v3614_v46 = vpop.permute.xlu0 %3613 }
 0x700   : > { %4232 = vmatpush.msra.mxu0 %v2938_v43 }
 0x701   : > { %4233 = vmatmul.f32.vlgmr.msra.gmra.mxu0 %v10328_v21 }
 0x706   : > { %v3646_v40 = vpop.permute.xlu1 %3645  ;;  %v10954_v42 = vpop.permute.xlu2 %3689 }
 0x707   : > { %v3644_v33 = vpop.permute.xlu0 %3643  ;;  %v3659_v59 = vsel %vm15019_vm6, %v3646_v40, %v3654_v16  ;;  %v3663_v21 = vsel %vm15020_vm5, %v3654_v16, %v3646_v40  ;;  %vm15026_vm6 = vmmov %vm15021_vm0 }
 0x708   : > { %v3669_v16 = vmul.f32 %v3659_v59, %v15023_v0  ;;  %vm15027_vm5 = vmmov %vm15021_vm0 }
 0x709   : > { %4236 = vmatmul.f32.gmra.mxu0 %v10371_v2 }
 0x70e   : > { %v3652_v49 = vpop.permute.xlu1 %3651  ;;  %v10987_v59 = vpop.permute.xlu2 %3695 }
 0x70f   : > { %v3650_v20 = vpop.permute.xlu0 %3649  ;;  %v3658_v25 = vsel %vm15025_vm15, %v3644_v33, %v3652_v49  ;;  %v3662_v52 = vsel %vm15026_vm6, %v3652_v49, %v3644_v33  ;;  %vm15030_vm6 = vcmp.lt.s32.totalorder %v7177_v34, 94 }
 0x711   : > { %4239 = vmatmul.f32.gmra.mxu0 %v10418_v38  ;;  %v15024_v38 = vld [vmem:[#allocation39_spill] sm:$0xff] }
 0x712   : > { %v3670_v40 = vmul.f32 %v3663_v21, %v15024_v38  ;;  %v3668_v33 = vmul.f32 %v3662_v52, %v15024_v38 }
 0x716   : > { %v10956_v12 = vpop.permute.xlu1 %3681 }
 0x717   : > { %v3656_v37 = vpop.permute.xlu0 %3655 }
 0x718   : > { %v3660_v2 = vsel %vm15021_vm0, %v3648_v23, %v3656_v37  ;;  %v3664_v55 = vsel %vm15022_vm1, %v3656_v37, %v3648_v23  ;;  %v3657_v23 = vsel %vm15027_vm5, %v10893_v36, %v3650_v20  ;;  %v3667_v37 = vmul.f32 %v3658_v25, %v15023_v0 }
 0x719   : > { %v3671_v43 = vmul.f32 %v3660_v2, %v15023_v0  ;;  %v3672_v61 = vmul.f32 %v3664_v55, %v15024_v38  ;;  %4242 = vmatmul.f32.gmra.mxu0 %v10559_v4  ;;  %v3661_v4 = vsel %vm15021_vm0, %v3650_v20, %v10893_v36  ;;  %vm15028_vm1 = vcmp.lt.s32.totalorder %v7177_v34, 96  ;;  %v15033_v2 = vld [vmem:[#allocation36_spill] sm:$0xff] }
 0x71a   : > { %vm15029_vm15 = vmmov %vm15028_vm1  ;;  %v3665_v52 = vmul.f32 %v3657_v23, %v15023_v0  ;;  %v3666_v25 = vmul.f32 %v3661_v4, %v15024_v38 }
 0x71b   : > { %4130 = vmatpush.msrb.mxu2 %v3671_v43  ;;  %4333 = vmatpush.msrb.mxu0 %v3672_v61  ;;  %v3620_v61 = vsel %vm15028_vm1, %v3608_v26, %v3616_v27  ;;  %v3624_v49 = vsel %vm15029_vm15, %v3616_v27, %v3608_v26  ;;  %vm15031_vm5 = vmmov %vm15028_vm1  ;;  %v15034_v43 = vld [vmem:[#allocation40_spill] sm:$0xff] }
 0x71c   : > { %v3619_v26 = vsel %vm15031_vm5, %v10813_v13, %v3614_v46  ;;  %vm15032_vm0 = vmmov %vm15028_vm1 }
 0x71d   : > { %4131 = vmatpush.msrb.mxu2 %v3669_v16  ;;  %4334 = vmatpush.msrb.mxu0 %v3670_v40  ;;  %v3623_v27 = vsel %vm15032_vm0, %v3614_v46, %v10813_v13  ;;  %v3631_v16 = vmul.f32 %v3620_v61, %v15034_v43  ;;  %v15035_v40 = vld [vmem:[#allocation41_spill] sm:$0xff]  ;;  %vm15036_vm1 = vmmov %vm15032_vm0  ;;  %v3629_v13 = vmul.f32 %v3619_v26, %v15034_v43 }
 0x71e   : > { %v10989_v21 = vpop.permute.xlu1 %3687  ;;  %v3618_v23 = vsel %vm15036_vm1, %v10900_v51, %v10859_v63  ;;  %vm15037_vm15 = vmmov %vm15032_vm0  ;;  %v3630_v46 = vmul.f32 %v3623_v27, %v15035_v40 }
 0x71f   : > { %v3700_v36 = vsel %vm15030_vm6, %v10989_v21, %v10987_v59  ;;  %v10995_v20 = vpop.permute.xlu0 %3685  ;;  %4132 = vmatpush.msrb.mxu2 %v3667_v37  ;;  %4335 = vmatpush.msrb.mxu0 %v3668_v33  ;;  %v3632_v37 = vmul.f32 %v3624_v49, %v15035_v40  ;;  %v3622_v4 = vsel %vm15037_vm15, %v10859_v63, %v10900_v51  ;;  %vm15038_vm6 = vmmov %vm15032_vm0  ;;  %vm15042_vm15 = vcmp.lt.s32.totalorder %v7177_v34, 94 }
 0x720   : > { %v3711_v55 = vmul.f32 %v3700_v36, %v15033_v2  ;;  %v3617_v33 = vsel %vm15038_vm6, %v10910_v6, %v10927_v3  ;;  %vm15039_vm5 = vmmov %vm15032_vm0  ;;  %v3627_v63 = vmul.f32 %v3618_v23, %v15034_v43  ;;  %v3628_v51 = vmul.f32 %v3622_v4, %v15035_v40  ;;  %v15048_v4 = vld [vmem:[#allocation43_spill] sm:$0xff] }
 0x721   : > { %4133 = vmatpush.msrb.mxu2 %v3665_v52  ;;  %4336 = vmatpush.msrb.mxu0 %v3666_v25  ;;  %v3621_v61 = vsel %vm15039_vm5, %v10927_v3, %v10910_v6  ;;  %vm15040_vm0 = vcmp.lt.s32.totalorder %v7177_v34, 97  ;;  %v3625_v25 = vmul.f32 %v3617_v33, %v15034_v43  ;;  %v15185_v43 = vld [vmem:[#allocation34_spill] sm:$0xff] }
 0x722   : > { %4171 = vmatpush.msra.mxu1 %v3711_v55  ;;  %v3580_v49 = vsel %vm15040_vm0, %v10841_v11, %v10755_v1  ;;  %vm15041_vm1 = vmmov %vm15040_vm0  ;;  %v3626_v26 = vmul.f32 %v3621_v61, %v15035_v40 }
 0x723   : > { %4134 = vmatpush.msrb.mxu2 %v3631_v16  ;;  %4337 = vmatpush.msrb.mxu0 %v3632_v37  ;;  %v3584_v36 = vsel %vm15041_vm1, %v10755_v1, %v10841_v11  ;;  %vm15043_vm6 = vmmov %vm15040_vm0  ;;  %v15047_v37 = vld [vmem:[#allocation42_spill] sm:$0xff] }
 0x724   : > { %v3579_v1 = vsel %vm15043_vm6, %v10852_v41, %v10871_v47  ;;  %vm15044_vm5 = vmmov %vm15040_vm0  ;;  %v3591_v23 = vmul.f32 %v3580_v49, %v15047_v37 }
 0x725   : > { %4135 = vmatpush.msrb.mxu2 %v3629_v13  ;;  %4338 = vmatpush.msrb.mxu0 %v3630_v46  ;;  %v3583_v11 = vsel %vm15044_vm5, %v10871_v47, %v10852_v41  ;;  %vm15045_vm0 = vmmov %vm15042_vm15  ;;  %v3592_v13 = vmul.f32 %v3584_v36, %v15048_v4  ;;  %v3589_v61 = vmul.f32 %v3579_v1, %v15047_v37  ;;  %v15055_v36 = vld [vmem:[#allocation7_spill] sm:$0xff] }
 0x726   : > { %v11036_v52 = vpop.permute.xlu1 %3693  ;;  %vm15046_vm1 = vmmov %vm15045_vm0 }
 0x727   : > { %v3699_v6 = vsel %vm15042_vm15, %v10995_v20, %v11036_v52  ;;  %v11042_v3 = vpop.permute.xlu0 %3691  ;;  %4136 = vmatpush.msrb.mxu2 %v3627_v63  ;;  %4339 = vmatpush.msrb.mxu0 %v3628_v51  ;;  %v3697_v16 = vsel %vm15046_vm1, %v10956_v12, %v10954_v42  ;;  %vm15049_vm15 = vmmov %vm15044_vm5  ;;  %v3590_v63 = vmul.f32 %v3583_v11, %v15048_v4  ;;  %v15064_v11 = vld [vmem:[#allocation44_spill] sm:$0xff] }
 0x728   : > { %v3698_v27 = vsel %vm15045_vm0, %v10951_v15, %v11042_v3  ;;  %v3709_v55 = vmul.f32 %v3699_v6, %v15033_v2  ;;  %v3578_v41 = vsel %vm15049_vm15, %v10671_v18, %v10881_v56  ;;  %vm15050_vm6 = vmmov %vm15044_vm5  ;;  %vm15051_vm5 = vcmp.lt.s32.totalorder %v7177_v34, 114 }
 0x729   : > { %4137 = vmatpush.msrb.mxu2 %v3625_v25  ;;  %4340 = vmatpush.msrb.mxu0 %v3626_v26  ;;  %v3582_v47 = vsel %vm15050_vm6, %v10881_v56, %v10671_v18  ;;  %v3707_v46 = vmul.f32 %v3698_v27, %v15033_v2  ;;  %v3344_v33 = vsel %vm15051_vm5, %v10286_v8, %v10308_v9  ;;  %vm15052_vm0 = vmmov %vm15050_vm6  ;;  %vm15056_vm6 = vcmp.lt.s32.totalorder %v7177_v34, 98 }
 0x72a   : > { %4172 = vmatpush.msra.mxu1 %v3709_v55  ;;  %v3577_v51 = vsel %vm15052_vm0, %v10799_v28, %v10711_v19  ;;  %vm15053_vm1 = vmmov %vm15052_vm0  ;;  %v3705_v56 = vmul.f32 %v3697_v16, %v15033_v2  ;;  %v3587_v8 = vmul.f32 %v3578_v41, %v15047_v37  ;;  %v3588_v49 = vmul.f32 %v3582_v47, %v15048_v4  ;;  %v15065_v55 = vld [vmem:[#allocation45_spill] sm:$0xff]  ;;  %v15069_v41 = vld [vmem:[#allocation152_spill] sm:$0xff] }
 0x72b   : > { %4138 = vmatpush.msrb.mxu2 %v3591_v23  ;;  %4341 = vmatpush.msrb.mxu0 %v3592_v13  ;;  %v3581_v18 = vsel %vm15053_vm1, %v10711_v19, %v10799_v28  ;;  %vm15054_vm15 = vmmov %vm15051_vm5  ;;  %v3352_v6 = vmul.f32 %v3344_v33, %v15055_v36  ;;  %v3540_v19 = vsel %vm15056_vm6, %v10650_v62, %v10811_v45  ;;  %v15068_v13 = vld [vmem:[#allocation110_spill] sm:$0xff] }
 0x72c   : > { %4173 = vmatpush.msra.mxu1 %v3707_v46  ;;  %v3343_v9 = vsel %vm15054_vm15, %v10330_v14, %v10316_v60  ;;  %vm15057_vm5 = vmmov %vm15056_vm6  ;;  %v3585_v14 = vmul.f32 %v3577_v51, %v15047_v37  ;;  %v3586_v25 = vmul.f32 %v3581_v18, %v15048_v4  ;;  %v3551_v27 = vmul.f32 %v3540_v19, %v15064_v11  ;;  %v15074_v51 = vld [vmem:[#allocation80_spill] sm:$0xff]  ;;  %v15079_v19 = vld [vmem:[#allocation89_spill] sm:$0xff] }
 0x72d   : > { %4139 = vmatpush.msrb.mxu2 %v3589_v61  ;;  %4342 = vmatpush.msrb.mxu0 %v3590_v63  ;;  %v3544_v28 = vsel %vm15057_vm5, %v10811_v45, %v10650_v62  ;;  %vm15058_vm0 = vmmov %vm15054_vm15  ;;  %v3350_v45 = vmul.f32 %v3343_v9, %v15055_v36  ;;  %v15073_v63 = vld [vmem:[#allocation61_spill] sm:$0xff] }
 0x72e   : > { %4174 = vmatpush.msra.mxu1 %v3705_v56  ;;  %v3342_v60 = vsel %vm15058_vm0, %v10339_v57, %v10250_v35  ;;  %vm15059_vm1 = vmmov %vm15057_vm5  ;;  %v15061_v35 = vld [vmem:[#allocation151_spill] sm:$0xff]  ;;  %v3552_v16 = vmul.f32 %v3544_v28, %v15065_v55  ;;  %v15080_v28 = vld [vmem:[#allocation149_spill] sm:$0xff] }
 0x72f   : > { %4140 = vmatpush.msrb.mxu2 %v3587_v8  ;;  %4343 = vmatpush.msrb.mxu0 %v3588_v49  ;;  %v3539_v26 = vsel %vm15059_vm1, %v10709_v53, %v10659_v22  ;;  %vm15060_vm15 = vmmov %vm15059_vm1  ;;  %v15062_v57 = vld [vmem:[#allocation95_spill] sm:$0xff]  ;;  %v15077_v49 = vld [vmem:[#allocation112_spill] sm:$0xff] }
 0x730   : > { %v3543_v62 = vsel %vm15060_vm15, %v10659_v22, %v10709_v53  ;;  %4275 = vmatpush.msrb.mxu1 %v3352_v6  ;;  %vm15063_vm6 = vmmov %vm15058_vm0  ;;  %v3348_v53 = vmul.f32 %v3342_v60, %v15055_v36  ;;  %v3549_v46 = vmul.f32 %v3539_v26, %v15064_v11  ;;  %v15076_v8 = vld [vmem:[#allocation111_spill] sm:$0xff] }
 0x731   : > { %v3341_v1 = vsel %vm15063_vm6, %v15062_v57, %v15061_v35  ;;  %4141 = vmatpush.msrb.mxu2 %v3585_v14  ;;  %4344 = vmatpush.msrb.mxu0 %v3586_v25  ;;  %vm15066_vm5 = vmmov %vm15059_vm1  ;;  %v3550_v33 = vmul.f32 %v3543_v62, %v15065_v55  ;;  %v3212_v6 = vsel %vm681_vm3, %v15077_v49, %v15076_v8  ;;  %v3726_v26 = vld [vmem:[%s14908_s4 + $0x28] sm:$0xff] }
 0x732   : > { %v3538_v23 = vsel %vm15066_vm5, %v10721_v29, %v10753_v39  ;;  %vm15067_vm0 = vmmov %vm15059_vm1  ;;  %4276 = vmatpush.msrb.mxu1 %v3350_v45  ;;  %vm15070_vm1 = vcmp.lt.s32.totalorder %v7177_v34, 126  ;;  %v15082_v62 = vld [vmem:[#allocation115_spill] sm:$0xff]  ;;  %v15083_v45 = vld [vmem:[#allocation137_spill] sm:$0xff] }
 0x733   : > { %v3542_v22 = vsel %vm15067_vm0, %v10753_v39, %v10721_v29  ;;  %v3304_v47 = vsel %vm15070_vm1, %v15069_v41, %v15068_v13  ;;  %4142 = vmatpush.msrb.mxu2 %v3551_v27  ;;  %4345 = vmatpush.msrb.mxu0 %v3552_v16  ;;  %vm15071_vm15 = vmmov %vm15067_vm0  ;;  %v3346_v39 = vmul.f32 %v3341_v1, %v15055_v36  ;;  %v11177_v1 = vld [vmem:[%s14908_s4 + $0x30] sm:$0xff]  ;;  %v15084_v27 = vld [vmem:[#allocation13_spill] sm:$0xff] }
 0x734   : > { %v3537_v61 = vsel %vm15071_vm15, %v10639_v31, %v10767_v54  ;;  %vm15072_vm6 = vmmov %vm15067_vm0  ;;  %4277 = vmatpush.msrb.mxu1 %v3348_v53  ;;  %v3547_v56 = vmul.f32 %v3538_v23, %v15064_v11  ;;  %v3548_v9 = vmul.f32 %v3542_v22, %v15065_v55  ;;  %v3211_v35 = vsel %vm681_vm3, %v15083_v45, %v15082_v62  ;;  %v15085_v23 = vld [vmem:[#allocation105_spill] sm:$0xff]  ;;  %v15086_v22 = vld [vmem:[#allocation150_spill] sm:$0xff] }
 0x735   : > { %v3541_v29 = vsel %vm15072_vm6, %v10767_v54, %v10639_v31  ;;  %vm15075_vm5 = vmmov %vm15070_vm1  ;;  %4143 = vmatpush.msrb.mxu2 %v3549_v46  ;;  %4346 = vmatpush.msrb.mxu0 %v3550_v33  ;;  %v15078_v31 = vld [vmem:[#allocation9_spill] sm:$0xff]  ;;  %v3545_v14 = vmul.f32 %v3537_v61, %v15064_v11  ;;  %v3224_v16 = vmul.f32 %v3212_v6, %v15084_v27  ;;  %v15088_v13 = vld [vmem:[#allocation128_spill] sm:$0xff]  ;;  %vm15092_vm15 = vcmp.lt.s32.totalorder %v7177_v34, 127 }
 0x736   : > { %v3303_v18 = vsel %vm15075_vm5, %v15074_v51, %v15073_v63  ;;  %4278 = vmatpush.msrb.mxu1 %v3346_v39  ;;  %v3312_v54 = vmul.f32 %v3304_v47, %v15078_v31  ;;  %vm15081_vm0 = vmmov %vm15070_vm1  ;;  %v3546_v25 = vmul.f32 %v3541_v29, %v15065_v55  ;;  %v15089_v41 = vld [vmem:[#allocation119_spill] sm:$0xff]  ;;  %v15090_v33 = vld [vmem:[#allocation102_spill] sm:$0xff]  ;;  %v3222_v39 = vmul.f32 %v3211_v35, %v15084_v27 }
 0x737   : > { %v3302_v60 = vsel %vm15081_vm0, %v15080_v28, %v15079_v19  ;;  %4144 = vmatpush.msrb.mxu2 %v3547_v56  ;;  %4347 = vmatpush.msrb.mxu0 %v3548_v9  ;;  %v3310_v57 = vmul.f32 %v3303_v18, %v15078_v31  ;;  %vm15087_vm1 = vmmov %vm15081_vm0  ;;  %v3210_v47 = vsel %vm681_vm3, %v15089_v41, %v15088_v13  ;;  %v15091_v61 = vld [vmem:[#allocation72_spill] sm:$0xff]  ;;  %v15093_v63 = vld [vmem:[#allocation118_spill] sm:$0xff] }
 0x738   : > { %4279 = vmatpush.msrb.mxu1 %v3312_v54  ;;  %v3301_v53 = vsel %vm15087_vm1, %v15086_v22, %v15085_v23  ;;  %v3308_v46 = vmul.f32 %v3302_v60, %v15078_v31  ;;  %v3264_v29 = vsel %vm15092_vm15, %v15091_v61, %v15090_v33  ;;  %v15094_v51 = vld [vmem:[#allocation134_spill] sm:$0xff]  ;;  %v15095_v9 = vld [vmem:[#allocation132_spill] sm:$0xff]  ;;  %v15096_v8 = vld [vmem:[#allocation107_spill] sm:$0xff]  ;;  %v3220_v6 = vmul.f32 %v3210_v47, %v15084_v27 }
 0x739   : > { %4145 = vmatpush.msrb.mxu2 %v3545_v14  ;;  %4348 = vmatpush.msrb.mxu0 %v3546_v25  ;;  %v3209_v18 = vsel %vm681_vm3, %v15094_v51, %v15093_v63  ;;  %v3306_v56 = vmul.f32 %v3301_v53, %v15078_v31  ;;  %vm15097_vm6 = vmmov %vm15092_vm15  ;;  %v15098_v54 = vld [vmem:[#allocation116_spill] sm:$0xff]  ;;  %v15099_v19 = vld [vmem:[#allocation121_spill] sm:$0xff]  ;;  %vm15116_vm1 = vcmp.lt.s32.totalorder %v7177_v34, 14 }
 0x73a   : > { %4146 = vmatmul.f32.vlgmr.msrb.gmra.mxu2 %v3726_v26  ;;  %4280 = vmatpush.msrb.mxu1 %v3310_v57  ;;  %v3263_v49 = vsel %vm15097_vm6, %v15096_v8, %v15095_v9  ;;  %v3172_v28 = vsel %vm665_vm4, %v15099_v19, %v15098_v54  ;;  %v15100_v60 = vld [vmem:[#allocation11_spill] sm:$0xff]  ;;  %v15101_v25 = vld [vmem:[#allocation136_spill] sm:$0xff]  ;;  %v15102_v62 = vld [vmem:[#allocation133_spill] sm:$0xff]  ;;  %v3218_v45 = vmul.f32 %v3209_v18, %v15084_v27 }
 0x73b   : > { %4246 = vmatpush.msra.mxu2 %v3224_v16  ;;  %6841 = vmatmul.msk.f32.vlgmr.msra.gmra.mxu1 %vm2326_vm2, %v11177_v1  ;;  %v3272_v14 = vmul.f32 %v3264_v29, %v15100_v60  ;;  %vm15103_vm5 = vmmov %vm15097_vm6  ;;  %v3733_v35 = vld [vmem:[%s14908_s4 + $0x60] sm:$0xff]  ;;  %v15104_v57 = vld [vmem:[#allocation135_spill] sm:$0xff]  ;;  %v3270_v22 = vmul.f32 %v3263_v49, %v15100_v60 }
 0x73c   : > { %4281 = vmatpush.msrb.mxu1 %v3308_v46  ;;  %4349 = vmatmul.f32.vlgmr.msrb.gmra.mxu0 %v3726_v26  ;;  %v3262_v26 = vsel %vm15103_vm5, %v15102_v62, %v15101_v25  ;;  %v15105_v16 = vld [vmem:[#allocation138_spill] sm:$0xff]  ;;  %v15107_v41 = vld [vmem:[#allocation109_spill] sm:$0xff]  ;;  %vm15108_vm0 = vmmov %vm15103_vm5 }
 0x73d   : > { %4247 = vmatpush.msra.mxu2 %v3222_v39  ;;  %v3171_v23 = vsel %vm665_vm4, %v15105_v16, %v15104_v57  ;;  %v11227_v53 = vld [vmem:[%s14908_s4 + $0x68] sm:$0xff]  ;;  %v15111_v29 = vld [vmem:[#allocation108_spill] sm:$0xff]  ;;  %v3268_v63 = vmul.f32 %v3262_v26, %v15100_v60  ;;  %v15112_v18 = vld [vmem:[#allocation113_spill] sm:$0xff] }
 0x73e   : > { %4282 = vmatpush.msrb.mxu1 %v3306_v56  ;;  %v15106_v13 = vld [vmem:[#allocation106_spill] sm:$0xff]  ;;  %v15109_v46 = vld [vmem:[#allocation15_spill] sm:$0xff]  ;;  %v15117_v25 = vld [vmem:[#allocation140_spill] sm:$0xff] }
 0x73f   : > { %4248 = vmatpush.msra.mxu2 %v3220_v6  ;;  %v3261_v47 = vsel %vm15108_vm0, %v15107_v41, %v15106_v13  ;;  %v3184_v33 = vmul.f32 %v3172_v28, %v15109_v46  ;;  %v15110_v61 = vld [vmem:[#allocation139_spill] sm:$0xff]  ;;  %v3182_v51 = vmul.f32 %v3171_v23, %v15109_v46  ;;  %v15113_v56 = vld [vmem:[#allocation122_spill] sm:$0xff]  ;;  %v15114_v6 = vld [vmem:[#allocation117_spill] sm:$0xff]  ;;  %vm15129_vm0 = vcmp.lt.s32.totalorder %v7177_v34, 15 }
 0x740   : > { %4283 = vmatpush.msrb.mxu1 %v3272_v14  ;;  %v3170_v39 = vsel %vm665_vm4, %v15111_v29, %v15110_v61  ;;  %v3169_v9 = vsel %vm665_vm4, %v15113_v56, %v15112_v18  ;;  %v3266_v8 = vmul.f32 %v3261_v47, %v15100_v60  ;;  %v15115_v54 = vld [vmem:[#allocation143_spill] sm:$0xff]  ;;  %v3740_v14 = vld [vmem:[%s14908_s4 + $0x98] sm:$0xff]  ;;  %v15118_v62 = vld [vmem:[#allocation130_spill] sm:$0xff] }
 0x741   : > { %4249 = vmatpush.msra.mxu2 %v3218_v45  ;;  %v3180_v49 = vmul.f32 %v3170_v39, %v15109_v46  ;;  %v3132_v19 = vsel %vm15116_vm1, %v15115_v54, %v15114_v6  ;;  %v3178_v28 = vmul.f32 %v3169_v9, %v15109_v46  ;;  %vm15119_vm15 = vmmov %vm15116_vm1  ;;  %v11264_v45 = vld [vmem:[%s14908_s4 + $0xa0] sm:$0xff]  ;;  %v15122_v23 = vld [vmem:[#allocation124_spill] sm:$0xff] }
 0x742   : > { %4149 = vmatmul.f32.gmra.mxu2 %v3733_v35  ;;  %4284 = vmatpush.msrb.mxu1 %v3270_v22  ;;  %v3131_v26 = vsel %vm15119_vm15, %v15118_v62, %v15117_v25  ;;  %v15121_v16 = vld [vmem:[#allocation145_spill] sm:$0xff]  ;;  %vm15123_vm6 = vmmov %vm15116_vm1  ;;  %v15125_v41 = vld [vmem:[#allocation123_spill] sm:$0xff] }
 0x743   : > { %4250 = vmatpush.msra.mxu2 %v3184_v33  ;;  %6842 = vmatmul.msk.f32.gmra.mxu1 %vm2326_vm2, %v11227_v53  ;;  %v3130_v22 = vsel %vm15123_vm6, %v15122_v23, %v15121_v16  ;;  %vm15126_vm5 = vmmov %vm15116_vm1  ;;  %v15127_v61 = vld [vmem:[#allocation127_spill] sm:$0xff]  ;;  %v15128_v29 = vld [vmem:[#allocation126_spill] sm:$0xff] }
 0x744   : > { %4285 = vmatpush.msrb.mxu1 %v3268_v63  ;;  %4352 = vmatmul.f32.gmra.mxu0 %v3733_v35  ;;  %v15120_v35 = vld [vmem:[#allocation17_spill] sm:$0xff]  ;;  %v15130_v39 = vld [vmem:[#allocation84_spill] sm:$0xff]  ;;  %vm15133_vm1 = vmmov %vm15129_vm0 }
 0x745   : > { %4251 = vmatpush.msra.mxu2 %v3182_v51  ;;  %v3144_v57 = vmul.f32 %v3132_v19, %v15120_v35  ;;  %v3142_v13 = vmul.f32 %v3131_v26, %v15120_v35  ;;  %v3140_v33 = vmul.f32 %v3130_v22, %v15120_v35  ;;  %v3747_v51 = vld [vmem:[%s14908_s4 + $0xd0] sm:$0xff]  ;;  %v3748_v9 = vld [vmem:[%s14908_s4 + $0xd8] sm:$0xff]  ;;  %vm15137_vm15 = vmmov %vm15129_vm0 }
 0x746   : > { %4286 = vmatpush.msrb.mxu1 %v3266_v8  ;;  %v15131_v18 = vld [vmem:[#allocation120_spill] sm:$0xff]  ;;  %v15134_v8 = vld [vmem:[#allocation19_spill] sm:$0xff]  ;;  %v15135_v6 = vld [vmem:[#allocation141_spill] sm:$0xff] }
 0x747   : > { %4252 = vmatpush.msra.mxu2 %v3180_v49  ;;  %v15136_v54 = vld [vmem:[#allocation131_spill] sm:$0xff]  ;;  %v15139_v25 = vld [vmem:[#allocation144_spill] sm:$0xff]  ;;  %vm15140_vm6 = vmmov %vm15129_vm0 }
 0x748   : > { %4287 = vmatpush.msrb.mxu1 %v9556_v5  ;;  %v15124_v5 = vld [vmem:[#allocation114_spill] sm:$0xff]  ;;  %v3090_v19 = vsel %vm15137_vm15, %v15136_v54, %v15135_v6  ;;  %v15143_v22 = vld [vmem:[#allocation37_spill] sm:$0xff]  ;;  %v15171_v60 = vld [vmem:[#allocation28_spill] sm:$0xff] }
 0x749   : > { %4253 = vmatpush.msra.mxu2 %v3178_v28  ;;  %v3129_v47 = vsel %vm15126_vm5, %v15125_v41, %v15124_v5  ;;  %vm15141_vm5 = vcmp.lt.s32.totalorder %v7177_v34, 94  ;;  %v6908_v41 = vld [vmem:[%s14908_s4 + $0x80] sm:$0xff] }
 0x74a   : > { %4152 = vmatmul.f32.gmra.mxu2 %v3740_v14  ;;  %4288 = vmatpush.msrb.mxu1 %v9548_v50  ;;  %v3092_v50 = vsel %vm15129_vm0, %v15128_v29, %v15127_v61  ;;  %v3138_v63 = vmul.f32 %v3129_v47, %v15120_v35  ;;  %v3704_v26 = vsel %vm15141_vm5, %v10987_v59, %v10989_v21  ;;  %vm15142_vm0 = vmmov %vm15141_vm5  ;;  %v15146_v47 = vld [vmem:[#allocation81_spill] sm:$0xff]  ;;  %v15148_v61 = vld [vmem:[#allocation90_spill] sm:$0xff]  ;;  %v4002_v29 = vpop.f32.mrf.mxu0 }
 0x74b   : > { %4254 = vmatpush.msra.mxu2 %v3144_v57  ;;  %6843 = vmatmul.msk.f32.gmra.mxu1 %vm2326_vm2, %v11264_v45  ;;  %v3104_v49 = vmul.f32 %v3092_v50, %v15134_v8  ;;  %v3100_v57 = vmul.f32 %v3090_v19, %v15134_v8  ;;  %v3703_v16 = vsel %vm15142_vm0, %v11036_v52, %v10995_v20  ;;  %vm15145_vm15 = vmmov %vm15142_vm0  ;;  %v6904_v20 = vld [vmem:[%s14908_s4 + $0x10] sm:$0xff]  ;;  %v6905_v52 = vld [vmem:[%s14908_s4 + $0x18] sm:$0xff] }
 0x74c   : > { %4289 = vmatpush.msrb.mxu1 %v9540_v30  ;;  %4355 = vmatmul.f32.gmra.mxu0 %v3740_v14  ;;  %v15132_v30 = vld [vmem:[#allocation147_spill] sm:$0xff]  ;;  %v15138_v14 = vld [vmem:[#allocation142_spill] sm:$0xff]  ;;  %v3710_v59 = vmul.f32 %v3703_v16, %v15143_v22  ;;  %v3701_v21 = vsel %vm15145_vm15, %v10954_v42, %v10956_v12  ;;  %vm15246_vm15 = vcmp.lt.s32.totalorder %v7177_v34, 15 }
 0x74d   : > { %4255 = vmatpush.msra.mxu2 %v3142_v13  ;;  %v3091_v56 = vsel %vm15133_vm1, %v15132_v30, %v15131_v18  ;;  %v3089_v62 = vsel %vm15140_vm6, %v15139_v25, %v15138_v14  ;;  %v3712_v13 = vmul.f32 %v3704_v26, %v15143_v22  ;;  %vm15144_vm1 = vmmov %vm15142_vm0  ;;  %v6906_v42 = vld [vmem:[%s14908_s4 + $0x48] sm:$0xff]  ;;  %v6907_v12 = vld [vmem:[%s14908_s4 + $0x50] sm:$0xff]  ;;  %vm15238_vm6 = vcmp.lt.s32.totalorder %v7177_v34, 14 }
 0x74e   : > { %4290 = vmatpush.msrb.mxu1 %v15130_v39  ;;  %v3102_v28 = vmul.f32 %v3091_v56, %v15134_v8  ;;  %v3098_v23 = vmul.f32 %v3089_v62, %v15134_v8  ;;  %v3702_v5 = vsel %vm15144_vm1, %v11042_v3, %v10951_v15  ;;  %v3706_v3 = vmul.f32 %v3701_v21, %v15143_v22  ;;  %v4060_v39 = vpop.f32.mrf.mxu1  ;;  %v4089_v56 = vpop.f32.mrf.mxu3  ;;  %vm15242_vm5 = vmmov %vm15238_vm6 }
 0x74f   : > { %4256 = vmatpush.msra.mxu2 %v3140_v33  ;;  %v3708_v15 = vmul.f32 %v3702_v5, %v15143_v22  ;;  %v15147_v33 = vld [vmem:[#allocation75_spill] sm:$0xff]  ;;  %v11358_v62 = vpop.permute.xlu1 %3960  ;;  %v11361_v21 = vpop.permute.xlu2 %3965  ;;  %vm15244_vm0 = vmmov %vm15242_vm5 }
 0x750   : > { %vm15245_vm1 = vmmov %vm15244_vm0 }
 0x751   : > { %4257 = vmatpush.msra.mxu2 %v3138_v63 }
 0x752   : > { %4155 = vmatmul.f32.gmra.mxu2 %v3747_v51  ;;  %v4005_v50 = vpop.f32.mrf.mxu0 }
 0x753   : > { %4258 = vmatpush.msra.mxu2 %v3104_v49  ;;  %6844 = vmatmul.msk.f32.gmra.mxu1 %vm2326_vm2, %v3748_v9 }
 0x754   : > { %4358 = vmatmul.f32.gmra.mxu0 %v3747_v51  ;;  %v4031_v51 = vpop.f32.mrf.mxu2 }
 0x755   : > { %4259 = vmatpush.msra.mxu2 %v3102_v28 }
 0x756   : > { %v4063_v18 = vpop.f32.mrf.mxu1  ;;  %v4092_v19 = vpop.f32.mrf.mxu3 }
 0x757   : > { %4260 = vmatpush.msra.mxu2 %v3100_v57  ;;  %v4006_v57 = vadd.f32 %v4005_v50, %v11358_v62 }
 0x759   : > { %4261 = vmatpush.msra.mxu2 %v3098_v23 }
 0x75a   : > { %4262 = vmatmul.f32.vlgmr.msra.gmra.mxu2 %v6904_v20  ;;  %v4008_v63 = vpop.f32.mrf.mxu0 }
 0x75b   : > { %4374 = vmatpush.msrb.mxu2 %v3712_v13  ;;  %4291 = vmatmul.f32.vlgmr.msrb.gmra.mxu1 %v6905_v52 }
 0x75c   : > { %v4034_v49 = vpop.f32.mrf.mxu2 }
 0x75d   : > { %4375 = vmatpush.msrb.mxu2 %v3710_v59  ;;  %v4035_v13 = vadd.f32 %v4034_v49, %v4006_v57 }
 0x75e   : > { %v4066_v54 = vpop.f32.mrf.mxu1  ;;  %v4095_v26 = vpop.f32.mrf.mxu3 }
 0x75f   : > { %4376 = vmatpush.msrb.mxu2 %v3708_v15  ;;  %v4009_v15 = vadd.f32 %v4008_v63, %v11361_v21 }
 0x761   : > { %4377 = vmatpush.msrb.mxu2 %v3706_v3  ;;  %v4064_v3 = vadd.f32 %v4063_v18, %v4035_v13 }
 0x762   : > { %4265 = vmatmul.f32.gmra.mxu2 %v6906_v42  ;;  %v4011_v30 = vpop.f32.mrf.mxu0 }
 0x763   : > { %4294 = vmatmul.f32.gmra.mxu1 %v6907_v12 }
 0x764   : > { %v4037_v28 = vpop.f32.mrf.mxu2 }
 0x766   : > { %v4069_v14 = vpop.f32.mrf.mxu1  ;;  %v4098_v12 = vpop.f32.mrf.mxu3 }
 0x76a   : > { %4268 = vmatmul.f32.gmra.mxu2 %v6908_v41  ;;  %v4118_v6 = vpop.f32.mrf.mxu0 }
 0x76b   : > { %4297 = vmatmul.f32.gmra.mxu1 %v15146_v47 }
 0x772   : > { %4271 = vmatmul.f32.gmra.mxu2 %v15147_v33  ;;  %v4038_v33 = vadd.f32 %v4037_v28, %v4009_v15 }
 0x773   : > { %4300 = vmatmul.f32.gmra.mxu1 %v15148_v61  ;;  %v4093_v61 = vadd.f32 %v4092_v19, %v4064_v3 }
 0x774   : > { %v4067_v49 = vadd.f32 %v4066_v54, %v4038_v33 }
 0x77a   : > { %6845 = vmatmul.msk.f32.vlgmr.msrb.gmra.mxu2 %vm2326_vm2, %v11177_v1  ;;  %v11355_v1 = vpop.permute.xlu0 %3955 }
 0x782   : > { %6846 = vmatmul.msk.f32.gmra.mxu2 %vm2326_vm2, %v11227_v53  ;;  %v4003_v53 = vadd.f32 %v4002_v29, %v11355_v1  ;;  %v11366_v50 = vpop.permute.xlu0 %3970 }
 0x783   : > { %v4012_v63 = vadd.f32 %v4011_v30, %v11366_v50 }
 0x784   : > { %v4032_v25 = vadd.f32 %v4031_v51, %v4003_v53  ;;  %v4096_v53 = vadd.f32 %v4095_v26, %v4067_v49 }
 0x786   : > { %v4061_v16 = vadd.f32 %v4060_v39, %v4032_v25  ;;  %v4205_v25 = vpop.f32.mrf.mxu3 }
 0x788   : > { %v4090_v5 = vadd.f32 %v4089_v56, %v4061_v16 }
 0x78a   : > { %6847 = vmatmul.msk.f32.gmra.mxu2 %vm2326_vm2, %v11264_v45  ;;  %v4121_v45 = vpop.f32.mrf.mxu0  ;;  %v4119_v20 = vadd.f32 %v4118_v6, %v4090_v5 }
 0x78b   : > { %v4122_v39 = vadd.f32 %v4121_v45, %v4093_v61 }
 0x78e   : > { %v4208_v30 = vpop.f32.mrf.mxu3 }
 0x792   : > { %6848 = vmatmul.msk.f32.gmra.mxu2 %vm2326_vm2, %v3748_v9  ;;  %v4040_v9 = vpop.f32.mrf.mxu2  ;;  %v4124_v59 = vpop.f32.mrf.mxu0 }
 0x793   : > { %v4041_v57 = vadd.f32 %v4040_v9, %v4012_v63  ;;  %v4125_v16 = vadd.f32 %v4124_v59, %v4096_v53 }
 0x79a   : > { %v4127_v51 = vpop.f32.mrf.mxu0 }
 0x7a2   : > { %v4234_v13 = vpop.f32.mrf.mxu0 }
 0x7aa   : > { %v4237_v59 = vpop.f32.mrf.mxu0 }
 0x7b8   : > { %v4176_v23 = vpop.f32.mrf.mxu1 }
 0x7bd   : > { %v4147_v52 = vpop.f32.mrf.mxu2 }
 0x7be   : > { %v4148_v42 = vadd.f32 %v4147_v52, %v4119_v20 }
 0x7c0   : > { %v4177_v41 = vadd.f32 %v4176_v23, %v4148_v42  ;;  %v4179_v47 = vpop.f32.mrf.mxu1  ;;  %v4070_v23 = vadd.f32 %v4069_v14, %v4041_v57  ;;  %v4211_v14 = vpop.f32.mrf.mxu3  ;;  %v4209_v57 = vadd.f32 %v4208_v30, %v11358_v62 }
 0x7c2   : > { %v11364_v29 = vmax.f32 %v4177_v41, 0.0  ;;  %v4099_v54 = vadd.f32 %v4098_v12, %v4070_v23  ;;  %v4240_v12 = vpop.f32.mrf.mxu0  ;;  %v4238_v23 = vadd.f32 %v4237_v59, %v4209_v57 }
 0x7c4   : > { %4399 = vrot.lane.b32.xlu1 %v11364_v29, %s14779_s8  ;;  %v4128_v15 = vadd.f32 %v4127_v51, %v4099_v54 }
 0x7c5   : > { %v4150_v56 = vpop.f32.mrf.mxu2 }
 0x7c6   : > { %v4151_v18 = vadd.f32 %v4150_v56, %v4122_v39  ;;  %v4206_v56 = vadd.f32 %v4205_v25, %v11355_v1 }
 0x7c8   : > { %v4180_v6 = vadd.f32 %v4179_v47, %v4151_v18  ;;  %v4182_v19 = vpop.f32.mrf.mxu1  ;;  %v4214_v61 = vpop.f32.mrf.mxu3  ;;  %v4235_v63 = vadd.f32 %v4234_v13, %v4206_v56 }
 0x7c9   : > { %v4215_v30 = vadd.f32 %v4214_v61, %v11366_v50 }
 0x7ca   : > { %v11371_v28 = vmax.f32 %v4180_v6, 0.0  ;;  %v4243_v39 = vpop.f32.mrf.mxu0 }
 0x7cc   : > { %4401 = vrot.lane.b32.xlu2 %v11371_v28, %s14779_s8 }
 0x7cd   : > { %v4153_v45 = vpop.f32.mrf.mxu2 }
 0x7ce   : > { %v4154_v5 = vadd.f32 %v4153_v45, %v4125_v16 }
 0x7d0   : > { %v4183_v20 = vadd.f32 %v4182_v19, %v4154_v5  ;;  %v4185_v26 = vpop.f32.mrf.mxu1  ;;  %v4321_v18 = vpop.f32.mrf.mxu3 }
 0x7d2   : > { %v11375_v52 = vmax.f32 %v4183_v20, 0.0  ;;  %v4350_v53 = vpop.f32.mrf.mxu0 }
 0x7d4   : > { %4403 = vrot.lane.b32.xlu0 %v11375_v52, %s14779_s8 }
 0x7d5   : > { %v4156_v9 = vpop.f32.mrf.mxu2 }
 0x7d6   : > { %v4157_v3 = vadd.f32 %v4156_v9, %v4128_v15  ;;  %v4212_v15 = vadd.f32 %v4211_v14, %v11361_v21  ;;  %v4244_v14 = vadd.f32 %v4243_v39, %v4215_v30 }
 0x7d8   : > { %v4186_v42 = vadd.f32 %v4185_v26, %v4157_v3  ;;  %v4292_v51 = vpop.f32.mrf.mxu1  ;;  %v4324_v54 = vpop.f32.mrf.mxu3  ;;  %v4241_v25 = vadd.f32 %v4240_v12, %v4212_v15 }
 0x7da   : > { %v11379_v41 = vmax.f32 %v4186_v42, 0.0  ;;  %v4353_v3 = vpop.f32.mrf.mxu0 }
 0x7dc   : > { %4405 = vrot.lane.b32.xlu1 %v11379_v41, %s14779_s8 }
 0x7dd   : > { %v4263_v47 = vpop.f32.mrf.mxu2 }
 0x7de   : > { %v4264_v6 = vadd.f32 %v4263_v47, %v4235_v63 }
 0x7e0   : > { %v4293_v19 = vadd.f32 %v4292_v51, %v4264_v6  ;;  %v4295_v16 = vpop.f32.mrf.mxu1  ;;  %v4327_v62 = vpop.f32.mrf.mxu3 }
 0x7e2   : > { %v4322_v5 = vadd.f32 %v4321_v18, %v4293_v19  ;;  %v4356_v18 = vpop.f32.mrf.mxu0 }
 0x7e4   : > { %v4351_v9 = vadd.f32 %v4350_v53, %v4322_v5 }
 0x7e5   : > { %v4266_v33 = vpop.f32.mrf.mxu2 }
 0x7e6   : > { %v4267_v20 = vadd.f32 %v4266_v33, %v4238_v23 }
 0x7e8   : > { %v4296_v26 = vadd.f32 %v4295_v16, %v4267_v20  ;;  %v4298_v42 = vpop.f32.mrf.mxu1  ;;  %v4330_v16 = vpop.f32.mrf.mxu3 }
 0x7ea   : > { %v4325_v47 = vadd.f32 %v4324_v54, %v4296_v26  ;;  %v4359_v20 = vpop.f32.mrf.mxu0 }
 0x7ec   : > { %v4354_v59 = vadd.f32 %v4353_v3, %v4325_v47 }
 0x7ed   : > { %v4269_v49 = vpop.f32.mrf.mxu2 }
 0x7ee   : > { %v4270_v56 = vadd.f32 %v4269_v49, %v4241_v25 }
 0x7f0   : > { %v4299_v33 = vadd.f32 %v4298_v42, %v4270_v56  ;;  %v4301_v57 = vpop.f32.mrf.mxu1 }
 0x7f2   : > { %v4328_v6 = vadd.f32 %v4327_v62, %v4299_v33 }
 0x7f4   : > { %v4357_v49 = vadd.f32 %v4356_v18, %v4328_v6 }
 0x7f5   : > { %v4272_v45 = vpop.f32.mrf.mxu2 }
 0x7f6   : > { %v4273_v12 = vadd.f32 %v4272_v45, %v4244_v14 }
 0x7f8   : > { %v4302_v19 = vadd.f32 %v4301_v57, %v4273_v12 }
 0x7fa   : > { %v4331_v50 = vadd.f32 %v4330_v16, %v4302_v19 }
 0x7fc   : > { %v4360_v39 = vadd.f32 %v4359_v20, %v4331_v50 }
 0x7fd   : > { %v4379_v1 = vpop.f32.mrf.mxu2 }
 0x7fe   : > { %v4380_v13 = vadd.f32 %v4379_v1, %v4351_v9 }
 0x800   : > { %v11386_v63 = vmax.f32 %v4380_v13, 0.0 }
 0x802   : > { %4407 = vrot.lane.b32.xlu2 %v11386_v63, %s14779_s8 }
 0x805   : > { %v4382_v21 = vpop.f32.mrf.mxu2 }
 0x806   : > { %v4383_v51 = vadd.f32 %v4382_v21, %v4354_v59 }
 0x808   : > { %v11391_v53 = vmax.f32 %v4383_v51, 0.0 }
 0x80a   : > { %4409 = vrot.lane.b32.xlu0 %v11391_v53, %s14779_s8 }
 0x80d   : > { %v4385_v23 = vpop.f32.mrf.mxu2 }
 0x80e   : > { %v4386_v5 = vadd.f32 %v4385_v23, %v4357_v49 }
 0x810   : > { %v11395_v61 = vmax.f32 %v4386_v5, 0.0 }
 0x812   : > { %4411 = vrot.lane.b32.xlu1 %v11395_v61, %s14779_s8  ;;  %4439 = vrot.lane.b32.xlu0 %v11364_v29, %s14780_s12 }
 0x815   : > { %v4388_v45 = vpop.f32.mrf.mxu2 }
 0x816   : > { %v4389_v54 = vadd.f32 %v4388_v45, %v4360_v39 }
 0x818   : > { %v11401_v15 = vmax.f32 %v4389_v54, 0.0 }
 0x81a   : > { %4413 = vrot.lane.b32.xlu2 %v11401_v15, %s14779_s8  ;;  %4441 = vrot.lane.b32.xlu1 %v11371_v28, %s14780_s12 }
 0x81b   : > { %4445 = vrot.lane.b32.xlu0 %v11379_v41, %s14780_s12 }
 0x822   : > { %4447 = vrot.lane.b32.xlu1 %v11386_v63, %s14780_s12  ;;  %4443 = vrot.lane.b32.xlu2 %v11375_v52, %s14780_s12 }
 0x823   : > { %4451 = vrot.lane.b32.xlu0 %v11395_v61, %s14780_s12 }
 0x826   : > { %v11463_v9 = vpop.permute.xlu2 %4401 }
 0x827   : > { %15149 = vst [vmem:[#allocation70_spill] sm:$0xff] %v11463_v9 }
 0x82a   : > { %4453 = vrot.lane.b32.xlu1 %v11401_v15, %s14780_s12  ;;  %4449 = vrot.lane.b32.xlu2 %v11391_v53, %s14780_s12 }
 0x82b   : > { %4481 = vrot.lane.b32.xlu0 %v11371_v28, %s14781_s2 }
 0x832   : > { %4483 = vrot.lane.b32.xlu1 %v11375_v52, %s14781_s2  ;;  %4479 = vrot.lane.b32.xlu2 %v11364_v29, %s14781_s2 }
 0x833   : > { %4487 = vrot.lane.b32.xlu0 %v11386_v63, %s14781_s2 }
 0x836   : > { %v11477_v3 = vpop.permute.xlu1 %4399 }
 0x837   : > { %15151 = vst [vmem:[#allocation57_spill] sm:$0xff] %v11477_v3 }
 0x83a   : > { %4489 = vrot.lane.b32.xlu1 %v11391_v53, %s14781_s2  ;;  %4485 = vrot.lane.b32.xlu2 %v11379_v41, %s14781_s2 }
 0x83b   : > { %4493 = vrot.lane.b32.xlu0 %v11401_v15, %s14781_s2 }
 0x842   : > { %4519 = vrot.lane.b32.xlu1 %v11364_v29, %s14783_s7  ;;  %4491 = vrot.lane.b32.xlu2 %v11395_v61, %s14781_s2 }
 0x843   : > { %4523 = vrot.lane.b32.xlu0 %v11375_v52, %s14783_s7 }
 0x846   : > { %v11481_v1 = vpop.permute.xlu0 %4403 }
 0x847   : > { %15152 = vst [vmem:[#allocation101_spill] sm:$0xff] %v11481_v1 }
 0x84a   : > { %4525 = vrot.lane.b32.xlu1 %v11379_v41, %s14783_s7  ;;  %4521 = vrot.lane.b32.xlu2 %v11371_v28, %s14783_s7 }
 0x84b   : > { %4529 = vrot.lane.b32.xlu0 %v11391_v53, %s14783_s7 }
 0x84e   : > { %v11489_v13 = vpop.permute.xlu1 %4405 }
 0x84f   : > { %15154 = vst [vmem:[#allocation88_spill] sm:$0xff] %v11489_v13 }
 0x852   : > { %4531 = vrot.lane.b32.xlu1 %v11395_v61, %s14783_s7  ;;  %4527 = vrot.lane.b32.xlu2 %v11386_v63, %s14783_s7 }
 0x853   : > { %4559 = vrot.lane.b32.xlu0 %v11364_v29, %s14784_s13 }
 0x85a   : > { %4561 = vrot.lane.b32.xlu1 %v11371_v28, %s14784_s13  ;;  %4533 = vrot.lane.b32.xlu2 %v11401_v15, %s14783_s7 }
 0x85b   : > { %4565 = vrot.lane.b32.xlu0 %v11379_v41, %s14784_s13 }
 0x85c   : > { %v11471_v26 = vpop.permute.xlu2 %4407 }
 0x85d   : > { %15150 = vst [vmem:[#allocation103_spill] sm:$0xff] %v11471_v26 }
 0x862   : > { %4567 = vrot.lane.b32.xlu1 %v11386_v63, %s14784_s13  ;;  %4563 = vrot.lane.b32.xlu2 %v11375_v52, %s14784_s13 }
 0x863   : > { %4571 = vrot.lane.b32.xlu0 %v11395_v61, %s14784_s13 }
 0x86a   : > { %4573 = vrot.lane.b32.xlu1 %v11401_v15, %s14784_s13  ;;  %4569 = vrot.lane.b32.xlu2 %v11391_v53, %s14784_s13 }
 0x86b   : > { %4601 = vrot.lane.b32.xlu0 %v11371_v28, %s14788_s27 }
 0x872   : > { %4603 = vrot.lane.b32.xlu1 %v11375_v52, %s14788_s27  ;;  %4599 = vrot.lane.b32.xlu2 %v11364_v29, %s14788_s27 }
 0x873   : > { %4607 = vrot.lane.b32.xlu0 %v11386_v63, %s14788_s27 }
 0x874   : > { %v11483_v25 = vpop.permute.xlu2 %4413 }
 0x875   : > { %15153 = vst [vmem:[#allocation83_spill] sm:$0xff] %v11483_v25 }
 0x87a   : > { %4609 = vrot.lane.b32.xlu1 %v11391_v53, %s14788_s27  ;;  %4605 = vrot.lane.b32.xlu2 %v11379_v41, %s14788_s27 }
 0x87b   : > { %4613 = vrot.lane.b32.xlu0 %v11401_v15, %s14788_s27 }
 0x87c   : > { %v11493_v42 = vpop.permute.xlu0 %4409  ;;  %v11495_v47 = vpop.permute.xlu2 %4443 }
 0x87d   : > { %15155 = vst [vmem:[#allocation64_spill] sm:$0xff] %v11493_v42 }
 0x87e   : > { %15156 = vst [vmem:[#allocation93_spill] sm:$0xff] %v11495_v47 }
 0x882   : > { %4639 = vrot.lane.b32.xlu1 %v11364_v29, %s14432_s21  ;;  %4611 = vrot.lane.b32.xlu2 %v11395_v61, %s14788_s27 }
 0x883   : > { %4643 = vrot.lane.b32.xlu0 %v11375_v52, %s14432_s21 }
 0x884   : > { %v11503_v56 = vpop.permute.xlu1 %4411  ;;  %v11505_v62 = vpop.permute.xlu0 %4439 }
 0x885   : > { %15157 = vst [vmem:[#allocation65_spill] sm:$0xff] %v11503_v56  ;;  %v11507_v30 = vpop.permute.xlu2 %4449 }
 0x886   : > { %15158 = vst [vmem:[#allocation63_spill] sm:$0xff] %v11505_v62 }
 0x887   : > { %15159 = vst [vmem:[#allocation82_spill] sm:$0xff] %v11507_v30 }
 0x88a   : > { %4645 = vrot.lane.b32.xlu1 %v11379_v41, %s14432_s21  ;;  %4641 = vrot.lane.b32.xlu2 %v11371_v28, %s14432_s21 }
 0x88b   : > { %4649 = vrot.lane.b32.xlu0 %v11391_v53, %s14432_s21 }
 0x88c   : > { %v11515_v59 = vpop.permute.xlu1 %4441 }
 0x88d   : > { %15160 = vst [vmem:[#allocation69_spill] sm:$0xff] %v11515_v59  ;;  %v11517_v33 = vpop.permute.xlu0 %4445  ;;  %v11519_v21 = vpop.permute.xlu2 %4479 }
 0x88e   : > { %15161 = vst [vmem:[#allocation76_spill] sm:$0xff] %v11517_v33 }
 0x88f   : > { %15162 = vst [vmem:[#allocation54_spill] sm:$0xff] %v11519_v21 }
 0x892   : > { %4651 = vrot.lane.b32.xlu1 %v11395_v61, %s14432_s21  ;;  %4647 = vrot.lane.b32.xlu2 %v11386_v63, %s14432_s21 }
 0x893   : > { %4679 = vrot.lane.b32.xlu0 %v11364_v29, %s14799_s16 }
 0x894   : > { %v11527_v14 = vpop.permute.xlu1 %4447 }
 0x895   : > { %15163 = vst [vmem:[#allocation56_spill] sm:$0xff] %v11527_v14  ;;  %v11529_v51 = vpop.permute.xlu0 %4451  ;;  %v11531_v18 = vpop.permute.xlu2 %4485 }
 0x896   : > { %15164 = vst [vmem:[#allocation100_spill] sm:$0xff] %v11529_v51 }
 0x89a   : > { %4681 = vrot.lane.b32.xlu1 %v11371_v28, %s14799_s16  ;;  %4653 = vrot.lane.b32.xlu2 %v11401_v15, %s14432_s21 }
 0x89b   : > { %4685 = vrot.lane.b32.xlu0 %v11379_v41, %s14799_s16 }
 0x89c   : > { %v11539_v6 = vpop.permute.xlu1 %4453 }
 0x89d   : > { %15165 = vst [vmem:[#allocation99_spill] sm:$0xff] %v11539_v6  ;;  %v11541_v12 = vpop.permute.xlu0 %4481  ;;  %v11543_v57 = vpop.permute.xlu2 %4491 }
 0x89e   : > { %15166 = vst [vmem:[#allocation129_spill] sm:$0xff] %v11541_v12 }
 0x8a2   : > { %4687 = vrot.lane.b32.xlu1 %v11386_v63, %s14799_s16  ;;  %4683 = vrot.lane.b32.xlu2 %v11375_v52, %s14799_s16 }
 0x8a3   : > { %4691 = vrot.lane.b32.xlu0 %v11395_v61, %s14799_s16 }
 0x8a4   : > { %v11551_v49 = vpop.permute.xlu1 %4483 }
 0x8a5   : > { %15167 = vst [vmem:[#allocation125_spill] sm:$0xff] %v11551_v49  ;;  %v11553_v19 = vpop.permute.xlu0 %4487  ;;  %v11555_v16 = vpop.permute.xlu2 %4521 }
 0x8a6   : > { %15168 = vst [vmem:[#allocation148_spill] sm:$0xff] %v11553_v19 }
 0x8aa   : > { %4693 = vrot.lane.b32.xlu1 %v11401_v15, %s14799_s16  ;;  %4689 = vrot.lane.b32.xlu2 %v11391_v53, %s14799_s16 }
 0x8ab   : > { %4721 = vrot.lane.b32.xlu0 %v11371_v28, %s14805_s15 }
 0x8ac   : > { %v11563_v23 = vpop.permute.xlu1 %4489 }
 0x8ad   : > { %15169 = vst [vmem:[#allocation146_spill] sm:$0xff] %v11563_v23  ;;  %v11565_v5 = vpop.permute.xlu0 %4493  ;;  %v11567_v50 = vpop.permute.xlu2 %4527 }
 0x8ae   : > { %v4502_v27 = vsel %vm537_vm12, %v11565_v5, %v11531_v18 }
 0x8af   : > { %v4509_v2 = vmul.f32 %v4502_v27, %v15177_v17  ;;  %v4462_v27 = vsel %vm521_vm13, %v11539_v6, %v11517_v33 }
 0x8b0   : > { %v4469_v58 = vmul.f32 %v4462_v27, %v15181_v7  ;;  %v4422_v27 = vsel %vm505_vm14, %v11483_v25, %v11489_v13 }
 0x8b1   : > { %v4429_v44 = vmul.f32 %v4422_v27, %v15185_v43 }
 0x8b2   : > { %4723 = vrot.lane.b32.xlu1 %v11375_v52, %s14805_s15  ;;  %4719 = vrot.lane.b32.xlu2 %v11364_v29, %s14805_s15 }
 0x8b3   : > { %4727 = vrot.lane.b32.xlu0 %v11386_v63, %s14805_s15 }
 0x8b4   : > { %v11575_v20 = vpop.permute.xlu1 %4519 }
 0x8b5   : > { %v11577_v39 = vpop.permute.xlu0 %4523  ;;  %v11579_v45 = vpop.permute.xlu2 %4533  ;;  %v4539_v35 = vsel %vm553_vm11, %v11567_v50, %v11575_v20 }
 0x8ba   : > { %4729 = vrot.lane.b32.xlu1 %v11391_v53, %s14805_s15  ;;  %4725 = vrot.lane.b32.xlu2 %v11379_v41, %s14805_s15 }
 0x8bb   : > { %4733 = vrot.lane.b32.xlu0 %v11401_v15, %s14805_s15 }
 0x8bc   : > { %v11587_v54 = vpop.permute.xlu1 %4525 }
 0x8bd   : > { %v4542_v55 = vsel %vm553_vm11, %v11579_v45, %v11587_v54  ;;  %v11593_v4 = vpop.permute.xlu0 %4529  ;;  %v11595_v40 = vpop.permute.xlu2 %4563 }
 0x8be   : > { %15170 = vst [vmem:[#allocation97_spill] sm:$0xff] %v11595_v40  ;;  %v4549_v22 = vmul.f32 %v4542_v55, %v15171_v60 }
 0x8c0   : > { %5599 = vmatpush.msra.mxu1 %v4549_v22  ;;  %v4540_v22 = vsel %vm553_vm11, %v11593_v4, %v11555_v16 }
 0x8c1   : > { %v4545_v46 = vmul.f32 %v4540_v22, %v15171_v60 }
 0x8c2   : > { %4759 = vrot.lane.b32.xlu1 %v11364_v29, %s14457_s29  ;;  %4731 = vrot.lane.b32.xlu2 %v11395_v61, %s14805_s15 }
 0x8c3   : > { %4763 = vrot.lane.b32.xlu0 %v11375_v52, %s14457_s29 }
 0x8c4   : > { %v11604_v38 = vpop.permute.xlu1 %4531 }
 0x8c5   : > { %v4541_v31 = vsel %vm553_vm11, %v11604_v38, %v11577_v39  ;;  %v11610_v8 = vpop.permute.xlu0 %4559  ;;  %v11612_v55 = vpop.permute.xlu2 %4569 }
 0x8c6   : > { %15172 = vst [vmem:[#allocation59_spill] sm:$0xff] %v11610_v8  ;;  %v4547_v36 = vmul.f32 %v4541_v31, %v15171_v60  ;;  %v4543_v31 = vmul.f32 %v4539_v35, %v15171_v60  ;;  %v4499_v60 = vsel %vm537_vm12, %v11553_v19, %v11519_v21 }
 0x8c7   : > { %15173 = vst [vmem:[#allocation60_spill] sm:$0xff] %v11612_v55 }
 0x8c8   : > { %5600 = vmatpush.msra.mxu1 %v4547_v36  ;;  %v4501_v36 = vsel %vm537_vm12, %v11543_v57, %v11551_v49 }
 0x8c9   : > { %v4507_v35 = vmul.f32 %v4501_v36, %v15177_v17  ;;  %v4461_v36 = vsel %vm521_vm13, %v11529_v51, %v11495_v47 }
 0x8ca   : > { %4765 = vrot.lane.b32.xlu1 %v11379_v41, %s14457_s29  ;;  %4761 = vrot.lane.b32.xlu2 %v11371_v28, %s14457_s29 }
 0x8cb   : > { %4769 = vrot.lane.b32.xlu0 %v11391_v53, %s14457_s29  ;;  %5601 = vmatpush.msra.mxu1 %v4545_v46  ;;  %v4500_v46 = vsel %vm537_vm12, %v11563_v23, %v11541_v12 }
 0x8cc   : > { %v11639_v22 = vpop.permute.xlu1 %4561 }
 0x8cd   : > { %15174 = vst [vmem:[#allocation77_spill] sm:$0xff] %v11639_v22  ;;  %v11641_v11 = vpop.permute.xlu0 %4565  ;;  %5602 = vmatpush.msra.mxu1 %v4543_v31  ;;  %v11643_v24 = vpop.permute.xlu2 %4599  ;;  %v4505_v31 = vmul.f32 %v4500_v46, %v15177_v17 }
 0x8ce   : > { %15175 = vst [vmem:[#allocation66_spill] sm:$0xff] %v11641_v11 }
 0x8cf   : > { %15176 = vst [vmem:[#allocation85_spill] sm:$0xff] %v11643_v24  ;;  %5603 = vmatpush.msra.mxu1 %v4509_v2  ;;  %v4503_v2 = vmul.f32 %v4499_v60, %v15177_v17  ;;  %v4467_v60 = vmul.f32 %v4461_v36, %v15181_v7  ;;  %v4459_v17 = vsel %vm521_vm13, %v11527_v14, %v11505_v62 }
 0x8d0   : > { %v4421_v36 = vsel %vm505_vm14, %v11503_v56, %v11481_v1 }
 0x8d1   : > { %5604 = vmatpush.msra.mxu1 %v4507_v35 }
 0x8d2   : > { %4771 = vrot.lane.b32.xlu1 %v11395_v61, %s14457_s29  ;;  %4767 = vrot.lane.b32.xlu2 %v11386_v63, %s14457_s29 }
 0x8d3   : > { %4799 = vrot.lane.b32.xlu0 %v11364_v29, %s14464_s24  ;;  %5605 = vmatpush.msra.mxu1 %v4505_v31  ;;  %v4460_v31 = vsel %vm521_vm13, %v11507_v30, %v11515_v59 }
 0x8d4   : > { %v11671_v46 = vpop.permute.xlu1 %4567 }
 0x8d5   : > { %15178 = vst [vmem:[#allocation67_spill] sm:$0xff] %v11671_v46  ;;  %v11673_v35 = vpop.permute.xlu0 %4571  ;;  %5606 = vmatpush.msra.mxu1 %v4503_v2  ;;  %v11675_v37 = vpop.permute.xlu2 %4605  ;;  %v4465_v2 = vmul.f32 %v4460_v31, %v15181_v7 }
 0x8d6   : > { %15179 = vst [vmem:[#allocation78_spill] sm:$0xff] %v11673_v35 }
 0x8d7   : > { %15180 = vst [vmem:[#allocation104_spill] sm:$0xff] %v11675_v37  ;;  %5607 = vmatpush.msra.mxu1 %v4469_v58  ;;  %v4463_v58 = vmul.f32 %v4459_v17, %v15181_v7  ;;  %v4427_v17 = vmul.f32 %v4421_v36, %v15185_v43  ;;  %v4419_v7 = vsel %vm505_vm14, %v11471_v26, %v11477_v3 }
 0x8d9   : > { %5608 = vmatpush.msra.mxu1 %v4467_v60 }
 0x8da   : > { %4801 = vrot.lane.b32.xlu1 %v11371_v28, %s14464_s24  ;;  %4773 = vrot.lane.b32.xlu2 %v11401_v15, %s14457_s29 }
 0x8db   : > { %4805 = vrot.lane.b32.xlu0 %v11379_v41, %s14464_s24  ;;  %5609 = vmatpush.msra.mxu1 %v4465_v2  ;;  %v4420_v2 = vsel %vm505_vm14, %v11493_v42, %v11463_v9 }
 0x8dc   : > { %v11703_v31 = vpop.permute.xlu1 %4573 }
 0x8dd   : > { %15182 = vst [vmem:[#allocation71_spill] sm:$0xff] %v11703_v31  ;;  %v11705_v60 = vpop.permute.xlu0 %4601  ;;  %5610 = vmatpush.msra.mxu1 %v4463_v58  ;;  %v11707_v48 = vpop.permute.xlu2 %4611  ;;  %v4425_v58 = vmul.f32 %v4420_v2, %v15185_v43 }
 0x8de   : > { %15183 = vst [vmem:[#allocation98_spill] sm:$0xff] %v11705_v60 }
 0x8df   : > { %15184 = vst [vmem:[#allocation58_spill] sm:$0xff] %v11707_v48  ;;  %5611 = vmatpush.msra.mxu1 %v4429_v44  ;;  %v4423_v44 = vmul.f32 %v4419_v7, %v15185_v43 }
 0x8e1   : > { %5612 = vmatpush.msra.mxu1 %v4427_v17 }
 0x8e2   : > { %4807 = vrot.lane.b32.xlu1 %v11386_v63, %s14464_s24  ;;  %4803 = vrot.lane.b32.xlu2 %v11375_v52, %s14464_s24 }
 0x8e3   : > { %4811 = vrot.lane.b32.xlu0 %v11395_v61, %s14464_s24  ;;  %5613 = vmatpush.msra.mxu1 %v4425_v58 }
 0x8e4   : > { %v11727_v27 = vpop.permute.xlu1 %4603 }
 0x8e5   : > { %15186 = vst [vmem:[#allocation91_spill] sm:$0xff] %v11727_v27  ;;  %v11729_v36 = vpop.permute.xlu0 %4607  ;;  %5614 = vmatpush.msra.mxu1 %v4423_v44  ;;  %v11731_v17 = vpop.permute.xlu2 %4641 }
 0x8e6   : > { %15187 = vst [vmem:[#allocation86_spill] sm:$0xff] %v11729_v36 }
 0x8e7   : > { %15188 = vst [vmem:[#allocation74_spill] sm:$0xff] %v11731_v17 }
 0x8ea   : > { %4813 = vrot.lane.b32.xlu1 %v11401_v15, %s14464_s24  ;;  %4809 = vrot.lane.b32.xlu2 %v11391_v53, %s14464_s24 }
 0x8eb   : > { %4841 = vrot.lane.b32.xlu0 %v11371_v28, %s14472_s26 }
 0x8ec   : > { %v11739_v2 = vpop.permute.xlu1 %4609 }
 0x8ed   : > { %15189 = vst [vmem:[#allocation92_spill] sm:$0xff] %v11739_v2  ;;  %v11741_v58 = vpop.permute.xlu0 %4613  ;;  %v11743_v7 = vpop.permute.xlu2 %4647 }
 0x8ee   : > { %15190 = vst [vmem:[#allocation73_spill] sm:$0xff] %v11741_v58 }
 0x8ef   : > { %15191 = vst [vmem:[#allocation94_spill] sm:$0xff] %v11743_v7 }
 0x8f2   : > { %4843 = vrot.lane.b32.xlu1 %v11375_v52, %s14472_s26  ;;  %4839 = vrot.lane.b32.xlu2 %v11364_v29, %s14472_s26 }
 0x8f3   : > { %4847 = vrot.lane.b32.xlu0 %v11386_v63, %s14472_s26 }
 0x8f4   : > { %v11751_v44 = vpop.permute.xlu1 %4639 }
 0x8f5   : > { %15192 = vst [vmem:[#allocation87_spill] sm:$0xff] %v11751_v44  ;;  %v11753_v43 = vpop.permute.xlu0 %4643  ;;  %v11755_v3 = vpop.permute.xlu2 %4653 }
 0x8f6   : > { %15193 = vst [vmem:[#allocation79_spill] sm:$0xff] %v11753_v43 }
 0x8f7   : > { %15194 = vst [vmem:[#allocation55_spill] sm:$0xff] %v11755_v3 }
 0x8fa   : > { %4849 = vrot.lane.b32.xlu1 %v11391_v53, %s14472_s26  ;;  %4845 = vrot.lane.b32.xlu2 %v11379_v41, %s14472_s26 }
 0x8fb   : > { %4853 = vrot.lane.b32.xlu0 %v11401_v15, %s14472_s26 }
 0x8fc   : > { %v11763_v26 = vpop.permute.xlu1 %4645 }
 0x8fd   : > { %15195 = vst [vmem:[#allocation68_spill] sm:$0xff] %v11763_v26  ;;  %v11765_v9 = vpop.permute.xlu0 %4649  ;;  %v11767_v42 = vpop.permute.xlu2 %4683 }
 0x8fe   : > { %15196 = vst [vmem:[#allocation96_spill] sm:$0xff] %v11765_v9 }
 0x8ff   : > { %15197 = vst [vmem:[#allocation62_spill] sm:$0xff] %v11767_v42 }
 0x902   : > { %4887 = vrot.lane.b32.xlu1 %v11364_v29, %s14478_s11  ;;  %4851 = vrot.lane.b32.xlu2 %v11395_v61, %s14472_s26 }
 0x903   : > { %4891 = vrot.lane.b32.xlu0 %v11375_v52, %s14478_s11 }
 0x904   : > { %v11775_v1 = vpop.permute.xlu1 %4651 }
 0x905   : > { %15198 = vst [vmem:[#allocation151_spill] sm:$0xff] %v11775_v1  ;;  %v11777_v56 = vpop.permute.xlu0 %4679  ;;  %v11779_v13 = vpop.permute.xlu2 %4689 }
 0x906   : > { %15199 = vst [vmem:[#allocation95_spill] sm:$0xff] %v11777_v56 }
 0x907   : > { %15200 = vst [vmem:[#allocation110_spill] sm:$0xff] %v11779_v13 }
 0x90a   : > { %4893 = vrot.lane.b32.xlu1 %v11379_v41, %s14478_s11  ;;  %4889 = vrot.lane.b32.xlu2 %v11371_v28, %s14478_s11 }
 0x90b   : > { %4897 = vrot.lane.b32.xlu0 %v11391_v53, %s14478_s11 }
 0x90c   : > { %v11787_v25 = vpop.permute.xlu1 %4681 }
 0x90d   : > { %15201 = vst [vmem:[#allocation152_spill] sm:$0xff] %v11787_v25  ;;  %v11789_v62 = vpop.permute.xlu0 %4685  ;;  %v11791_v14 = vpop.permute.xlu2 %4719  ;;  %v4700_v23 = vsel %vm617_vm7, %v11779_v13, %v11787_v25 }
 0x90e   : > { %15202 = vst [vmem:[#allocation61_spill] sm:$0xff] %v11789_v62 }
 0x90f   : > { %15203 = vst [vmem:[#allocation80_spill] sm:$0xff] %v11791_v14 }
 0x912   : > { %4899 = vrot.lane.b32.xlu1 %v11395_v61, %s14478_s11  ;;  %4895 = vrot.lane.b32.xlu2 %v11386_v63, %s14478_s11 }
 0x913   : > { %4927 = vrot.lane.b32.xlu0 %v11364_v29, %s14485_s25 }
 0x914   : > { %v11799_v59 = vpop.permute.xlu1 %4687 }
 0x915   : > { %15204 = vst [vmem:[#allocation111_spill] sm:$0xff] %v11799_v59  ;;  %v11801_v30 = vpop.permute.xlu0 %4691  ;;  %v11803_v47 = vpop.permute.xlu2 %4725 }
 0x916   : > { %15205 = vst [vmem:[#allocation112_spill] sm:$0xff] %v11803_v47  ;;  %v4701_v19 = vsel %vm617_vm7, %v11801_v30, %v11767_v42 }
 0x917   : > { %v4707_v49 = vmul.f32 %v4701_v19, %v15208_v10 }
 0x91a   : > { %4929 = vrot.lane.b32.xlu1 %v11371_v28, %s14485_s25  ;;  %4901 = vrot.lane.b32.xlu2 %v11401_v15, %s14478_s11 }
 0x91b   : > { %4933 = vrot.lane.b32.xlu0 %v11379_v41, %s14485_s25 }
 0x91c   : > { %v11811_v51 = vpop.permute.xlu1 %4693 }
 0x91d   : > { %v4702_v33 = vsel %vm617_vm7, %v11811_v51, %v11789_v62  ;;  %v11817_v6 = vpop.permute.xlu0 %4721  ;;  %v11819_v21 = vpop.permute.xlu2 %4731  ;;  %v4699_v62 = vsel %vm617_vm7, %v11799_v59, %v11777_v56 }
 0x91e   : > { %15206 = vst [vmem:[#allocation89_spill] sm:$0xff] %v11817_v6  ;;  %v4709_v12 = vmul.f32 %v4702_v33, %v15208_v10  ;;  %v4705_v33 = vmul.f32 %v4700_v23, %v15208_v10  ;;  %v4703_v25 = vmul.f32 %v4699_v62, %v15208_v10  ;;  %v15212_v23 = vld [vmem:[#allocation22_spill] sm:$0xff]  ;;  %v4659_v62 = vsel %vm601_vm8, %v11743_v7, %v11751_v44 }
 0x91f   : > { %15207 = vst [vmem:[#allocation149_spill] sm:$0xff] %v11819_v21  ;;  %v4663_v44 = vmul.f32 %v4659_v62, %v15212_v23  ;;  %v4619_v62 = vsel %vm585_vm9, %v11729_v36, %v11643_v24 }
 0x920   : > { %5622 = vmatpush.msra.mxu3 %v4709_v12  ;;  %v4662_v12 = vsel %vm601_vm8, %v11755_v3, %v11763_v26  ;;  %v4660_v26 = vsel %vm601_vm8, %v11765_v9, %v11731_v17 }
 0x921   : > { %v4669_v13 = vmul.f32 %v4662_v12, %v15212_v23 }
 0x922   : > { %4935 = vrot.lane.b32.xlu1 %v11386_v63, %s14485_s25  ;;  %4931 = vrot.lane.b32.xlu2 %v11375_v52, %s14485_s25 }
 0x923   : > { %4939 = vrot.lane.b32.xlu0 %v11395_v61, %s14485_s25  ;;  %5623 = vmatpush.msra.mxu3 %v4707_v49  ;;  %v4661_v49 = vsel %vm601_vm8, %v11775_v1, %v11753_v43  ;;  %v15233_v43 = vld [vmem:[#allocation12_spill] sm:$0xff] }
 0x924   : > { %v11846_v19 = vpop.permute.xlu1 %4723 }
 0x925   : > { %15209 = vst [vmem:[#allocation115_spill] sm:$0xff] %v11846_v19  ;;  %v11848_v56 = vpop.permute.xlu0 %4727  ;;  %5624 = vmatpush.msra.mxu3 %v4705_v33  ;;  %v11850_v59 = vpop.permute.xlu2 %4761  ;;  %v4667_v33 = vmul.f32 %v4661_v49, %v15212_v23 }
 0x926   : > { %15210 = vst [vmem:[#allocation137_spill] sm:$0xff] %v11848_v56 }
 0x927   : > { %15211 = vst [vmem:[#allocation105_spill] sm:$0xff] %v11850_v59  ;;  %5625 = vmatpush.msra.mxu3 %v4703_v25  ;;  %v4665_v25 = vmul.f32 %v4660_v26, %v15212_v23  ;;  %v15216_v26 = vld [vmem:[#allocation24_spill] sm:$0xff] }
 0x928   : > { %v4623_v24 = vmul.f32 %v4619_v62, %v15216_v26  ;;  %v4579_v62 = vsel %vm569_vm10, %v11671_v46, %v11610_v8 }
 0x929   : > { %5626 = vmatpush.msra.mxu3 %v4669_v13  ;;  %v4622_v13 = vsel %vm585_vm9, %v11741_v58, %v11675_v37  ;;  %v4620_v37 = vsel %vm585_vm9, %v11739_v2, %v11705_v60 }
 0x92a   : > { %4941 = vrot.lane.b32.xlu1 %v11401_v15, %s14485_s25  ;;  %4937 = vrot.lane.b32.xlu2 %v11391_v53, %s14485_s25  ;;  %v4629_v7 = vmul.f32 %v4622_v13, %v15216_v26 }
 0x92b   : > { %4969 = vrot.lane.b32.xlu0 %v11371_v28, %s14493_s30  ;;  %5627 = vmatpush.msra.mxu3 %v4667_v33  ;;  %v4621_v33 = vsel %vm585_vm9, %v11707_v48, %v11727_v27 }
 0x92c   : > { %v11878_v12 = vpop.permute.xlu1 %4729 }
 0x92d   : > { %15213 = vst [vmem:[#allocation150_spill] sm:$0xff] %v11878_v12  ;;  %v11880_v49 = vpop.permute.xlu0 %4733  ;;  %5628 = vmatpush.msra.mxu3 %v4665_v25  ;;  %v11882_v10 = vpop.permute.xlu2 %4767  ;;  %v4627_v25 = vmul.f32 %v4621_v33, %v15216_v26 }
 0x92e   : > { %15214 = vst [vmem:[#allocation128_spill] sm:$0xff] %v11880_v49 }
 0x92f   : > { %15215 = vst [vmem:[#allocation119_spill] sm:$0xff] %v11882_v10  ;;  %5629 = vmatpush.msra.mxu3 %v4663_v44  ;;  %v4625_v44 = vmul.f32 %v4620_v37, %v15216_v26  ;;  %v15219_v37 = vld [vmem:[#allocation26_spill] sm:$0xff] }
 0x930   : > { %v4583_v26 = vmul.f32 %v4579_v62, %v15219_v37 }
 0x931   : > { %5630 = vmatpush.msra.mxu3 %v4629_v7  ;;  %v4582_v7 = vsel %vm569_vm10, %v11703_v31, %v11641_v11  ;;  %v4580_v11 = vsel %vm569_vm10, %v11612_v55, %v11639_v22 }
 0x932   : > { %4973 = vrot.lane.b32.xlu1 %v11379_v41, %s14493_s30  ;;  %4967 = vrot.lane.b32.xlu2 %v11364_v29, %s14493_s30  ;;  %v4589_v36 = vmul.f32 %v4582_v7, %v15219_v37 }
 0x933   : > { %4971 = vrot.lane.b32.xlu0 %v11375_v52, %s14493_s30  ;;  %5631 = vmatpush.msra.mxu3 %v4627_v25  ;;  %v4581_v25 = vsel %vm569_vm10, %v11673_v35, %v11595_v40 }
 0x934   : > { %v11910_v13 = vpop.permute.xlu1 %4759 }
 0x935   : > { %15217 = vst [vmem:[#allocation102_spill] sm:$0xff] %v11910_v13  ;;  %v11912_v33 = vpop.permute.xlu0 %4763  ;;  %5632 = vmatpush.msra.mxu3 %v4625_v44  ;;  %v11914_v23 = vpop.permute.xlu2 %4773  ;;  %v4587_v44 = vmul.f32 %v4581_v25, %v15219_v37 }
 0x936   : > { %15218 = vst [vmem:[#allocation72_spill] sm:$0xff] %v11912_v33 }
 0x937   : > { %5633 = vmatpush.msra.mxu3 %v4623_v24  ;;  %v4585_v24 = vmul.f32 %v4580_v11, %v15219_v37 }
 0x939   : > { %5634 = vmatpush.msra.mxu3 %v4589_v36 }
 0x93a   : > { %4979 = vrot.lane.b32.xlu1 %v11395_v61, %s14493_s30  ;;  %4981 = vrot.lane.b32.xlu2 %v11401_v15, %s14493_s30 }
 0x93b   : > { %4975 = vrot.lane.b32.xlu0 %v11386_v63, %s14493_s30  ;;  %5635 = vmatpush.msra.mxu3 %v4587_v44 }
 0x93c   : > { %v11938_v36 = vpop.permute.xlu1 %4765 }
 0x93d   : > { %15220 = vst [vmem:[#allocation118_spill] sm:$0xff] %v11938_v36  ;;  %v11940_v7 = vpop.permute.xlu0 %4769  ;;  %5636 = vmatpush.msra.mxu3 %v4585_v24  ;;  %v11942_v25 = vpop.permute.xlu2 %4803 }
 0x93e   : > { %15221 = vst [vmem:[#allocation134_spill] sm:$0xff] %v11940_v7 }
 0x93f   : > { %5637 = vmatpush.msra.mxu3 %v4583_v26 }
 0x942   : > { %5133 = vrot.lane.b32.xlu1 %v11379_v41, %s14548_s20  ;;  %4977 = vrot.lane.b32.xlu2 %v11391_v53, %s14493_s30 }
 0x943   : > { %5131 = vrot.lane.b32.xlu0 %v11375_v52, %s14548_s20 }
 0x944   : > { %v11951_v11 = vpop.permute.xlu1 %4771 }
 0x945   : > { %15222 = vst [vmem:[#allocation132_spill] sm:$0xff] %v11951_v11  ;;  %v11953_v44 = vpop.permute.xlu0 %4799  ;;  %v11955_v8 = vpop.permute.xlu2 %4809 }
 0x946   : > { %15223 = vst [vmem:[#allocation107_spill] sm:$0xff] %v11953_v44 }
 0x94a   : > { %5139 = vrot.lane.b32.xlu1 %v11395_v61, %s14548_s20  ;;  %5141 = vrot.lane.b32.xlu2 %v11401_v15, %s14548_s20 }
 0x94b   : > { %5137 = vrot.lane.b32.xlu0 %v11391_v53, %s14548_s20 }
 0x94c   : > { %v11963_v26 = vpop.permute.xlu1 %4801 }
 0x94d   : > { %v11965_v62 = vpop.permute.xlu0 %4805  ;;  %v11967_v24 = vpop.permute.xlu2 %4839 }
 0x94e   : > { %15224 = vst [vmem:[#allocation116_spill] sm:$0xff] %v11965_v62 }
 0x94f   : > { %15225 = vst [vmem:[#allocation121_spill] sm:$0xff] %v11967_v24 }
 0x952   : > { %5293 = vrot.lane.b32.xlu1 %v11379_v41, %s14582_s1  ;;  %5129 = vrot.lane.b32.xlu2 %v11371_v28, %s14548_s20 }
 0x953   : > { %5127 = vrot.lane.b32.xlu0 %v11364_v29, %s14548_s20 }
 0x954   : > { %v11975_v37 = vpop.permute.xlu1 %4807 }
 0x955   : > { %15226 = vst [vmem:[#allocation136_spill] sm:$0xff] %v11975_v37  ;;  %v11977_v46 = vpop.permute.xlu0 %4811  ;;  %v11979_v22 = vpop.permute.xlu2 %4845 }
 0x95a   : > { %5135 = vrot.lane.b32.xlu1 %v11386_v63, %s14548_s20  ;;  %5301 = vrot.lane.b32.xlu2 %v11401_v15, %s14582_s1 }
 0x95b   : > { %5299 = vrot.lane.b32.xlu0 %v11395_v61, %s14582_s1 }
 0x95c   : > { %v11987_v55 = vpop.permute.xlu1 %4813 }
 0x95d   : > { %v11989_v40 = vpop.permute.xlu0 %4841  ;;  %v11991_v35 = vpop.permute.xlu2 %4851 }
 0x95e   : > { %15227 = vst [vmem:[#allocation133_spill] sm:$0xff] %v11989_v40 }
 0x962   : > { %5093 = vrot.lane.b32.xlu1 %v11379_v41, %s14536_s22  ;;  %5291 = vrot.lane.b32.xlu2 %v11375_v52, %s14582_s1 }
 0x963   : > { %5289 = vrot.lane.b32.xlu0 %v11371_v28, %s14582_s1 }
 0x964   : > { %v11999_v31 = vpop.permute.xlu1 %4843 }
 0x965   : > { %15228 = vst [vmem:[#allocation135_spill] sm:$0xff] %v11999_v31  ;;  %v12001_v60 = vpop.permute.xlu0 %4847  ;;  %v12003_v2 = vpop.permute.xlu2 %4889  ;;  %v4861_v17 = vsel %vm681_vm3, %v11991_v35, %v11999_v31 }
 0x966   : > { %15229 = vst [vmem:[#allocation138_spill] sm:$0xff] %v12001_v60  ;;  %v4867_v42 = vmul.f32 %v4861_v17, %v15233_v43  ;;  %v4859_v31 = vsel %vm681_vm3, %v12001_v60, %v11967_v24 }
 0x967   : > { %15230 = vst [vmem:[#allocation106_spill] sm:$0xff] %v12003_v2 }
 0x96a   : > { %5297 = vrot.lane.b32.xlu1 %v11391_v53, %s14582_s1  ;;  %5101 = vrot.lane.b32.xlu2 %v11401_v15, %s14536_s22 }
 0x96b   : > { %5099 = vrot.lane.b32.xlu0 %v11395_v61, %s14536_s22 }
 0x96c   : > { %v12011_v27 = vpop.permute.xlu1 %4849 }
 0x96d   : > { %15231 = vst [vmem:[#allocation109_spill] sm:$0xff] %v12011_v27  ;;  %v12013_v48 = vpop.permute.xlu0 %4853  ;;  %v12015_v58 = vpop.permute.xlu2 %4895  ;;  %v4860_v3 = vsel %vm681_vm3, %v12011_v27, %v11989_v40  ;;  %v4863_v40 = vmul.f32 %v4859_v31, %v15233_v43  ;;  %v4819_v31 = vsel %vm665_vm4, %v11975_v37, %v11953_v44 }
 0x96e   : > { %15232 = vst [vmem:[#allocation139_spill] sm:$0xff] %v12015_v58  ;;  %v4862_v9 = vsel %vm681_vm3, %v12013_v48, %v11979_v22 }
 0x96f   : > { %v4869_v1 = vmul.f32 %v4862_v9, %v15233_v43  ;;  %v4865_v9 = vmul.f32 %v4860_v3, %v15233_v43  ;;  %v15237_v3 = vld [vmem:[#allocation14_spill] sm:$0xff] }
 0x970   : > { %v4823_v44 = vmul.f32 %v4819_v31, %v15237_v3  ;;  %v4779_v31 = vsel %vm15245_vm1, %v11882_v10, %v11910_v13  ;;  %vm15257_vm1 = vcmp.lt.s32.totalorder %v7177_v34, 114 }
 0x971   : > { %5645 = vmatpush.msra.mxu0 %v4869_v1  ;;  %v4822_v1 = vsel %vm665_vm4, %v11987_v55, %v11965_v62  ;;  %v4820_v62 = vsel %vm665_vm4, %v11955_v8, %v11963_v26 }
 0x972   : > { %5287 = vrot.lane.b32.xlu1 %v11364_v29, %s14582_s1  ;;  %5091 = vrot.lane.b32.xlu2 %v11375_v52, %s14536_s22  ;;  %v4829_v27 = vmul.f32 %v4822_v1, %v15237_v3 }
 0x973   : > { %5089 = vrot.lane.b32.xlu0 %v11371_v28, %s14536_s22  ;;  %5646 = vmatpush.msra.mxu0 %v4867_v42  ;;  %v4821_v42 = vsel %vm665_vm4, %v11977_v46, %v11942_v25 }
 0x974   : > { %v12046_v17 = vpop.permute.xlu1 %4887 }
 0x975   : > { %15234 = vst [vmem:[#allocation108_spill] sm:$0xff] %v12046_v17  ;;  %v12048_v24 = vpop.permute.xlu0 %4891  ;;  %5647 = vmatpush.msra.mxu0 %v4865_v9  ;;  %v12050_v60 = vpop.permute.xlu2 %4901  ;;  %v4827_v9 = vmul.f32 %v4821_v42, %v15237_v3 }
 0x976   : > { %15235 = vst [vmem:[#allocation113_spill] sm:$0xff] %v12048_v24 }
 0x977   : > { %15236 = vst [vmem:[#allocation122_spill] sm:$0xff] %v12050_v60  ;;  %5648 = vmatpush.msra.mxu0 %v4863_v40  ;;  %v4825_v40 = vmul.f32 %v4820_v62, %v15237_v3  ;;  %v15243_v62 = vld [vmem:[#allocation16_spill] sm:$0xff] }
 0x978   : > { %v4783_v13 = vmul.f32 %v4779_v31, %v15243_v62 }
 0x979   : > { %5649 = vmatpush.msra.mxu0 %v4829_v27  ;;  %v4782_v27 = vsel %vm15238_vm6, %v11914_v23, %v11938_v36  ;;  %v4780_v36 = vsel %vm15244_vm0, %v11940_v7, %v11850_v59  ;;  %vm15248_vm6 = vmmov %vm15246_vm15 }
 0x97a   : > { %5097 = vrot.lane.b32.xlu1 %v11391_v53, %s14536_s22  ;;  %5295 = vrot.lane.b32.xlu2 %v11386_v63, %s14582_s1  ;;  %v4789_v37 = vmul.f32 %v4782_v27, %v15243_v62 }
 0x97b   : > { %5261 = vrot.lane.b32.xlu0 %v11401_v15, %s14579_s0  ;;  %5650 = vmatpush.msra.mxu0 %v4827_v9  ;;  %v4781_v9 = vsel %vm15242_vm5, %v11951_v11, %v11912_v33  ;;  %vm15250_vm5 = vmmov %vm15248_vm6 }
 0x97c   : > { %v12078_v1 = vpop.permute.xlu1 %4893  ;;  %vm15251_vm0 = vmmov %vm15250_vm5 }
 0x97d   : > { %15239 = vst [vmem:[#allocation117_spill] sm:$0xff] %v12078_v1  ;;  %v12080_v42 = vpop.permute.xlu0 %4897  ;;  %5651 = vmatpush.msra.mxu0 %v4825_v40  ;;  %v12082_v43 = vpop.permute.xlu2 %4931  ;;  %v4787_v40 = vmul.f32 %v4781_v9, %v15243_v62  ;;  %v4739_v31 = vsel %vm15251_vm0, %v11848_v56, %v11791_v14  ;;  %vm15264_vm0 = vcmp.lt.s32.totalorder %v7177_v34, 126 }
 0x97e   : > { %15240 = vst [vmem:[#allocation143_spill] sm:$0xff] %v12080_v42 }
 0x97f   : > { %15241 = vst [vmem:[#allocation140_spill] sm:$0xff] %v12082_v43  ;;  %5652 = vmatpush.msra.mxu0 %v4823_v44  ;;  %v4785_v44 = vmul.f32 %v4780_v36, %v15243_v62  ;;  %v15249_v36 = vld [vmem:[#allocation18_spill] sm:$0xff] }
 0x980   : > { %v4743_v62 = vmul.f32 %v4739_v31, %v15249_v36 }
 0x981   : > { %5653 = vmatpush.msra.mxu0 %v4789_v37  ;;  %v4742_v37 = vsel %vm15246_vm15, %v11880_v49, %v11803_v47  ;;  %v4740_v47 = vsel %vm15250_vm5, %v11878_v12, %v11817_v6  ;;  %vm15260_vm15 = vmmov %vm15257_vm1 }
 0x982   : > { %5087 = vrot.lane.b32.xlu1 %v11364_v29, %s14536_s22  ;;  %5253 = vrot.lane.b32.xlu2 %v11379_v41, %s14579_s0  ;;  %v4749_v10 = vmul.f32 %v4742_v37, %v15249_v36  ;;  %vm15263_vm5 = vmmov %vm15257_vm1 }
 0x983   : > { %5251 = vrot.lane.b32.xlu0 %v11375_v52, %s14579_s0  ;;  %5654 = vmatpush.msra.mxu0 %v4787_v40  ;;  %v4741_v40 = vsel %vm15248_vm6, %v11819_v21, %v11846_v19  ;;  %v15258_v19 = vld [vmem:[#allocation6_spill] sm:$0xff]  ;;  %vm15262_vm6 = vmmov %vm15257_vm1 }
 0x984   : > { %v12110_v27 = vpop.permute.xlu1 %4899 }
 0x985   : > { %15247 = vst [vmem:[#allocation130_spill] sm:$0xff] %v12110_v27  ;;  %v12112_v9 = vpop.permute.xlu0 %4927  ;;  %5655 = vmatpush.msra.mxu0 %v4785_v44  ;;  %v12114_v3 = vpop.permute.xlu2 %4937  ;;  %v4747_v44 = vmul.f32 %v4741_v40, %v15249_v36 }
 0x987   : > { %5656 = vmatpush.msra.mxu0 %v4783_v13  ;;  %v4745_v13 = vmul.f32 %v4740_v47, %v15249_v36 }
 0x989   : > { %5657 = vmatpush.msra.mxu0 %v4749_v10 }
 0x98a   : > { %5259 = vrot.lane.b32.xlu1 %v11395_v61, %s14579_s0  ;;  %5095 = vrot.lane.b32.xlu2 %v11386_v63, %s14536_s22 }
 0x98b   : > { %5061 = vrot.lane.b32.xlu0 %v11401_v15, %s14527_s23  ;;  %5658 = vmatpush.msra.mxu0 %v4747_v44 }
 0x98c   : > { %v12138_v10 = vpop.permute.xlu1 %4929 }
 0x98d   : > { %v12140_v37 = vpop.permute.xlu0 %4933  ;;  %5659 = vmatpush.msra.mxu0 %v4745_v13  ;;  %v12142_v40 = vpop.permute.xlu2 %4967 }
 0x98e   : > { %15252 = vst [vmem:[#allocation145_spill] sm:$0xff] %v12140_v37 }
 0x98f   : > { %15253 = vst [vmem:[#allocation124_spill] sm:$0xff] %v12142_v40  ;;  %5660 = vmatpush.msra.mxu0 %v4743_v62 }
 0x992   : > { %5249 = vrot.lane.b32.xlu1 %v11371_v28, %s14579_s0  ;;  %5053 = vrot.lane.b32.xlu2 %v11379_v41, %s14527_s23 }
 0x993   : > { %5051 = vrot.lane.b32.xlu0 %v11375_v52, %s14527_s23 }
 0x994   : > { %v12151_v47 = vpop.permute.xlu1 %4935 }
 0x995   : > { %v12153_v44 = vpop.permute.xlu0 %4939  ;;  %v12155_v14 = vpop.permute.xlu2 %4981 }
 0x996   : > { %15254 = vst [vmem:[#allocation114_spill] sm:$0xff] %v12153_v44 }
 0x997   : > { %15255 = vst [vmem:[#allocation123_spill] sm:$0xff] %v12155_v14 }
 0x99a   : > { %5059 = vrot.lane.b32.xlu1 %v11395_v61, %s14527_s23  ;;  %5257 = vrot.lane.b32.xlu2 %v11391_v53, %s14579_s0 }
 0x99b   : > { %5255 = vrot.lane.b32.xlu0 %v11386_v63, %s14579_s0 }
 0x99c   : > { %v12163_v62 = vpop.permute.xlu1 %4941 }
 0x99d   : > { %15256 = vst [vmem:[#allocation127_spill] sm:$0xff] %v12163_v62  ;;  %v12165_v31 = vpop.permute.xlu0 %4969  ;;  %v12167_v13 = vpop.permute.xlu2 %4977 }
 0x9a2   : > { %5049 = vrot.lane.b32.xlu1 %v11371_v28, %s14527_s23  ;;  %5247 = vrot.lane.b32.xlu2 %v11364_v29, %s14579_s0 }
 0x9a3   : > { %5213 = vrot.lane.b32.xlu0 %v11379_v41, %s14563_s18 }
 0x9a4   : > { %v12175_v36 = vpop.permute.xlu1 %4973 }
 0x9a5   : > { %v4986_v56 = vsel %vm15257_vm1, %v12175_v36, %v12155_v14  ;;  %v12181_v6 = vpop.permute.xlu0 %4971  ;;  %v12183_v12 = vpop.permute.xlu2 %5141  ;;  %vm15265_vm1 = vmmov %vm15264_vm0 }
 0x9a6   : > { %v4997_v21 = vmul.f32 %v4986_v56, %v15258_v19 }
 0x9a8   : > { %5668 = vmatpush.msra.mxu2 %v4997_v21  ;;  %v4984_v21 = vsel %vm15262_vm6, %v12165_v31, %v12167_v13  ;;  %vm15268_vm6 = vmmov %vm15264_vm0 }
 0x9a9   : > { %v4993_v14 = vmul.f32 %v4984_v21, %v15258_v19 }
 0x9aa   : > { %5221 = vrot.lane.b32.xlu1 %v11401_v15, %s14563_s18  ;;  %5057 = vrot.lane.b32.xlu2 %v11391_v53, %s14527_s23 }
 0x9ab   : > { %5055 = vrot.lane.b32.xlu0 %v11386_v63, %s14527_s23 }
 0x9ac   : > { %v12192_v49 = vpop.permute.xlu1 %4979 }
 0x9ad   : > { %15259 = vst [vmem:[#allocation126_spill] sm:$0xff] %v12192_v49  ;;  %v4985_v59 = vsel %vm15260_vm15, %v12181_v6, %v12192_v49  ;;  %v12198_v7 = vpop.permute.xlu0 %4975  ;;  %v12200_v56 = vpop.permute.xlu2 %5129  ;;  %v4946_v49 = vsel %vm15264_vm0, %v12140_v37, %v12163_v62  ;;  %vm15266_vm15 = vcmp.lt.s32.totalorder %v7177_v34, 110 }
 0x9ae   : > { %15261 = vst [vmem:[#allocation84_spill] sm:$0xff] %v12198_v7  ;;  %v4995_v33 = vmul.f32 %v4985_v59, %v15258_v19  ;;  %v4983_v11 = vsel %vm15263_vm5, %v12142_v40, %v12198_v7  ;;  %vm15269_vm5 = vmmov %vm15264_vm0  ;;  %vm15270_vm0 = vcmp.lt.s32.totalorder %v7177_v34, 127 }
 0x9af   : > { %v4991_v59 = vmul.f32 %v4983_v11, %v15258_v19  ;;  %v4944_v11 = vsel %vm15268_vm6, %v12138_v10, %v12114_v3  ;;  %vm15273_vm6 = vmmov %vm15270_vm0 }
 0x9b0   : > { %5669 = vmatpush.msra.mxu2 %v4995_v33  ;;  %v4945_v33 = vsel %vm15265_vm1, %v12082_v43, %v12153_v44  ;;  %v4943_v43 = vsel %vm15269_vm5, %v12112_v9, %v12151_v47  ;;  %vm15271_vm1 = vmmov %vm15270_vm0 }
 0x9b1   : > { %vm15274_vm5 = vmmov %vm15266_vm15 }
 0x9b2   : > { %5211 = vrot.lane.b32.xlu1 %v11375_v52, %s14563_s18  ;;  %5047 = vrot.lane.b32.xlu2 %v11364_v29, %s14527_s23 }
 0x9b3   : > { %5333 = vrot.lane.b32.xlu0 %v11379_v41, %s14603_s17  ;;  %5670 = vmatpush.msra.mxu2 %v4993_v14  ;;  %v15267_v14 = vld [vmem:[#allocation8_spill] sm:$0xff] }
 0x9b4   : > { %v12227_v21 = vpop.permute.xlu1 %5133  ;;  %v4957_v40 = vmul.f32 %v4946_v49, %v15267_v14  ;;  %v4955_v44 = vmul.f32 %v4945_v33, %v15267_v14  ;;  %v4906_v49 = vsel %vm15270_vm0, %v12078_v1, %v12050_v60  ;;  %v15298_v1 = vld [vmem:[#allocation93_spill] sm:$0xff] }
 0x9b5   : > { %v5146_v62 = vsel %vm15266_vm15, %v12227_v21, %v12183_v12  ;;  %v12233_v37 = vpop.permute.xlu0 %5131  ;;  %5671 = vmatpush.msra.mxu2 %v4991_v59  ;;  %v12235_v7 = vpop.permute.xlu2 %5301  ;;  %v4953_v59 = vmul.f32 %v4944_v11, %v15267_v14 }
 0x9b6   : > { %v5157_v19 = vmul.f32 %v5146_v62, %v14951_v32 }
 0x9b7   : > { %5672 = vmatpush.msra.mxu2 %v4957_v40  ;;  %v4905_v40 = vsel %vm15271_vm1, %v12048_v24, %v12110_v27  ;;  %vm15277_vm1 = vcmp.lt.s32.totalorder %v7177_v34, 95 }
 0x9b8   : > { %5691 = vmatpush.msrb.mxu1 %v5157_v19  ;;  %v4951_v19 = vmul.f32 %v4943_v43, %v15267_v14  ;;  %v4904_v43 = vsel %vm15273_vm6, %v12003_v2, %v12080_v42  ;;  %vm15283_vm6 = vmmov %vm15277_vm1 }
 0x9b9   : > { %5673 = vmatpush.msra.mxu2 %v4955_v44 }
 0x9ba   : > { %5341 = vrot.lane.b32.xlu1 %v11401_v15, %s14603_s17  ;;  %5219 = vrot.lane.b32.xlu2 %v11395_v61, %s14563_s18 }
 0x9bb   : > { %5021 = vrot.lane.b32.xlu0 %v11401_v15, %s14521_s14  ;;  %5674 = vmatpush.msra.mxu2 %v4953_v59  ;;  %v15272_v59 = vld [vmem:[#allocation10_spill] sm:$0xff] }
 0x9bc   : > { %v12264_v44 = vpop.permute.xlu1 %5139  ;;  %v4917_v60 = vmul.f32 %v4906_v49, %v15272_v59  ;;  %v4915_v24 = vmul.f32 %v4905_v40, %v15272_v59  ;;  %v4903_v49 = vsel %vm15270_vm0, %v12046_v17, %v12015_v58  ;;  %vm15304_vm0 = vmmov %vm15277_vm1 }
 0x9bd   : > { %v5145_v62 = vsel %vm15266_vm15, %v12233_v37, %v12264_v44  ;;  %v12270_v33 = vpop.permute.xlu0 %5137  ;;  %5675 = vmatpush.msra.mxu2 %v4951_v19  ;;  %v12272_v11 = vpop.permute.xlu2 %5291  ;;  %v4913_v19 = vmul.f32 %v4904_v43, %v15272_v59  ;;  %vm15281_vm15 = vmmov %vm15274_vm5 }
 0x9be   : > { %v5155_v14 = vmul.f32 %v5145_v62, %v14951_v32  ;;  %v5144_v27 = vsel %vm15274_vm5, %v12200_v56, %v12270_v33  ;;  %vm15290_vm5 = vcmp.lt.s32.totalorder %v7177_v34, 111 }
 0x9bf   : > { %5676 = vmatpush.msra.mxu2 %v4917_v60  ;;  %v5153_v62 = vmul.f32 %v5144_v27, %v14951_v32  ;;  %v4911_v60 = vmul.f32 %v4903_v49, %v15272_v59  ;;  %v12349_v59 = vld [vmem:[%s15275_s6 + $0x18] sm:$0xff] }
 0x9c0   : > { %5692 = vmatpush.msrb.mxu1 %v5155_v14  ;;  %15280 = vst [vmem:[#allocation141_spill] sm:$0xff] %v12349_v59 }
 0x9c1   : > { %5677 = vmatpush.msra.mxu2 %v4915_v24  ;;  %v12301_v24 = vld [vmem:[%s15275_s6 + $0x8] sm:$0xff] }
 0x9c2   : > { %5209 = vrot.lane.b32.xlu1 %v11371_v28, %s14563_s18  ;;  %5013 = vrot.lane.b32.xlu2 %v11379_v41, %s14521_s14  ;;  %15276 = vst [vmem:[#allocation120_spill] sm:$0xff] %v12301_v24 }
 0x9c3   : > { %5331 = vrot.lane.b32.xlu0 %v11375_v52, %s14603_s17  ;;  %5678 = vmatpush.msra.mxu2 %v4913_v19  ;;  %v12318_v19 = vld [vmem:[%s15275_s6] sm:$0xff] }
 0x9c4   : > { %5693 = vmatpush.msrb.mxu1 %v5153_v62  ;;  %v12303_v14 = vpop.permute.xlu1 %5293  ;;  %5638 = vmatmul.f32.vlgmr.msra.gmra.mxu3 %v12301_v24  ;;  %v4538_v62 = vsel %vm553_vm11, %v11587_v54, %v11579_v45  ;;  %v12341_v45 = vld [vmem:[%s15275_s6 + $0x10] sm:$0xff]  ;;  %v15279_v54 = vld [vmem:[#allocation29_spill] sm:$0xff] }
 0x9c5   : > { %v5306_v27 = vsel %vm15277_vm1, %v12303_v14, %v12235_v7  ;;  %v12310_v40 = vpop.permute.xlu0 %5127  ;;  %5679 = vmatpush.msra.mxu2 %v4911_v60  ;;  %v12312_v43 = vpop.permute.xlu2 %5101  ;;  %5615 = vmatmul.f32.vlgmr.msra.gmra.mxu1 %v12318_v19  ;;  %v4537_v60 = vsel %vm553_vm11, %v11577_v39, %v11604_v38  ;;  %15278 = vst [vmem:[#allocation147_spill] sm:$0xff] %v12341_v45  ;;  %v15296_v24 = vld [vmem:[#allocation76_spill] sm:$0xff]  ;;  %vm15305_vm1 = vmmov %vm15290_vm5 }
 0x9c6   : > { %v5317_v49 = vmul.f32 %v5306_v27, %v15023_v0  ;;  %v4550_v27 = vmul.f32 %v4538_v62, %v15279_v54  ;;  %5661 = vmatmul.f32.vlgmr.msra.gmra.mxu0 %v12341_v45  ;;  %v4536_v38 = vsel %vm553_vm11, %v11555_v16, %v11593_v4  ;;  %v4548_v42 = vmul.f32 %v4537_v60, %v15279_v54 }
 0x9c7   : > { %5680 = vmatpush.msra.mxu2 %v11379_v41  ;;  %v4535_v16 = vsel %vm553_vm11, %v11575_v20, %v11567_v50  ;;  %v4546_v45 = vmul.f32 %v4536_v38, %v15279_v54  ;;  %v4498_v60 = vsel %vm537_vm12, %v11531_v18, %v11565_v5  ;;  %v15284_v20 = vld [vmem:[#allocation125_spill] sm:$0xff]  ;;  %v15285_v5 = vld [vmem:[#allocation31_spill] sm:$0xff] }
 0x9c8   : > { %5714 = vmatpush.msrb.mxu3 %v5317_v49  ;;  %v4544_v50 = vmul.f32 %v4535_v16, %v15279_v54 }
 0x9c9   : > { %5681 = vmatpush.msra.mxu2 %v11375_v52 }
 0x9ca   : > { %5339 = vrot.lane.b32.xlu1 %v11395_v61, %s14603_s17  ;;  %5217 = vrot.lane.b32.xlu2 %v11391_v53, %s14563_s18 }
 0x9cb   : > { %5019 = vrot.lane.b32.xlu0 %v11395_v61, %s14521_s14  ;;  %5682 = vmatpush.msra.mxu2 %v11371_v28 }
 0x9cc   : > { %v12344_v49 = vpop.permute.xlu1 %5135 }
 0x9cd   : > { %v5143_v39 = vsel %vm15281_vm15, %v12310_v40, %v12344_v49  ;;  %v12360_v62 = vpop.permute.xlu0 %5299  ;;  %5683 = vmatpush.msra.mxu2 %v11364_v29  ;;  %v12363_v58 = vpop.permute.xlu2 %5091  ;;  %vm15316_vm15 = vmmov %vm15304_vm0 }
 0x9ce   : > { %15282 = vst [vmem:[#allocation131_spill] sm:$0xff] %v12360_v62  ;;  %v5305_v17 = vsel %vm15283_vm6, %v12272_v11, %v12360_v62  ;;  %v5151_v4 = vmul.f32 %v5143_v39, %v14951_v32  ;;  %5684 = vmatmul.f32.vlgmr.msra.gmra.mxu2 %v12349_v59  ;;  %v15294_v32 = vld [vmem:[#allocation54_spill] sm:$0xff]  ;;  %v15309_v62 = vld [vmem:[#allocation88_spill] sm:$0xff]  ;;  %vm15319_vm6 = vcmp.lt.s32.totalorder %v7177_v34, 110 }
 0x9cf   : > { %5760 = vmatpush.msrb.mxu2 %v4550_v27  ;;  %v5315_v2 = vmul.f32 %v5305_v17, %v15023_v0  ;;  %v4497_v17 = vsel %vm537_vm12, %v15284_v20, %v11543_v57  ;;  %v12404_v57 = vld [vmem:[%s15275_s6 + $0x40] sm:$0xff]  ;;  %v15292_v20 = vld [vmem:[#allocation48_spill] sm:$0xff] }
 0x9d0   : > { %5694 = vmatpush.msrb.mxu1 %v5151_v4  ;;  %15287 = vst [vmem:[#allocation144_spill] sm:$0xff] %v12404_v57  ;;  %v15289_v27 = vld [vmem:[#allocation129_spill] sm:$0xff]  ;;  %5641 = vmatmul.f32.gmra.mxu3 %v12404_v57  ;;  %v15295_v57 = vld [vmem:[#allocation99_spill] sm:$0xff] }
 0x9d1   : > { %5761 = vmatpush.msrb.mxu2 %v4548_v42  ;;  %5715 = vmatpush.msrb.mxu3 %v5315_v2  ;;  %v4510_v2 = vmul.f32 %v4498_v60, %v15285_v5  ;;  %v12399_v42 = vld [vmem:[%s15275_s6 + $0x50] sm:$0xff]  ;;  %v12422_v60 = vld [vmem:[%s15275_s6 + $0x38] sm:$0xff] }
 0x9d2   : > { %5207 = vrot.lane.b32.xlu1 %v11364_v29, %s14563_s18  ;;  %5011 = vrot.lane.b32.xlu2 %v11375_v52, %s14521_s14  ;;  %15286 = vst [vmem:[#allocation142_spill] sm:$0xff] %v12399_v42 }
 0x9d3   : > { %5762 = vmatpush.msrb.mxu2 %v4546_v45  ;;  %5329 = vrot.lane.b32.xlu0 %v11371_v28, %s14603_s17  ;;  %v15288_v45 = vld [vmem:[#allocation146_spill] sm:$0xff] }
 0x9d4   : > { %v12393_v18 = vpop.permute.xlu1 %5093  ;;  %v4496_v38 = vsel %vm537_vm12, %v15289_v27, %v15288_v45  ;;  %5618 = vmatmul.f32.gmra.mxu1 %v12422_v60  ;;  %v15293_v27 = vld [vmem:[#allocation148_spill] sm:$0xff] }
 0x9d5   : > { %5763 = vmatpush.msrb.mxu2 %v4544_v50  ;;  %v5106_v39 = vsel %vm15290_vm5, %v12393_v18, %v12312_v43  ;;  %v12414_v4 = vpop.permute.xlu0 %5289  ;;  %v12416_v16 = vpop.permute.xlu2 %5295  ;;  %v4508_v50 = vmul.f32 %v4497_v17, %v15285_v5  ;;  %v4495_v54 = vsel %vm537_vm12, %v15294_v32, %v15293_v27  ;;  %v4506_v59 = vmul.f32 %v4496_v38, %v15285_v5  ;;  %vm15320_vm5 = vmmov %vm15319_vm6 }
 0x9d6   : > { %15291 = vst [vmem:[#allocation81_spill] sm:$0xff] %v12414_v4  ;;  %v5117_v45 = vmul.f32 %v5106_v39, %v15292_v20  ;;  %5687 = vmatmul.f32.gmra.mxu2 %v12399_v42  ;;  %v4458_v17 = vsel %vm521_vm13, %v15296_v24, %v15295_v57  ;;  %v15297_v39 = vld [vmem:[#allocation100_spill] sm:$0xff]  ;;  %v15302_v57 = vld [vmem:[#allocation82_spill] sm:$0xff] }
 0x9d7   : > { %5764 = vmatpush.msrb.mxu2 %v4510_v2  ;;  %v4504_v2 = vmul.f32 %v4495_v54, %v15285_v5  ;;  %v4457_v32 = vsel %vm521_vm13, %v15298_v1, %v15297_v39  ;;  %v12454_v54 = vld [vmem:[%s15275_s6 + $0x48] sm:$0xff] }
 0x9d8   : > { %5695 = vmatpush.msrb.mxu1 %v5117_v45  ;;  %15301 = vst [vmem:[#allocation90_spill] sm:$0xff] %v12454_v54  ;;  %5664 = vmatmul.f32.gmra.mxu0 %v12454_v54  ;;  %v15307_v5 = vld [vmem:[#allocation63_spill] sm:$0xff] }
 0x9d9   : > { %5765 = vmatpush.msrb.mxu2 %v4508_v50  ;;  %v15303_v50 = vld [vmem:[#allocation69_spill] sm:$0xff] }
 0x9da   : > { %5337 = vrot.lane.b32.xlu1 %v11391_v53, %s14603_s17  ;;  %5215 = vrot.lane.b32.xlu2 %v11386_v63, %s14563_s18  ;;  %v4456_v1 = vsel %vm521_vm13, %v15303_v50, %v15302_v57  ;;  %v15306_v50 = vld [vmem:[#allocation56_spill] sm:$0xff] }
 0x9db   : > { %5766 = vmatpush.msrb.mxu2 %v4506_v59  ;;  %5017 = vrot.lane.b32.xlu0 %v11391_v53, %s14521_s14  ;;  %v15300_v59 = vld [vmem:[#allocation33_spill] sm:$0xff]  ;;  %v4455_v42 = vsel %vm521_vm13, %v15307_v5, %v15306_v50 }
 0x9dc   : > { %v12448_v38 = vpop.permute.xlu1 %5297  ;;  %v4470_v24 = vmul.f32 %v4458_v17, %v15300_v59  ;;  %v4468_v39 = vmul.f32 %v4457_v32, %v15300_v59  ;;  %v4466_v54 = vmul.f32 %v4456_v1, %v15300_v59  ;;  %v4464_v32 = vmul.f32 %v4455_v42, %v15300_v59  ;;  %v15312_v5 = vld [vmem:[#allocation101_spill] sm:$0xff] }
 0x9dd   : > { %5767 = vmatpush.msrb.mxu2 %v4504_v2  ;;  %15299 = vst [vmem:[#allocation75_spill] sm:$0xff] %v12448_v38  ;;  %v5304_v45 = vsel %vm15304_vm0, %v12414_v4, %v12448_v38  ;;  %v12464_v27 = vpop.permute.xlu0 %5099  ;;  %v12466_v2 = vpop.permute.xlu2 %5253  ;;  %v15308_v4 = vld [vmem:[#allocation83_spill] sm:$0xff]  ;;  %vm15322_vm0 = vmmov %vm15320_vm5  ;;  %v15408_v59 = vld [vmem:[#allocation25_spill] sm:$0xff] }
 0x9de   : > { %v5105_v17 = vsel %vm15305_vm1, %v12363_v58, %v12464_v27  ;;  %v5313_v57 = vmul.f32 %v5304_v45, %v15023_v0  ;;  %v15311_v45 = vld [vmem:[#allocation65_spill] sm:$0xff] }
 0x9df   : > { %5768 = vmatpush.msrb.mxu2 %v4470_v24  ;;  %v5115_v38 = vmul.f32 %v5105_v17, %v15292_v20  ;;  %v4418_v24 = vsel %vm505_vm14, %v15309_v62, %v15308_v4  ;;  %v4417_v17 = vsel %vm505_vm14, %v15312_v5, %v15311_v45  ;;  %v15313_v4 = vld [vmem:[#allocation35_spill] sm:$0xff]  ;;  %v15318_v5 = vld [vmem:[#allocation57_spill] sm:$0xff] }
 0x9e0   : > { %5716 = vmatpush.msrb.mxu3 %v5313_v57  ;;  %v4428_v50 = vmul.f32 %v4417_v17, %v15313_v4  ;;  %v15317_v45 = vld [vmem:[#allocation103_spill] sm:$0xff] }
 0x9e1   : > { %5769 = vmatpush.msrb.mxu2 %v4468_v39  ;;  %5696 = vmatpush.msrb.mxu1 %v5115_v38  ;;  %v4430_v38 = vmul.f32 %v4418_v24, %v15313_v4  ;;  %v4415_v24 = vsel %vm505_vm14, %v15318_v5, %v15317_v45 }
 0x9e2   : > { %5173 = vrot.lane.b32.xlu1 %v11379_v41, %s15310_s19  ;;  %5009 = vrot.lane.b32.xlu2 %v11371_v28, %s14521_s14  ;;  %v15315_v41 = vld [vmem:[#allocation70_spill] sm:$0xff]  ;;  %v4424_v17 = vmul.f32 %v4415_v24, %v15313_v4 }
 0x9e3   : > { %5770 = vmatpush.msrb.mxu2 %v4466_v54  ;;  %5327 = vrot.lane.b32.xlu0 %v11364_v29, %s14603_s17  ;;  %v15314_v54 = vld [vmem:[#allocation64_spill] sm:$0xff] }
 0x9e4   : > { %v12496_v62 = vpop.permute.xlu1 %5287  ;;  %v4416_v42 = vsel %vm505_vm14, %v15315_v41, %v15314_v54  ;;  %v5150_v41 = vsel %vm15319_vm6, %v12183_v12, %v12227_v21  ;;  %v5148_v21 = vsel %vm15322_vm0, %v12270_v33, %v12200_v56  ;;  %vm15324_vm6 = vmmov %vm15322_vm0  ;;  %v15325_v33 = vld [vmem:[#allocation40_spill] sm:$0xff] }
 0x9e5   : > { %5771 = vmatpush.msrb.mxu2 %v4464_v32  ;;  %v5303_v1 = vsel %vm15316_vm15, %v12496_v62, %v12416_v16  ;;  %v5090_v39 = vpop.permute.xlu0 %5089  ;;  %v5096_v57 = vpop.permute.xlu2 %5095  ;;  %v4426_v54 = vmul.f32 %v4416_v42, %v15313_v4  ;;  %v15321_v42 = vld [vmem:[#allocation47_spill] sm:$0xff]  ;;  %vm15323_vm15 = vcmp.lt.s32.totalorder %v7177_v34, 96  ;;  %v5147_v56 = vsel %vm15324_vm6, %v12344_v49, %v12310_v40  ;;  %vm15327_vm0 = vmmov %vm15305_vm1  ;;  %v15328_v49 = vld [vmem:[#allocation49_spill] sm:$0xff] }
 0x9e6   : > { %v5311_v32 = vmul.f32 %v5303_v1, %v15023_v0  ;;  %v5158_v1 = vmul.f32 %v5150_v41, %v15321_v42  ;;  %v5152_v41 = vmul.f32 %v5147_v56, %v15321_v42  ;;  %v5109_v40 = vsel %vm15327_vm0, %v12464_v27, %v12363_v58  ;;  %vm15331_vm6 = vmmov %vm15327_vm0 }
 0x9e7   : > { %5772 = vmatpush.msrb.mxu2 %v4430_v38  ;;  %v5149_v38 = vsel %vm15320_vm5, %v12264_v44, %v12233_v37  ;;  %vm15326_vm5 = vmmov %vm15305_vm1 }
 0x9e8   : > { %5717 = vmatpush.msrb.mxu3 %v5311_v32  ;;  %v5156_v45 = vmul.f32 %v5149_v38, %v15321_v42 }
 0x9e9   : > { %5773 = vmatpush.msrb.mxu2 %v4428_v50 }
 0x9ea   : > { %5335 = vrot.lane.b32.xlu1 %v11386_v63, %s14603_s17  ;;  %5181 = vrot.lane.b32.xlu2 %v11401_v15, %s15310_s19 }
 0x9eb   : > { %5774 = vmatpush.msrb.mxu2 %v4426_v54  ;;  %5015 = vrot.lane.b32.xlu0 %v11386_v63, %s14521_s14  ;;  %v5110_v54 = vsel %vm15326_vm5, %v12312_v43, %v12393_v18  ;;  %vm15332_vm5 = vcmp.lt.s32.totalorder %v7177_v34, 96 }
 0x9ec   : > { %v5098_v12 = vpop.permute.xlu1 %5097  ;;  %v5118_v18 = vmul.f32 %v5110_v54, %v15328_v49  ;;  %v15337_v54 = vld [vmem:[#allocation51_spill] sm:$0xff] }
 0x9ed   : > { %5775 = vmatpush.msrb.mxu2 %v4424_v17  ;;  %v5104_v50 = vsel %vm15305_vm1, %v5090_v39, %v5098_v12  ;;  %v12536_v32 = vpop.permute.xlu0 %5261  ;;  %v5054_v37 = vpop.permute.xlu2 %5053  ;;  %vm15329_vm1 = vmmov %vm15327_vm0 }
 0x9ee   : > { %5776 = vmatmul.f32.vlgmr.msrb.gmra.mxu2 %v12318_v19  ;;  %v5266_v44 = vsel %vm15323_vm15, %v12466_v2, %v12536_v32  ;;  %v5113_v5 = vmul.f32 %v5104_v50, %v15292_v20  ;;  %v5154_v19 = vmul.f32 %v5148_v21, %v15321_v42  ;;  %vm15330_vm15 = vmmov %vm15327_vm0 }
 0x9ef   : > { %5852 = vmatpush.msra.mxu2 %v5158_v1  ;;  %v5277_v24 = vmul.f32 %v5266_v44, %v15325_v33  ;;  %vm15333_vm0 = vmmov %vm15332_vm5 }
 0x9f0   : > { %5697 = vmatpush.msrb.mxu1 %v5113_v5 }
 0x9f1   : > { %5853 = vmatpush.msra.mxu2 %v5156_v45  ;;  %5718 = vmatpush.msrb.mxu3 %v5277_v24  ;;  %v15336_v24 = vld [vmem:[#allocation50_spill] sm:$0xff] }
 0x9f2   : > { %5171 = vrot.lane.b32.xlu1 %v11375_v52, %s15310_s19  ;;  %5007 = vrot.lane.b32.xlu2 %v11364_v29, %s14521_s14  ;;  %v5108_v52 = vsel %vm15329_vm1, %v5098_v12, %v5090_v39  ;;  %vm15334_vm1 = vcmp.lt.s32.totalorder %v7177_v34, 112 }
 0x9f3   : > { %5854 = vmatpush.msra.mxu2 %v5154_v19  ;;  %5169 = vrot.lane.b32.xlu0 %v11371_v28, %s15310_s19  ;;  %v5116_v28 = vmul.f32 %v5109_v40, %v15328_v49  ;;  %v5114_v21 = vmul.f32 %v5108_v52, %v15328_v49  ;;  %v5582_v40 = vld [vmem:[%s15338_s28 + $0x8] sm:$0xff] }
 0x9f4   : > { %v5088_v43 = vpop.permute.xlu1 %5087 }
 0x9f5   : > { %5855 = vmatpush.msra.mxu2 %v5152_v41  ;;  %v5103_v17 = vsel %vm15330_vm15, %v5088_v43, %v5096_v57  ;;  %v5252_v38 = vpop.permute.xlu0 %5251  ;;  %v5258_v58 = vpop.permute.xlu2 %5257  ;;  %v5107_v1 = vsel %vm15331_vm6, %v5096_v57, %v5088_v43  ;;  %vm15335_vm15 = vmmov %vm15334_vm1 }
 0x9f6   : > { %5779 = vmatmul.f32.gmra.mxu2 %v12422_v60  ;;  %v5111_v27 = vmul.f32 %v5103_v17, %v15292_v20  ;;  %v5112_v39 = vmul.f32 %v5107_v1, %v15328_v49  ;;  %vm15339_vm6 = vmmov %vm15333_vm0 }
 0x9f7   : > { %5856 = vmatpush.msra.mxu2 %v5118_v18 }
 0x9f8   : > { %5698 = vmatpush.msrb.mxu1 %v5111_v27 }
 0x9f9   : > { %5857 = vmatpush.msra.mxu2 %v5116_v28  ;;  %v5581_v28 = vld [vmem:[%s15338_s28] sm:$0xff] }
 0x9fa   : > { %5177 = vrot.lane.b32.xlu1 %v11391_v53, %s15310_s19  ;;  %5179 = vrot.lane.b32.xlu2 %v11395_v61, %s15310_s19 }
 0x9fb   : > { %5858 = vmatpush.msra.mxu2 %v5114_v21  ;;  %5175 = vrot.lane.b32.xlu0 %v11386_v63, %s15310_s19 }
 0x9fc   : > { %v5260_v60 = vpop.permute.xlu1 %5259 }
 0x9fd   : > { %5859 = vmatpush.msra.mxu2 %v5112_v39  ;;  %v5265_v57 = vsel %vm15332_vm5, %v5252_v38, %v5260_v60  ;;  %v12588_v12 = vsel %vm15333_vm0, %v5260_v60, %v5252_v38  ;;  %v5062_v50 = vpop.permute.xlu0 %5061  ;;  %v5248_v44 = vpop.permute.xlu2 %5247  ;;  %vm15340_vm5 = vmmov %vm15333_vm0 }
 0x9fe   : > { %v5275_v45 = vmul.f32 %v5265_v57, %v15325_v33  ;;  %v5066_v5 = vsel %vm15334_vm1, %v5054_v37, %v5062_v50  ;;  %v5070_v56 = vsel %vm15335_vm15, %v5062_v50, %v5054_v37  ;;  %vm15341_vm0 = vmmov %vm15334_vm1 }
 0x9ff   : > { %v5077_v19 = vmul.f32 %v5066_v5, %v15336_v24  ;;  %v5078_v41 = vmul.f32 %v5070_v56, %v15337_v54  ;;  %vm15342_vm1 = vmmov %vm15341_vm0 }
 0xa00   : > { %5719 = vmatpush.msrb.mxu3 %v5275_v45  ;;  %vm15343_vm15 = vmmov %vm15340_vm5 }
 0xa01   : > { %5699 = vmatpush.msrb.mxu1 %v5077_v19  ;;  %5860 = vmatpush.msra.mxu2 %v5078_v41 }
 0xa02   : > { %5590 = vperm.xlu1 %6892, %v5582_v40   ;;  %5167 = vrot.lane.b32.xlu2 %v11364_v29, %s15310_s19 }
 0xa04   : > { %v5250_v43 = vpop.permute.xlu1 %5249 }
 0xa05   : > { %v5264_v18 = vsel %vm15339_vm6, %v5250_v43, %v5258_v58  ;;  %v12606_v37 = vsel %vm15340_vm5, %v5258_v58, %v5250_v43  ;;  %v5052_v52 = vpop.permute.xlu0 %5051  ;;  %v5058_v17 = vpop.permute.xlu2 %5057  ;;  %vm15344_vm6 = vmmov %vm15340_vm5 }
 0xa06   : > { %v5273_v38 = vmul.f32 %v5264_v18, %v15325_v33  ;;  %vm15345_vm5 = vmmov %vm15341_vm0 }
 0xa08   : > { %5720 = vmatpush.msrb.mxu3 %v5273_v38 }
 0xa0a   : > { %5585 = vperm.xlu2 %6893, %v5581_v28  }
 0xa0c   : > { %v5060_v27 = vpop.permute.xlu1 %5059 }
 0xa0d   : > { %v5065_v29 = vsel %vm15341_vm0, %v5052_v52, %v5060_v27  ;;  %v5069_v1 = vsel %vm15342_vm1, %v5060_v27, %v5052_v52  ;;  %v5256_v21 = vpop.permute.xlu0 %5255  ;;  %v5048_v58 = vpop.permute.xlu2 %5047  ;;  %vm15346_vm1 = vcmp.lt.s32.totalorder %v7177_v34, 97 }
 0xa0e   : > { %v5075_v39 = vmul.f32 %v5065_v29, %v15336_v24  ;;  %v5076_v60 = vmul.f32 %v5069_v1, %v15337_v54  ;;  %v5263_v57 = vsel %vm15343_vm15, %v5248_v44, %v5256_v21  ;;  %v12622_v50 = vsel %vm15344_vm6, %v5256_v21, %v5248_v44  ;;  %vm15347_vm15 = vmmov %vm15346_vm1  ;;  %v15348_v29 = vld [vmem:[#allocation42_spill] sm:$0xff] }
 0xa0f   : > { %v5271_v45 = vmul.f32 %v5263_v57, %v15325_v33  ;;  %vm15349_vm6 = vmmov %vm15341_vm0  ;;  %v15379_v33 = vld [vmem:[#allocation95_spill] sm:$0xff] }
 0xa10   : > { %5700 = vmatpush.msrb.mxu1 %v5075_v39  ;;  %5861 = vmatpush.msra.mxu2 %v5076_v60 }
 0xa11   : > { %5721 = vmatpush.msrb.mxu3 %v5271_v45 }
 0xa14   : > { %v5050_v5 = vpop.permute.xlu1 %5049 }
 0xa15   : > { %v5064_v56 = vsel %vm15345_vm5, %v5050_v5, %v5058_v17  ;;  %v5068_v19 = vsel %vm15341_vm0, %v5058_v17, %v5050_v5  ;;  %v5214_v41 = vpop.permute.xlu0 %5213  ;;  %v5220_v40 = vpop.permute.xlu2 %5219  ;;  %vm15350_vm5 = vmmov %vm15341_vm0 }
 0xa16   : > { %v5073_v43 = vmul.f32 %v5064_v56, %v15336_v24  ;;  %v5074_v18 = vmul.f32 %v5068_v19, %v15337_v54  ;;  %vm15351_vm0 = vmmov %vm15346_vm1 }
 0xa18   : > { %5701 = vmatpush.msrb.mxu1 %v5073_v43  ;;  %5862 = vmatpush.msra.mxu2 %v5074_v18 }
 0xa1c   : > { %v5222_v44 = vpop.permute.xlu1 %5221 }
 0xa1d   : > { %v5226_v52 = vsel %vm15346_vm1, %v5214_v41, %v5222_v44  ;;  %v12635_v38 = vsel %vm15347_vm15, %v5222_v44, %v5214_v41  ;;  %v5056_v28 = vpop.permute.xlu0 %5055  ;;  %v5014_v27 = vpop.permute.xlu2 %5013  ;;  %vm15352_vm1 = vmmov %vm15351_vm0  ;;  %vm15353_vm15 = vcmp.lt.s32.totalorder %v7177_v34, 94 }
 0xa1e   : > { %v5237_v17 = vmul.f32 %v5226_v52, %v15348_v29  ;;  %v5063_v1 = vsel %vm15349_vm6, %v5048_v58, %v5056_v28  ;;  %v5067_v21 = vsel %vm15350_vm5, %v5056_v28, %v5048_v58  ;;  %vm15354_vm6 = vmmov %vm15353_vm15  ;;  %v15355_v52 = vld [vmem:[#allocation36_spill] sm:$0xff]  ;;  %vm15356_vm5 = vcmp.lt.s32.totalorder %v7177_v34, 113 }
 0xa1f   : > { %v5071_v39 = vmul.f32 %v5063_v1, %v15336_v24  ;;  %v5072_v60 = vmul.f32 %v5067_v21, %v15337_v54  ;;  %v15358_v1 = vld [vmem:[#allocation52_spill] sm:$0xff] }
 0xa20   : > { %5722 = vmatpush.msrb.mxu3 %v5237_v17  ;;  %v15367_v24 = vld [vmem:[#allocation44_spill] sm:$0xff] }
 0xa21   : > { %5702 = vmatpush.msrb.mxu1 %v5071_v39  ;;  %5863 = vmatpush.msra.mxu2 %v5072_v60  ;;  %v15359_v39 = vld [vmem:[#allocation53_spill] sm:$0xff] }
 0xa24   : > { %v5212_v57 = vpop.permute.xlu1 %5211 }
 0xa25   : > { %v5225_v45 = vsel %vm15351_vm0, %v5212_v57, %v5220_v40  ;;  %v12648_v5 = vsel %vm15352_vm1, %v5220_v40, %v5212_v57  ;;  %v5334_v56 = vpop.permute.xlu0 %5333  ;;  %v5218_v41 = vpop.permute.xlu2 %5217  ;;  %vm15357_vm0 = vmmov %vm15356_vm5 }
 0xa26   : > { %v5235_v19 = vmul.f32 %v5225_v45, %v15348_v29 }
 0xa28   : > { %5723 = vmatpush.msrb.mxu3 %v5235_v19 }
 0xa2c   : > { %v5342_v58 = vpop.permute.xlu1 %5341 }
 0xa2d   : > { %v5346_v43 = vsel %vm15353_vm15, %v5334_v56, %v5342_v58  ;;  %v12655_v18 = vsel %vm15354_vm6, %v5342_v58, %v5334_v56  ;;  %v5022_v44 = vpop.permute.xlu0 %5021  ;;  %v5012_v57 = vpop.permute.xlu2 %5011  ;;  %vm15360_vm15 = vmmov %vm15352_vm1 }
 0xa2e   : > { %v5357_v28 = vmul.f32 %v5346_v43, %v15355_v52  ;;  %v5026_v40 = vsel %vm15356_vm5, %v5014_v27, %v5022_v44  ;;  %v5030_v17 = vsel %vm15357_vm0, %v5022_v44, %v5014_v27  ;;  %vm15361_vm5 = vmmov %vm15354_vm6 }
 0xa2f   : > { %v5037_v21 = vmul.f32 %v5026_v40, %v15358_v1  ;;  %v5038_v60 = vmul.f32 %v5030_v17, %v15359_v39 }
 0xa30   : > { %5749 = vmatpush.msrb.mxu0 %v5357_v28 }
 0xa31   : > { %5703 = vmatpush.msrb.mxu1 %v5037_v21  ;;  %5864 = vmatpush.msra.mxu2 %v5038_v60 }
 0xa34   : > { %v5210_v45 = vpop.permute.xlu1 %5209 }
 0xa35   : > { %v5224_v56 = vsel %vm15352_vm1, %v5210_v45, %v5218_v41  ;;  %v12668_v19 = vsel %vm15360_vm15, %v5218_v41, %v5210_v45  ;;  %v5332_v58 = vpop.permute.xlu0 %5331  ;;  %v5216_v27 = vpop.permute.xlu2 %5215  ;;  %vm15362_vm1 = vmmov %vm15357_vm0 }
 0xa36   : > { %v5233_v43 = vmul.f32 %v5224_v56, %v15348_v29 }
 0xa38   : > { %5724 = vmatpush.msrb.mxu3 %v5233_v43 }
 0xa3c   : > { %v5340_v44 = vpop.permute.xlu1 %5339 }
 0xa3d   : > { %v5345_v28 = vsel %vm15354_vm6, %v5332_v58, %v5340_v44  ;;  %v12675_v40 = vsel %vm15361_vm5, %v5340_v44, %v5332_v58  ;;  %v5020_v17 = vpop.permute.xlu0 %5019  ;;  %v5010_v54 = vpop.permute.xlu2 %5009  ;;  %vm15363_vm6 = vmmov %vm15360_vm15 }
 0xa3e   : > { %v5355_v21 = vmul.f32 %v5345_v28, %v15355_v52  ;;  %v5025_v41 = vsel %vm15357_vm0, %v5012_v57, %v5020_v17  ;;  %v5029_v60 = vsel %vm15362_vm1, %v5020_v17, %v5012_v57  ;;  %vm15364_vm1 = vmmov %vm15357_vm0 }
 0xa3f   : > { %v5035_v45 = vmul.f32 %v5025_v41, %v15358_v1  ;;  %v5036_v56 = vmul.f32 %v5029_v60, %v15359_v39 }
 0xa40   : > { %5750 = vmatpush.msrb.mxu0 %v5355_v21 }
 0xa41   : > { %5704 = vmatpush.msrb.mxu1 %v5035_v45  ;;  %5865 = vmatpush.msra.mxu2 %v5036_v56 }
 0xa44   : > { %v5208_v43 = vpop.permute.xlu1 %5207 }
 0xa45   : > { %v5223_v58 = vsel %vm15360_vm15, %v5208_v43, %v5216_v27  ;;  %v12688_v44 = vsel %vm15363_vm6, %v5216_v27, %v5208_v43  ;;  %v12690_v28 = vpop.permute.xlu0 %5329  ;;  %v5182_v56 = vpop.permute.xlu2 %5181  ;;  %vm15365_vm15 = vcmp.lt.s32.totalorder %v7177_v34, 98 }
 0xa46   : > { %v5231_v57 = vmul.f32 %v5223_v58, %v15348_v29  ;;  %vm15366_vm6 = vmmov %vm15365_vm15 }
 0xa48   : > { %5725 = vmatpush.msrb.mxu3 %v5231_v57 }
 0xa4c   : > { %v12693_v17 = vpop.permute.xlu1 %5337 }
 0xa4d   : > { %v5344_v21 = vsel %vm15361_vm5, %v12690_v28, %v12693_v17  ;;  %v5018_v41 = vpop.permute.xlu0 %5017 }
 0xa4e   : > { %v5353_v60 = vmul.f32 %v5344_v21, %v15355_v52  ;;  %v5024_v45 = vsel %vm15357_vm0, %v5010_v54, %v5018_v41  ;;  %v5028_v27 = vsel %vm15364_vm1, %v5018_v41, %v5010_v54  ;;  %v5008_v41 = vpop.permute.xlu2 %5007  ;;  %vm15369_vm1 = vmmov %vm15357_vm0 }
 0xa4f   : > { %v5033_v43 = vmul.f32 %v5024_v45, %v15358_v1  ;;  %v5034_v58 = vmul.f32 %v5028_v27, %v15359_v39 }
 0xa50   : > { %5751 = vmatpush.msrb.mxu0 %v5353_v60  ;;  %v15368_v60 = vld [vmem:[#allocation61_spill] sm:$0xff] }
 0xa51   : > { %5705 = vmatpush.msrb.mxu1 %v5033_v43  ;;  %5866 = vmatpush.msra.mxu2 %v5034_v58  ;;  %v4698_v27 = vsel %vm617_vm7, %v15368_v60, %v11811_v51  ;;  %v15370_v51 = vld [vmem:[#allocation62_spill] sm:$0xff] }
 0xa52   : > { %v4697_v60 = vsel %vm617_vm7, %v15370_v51, %v11801_v30  ;;  %v12751_v30 = vld [vmem:[%s15275_s6 + $0x30] sm:$0xff]  ;;  %v15375_v51 = vld [vmem:[#allocation13_spill] sm:$0xff] }
 0xa54   : > { %v5174_v57 = vpop.permute.xlu1 %5173 }
 0xa55   : > { %v5186_v49 = vsel %vm15365_vm15, %v5174_v57, %v5182_v56  ;;  %v12710_v21 = vsel %vm15366_vm6, %v5182_v56, %v5174_v57  ;;  %v12712_v42 = vpop.permute.xlu0 %5327  ;;  %vm15384_vm15 = vmmov %vm15366_vm6 }
 0xa56   : > { %v5197_v54 = vmul.f32 %v5186_v49, %v15367_v24  ;;  %v4858_v49 = vsel %vm681_vm3, %v11979_v22, %v12013_v48  ;;  %v5371_v48 = vld [vmem:[%s15275_s6 + $0x20] sm:$0xff]  ;;  %v12767_v4 = vpop.permute.xlu2 %5179 }
 0xa57   : > { %v15371_v22 = vld [vmem:[#allocation21_spill] sm:$0xff] }
 0xa58   : > { %5726 = vmatpush.msrb.mxu3 %v5197_v54 }
 0xa5c   : > { %v12715_v45 = vpop.permute.xlu1 %5335 }
 0xa5d   : > { %v5343_v43 = vsel %vm15361_vm5, %v12712_v42, %v12715_v45  ;;  %v5016_v56 = vpop.permute.xlu0 %5015  ;;  %vm15399_vm5 = vcmp.lt.s32.totalorder %v7177_v34, 14 }
 0xa5e   : > { %v5351_v58 = vmul.f32 %v5343_v43, %v15355_v52  ;;  %v5023_v57 = vsel %vm15357_vm0, %v5008_v41, %v5016_v56  ;;  %v5027_v54 = vsel %vm15369_vm1, %v5016_v56, %v5008_v41  ;;  %v4710_v43 = vmul.f32 %v4698_v27, %v15371_v22  ;;  %v15372_v52 = vld [vmem:[#allocation135_spill] sm:$0xff]  ;;  %v15373_v56 = vld [vmem:[#allocation110_spill] sm:$0xff]  ;;  %v15376_v27 = vld [vmem:[#allocation109_spill] sm:$0xff] }
 0xa5f   : > { %v5031_v20 = vmul.f32 %v5023_v57, %v15358_v1  ;;  %v5032_v29 = vmul.f32 %v5027_v54, %v15359_v39  ;;  %v4857_v41 = vsel %vm681_vm3, %v15372_v52, %v11991_v35  ;;  %v15374_v57 = vld [vmem:[#allocation152_spill] sm:$0xff]  ;;  %v4870_v39 = vmul.f32 %v4858_v49, %v15375_v51  ;;  %v15377_v1 = vld [vmem:[#allocation133_spill] sm:$0xff]  ;;  %vm15400_vm0 = vmmov %vm15366_vm6 }
 0xa60   : > { %5752 = vmatpush.msrb.mxu0 %v5351_v58  ;;  %v4696_v54 = vsel %vm617_vm7, %v15374_v57, %v15373_v56  ;;  %v4856_v35 = vsel %vm681_vm3, %v15377_v1, %v15376_v27  ;;  %v4708_v52 = vmul.f32 %v4697_v60, %v15371_v22  ;;  %v15378_v58 = vld [vmem:[#allocation111_spill] sm:$0xff]  ;;  %v15381_v49 = vld [vmem:[#allocation121_spill] sm:$0xff]  ;;  %v15383_v56 = vld [vmem:[#allocation68_spill] sm:$0xff]  ;;  %vm15404_vm1 = vcmp.lt.s32.totalorder %v7177_v34, 114 }
 0xa61   : > { %5706 = vmatpush.msrb.mxu1 %v5031_v20  ;;  %5867 = vmatpush.msra.mxu2 %v5032_v29  ;;  %v4695_v0 = vsel %vm617_vm7, %v15379_v33, %v15378_v58  ;;  %v4868_v20 = vmul.f32 %v4857_v41, %v15375_v51  ;;  %v15380_v29 = vld [vmem:[#allocation138_spill] sm:$0xff]  ;;  %v15382_v33 = vld [vmem:[#allocation55_spill] sm:$0xff]  ;;  %v4866_v27 = vmul.f32 %v4856_v35, %v15375_v51  ;;  %v5378_v35 = vld [vmem:[%s15275_s6 + $0x58] sm:$0xff] }
 0xa62   : > { %5707 = vmatmul.f32.vlgmr.msrb.gmra.mxu1 %v5371_v48  ;;  %5783 = vmatpush.msra.mxu0 %v4710_v43  ;;  %v4855_v1 = vsel %vm681_vm3, %v15381_v49, %v15380_v29  ;;  %v4706_v43 = vmul.f32 %v4696_v54, %v15371_v22  ;;  %v4704_v58 = vmul.f32 %v4695_v0, %v15371_v22  ;;  %v15387_v29 = vld [vmem:[#allocation79_spill] sm:$0xff] }
 0xa63   : > { %5806 = vmatpush.msra.mxu1 %v4870_v39  ;;  %6849 = vmatmul.msk.f32.vlgmr.msrb.gmra.mxu0 %vm2326_vm2, %v12751_v30  ;;  %v4658_v39 = vsel %vm601_vm8, %v15383_v56, %v15382_v33  ;;  %v4864_v33 = vmul.f32 %v4855_v1, %v15375_v51  ;;  %v15388_v0 = vld [vmem:[#allocation23_spill] sm:$0xff]  ;;  %v15390_v1 = vld [vmem:[#allocation74_spill] sm:$0xff]  ;;  %v15406_v51 = vld [vmem:[#allocation72_spill] sm:$0xff] }
 0xa64   : > { %5784 = vmatpush.msra.mxu0 %v4708_v52  ;;  %v12776_v60 = vpop.permute.xlu1 %5171  ;;  %5868 = vmatmul.f32.vlgmr.msra.gmra.mxu2 %v5371_v48  ;;  %v15385_v52 = vld [vmem:[#allocation116_spill] sm:$0xff]  ;;  %v12812_v56 = vld [vmem:[%s15275_s6 + $0x68] sm:$0xff] }
 0xa65   : > { %5807 = vmatpush.msra.mxu1 %v4868_v20  ;;  %v5185_v41 = vsel %vm15384_vm15, %v12776_v60, %v12767_v4  ;;  %v12787_v57 = vpop.permute.xlu0 %5169  ;;  %v4818_v48 = vsel %vm665_vm4, %v15385_v52, %v11987_v55  ;;  %v15386_v20 = vld [vmem:[#allocation151_spill] sm:$0xff]  ;;  %v4817_v55 = vsel %vm665_vm4, %v11942_v25, %v11977_v46  ;;  %v4816_v46 = vsel %vm665_vm4, %v11963_v26, %v11955_v8  ;;  %vm15407_vm15 = vmmov %vm15399_vm5 }
 0xa66   : > { %v5195_v54 = vmul.f32 %v5185_v41, %v15367_v24  ;;  %5785 = vmatpush.msra.mxu0 %v4706_v43  ;;  %v4657_v49 = vsel %vm601_vm8, %v15387_v29, %v15386_v20  ;;  %v4670_v43 = vmul.f32 %v4658_v39, %v15388_v0  ;;  %v15389_v41 = vld [vmem:[#allocation96_spill] sm:$0xff]  ;;  %v15391_v52 = vld [vmem:[#allocation15_spill] sm:$0xff]  ;;  %v15392_v39 = vld [vmem:[#allocation94_spill] sm:$0xff] }
 0xa67   : > { %5808 = vmatpush.msra.mxu1 %v4866_v27  ;;  %v4656_v27 = vsel %vm601_vm8, %v15390_v1, %v15389_v41  ;;  %v4830_v20 = vmul.f32 %v4818_v48, %v15391_v52  ;;  %v4668_v25 = vmul.f32 %v4657_v49, %v15388_v0  ;;  %v4828_v29 = vmul.f32 %v4817_v55, %v15391_v52  ;;  %v15394_v48 = vld [vmem:[#allocation136_spill] sm:$0xff]  ;;  %v12842_v55 = vpop.permute.xlu2 %5167 }
 0xa68   : > { %5786 = vmatpush.msra.mxu0 %v4704_v58  ;;  %5727 = vmatpush.msrb.mxu3 %v5195_v54  ;;  %v15393_v54 = vld [vmem:[#allocation87_spill] sm:$0xff]  ;;  %v4666_v49 = vmul.f32 %v4656_v27, %v15388_v0  ;;  %v15397_v41 = vld [vmem:[#allocation104_spill] sm:$0xff]  ;;  %v15398_v27 = vld [vmem:[#allocation118_spill] sm:$0xff] }
 0xa69   : > { %5809 = vmatpush.msra.mxu1 %v4864_v33  ;;  %v4655_v58 = vsel %vm601_vm8, %v15393_v54, %v15392_v39  ;;  %v15395_v33 = vld [vmem:[#allocation107_spill] sm:$0xff] }
 0xa6a   : > { %5710 = vmatmul.f32.gmra.mxu1 %v5378_v35  ;;  %5787 = vmatpush.msra.mxu0 %v4670_v43  ;;  %v4815_v8 = vsel %vm665_vm4, %v15395_v33, %v15394_v48  ;;  %v15396_v43 = vld [vmem:[#allocation73_spill] sm:$0xff]  ;;  %v4664_v48 = vmul.f32 %v4655_v58, %v15388_v0  ;;  %v15401_v33 = vld [vmem:[#allocation58_spill] sm:$0xff] }
 0xa6b   : > { %5810 = vmatpush.msra.mxu1 %v4830_v20  ;;  %6850 = vmatmul.msk.f32.gmra.mxu0 %vm2326_vm2, %v12812_v56  ;;  %v4618_v1 = vsel %vm585_vm9, %v15397_v41, %v15396_v43  ;;  %v15402_v43 = vld [vmem:[#allocation91_spill] sm:$0xff] }
 0xa6c   : > { %5788 = vmatpush.msra.mxu0 %v4668_v25  ;;  %v12835_v26 = vpop.permute.xlu1 %5177  ;;  %5871 = vmatmul.f32.gmra.mxu2 %v5378_v35  ;;  %v4826_v25 = vmul.f32 %v4816_v46, %v15391_v52  ;;  %v4778_v35 = vsel %vm15399_vm5, %v15398_v27, %v11914_v23  ;;  %v4617_v46 = vsel %vm585_vm9, %v15402_v43, %v15401_v33  ;;  %v15403_v41 = vld [vmem:[#allocation123_spill] sm:$0xff]  ;;  %v15405_v27 = vld [vmem:[#allocation132_spill] sm:$0xff]  ;;  %v15411_v43 = vld [vmem:[#allocation126_spill] sm:$0xff] }
 0xa6d   : > { %5811 = vmatpush.msra.mxu1 %v4828_v29  ;;  %v5184_v20 = vsel %vm15366_vm6, %v12787_v57, %v12835_v26  ;;  %v12848_v39 = vpop.permute.xlu0 %5175  ;;  %v4990_v23 = vsel %vm15404_vm1, %v15403_v41, %v12175_v36  ;;  %v4630_v0 = vmul.f32 %v4618_v1, %v15408_v59  ;;  %v12879_v33 = vld [vmem:[%s15275_s6 + $0x28] sm:$0xff]  ;;  %v15409_v36 = vld [vmem:[#allocation92_spill] sm:$0xff]  ;;  %vm15412_vm6 = vmmov %vm15404_vm1 }
 0xa6e   : > { %v5193_v54 = vmul.f32 %v5184_v20, %v15367_v24  ;;  %v5183_v29 = vsel %vm15400_vm0, %v12842_v55, %v12848_v39  ;;  %5789 = vmatpush.msra.mxu0 %v4666_v49  ;;  %v4824_v20 = vmul.f32 %v4815_v8, %v15391_v52  ;;  %v4777_v49 = vsel %vm15407_vm15, %v15406_v51, %v15405_v27  ;;  %v15415_v1 = vld [vmem:[#allocation105_spill] sm:$0xff]  ;;  %v15416_v27 = vld [vmem:[#allocation7_spill] sm:$0xff]  ;;  %vm15419_vm0 = vmmov %vm15404_vm1 }
 0xa6f   : > { %5812 = vmatpush.msra.mxu1 %v4826_v25  ;;  %v5191_v58 = vmul.f32 %v5183_v29, %v15367_v24  ;;  %v15410_v25 = vld [vmem:[#allocation98_spill] sm:$0xff]  ;;  %v4989_v51 = vsel %vm15412_vm6, %v15411_v43, %v12181_v6  ;;  %v15413_v29 = vld [vmem:[#allocation17_spill] sm:$0xff]  ;;  %v4998_v52 = vmul.f32 %v4990_v23, %v15416_v27  ;;  %v4628_v24 = vmul.f32 %v4617_v46, %v15408_v59  ;;  %v15420_v23 = vld [vmem:[#allocation119_spill] sm:$0xff] }
 0xa70   : > { %5790 = vmatpush.msra.mxu0 %v4664_v48  ;;  %5728 = vmatpush.msrb.mxu3 %v5193_v54  ;;  %v4616_v8 = vsel %vm585_vm9, %v15410_v25, %v15409_v36  ;;  %v4790_v54 = vmul.f32 %v4778_v35, %v15413_v29  ;;  %v15414_v48 = vld [vmem:[#allocation134_spill] sm:$0xff]  ;;  %v15418_v25 = vld [vmem:[#allocation85_spill] sm:$0xff]  ;;  %v4988_v6 = vsel %vm15419_vm0, %v12167_v13, %v12165_v31  ;;  %vm15422_vm1 = vmmov %vm15399_vm5  ;;  %vm15430_vm6 = vcmp.lt.s32.totalorder %v7177_v34, 15 }
 0xa71   : > { %5813 = vmatpush.msra.mxu1 %v4824_v20  ;;  %v4776_v41 = vsel %vm15399_vm5, %v15415_v1, %v15414_v48  ;;  %v15417_v36 = vld [vmem:[#allocation86_spill] sm:$0xff]  ;;  %v4788_v35 = vmul.f32 %v4777_v49, %v15413_v29  ;;  %v4626_v20 = vmul.f32 %v4616_v8, %v15408_v59  ;;  %v15423_v43 = vld [vmem:[#allocation71_spill] sm:$0xff]  ;;  %v15425_v13 = vld [vmem:[#allocation124_spill] sm:$0xff]  ;;  %vm15435_vm5 = vcmp.lt.s32.totalorder %v7177_v34, 126 }
 0xa72   : > { %5791 = vmatpush.msra.mxu0 %v4630_v0  ;;  %5729 = vmatpush.msrb.mxu3 %v5191_v58  ;;  %v4615_v22 = vsel %vm585_vm9, %v15418_v25, %v15417_v36  ;;  %v15421_v0 = vld [vmem:[#allocation102_spill] sm:$0xff]  ;;  %v4996_v58 = vmul.f32 %v4989_v51, %v15416_v27  ;;  %vm15427_vm15 = vmmov %vm15419_vm0  ;;  %v4786_v1 = vmul.f32 %v4776_v41, %v15413_v29  ;;  %v15428_v36 = vld [vmem:[#allocation128_spill] sm:$0xff] }
 0xa73   : > { %5814 = vmatpush.msra.mxu1 %v4790_v54  ;;  %5730 = vmatmul.f32.vlgmr.msrb.gmra.mxu3 %v12879_v33  ;;  %v4775_v46 = vsel %vm15422_vm1, %v15421_v0, %v15420_v23  ;;  %v15424_v48 = vld [vmem:[#allocation66_spill] sm:$0xff]  ;;  %v15426_v54 = vld [vmem:[#allocation84_spill] sm:$0xff]  ;;  %v4624_v8 = vmul.f32 %v4615_v22, %v15408_v59  ;;  %v4994_v51 = vmul.f32 %v4988_v6, %v15416_v27  ;;  %v15432_v23 = vld [vmem:[#allocation97_spill] sm:$0xff] }
 0xa74   : > { %5792 = vmatpush.msra.mxu0 %v4628_v24  ;;  %5829 = vmatpush.msra.mxu3 %v4998_v52  ;;  %v4578_v31 = vsel %vm569_vm10, %v15424_v48, %v15423_v43  ;;  %v4987_v49 = vsel %vm15427_vm15, %v15426_v54, %v15425_v13  ;;  %v15429_v24 = vld [vmem:[#allocation112_spill] sm:$0xff]  ;;  %v15431_v25 = vld [vmem:[#allocation78_spill] sm:$0xff]  ;;  %v15433_v43 = vld [vmem:[#allocation145_spill] sm:$0xff]  ;;  %v4784_v48 = vmul.f32 %v4775_v46, %v15413_v29 }
 0xa75   : > { %5815 = vmatpush.msra.mxu1 %v4788_v35  ;;  %v4738_v52 = vsel %vm15430_vm6, %v15429_v24, %v15428_v36  ;;  %v4577_v0 = vsel %vm569_vm10, %v15432_v23, %v15431_v25  ;;  %v15434_v35 = vld [vmem:[#allocation127_spill] sm:$0xff]  ;;  %v15436_v13 = vld [vmem:[#allocation149_spill] sm:$0xff]  ;;  %vm15438_vm0 = vmmov %vm15430_vm6  ;;  %v4992_v54 = vmul.f32 %v4987_v49, %v15416_v27 }
 0xa76   : > { %5793 = vmatpush.msra.mxu0 %v4626_v20  ;;  %5830 = vmatpush.msra.mxu3 %v4996_v58  ;;  %v4950_v41 = vsel %vm15435_vm5, %v15434_v35, %v15433_v43  ;;  %v15437_v20 = vld [vmem:[#allocation115_spill] sm:$0xff]  ;;  %v12945_v36 = vld [vmem:[%s15275_s6 + $0x60] sm:$0xff]  ;;  %v15440_v24 = vld [vmem:[#allocation60_spill] sm:$0xff] }
 0xa77   : > { %5816 = vmatpush.msra.mxu1 %v4786_v1  ;;  %v4737_v22 = vsel %vm15438_vm0, %v15437_v20, %v15436_v13  ;;  %v15439_v6 = vld [vmem:[#allocation27_spill] sm:$0xff]  ;;  %v15441_v1 = vld [vmem:[#allocation77_spill] sm:$0xff]  ;;  %v15442_v25 = vld [vmem:[#allocation140_spill] sm:$0xff] }
 0xa78   : > { %5794 = vmatpush.msra.mxu0 %v4624_v8  ;;  %5831 = vmatpush.msra.mxu3 %v4994_v51  ;;  %v4590_v58 = vmul.f32 %v4578_v31, %v15439_v6  ;;  %v4576_v46 = vsel %vm569_vm10, %v15441_v1, %v15440_v24  ;;  %v15443_v23 = vld [vmem:[#allocation114_spill] sm:$0xff]  ;;  %vm15444_vm1 = vmmov %vm15435_vm5  ;;  %v15445_v51 = vld [vmem:[#allocation19_spill] sm:$0xff]  ;;  %v4588_v13 = vmul.f32 %v4577_v0, %v15439_v6 }
 0xa79   : > { %v4949_v8 = vsel %vm15444_vm1, %v15443_v23, %v15442_v25  ;;  %5817 = vmatpush.msra.mxu1 %v4784_v48  ;;  %v4750_v31 = vmul.f32 %v4738_v52, %v15445_v51  ;;  %v15446_v43 = vld [vmem:[#allocation150_spill] sm:$0xff]  ;;  %v15447_v49 = vld [vmem:[#allocation89_spill] sm:$0xff]  ;;  %vm15448_vm15 = vmmov %vm15438_vm0  ;;  %v4748_v48 = vmul.f32 %v4737_v22, %v15445_v51  ;;  %v4947_v22 = vsel %vm15444_vm1, %v12151_v47, %v12112_v9 }
 0xa7a   : > { %v4736_v35 = vsel %vm15448_vm15, %v15447_v49, %v15446_v43  ;;  %5795 = vmatpush.msra.mxu0 %v4590_v58  ;;  %5832 = vmatpush.msra.mxu3 %v4992_v54  ;;  %v15449_v20 = vld [vmem:[#allocation9_spill] sm:$0xff]  ;;  %v15450_v24 = vld [vmem:[#allocation67_spill] sm:$0xff]  ;;  %vm15452_vm6 = vmmov %vm15444_vm1 }
 0xa7b   : > { %v4958_v29 = vmul.f32 %v4950_v41, %v15449_v20  ;;  %v15451_v1 = vld [vmem:[#allocation59_spill] sm:$0xff]  ;;  %v4948_v52 = vsel %vm15452_vm6, %v12114_v3, %v12138_v10  ;;  %5818 = vmatpush.msra.mxu1 %v4750_v31  ;;  %5733 = vmatmul.f32.gmra.mxu3 %v12945_v36  ;;  %v15453_v58 = vld [vmem:[#allocation137_spill] sm:$0xff]  ;;  %v15454_v54 = vld [vmem:[#allocation80_spill] sm:$0xff]  ;;  %v4586_v41 = vmul.f32 %v4576_v46, %v15439_v6  ;;  %vm15461_vm6 = vcmp.lt.s32.totalorder %v7177_v34, 127 }
 0xa7c   : > { %v4575_v27 = vsel %vm569_vm10, %v15451_v1, %v15450_v24  ;;  %vm15455_vm5 = vmmov %vm15438_vm0  ;;  %5796 = vmatpush.msra.mxu0 %v4588_v13  ;;  %v4956_v25 = vmul.f32 %v4949_v8, %v15449_v20  ;;  %vm15456_vm0 = vcmp.lt.s32.totalorder %v7177_v34, 95  ;;  %v4746_v10 = vmul.f32 %v4736_v35, %v15445_v51  ;;  %v15457_v23 = vld [vmem:[#allocation131_spill] sm:$0xff]  ;;  %v15460_v31 = vld [vmem:[#allocation122_spill] sm:$0xff] }
 0xa7d   : > { %v4735_v0 = vsel %vm15455_vm5, %v15454_v54, %v15453_v58  ;;  %5833 = vmatpush.msra.mxu3 %v4958_v29  ;;  %v5310_v3 = vsel %vm15456_vm0, %v12235_v7, %v12303_v14  ;;  %5819 = vmatpush.msra.mxu1 %v4748_v48  ;;  %v4584_v29 = vmul.f32 %v4575_v27, %v15439_v6  ;;  %vm15458_vm15 = vmmov %vm15456_vm0  ;;  %v15459_v14 = vld [vmem:[#allocation117_spill] sm:$0xff]  ;;  %v15462_v9 = vld [vmem:[#allocation39_spill] sm:$0xff] }
 0xa7e   : > { %5797 = vmatpush.msra.mxu0 %v4586_v41  ;;  %v4954_v46 = vmul.f32 %v4948_v52, %v15449_v20  ;;  %v5309_v8 = vsel %vm15458_vm15, %v15457_v23, %v12272_v11  ;;  %v4744_v7 = vmul.f32 %v4735_v0, %v15445_v51  ;;  %v4910_v43 = vsel %vm15461_vm6, %v15460_v31, %v15459_v14  ;;  %v15463_v49 = vld [vmem:[#allocation37_spill] sm:$0xff]  ;;  %v15465_v13 = vld [vmem:[#allocation75_spill] sm:$0xff]  ;;  %vm15466_vm5 = vmmov %vm15456_vm0 }
 0xa7f   : > { %5834 = vmatpush.msra.mxu3 %v4956_v25  ;;  %5820 = vmatpush.msra.mxu1 %v4746_v10  ;;  %v5318_v47 = vmul.f32 %v5310_v3, %v15462_v9  ;;  %v5358_v27 = vmul.f32 %v12655_v18, %v15463_v49  ;;  %v15464_v35 = vld [vmem:[#allocation81_spill] sm:$0xff]  ;;  %vm15467_vm0 = vcmp.lt.s32.totalorder %v7177_v34, 94  ;;  %v15468_v1 = vld [vmem:[#allocation120_spill] sm:$0xff]  ;;  %v4952_v52 = vmul.f32 %v4947_v22, %v15449_v20  ;;  %v15470_v58 = vld [vmem:[#allocation130_spill] sm:$0xff] }
 0xa80   : > { %5798 = vmatpush.msra.mxu0 %v4584_v29  ;;  %v5308_v11 = vsel %vm15466_vm5, %v15465_v13, %v15464_v35  ;;  %v5348_v24 = vsel %vm15467_vm0, %v12693_v17, %v12690_v28  ;;  %v15469_v48 = vld [vmem:[#allocation113_spill] sm:$0xff]  ;;  %vm15471_vm1 = vmmov %vm15461_vm6  ;;  %v5356_v54 = vmul.f32 %v12675_v40, %v15463_v49  ;;  %v5316_v0 = vmul.f32 %v5309_v8, %v15462_v9  ;;  %v15474_v41 = vld [vmem:[#allocation147_spill] sm:$0xff] }
 0xa81   : > { %5835 = vmatpush.msra.mxu3 %v4954_v46  ;;  %5821 = vmatpush.msra.mxu1 %v4744_v7  ;;  %v4909_v18 = vsel %vm15471_vm1, %v15470_v58, %v15469_v48  ;;  %vm15472_vm15 = vmmov %vm15466_vm5  ;;  %v15475_v25 = vld [vmem:[#allocation11_spill] sm:$0xff]  ;;  %v15476_v40 = vld [vmem:[#allocation106_spill] sm:$0xff]  ;;  %v5354_v29 = vmul.f32 %v5348_v24, %v15463_v49 }
 0xa82   : > { %5799 = vmatmul.f32.vlgmr.msra.gmra.mxu0 %v15468_v1  ;;  %v5307_v28 = vsel %vm15472_vm15, %v12416_v16, %v12496_v62  ;;  %vm15473_vm6 = vmmov %vm15467_vm0  ;;  %5822 = vmatmul.f32.vlgmr.msra.gmra.mxu1 %v15474_v41  ;;  %v4918_v3 = vmul.f32 %v4910_v43, %v15475_v25  ;;  %v15477_v10 = vld [vmem:[#allocation143_spill] sm:$0xff]  ;;  %v5314_v16 = vmul.f32 %v5308_v11, %v15462_v9  ;;  %vm15479_vm0 = vcmp.lt.s32.totalorder %v7177_v34, 96  ;;  %v15483_v31 = vld [vmem:[#allocation144_spill] sm:$0xff]  ;;  %v5591_v1 = vpop.permute.xlu1 %5590 }
 0xa83   : > { %5875 = vmatpush.msrb.mxu0 %v5318_v47  ;;  %5910 = vmatpush.msrb.mxu1 %v5358_v27  ;;  %v5347_v17 = vsel %vm15473_vm6, %v12715_v45, %v12712_v42  ;;  %vm15478_vm5 = vmmov %vm15471_vm1  ;;  %v5270_v62 = vsel %vm15479_vm0, %v12536_v32, %v12466_v2  ;;  %v4916_v42 = vmul.f32 %v4909_v18, %v15475_v25  ;;  %v15480_v45 = vld [vmem:[#allocation108_spill] sm:$0xff]  ;;  %v15481_v46 = vld [vmem:[#allocation139_spill] sm:$0xff]  ;;  %vm15487_vm15 = vcmp.lt.s32.totalorder %v7177_v34, 98 }
 0xa84   : > { %5836 = vmatpush.msra.mxu3 %v4952_v52  ;;  %v4908_v22 = vsel %vm15478_vm5, %v15477_v10, %v15476_v40  ;;  %v4907_v23 = vsel %vm15471_vm1, %v15481_v46, %v15480_v45  ;;  %v5352_v8 = vmul.f32 %v5347_v17, %v15463_v49  ;;  %v5312_v7 = vmul.f32 %v5307_v28, %v15462_v9  ;;  %v15482_v2 = vld [vmem:[#allocation41_spill] sm:$0xff]  ;;  %v15484_v27 = vld [vmem:[#allocation90_spill] sm:$0xff]  ;;  %v15485_v11 = vld [vmem:[#allocation43_spill] sm:$0xff] }
 0xa85   : > { %5876 = vmatpush.msrb.mxu0 %v5316_v0  ;;  %5911 = vmatpush.msrb.mxu1 %v5356_v54  ;;  %v4914_v14 = vmul.f32 %v4908_v22, %v15475_v25  ;;  %v5278_v32 = vmul.f32 %v5270_v62, %v15482_v2  ;;  %v4912_v43 = vmul.f32 %v4907_v23, %v15475_v25  ;;  %vm15489_vm6 = vmmov %vm15487_vm15  ;;  %v5685_v54 = vpop.f32.mrf.mxu2 }
 0xa86   : > { %5837 = vmatpush.msra.mxu3 %v4918_v3  ;;  %v5276_v47 = vmul.f32 %v12588_v12, %v15482_v2  ;;  %v5274_v35 = vmul.f32 %v12606_v37, %v15482_v2  ;;  %v5272_v13 = vmul.f32 %v12622_v50, %v15482_v2  ;;  %v5238_v24 = vmul.f32 %v12635_v38, %v15485_v11  ;;  %v15486_v37 = vld [vmem:[#allocation141_spill] sm:$0xff]  ;;  %vm15490_vm5 = vmmov %vm15489_vm6 }
 0xa87   : > { %5877 = vmatpush.msrb.mxu0 %v5314_v16  ;;  %5912 = vmatpush.msrb.mxu1 %v5354_v29  ;;  %v5236_v12 = vmul.f32 %v12648_v5, %v15485_v11  ;;  %v15488_v50 = vld [vmem:[#allocation45_spill] sm:$0xff]  ;;  %v5188_v38 = vsel %vm15489_vm6, %v12835_v26, %v12787_v57  ;;  %v5639_v57 = vpop.f32.mrf.mxu3  ;;  %v5662_v26 = vpop.f32.mrf.mxu0  ;;  %vm15518_vm0 = vmmov %vm15471_vm1  ;;  %vm15522_vm6 = vcmp.lt.s32.totalorder %v7177_v34, 95 }
 0xa88   : > { %5838 = vmatpush.msra.mxu3 %v4916_v42 }
 0xa89   : > { %5878 = vmatpush.msrb.mxu0 %v5312_v7  ;;  %5913 = vmatpush.msrb.mxu1 %v5352_v8 }
 0xa8a   : > { %5839 = vmatpush.msra.mxu3 %v4914_v14  ;;  %5802 = vmatmul.f32.gmra.mxu0 %v15483_v31 }
 0xa8b   : > { %5879 = vmatpush.msrb.mxu0 %v5278_v32  ;;  %5825 = vmatmul.f32.gmra.mxu1 %v15484_v27 }
 0xa8c   : > { %5840 = vmatpush.msra.mxu3 %v4912_v43 }
 0xa8d   : > { %5880 = vmatpush.msrb.mxu0 %v5276_v47  ;;  %v5688_v22 = vpop.f32.mrf.mxu2 }
 0xa8e   : > { %5841 = vmatpush.msra.mxu3 %v11401_v15  ;;  %v5234_v15 = vmul.f32 %v12668_v19, %v15485_v11  ;;  %v5187_v19 = vsel %vm15490_vm5, %v12848_v39, %v12842_v55  ;;  %vm15523_vm5 = vmmov %vm15522_vm6 }
 0xa8f   : > { %5881 = vmatpush.msrb.mxu0 %v5274_v35  ;;  %v5642_v52 = vpop.f32.mrf.mxu3  ;;  %v5665_v48 = vpop.f32.mrf.mxu0 }
 0xa90   : > { %5842 = vmatpush.msra.mxu3 %v11395_v61  ;;  %v5232_v61 = vmul.f32 %v12688_v44, %v15485_v11  ;;  %v15491_v44 = vld [vmem:[#allocation142_spill] sm:$0xff] }
 0xa91   : > { %5882 = vmatpush.msrb.mxu0 %v5272_v13 }
 0xa92   : > { %5843 = vmatpush.msra.mxu3 %v11391_v53  ;;  %v5189_v53 = vsel %vm15487_vm15, %v12767_v4, %v12776_v60  ;;  %v5194_v4 = vmul.f32 %v5188_v38, %v15488_v50  ;;  %v5586_v60 = vpop.permute.xlu2 %5585  ;;  %vm15521_vm15 = vmmov %vm15518_vm0 }
 0xa93   : > { %5883 = vmatpush.msrb.mxu0 %v5238_v24  ;;  %6851 = vmatmul.msk.f32.vlgmr.msrb.gmra.mxu1 %vm2326_vm2, %v12751_v30  ;;  %v5196_v5 = vmul.f32 %v5189_v53, %v15488_v50  ;;  %v5616_v30 = vpop.f32.mrf.mxu1 }
 0xa94   : > { %5844 = vmatpush.msra.mxu3 %v11386_v63  ;;  %v5198_v63 = vmul.f32 %v12710_v21, %v15488_v50  ;;  %v5192_v21 = vmul.f32 %v5187_v19, %v15488_v50  ;;  %v5617_v55 = vadd.f32 %v5616_v30, %v5586_v60 }
 0xa95   : > { %5845 = vmatmul.f32.vlgmr.msra.gmra.mxu3 %v15486_v37  ;;  %5884 = vmatpush.msrb.mxu0 %v5236_v12  ;;  %v5777_v14 = vpop.f32.mrf.mxu2 }
 0xa96   : > { %v5778_v47 = vadd.f32 %v5777_v14, %v5586_v60 }
 0xa97   : > { %5885 = vmatpush.msrb.mxu0 %v5234_v15 }
 0xa99   : > { %5886 = vmatpush.msrb.mxu0 %v5232_v61 }
 0xa9b   : > { %5887 = vmatpush.msrb.mxu0 %v5198_v63  ;;  %6852 = vmatmul.msk.f32.gmra.mxu1 %vm2326_vm2, %v12812_v56  ;;  %v5619_v39 = vpop.f32.mrf.mxu1  ;;  %v5640_v56 = vadd.f32 %v5639_v57, %v5617_v55  ;;  %vm15517_vm2 = vmmov %vm15471_vm1 }
 0xa9c   : > { %v5620_v18 = vadd.f32 %v5619_v39, %v5591_v1  ;;  %vm15520_vm1 = vmmov %vm15518_vm0 }
 0xa9d   : > { %5848 = vmatmul.f32.gmra.mxu3 %v15491_v44  ;;  %5888 = vmatpush.msrb.mxu0 %v5196_v5  ;;  %v5663_v58 = vadd.f32 %v5662_v26, %v5640_v56  ;;  %v5780_v43 = vpop.f32.mrf.mxu2 }
 0xa9e   : > { %v5643_v28 = vadd.f32 %v5642_v52, %v5620_v18  ;;  %v5781_v37 = vadd.f32 %v5780_v43, %v5591_v1 }
 0xa9f   : > { %5889 = vmatpush.msrb.mxu0 %v5194_v4  ;;  %v5686_v17 = vadd.f32 %v5685_v54, %v5663_v58 }
 0xaa1   : > { %5890 = vmatpush.msrb.mxu0 %v5192_v21 }
 0xaa2   : > { %5891 = vmatmul.f32.vlgmr.msrb.gmra.mxu0 %v12879_v33 }
 0xaaa   : > { %5894 = vmatmul.f32.gmra.mxu0 %v12945_v36  ;;  %v5666_v36 = vadd.f32 %v5665_v48, %v5643_v28 }
 0xaac   : > { %v5689_v16 = vadd.f32 %v5688_v22, %v5666_v36 }
 0xadf   : > { %v5708_v0 = vpop.f32.mrf.mxu1 }
 0xae0   : > { %v5709_v41 = vadd.f32 %v5708_v0, %v5686_v17  ;;  %v5754_v33 = vpop.f32.mrf.mxu0 }
 0xae7   : > { %v5711_v29 = vpop.f32.mrf.mxu1  ;;  %v5869_v15 = vpop.f32.mrf.mxu2 }
 0xae8   : > { %v5712_v42 = vadd.f32 %v5711_v29, %v5689_v16  ;;  %v5757_v23 = vpop.f32.mrf.mxu0 }
 0xaef   : > { %v5872_v57 = vpop.f32.mrf.mxu2 }
 0xaf6   : > { %v5731_v3 = vpop.f32.mrf.mxu3 }
 0xaf7   : > { %v5732_v40 = vadd.f32 %v5731_v3, %v5709_v41 }
 0xaf9   : > { %v5755_v10 = vadd.f32 %v5754_v33, %v5732_v40 }
 0xafb   : > { %v13093_v62 = vmax.f32 %v5755_v10, 0.0 }
 0xafd   : > { %5925 = vrot.lane.b32.xlu0 %v13093_v62, %s14779_s8 }
 0xafe   : > { %v5734_v45 = vpop.f32.mrf.mxu3 }
 0xaff   : > { %v5735_v46 = vadd.f32 %v5734_v45, %v5712_v42  ;;  %v5823_v32 = vpop.f32.mrf.mxu1  ;;  %v5800_v31 = vpop.f32.mrf.mxu0  ;;  %v15492_v42 = vld [vmem:[#allocation20_spill] sm:$0xff] }
 0xb00   : > { %v5801_v27 = vadd.f32 %v5800_v31, %v5778_v47 }
 0xb01   : > { %v5758_v8 = vadd.f32 %v5757_v23, %v5735_v46  ;;  %v15493_v46 = vld [vmem:[#allocation21_spill] sm:$0xff] }
 0xb02   : > { %v5824_v24 = vadd.f32 %v5823_v32, %v5801_v27 }
 0xb03   : > { %v13097_v7 = vmax.f32 %v5758_v8, 0.0 }
 0xb05   : > { %5927 = vrot.lane.b32.xlu1 %v13097_v7, %s14779_s8  ;;  %6067 = vrot.lane.b32.xlu0 %v13097_v7, %s14799_s16 }
 0xb07   : > { %v5803_v13 = vpop.f32.mrf.mxu0 }
 0xb08   : > { %v5826_v35 = vpop.f32.mrf.mxu1  ;;  %v5804_v53 = vadd.f32 %v5803_v13, %v5781_v37  ;;  %v15494_v13 = vld [vmem:[#allocation22_spill] sm:$0xff] }
 0xb0a   : > { %v5827_v19 = vadd.f32 %v5826_v35, %v5804_v53 }
 0xb10   : > { %v5915_v63 = vpop.f32.mrf.mxu1 }
 0xb18   : > { %v5846_v12 = vpop.f32.mrf.mxu3  ;;  %v5918_v39 = vpop.f32.mrf.mxu1 }
 0xb19   : > { %v5847_v61 = vadd.f32 %v5846_v12, %v5824_v24  ;;  %v15495_v12 = vld [vmem:[#allocation23_spill] sm:$0xff] }
 0xb1b   : > { %v5870_v38 = vadd.f32 %v5869_v15, %v5847_v61 }
 0xb1f   : > { %v5892_v5 = vpop.f32.mrf.mxu0 }
 0xb20   : > { %v5893_v4 = vadd.f32 %v5892_v5, %v5870_v38  ;;  %v5849_v44 = vpop.f32.mrf.mxu3 }
 0xb21   : > { %v5850_v21 = vadd.f32 %v5849_v44, %v5827_v19 }
 0xb22   : > { %v5916_v30 = vadd.f32 %v5915_v63, %v5893_v4 }
 0xb23   : > { %v5873_v60 = vadd.f32 %v5872_v57, %v5850_v21  ;;  %v15496_v21 = vld [vmem:[#allocation24_spill] sm:$0xff] }
 0xb24   : > { %v13103_v26 = vmax.f32 %v5916_v30, 0.0 }
 0xb26   : > { %5929 = vrot.lane.b32.xlu2 %v13103_v26, %s14779_s8  ;;  %6069 = vrot.lane.b32.xlu0 %v13103_v26, %s14799_s16 }
 0xb27   : > { %v5895_v55 = vpop.f32.mrf.mxu0 }
 0xb28   : > { %v5896_v56 = vadd.f32 %v5895_v55, %v5873_v60 }
 0xb2a   : > { %v5919_v1 = vadd.f32 %v5918_v39, %v5896_v56 }
 0xb2c   : > { %v13109_v52 = vmax.f32 %v5919_v1, 0.0 }
 0xb2e   : > { %6071 = vrot.lane.b32.xlu1 %v13109_v52, %s14799_s16  ;;  %6065 = vrot.lane.b32.xlu2 %v13093_v62, %s14799_s16 }
 0xb2f   : > { %6045 = vrot.lane.b32.xlu0 %v13093_v62, %s14432_s21 }
 0xb36   : > { %6047 = vrot.lane.b32.xlu1 %v13097_v7, %s14432_s21  ;;  %6051 = vrot.lane.b32.xlu2 %v13109_v52, %s14432_s21 }
 0xb37   : > { %6031 = vrot.lane.b32.xlu0 %v13109_v52, %s14788_s27 }
 0xb3e   : > { %6049 = vrot.lane.b32.xlu1 %v13103_v26, %s14432_s21  ;;  %6027 = vrot.lane.b32.xlu2 %v13097_v7, %s14788_s27 }
 0xb3f   : > { %6007 = vrot.lane.b32.xlu0 %v13097_v7, %s14784_s13 }
 0xb46   : > { %6025 = vrot.lane.b32.xlu1 %v13093_v62, %s14788_s27  ;;  %6029 = vrot.lane.b32.xlu2 %v13103_v26, %s14788_s27 }
 0xb47   : > { %6009 = vrot.lane.b32.xlu0 %v13103_v26, %s14784_s13 }
 0xb4e   : > { %6011 = vrot.lane.b32.xlu1 %v13109_v52, %s14784_s13  ;;  %6005 = vrot.lane.b32.xlu2 %v13093_v62, %s14784_s13 }
 0xb4f   : > { %5985 = vrot.lane.b32.xlu0 %v13093_v62, %s14783_s7 }
 0xb56   : > { %5987 = vrot.lane.b32.xlu1 %v13097_v7, %s14783_s7  ;;  %5991 = vrot.lane.b32.xlu2 %v13109_v52, %s14783_s7 }
 0xb57   : > { %5971 = vrot.lane.b32.xlu0 %v13109_v52, %s14781_s2 }
 0xb5e   : > { %5989 = vrot.lane.b32.xlu1 %v13103_v26, %s14783_s7  ;;  %5967 = vrot.lane.b32.xlu2 %v13097_v7, %s14781_s2 }
 0xb5f   : > { %5947 = vrot.lane.b32.xlu0 %v13097_v7, %s14780_s12 }
 0xb66   : > { %5965 = vrot.lane.b32.xlu1 %v13093_v62, %s14781_s2  ;;  %5969 = vrot.lane.b32.xlu2 %v13103_v26, %s14781_s2 }
 0xb67   : > { %5949 = vrot.lane.b32.xlu0 %v13103_v26, %s14780_s12 }
 0xb6e   : > { %5951 = vrot.lane.b32.xlu1 %v13109_v52, %s14780_s12  ;;  %5945 = vrot.lane.b32.xlu2 %v13093_v62, %s14780_s12 }
 0xb6f   : > { %5931 = vrot.lane.b32.xlu0 %v13109_v52, %s14779_s8  ;;  %v5926_v48 = vpop.permute.xlu0 %5925 }
 0xb76   : > { %6211 = vrot.lane.b32.xlu1 %v13097_v7, %s14493_s30  ;;  %6215 = vrot.lane.b32.xlu2 %v13109_v52, %s14493_s30 }
 0xb77   : > { %6191 = vrot.lane.b32.xlu0 %v13097_v7, %s14485_s25  ;;  %v6068_v28 = vpop.permute.xlu0 %6067  ;;  %v13201_v41 = vpop.permute.xlu1 %5927 }
 0xb7e   : > { %6209 = vrot.lane.b32.xlu1 %v13093_v62, %s14493_s30  ;;  %6213 = vrot.lane.b32.xlu2 %v13103_v26, %s14493_s30 }
 0xb7f   : > { %6193 = vrot.lane.b32.xlu0 %v13103_v26, %s14485_s25 }
 0xb80   : > { %v5930_v58 = vpop.permute.xlu2 %5929 }
 0xb81   : > { %v13179_v18 = vsel %vm505_vm14, %v5926_v48, %v5930_v58  ;;  %v13183_v54 = vsel %vm505_vm14, %v5930_v58, %v5926_v48 }
 0xb86   : > { %6195 = vrot.lane.b32.xlu1 %v13109_v52, %s14485_s25  ;;  %6189 = vrot.lane.b32.xlu2 %v13093_v62, %s14485_s25 }
 0xb87   : > { %6371 = vrot.lane.b32.xlu0 %v13097_v7, %s14582_s1 }
 0xb88   : > { %v6066_v0 = vpop.permute.xlu2 %6065 }
 0xb8e   : > { %6171 = vrot.lane.b32.xlu1 %v13097_v7, %s14478_s11  ;;  %6175 = vrot.lane.b32.xlu2 %v13109_v52, %s14478_s11 }
 0xb8f   : > { %6173 = vrot.lane.b32.xlu0 %v13103_v26, %s14478_s11 }
 0xb90   : > { %v6052_v17 = vpop.permute.xlu2 %6051 }
 0xb96   : > { %6375 = vrot.lane.b32.xlu1 %v13109_v52, %s14582_s1  ;;  %6169 = vrot.lane.b32.xlu2 %v13093_v62, %s14478_s11 }
 0xb97   : > { %6351 = vrot.lane.b32.xlu0 %v13097_v7, %s14579_s0 }
 0xb98   : > { %v6028_v33 = vpop.permute.xlu2 %6027  ;;  %v6070_v3 = vpop.permute.xlu0 %6069 }
 0xb99   : > { %v6075_v16 = vsel %vm617_vm7, %v6070_v3, %v6066_v0  ;;  %v6073_v8 = vsel %vm617_vm7, %v6066_v0, %v6070_v3 }
 0xb9a   : > { %v6077_v14 = vmul.f32 %v6075_v16, %v15492_v42  ;;  %v6078_v32 = vmul.f32 %v6073_v8, %v15493_v46  ;;  %v15498_v8 = vld [vmem:[#allocation28_spill] sm:$0xff] }
 0xb9e   : > { %6369 = vrot.lane.b32.xlu1 %v13093_v62, %s14582_s1  ;;  %6373 = vrot.lane.b32.xlu2 %v13103_v26, %s14582_s1 }
 0xb9f   : > { %6353 = vrot.lane.b32.xlu0 %v13103_v26, %s14579_s0 }
 0xba0   : > { %v6072_v36 = vpop.permute.xlu1 %6071  ;;  %v6030_v40 = vpop.permute.xlu2 %6029 }
 0xba1   : > { %v6074_v10 = vsel %vm617_vm7, %v6068_v28, %v6072_v36  ;;  %v6076_v22 = vsel %vm617_vm7, %v6072_v36, %v6068_v28  ;;  %v6046_v29 = vpop.permute.xlu0 %6045  ;;  %v15497_v36 = vld [vmem:[#allocation26_spill] sm:$0xff]  ;;  %vm15507_vm7 = vcmp.lt.s32.totalorder %v7177_v34, 114 }
 0xba2   : > { %v6079_v45 = vmul.f32 %v6076_v22, %v15492_v42  ;;  %v6080_v23 = vmul.f32 %v6074_v10, %v15493_v46 }
 0xba4   : > { %6528 = vmatpush.msrb.mxu3 %v6079_v45  ;;  %6608 = vmatpush.msra.mxu0 %v6080_v23 }
 0xba6   : > { %6355 = vrot.lane.b32.xlu1 %v13109_v52, %s14579_s0  ;;  %6349 = vrot.lane.b32.xlu2 %v13093_v62, %s14579_s0 }
 0xba7   : > { %6331 = vrot.lane.b32.xlu0 %v13097_v7, %s14563_s18  ;;  %6529 = vmatpush.msrb.mxu3 %v6077_v14 }
 0xba8   : > { %6609 = vmatpush.msra.mxu0 %v6078_v32  ;;  %v6048_v31 = vpop.permute.xlu1 %6047  ;;  %v6006_v43 = vpop.permute.xlu2 %6005  ;;  %v15499_v32 = vld [vmem:[#allocation29_spill] sm:$0xff] }
 0xba9   : > { %v6054_v47 = vsel %vm601_vm8, %v6048_v31, %v6052_v17  ;;  %v6056_v27 = vsel %vm601_vm8, %v6052_v17, %v6048_v31  ;;  %v6032_v35 = vpop.permute.xlu0 %6031 }
 0xbaa   : > { %v6059_v24 = vmul.f32 %v6056_v27, %v15494_v13  ;;  %v6060_v15 = vmul.f32 %v6054_v47, %v15495_v12  ;;  %v6036_v5 = vsel %vm585_vm9, %v6032_v35, %v6028_v33  ;;  %v6034_v44 = vsel %vm585_vm9, %v6028_v33, %v6032_v35 }
 0xbab   : > { %v6039_v30 = vmul.f32 %v6036_v5, %v15496_v21  ;;  %v6040_v57 = vmul.f32 %v6034_v44, %v15408_v59 }
 0xbac   : > { %6530 = vmatpush.msrb.mxu3 %v6059_v24  ;;  %6610 = vmatpush.msra.mxu0 %v6060_v15 }
 0xbae   : > { %6147 = vrot.lane.b32.xlu1 %v13097_v7, %s14472_s26  ;;  %6151 = vrot.lane.b32.xlu2 %v13109_v52, %s14472_s26 }
 0xbaf   : > { %6149 = vrot.lane.b32.xlu0 %v13103_v26, %s14472_s26 }
 0xbb0   : > { %v6050_v37 = vpop.permute.xlu1 %6049  ;;  %v5992_v61 = vpop.permute.xlu2 %5991 }
 0xbb1   : > { %v6053_v53 = vsel %vm601_vm8, %v6046_v29, %v6050_v37  ;;  %v6055_v63 = vsel %vm601_vm8, %v6050_v37, %v6046_v29  ;;  %v6008_v38 = vpop.permute.xlu0 %6007  ;;  %vm15508_vm8 = vmmov %vm15507_vm7 }
 0xbb2   : > { %v6057_v19 = vmul.f32 %v6055_v63, %v15494_v13  ;;  %v6058_v4 = vmul.f32 %v6053_v53, %v15495_v12  ;;  %v15501_v63 = vld [vmem:[#allocation31_spill] sm:$0xff] }
 0xbb4   : > { %6531 = vmatpush.msrb.mxu3 %v6057_v19  ;;  %6611 = vmatpush.msra.mxu0 %v6058_v4 }
 0xbb6   : > { %6335 = vrot.lane.b32.xlu1 %v13109_v52, %s14563_s18  ;;  %6145 = vrot.lane.b32.xlu2 %v13093_v62, %s14472_s26  ;;  %s15588_s26 = sld [smem:[#allocation163_spill]] }
 0xbb7   : > { %6127 = vrot.lane.b32.xlu0 %v13097_v7, %s14464_s24  ;;  %6532 = vmatpush.msrb.mxu3 %v6039_v30 }
 0xbb8   : > { %6612 = vmatpush.msra.mxu0 %v6040_v57  ;;  %v6026_v60 = vpop.permute.xlu1 %6025  ;;  %v5968_v55 = vpop.permute.xlu2 %5967 }
 0xbb9   : > { %v6033_v39 = vsel %vm585_vm9, %v6026_v60, %v6030_v40  ;;  %v6035_v56 = vsel %vm585_vm9, %v6030_v40, %v6026_v60  ;;  %v6010_v1 = vpop.permute.xlu0 %6009  ;;  %vm15510_vm9 = vmmov %vm15507_vm7 }
 0xbba   : > { %v6037_v48 = vmul.f32 %v6035_v56, %v15496_v21  ;;  %v6038_v58 = vmul.f32 %v6033_v39, %v15408_v59  ;;  %v6015_v3 = vsel %vm569_vm10, %v6010_v1, %v6006_v43  ;;  %v6013_v22 = vsel %vm569_vm10, %v6006_v43, %v6010_v1 }
 0xbbb   : > { %v6017_v29 = vmul.f32 %v6015_v3, %v15497_v36  ;;  %v6018_v16 = vmul.f32 %v6013_v22, %v15439_v6  ;;  %v15505_v22 = vld [vmem:[#allocation34_spill] sm:$0xff] }
 0xbbc   : > { %6533 = vmatpush.msrb.mxu3 %v6037_v48  ;;  %6613 = vmatpush.msra.mxu0 %v6038_v58  ;;  %v15502_v58 = vld [vmem:[#allocation32_spill] sm:$0xff] }
 0xbbe   : > { %6329 = vrot.lane.b32.xlu1 %v13093_v62, %s14563_s18  ;;  %6333 = vrot.lane.b32.xlu2 %v13103_v26, %s14563_s18 }
 0xbbf   : > { %6315 = vrot.lane.b32.xlu0 %v13109_v52, %s15310_s19 }
 0xbc0   : > { %v6012_v0 = vpop.permute.xlu1 %6011  ;;  %v5970_v28 = vpop.permute.xlu2 %5969 }
 0xbc1   : > { %v6014_v17 = vsel %vm569_vm10, %v6008_v38, %v6012_v0  ;;  %v6016_v33 = vsel %vm569_vm10, %v6012_v0, %v6008_v38  ;;  %v5986_v59 = vpop.permute.xlu0 %5985  ;;  %vm15511_vm10 = vmmov %vm15507_vm7 }
 0xbc2   : > { %v6019_v40 = vmul.f32 %v6016_v33, %v15497_v36  ;;  %v6020_v10 = vmul.f32 %v6014_v17, %v15439_v6 }
 0xbc4   : > { %6534 = vmatpush.msrb.mxu3 %v6019_v40  ;;  %6614 = vmatpush.msra.mxu0 %v6020_v10 }
 0xbc6   : > { %6131 = vrot.lane.b32.xlu1 %v13109_v52, %s14464_s24  ;;  %6311 = vrot.lane.b32.xlu2 %v13097_v7, %s15310_s19 }
 0xbc7   : > { %6309 = vrot.lane.b32.xlu0 %v13093_v62, %s15310_s19  ;;  %6535 = vmatpush.msrb.mxu3 %v6017_v29 }
 0xbc8   : > { %6615 = vmatpush.msra.mxu0 %v6018_v16  ;;  %v5988_v42 = vpop.permute.xlu1 %5987  ;;  %v5946_v45 = vpop.permute.xlu2 %5945 }
 0xbc9   : > { %v5994_v46 = vsel %vm553_vm11, %v5988_v42, %v5992_v61  ;;  %v5996_v23 = vsel %vm553_vm11, %v5992_v61, %v5988_v42  ;;  %v5972_v6 = vpop.permute.xlu0 %5971  ;;  %v15500_v61 = vld [vmem:[#allocation30_spill] sm:$0xff] }
 0xbca   : > { %v5999_v14 = vmul.f32 %v5996_v23, %v15498_v8  ;;  %v6000_v31 = vmul.f32 %v5994_v46, %v15499_v32  ;;  %v5976_v24 = vsel %vm537_vm12, %v5972_v6, %v5968_v55  ;;  %v5974_v37 = vsel %vm537_vm12, %v5968_v55, %v5972_v6 }
 0xbcb   : > { %v5979_v53 = vmul.f32 %v5976_v24, %v15500_v61  ;;  %v5980_v38 = vmul.f32 %v5974_v37, %v15501_v63  ;;  %v5937_v46 = vmul.f32 %v13183_v54, %v15505_v22 }
 0xbcc   : > { %6536 = vmatpush.msrb.mxu3 %v5999_v14  ;;  %6616 = vmatpush.msra.mxu0 %v6000_v31  ;;  %v15509_v31 = vld [vmem:[#allocation6_spill] sm:$0xff] }
 0xbce   : > { %6125 = vrot.lane.b32.xlu1 %v13093_v62, %s14464_s24  ;;  %6129 = vrot.lane.b32.xlu2 %v13103_v26, %s14464_s24  ;;  %s15504_s24 = sld [smem:[#allocation159_spill]] }
 0xbcf   : > { %6111 = vrot.lane.b32.xlu0 %v13109_v52, %s14457_s29 }
 0xbd0   : > { %v5990_v43 = vpop.permute.xlu1 %5989  ;;  %v6216_v47 = vpop.permute.xlu2 %6215 }
 0xbd1   : > { %v5993_v27 = vsel %vm553_vm11, %v5986_v59, %v5990_v43  ;;  %v5995_v35 = vsel %vm553_vm11, %v5990_v43, %v5986_v59  ;;  %v5948_v13 = vpop.permute.xlu0 %5947  ;;  %vm15512_vm11 = vcmp.lt.s32.totalorder %v7177_v34, 126 }
 0xbd2   : > { %v5997_v12 = vmul.f32 %v5995_v35, %v15498_v8  ;;  %v5998_v15 = vmul.f32 %v5993_v27, %v15499_v32 }
 0xbd4   : > { %6537 = vmatpush.msrb.mxu3 %v5997_v12  ;;  %6617 = vmatpush.msra.mxu0 %v5998_v15  ;;  %v13356_v10 = vld [vmem:[%s15504_s24] sm:$0xf] }
 0xbd5   : > { %v6518_v14 = vperm.slane %v13356_v10, 0 }
 0xbd6   : > { %6313 = vrot.lane.b32.xlu1 %v13103_v26, %s15310_s19  ;;  %6107 = vrot.lane.b32.xlu2 %v13097_v7, %s14457_s29 }
 0xbd7   : > { %6105 = vrot.lane.b32.xlu0 %v13093_v62, %s14457_s29  ;;  %6538 = vmatpush.msrb.mxu3 %v5979_v53 }
 0xbd8   : > { %6618 = vmatpush.msra.mxu0 %v5980_v38  ;;  %v5966_v5 = vpop.permute.xlu1 %5965  ;;  %v6214_v19 = vpop.permute.xlu2 %6213  ;;  %v15516_v38 = vld [vmem:[#allocation8_spill] sm:$0xff] }
 0xbd9   : > { %v5973_v4 = vsel %vm537_vm12, %v5966_v5, %v5970_v28  ;;  %v5975_v44 = vsel %vm537_vm12, %v5970_v28, %v5966_v5  ;;  %v5950_v21 = vpop.permute.xlu0 %5949  ;;  %v15503_v28 = vld [vmem:[#allocation33_spill] sm:$0xff]  ;;  %vm15513_vm12 = vmmov %vm15512_vm11 }
 0xbda   : > { %v5977_v30 = vmul.f32 %v5975_v44, %v15500_v61  ;;  %v5978_v57 = vmul.f32 %v5973_v4, %v15501_v63  ;;  %v5955_v48 = vsel %vm521_vm13, %v5950_v21, %v5946_v45  ;;  %v5953_v33 = vsel %vm521_vm13, %v5946_v45, %v5950_v21 }
 0xbdb   : > { %v5957_v3 = vmul.f32 %v5955_v48, %v15502_v58  ;;  %v5958_v40 = vmul.f32 %v5953_v33, %v15503_v28  ;;  %v15524_v33 = vld [vmem:[#allocation38_spill] sm:$0xff] }
 0xbdc   : > { %6539 = vmatpush.msrb.mxu3 %v5977_v30  ;;  %6619 = vmatpush.msra.mxu0 %v5978_v57 }
 0xbde   : > { %6291 = vrot.lane.b32.xlu1 %v13097_v7, %s14548_s20  ;;  %6295 = vrot.lane.b32.xlu2 %v13109_v52, %s14548_s20 }
 0xbdf   : > { %6293 = vrot.lane.b32.xlu0 %v13103_v26, %s14548_s20 }
 0xbe0   : > { %v5952_v60 = vpop.permute.xlu1 %5951  ;;  %v6190_v55 = vpop.permute.xlu2 %6189 }
 0xbe1   : > { %v5954_v39 = vsel %vm521_vm13, %v5948_v13, %v5952_v60  ;;  %v5956_v56 = vsel %vm521_vm13, %v5952_v60, %v5948_v13  ;;  %v5932_v1 = vpop.permute.xlu0 %5931  ;;  %vm15514_vm13 = vmmov %vm15512_vm11  ;;  %v15519_v60 = vld [vmem:[#allocation10_spill] sm:$0xff] }
 0xbe2   : > { %v5959_v0 = vmul.f32 %v5956_v56, %v15502_v58  ;;  %v5960_v17 = vmul.f32 %v5954_v39, %v15503_v28  ;;  %v5936_v59 = vsel %vm505_vm14, %v5932_v1, %v13201_v41  ;;  %v5934_v36 = vsel %vm505_vm14, %v13201_v41, %v5932_v1  ;;  %v15506_v41 = vld [vmem:[#allocation35_spill] sm:$0xff]  ;;  %vm15515_vm14 = vmmov %vm15512_vm11 }
 0xbe3   : > { %v5939_v29 = vmul.f32 %v5936_v59, %v15505_v22  ;;  %v5940_v16 = vmul.f32 %v5934_v36, %v15506_v41  ;;  %v5938_v32 = vmul.f32 %v13179_v18, %v15506_v41 }
 0xbe4   : > { %6540 = vmatpush.msrb.mxu3 %v5959_v0  ;;  %6620 = vmatpush.msra.mxu0 %v5960_v17 }
 0xbe6   : > { %6109 = vrot.lane.b32.xlu1 %v13103_v26, %s14457_s29  ;;  %6289 = vrot.lane.b32.xlu2 %v13093_v62, %s14548_s20  ;;  %s15587_s20 = sld [smem:[#allocation5_spill]] }
 0xbe7   : > { %6087 = vrot.lane.b32.xlu0 %v13097_v7, %s14805_s15  ;;  %6541 = vmatpush.msrb.mxu3 %v5957_v3 }
 0xbe8   : > { %6621 = vmatpush.msra.mxu0 %v5958_v40  ;;  %v6212_v42 = vpop.permute.xlu1 %6211  ;;  %v6176_v45 = vpop.permute.xlu2 %6175 }
 0xbe9   : > { %v6218_v23 = vsel %vm15507_vm7, %v6212_v42, %v6216_v47  ;;  %v13368_v6 = vsel %vm15508_vm8, %v6216_v47, %v6212_v42  ;;  %6542 = vmatpush.msrb.mxu3 %v5939_v29  ;;  %v6192_v8 = vpop.permute.xlu0 %6191  ;;  %vm15525_vm7 = vmmov %vm15523_vm5  ;;  %v6510_v42 = vld [vmem:[#allocation3] sm:$0x1] }
 0xbea   : > { %v6223_v43 = vmul.f32 %v6218_v23, %v15509_v31  ;;  %6622 = vmatpush.msra.mxu0 %v5940_v16  ;;  %vm15526_vm8 = vmmov %vm15523_vm5 }
 0xbeb   : > { %6543 = vmatpush.msrb.mxu3 %v5937_v46 }
 0xbec   : > { %6623 = vmatpush.msra.mxu0 %v5938_v32  ;;  %6548 = vmatpush.msrb.mxu2 %v6223_v43 }
 0xbed   : > { %6544 = vmatmul.f32.vlgmr.msrb.gmra.mxu3 %v6518_v14  ;;  %6624 = vmatmul.f32.vlgmr.msra.gmra.mxu0 %v6518_v14 }
 0xbee   : > { %6391 = vrot.lane.b32.xlu1 %v13097_v7, %s14603_s17  ;;  %6395 = vrot.lane.b32.xlu2 %v13109_v52, %s14603_s17 }
 0xbef   : > { %6275 = vrot.lane.b32.xlu0 %v13109_v52, %s14536_s22 }
 0xbf0   : > { %v6210_v54 = vpop.permute.xlu1 %6209  ;;  %v6170_v47 = vpop.permute.xlu2 %6169 }
 0xbf1   : > { %v6217_v18 = vsel %vm15510_vm9, %v6210_v54, %v6214_v19  ;;  %v13384_v27 = vsel %vm15511_vm10, %v6214_v19, %v6210_v54  ;;  %v6194_v35 = vpop.permute.xlu0 %6193  ;;  %vm15527_vm9 = vcmp.lt.s32.totalorder %v7177_v34, 96 }
 0xbf2   : > { %v6221_v13 = vmul.f32 %v6217_v18, %v15509_v31  ;;  %v13389_v24 = vsel %vm15512_vm11, %v6194_v35, %v6190_v55  ;;  %v6197_v63 = vsel %vm15515_vm14, %v6190_v55, %v6194_v35  ;;  %vm15528_vm10 = vmmov %vm15527_vm9  ;;  %v15531_v31 = vld [vmem:[#allocation40_spill] sm:$0xff] }
 0xbf3   : > { %v6201_v19 = vmul.f32 %v6197_v63, %v15516_v38  ;;  %vm15529_vm11 = vmmov %vm15527_vm9 }
 0xbf4   : > { %6549 = vmatpush.msrb.mxu2 %v6221_v13 }
 0xbf6   : > { %6091 = vrot.lane.b32.xlu1 %v13109_v52, %s14805_s15  ;;  %6271 = vrot.lane.b32.xlu2 %v13097_v7, %s14536_s22 }
 0xbf7   : > { %6085 = vrot.lane.b32.xlu0 %v13093_v62, %s14805_s15 }
 0xbf8   : > { %v6196_v12 = vpop.permute.xlu1 %6195  ;;  %v6374_v15 = vpop.permute.xlu2 %6373 }
 0xbf9   : > { %v6198_v37 = vsel %vm15513_vm12, %v6192_v8, %v6196_v12  ;;  %v13401_v61 = vsel %vm15514_vm13, %v6196_v12, %v6192_v8  ;;  %v6372_v53 = vpop.permute.xlu0 %6371  ;;  %vm15530_vm12 = vmmov %vm15527_vm9  ;;  %v15532_v12 = vld [vmem:[#allocation12_spill] sm:$0xff]  ;;  %vm15533_vm13 = vcmp.lt.s32.totalorder %v7177_v34, 97 }
 0xbfa   : > { %v6203_v5 = vmul.f32 %v6198_v37, %v15516_v38  ;;  %vm15534_vm14 = vmmov %vm15533_vm13 }
 0xbfc   : > { %6550 = vmatpush.msrb.mxu2 %v6203_v5 }
 0xbfe   : > { %6389 = vrot.lane.b32.xlu1 %v13093_v62, %s14603_s17  ;;  %6393 = vrot.lane.b32.xlu2 %v13103_v26, %s14603_s17 }
 0xbff   : > { %6273 = vrot.lane.b32.xlu0 %v13103_v26, %s14536_s22  ;;  %6551 = vmatpush.msrb.mxu2 %v6201_v19 }
 0xc00   : > { %v6172_v4 = vpop.permute.xlu1 %6171  ;;  %v6350_v44 = vpop.permute.xlu2 %6349 }
 0xc01   : > { %v6178_v21 = vsel %vm15517_vm2, %v6172_v4, %v6176_v45  ;;  %v13417_v30 = vsel %vm15518_vm0, %v6176_v45, %v6172_v4  ;;  %v6174_v57 = vpop.permute.xlu0 %6173  ;;  %v15535_v4 = vld [vmem:[#allocation42_spill] sm:$0xff]  ;;  %vm15538_vm0 = vcmp.lt.s32.totalorder %v7177_v34, 98 }
 0xc02   : > { %v6183_v55 = vmul.f32 %v6178_v21, %v15519_v60  ;;  %v6177_v39 = vsel %vm15520_vm1, %v6170_v47, %v6174_v57  ;;  %v13424_v56 = vsel %vm15521_vm15, %v6174_v57, %v6170_v47  ;;  %vm15539_vm1 = vmmov %vm15538_vm0  ;;  %vm15542_vm15 = vcmp.lt.s32.totalorder %v7177_v34, 14 }
 0xc03   : > { %v6181_v1 = vmul.f32 %v6177_v39, %v15519_v60 }
 0xc04   : > { %6552 = vmatpush.msrb.mxu2 %v6183_v55 }
 0xc06   : > { %6089 = vrot.lane.b32.xlu1 %v13103_v26, %s14805_s15  ;;  %6269 = vrot.lane.b32.xlu2 %v13093_v62, %s14536_s22  ;;  %s6801_s22 = sshll.u32 %s15587_s20, 1 }
 0xc07   : > { %6249 = vrot.lane.b32.xlu0 %v13093_v62, %s14527_s23  ;;  %6553 = vmatpush.msrb.mxu2 %v6181_v1  ;;  %s446_s11 = scalar_lea.vmem %s15588_s26, %s6801_s22 }
 0xc08   : > { %v6376_v48 = vpop.permute.xlu1 %6375  ;;  %v6152_v58 = vpop.permute.xlu2 %6151 }
 0xc09   : > { %v6378_v0 = vsel %vm15522_vm6, %v6372_v53, %v6376_v48  ;;  %v13437_v28 = vsel %vm15523_vm5, %v6376_v48, %v6372_v53  ;;  %6554 = vmatpush.msrb.mxu2 %v13097_v7  ;;  %v6352_v17 = vpop.permute.xlu0 %6351  ;;  %vm15543_vm6 = vmmov %vm15542_vm15 }
 0xc0a   : > { %v6383_v59 = vmul.f32 %v6378_v0, %v15524_v33  ;;  %v15540_v0 = vld [vmem:[#allocation44_spill] sm:$0xff]  ;;  %vm15545_vm5 = vmmov %vm15538_vm0 }
 0xc0b   : > { %6555 = vmatpush.msrb.mxu2 %v13093_v62 }
 0xc0c   : > { %6568 = vmatpush.msra.mxu1 %v6383_v59 }
 0xc0e   : > { %6251 = vrot.lane.b32.xlu1 %v13097_v7, %s14527_s23  ;;  %6255 = vrot.lane.b32.xlu2 %v13109_v52, %s14527_s23 }
 0xc0f   : > { %6235 = vrot.lane.b32.xlu0 %v13109_v52, %s14521_s14 }
 0xc10   : > { %v6370_v3 = vpop.permute.xlu1 %6369  ;;  %v6146_v36 = vpop.permute.xlu2 %6145 }
 0xc11   : > { %v6377_v40 = vsel %vm15525_vm7, %v6370_v3, %v6374_v15  ;;  %v13452_v22 = vsel %vm15526_vm8, %v6374_v15, %v6370_v3  ;;  %v6354_v29 = vpop.permute.xlu0 %6353  ;;  %vm15547_vm7 = vcmp.lt.s32.totalorder %v7177_v34, 110 }
 0xc12   : > { %v6381_v41 = vmul.f32 %v6377_v40, %v15524_v33  ;;  %v13457_v16 = vsel %vm15527_vm9, %v6354_v29, %v6350_v44  ;;  %v6357_v32 = vsel %vm15530_vm12, %v6350_v44, %v6354_v29  ;;  %v15541_v29 = vld [vmem:[#allocation14_spill] sm:$0xff]  ;;  %vm15549_vm8 = vmmov %vm15547_vm7  ;;  %vm15555_vm12 = vcmp.lt.s32.totalorder %v7177_v34, 15 }
 0xc13   : > { %v6361_v54 = vmul.f32 %v6357_v32, %v15531_v31  ;;  %vm15550_vm9 = vmmov %vm15543_vm6 }
 0xc14   : > { %6569 = vmatpush.msra.mxu1 %v6381_v41 }
 0xc16   : > { %6253 = vrot.lane.b32.xlu1 %v13103_v26, %s14527_s23  ;;  %6231 = vrot.lane.b32.xlu2 %v13097_v7, %s14521_s14 }
 0xc17   : > { %6513 = vperm.xlu0 %6891, %v6510_v42  }
 0xc18   : > { %v6356_v45 = vpop.permute.xlu1 %6355  ;;  %v6334_v46 = vpop.permute.xlu2 %6333 }
 0xc19   : > { %v6358_v23 = vsel %vm15528_vm10, %v6352_v17, %v6356_v45  ;;  %v13467_v8 = vsel %vm15529_vm11, %v6356_v45, %v6352_v17  ;;  %v6332_v14 = vpop.permute.xlu0 %6331  ;;  %vm15551_vm10 = vcmp.lt.s32.totalorder %v7177_v34, 94  ;;  %vm15553_vm11 = vcmp.lt.s32.totalorder %v7177_v34, 111 }
 0xc1a   : > { %v6363_v43 = vmul.f32 %v6358_v23, %v15531_v31 }
 0xc1c   : > { %6570 = vmatpush.msra.mxu1 %v6363_v43 }
 0xc1e   : > { %6229 = vrot.lane.b32.xlu1 %v13093_v62, %s14521_s14  ;;  %6233 = vrot.lane.b32.xlu2 %v13103_v26, %s14521_s14  ;;  %s15590_s14 = sld [smem:[#allocation164_spill]] }
 0xc1f   : > { %6571 = vmatpush.msra.mxu1 %v6361_v54  ;;  %v15544_v54 = vld [vmem:[#allocation16_spill] sm:$0xff] }
 0xc20   : > { %v6148_v7 = vpop.permute.xlu1 %6147  ;;  %v6312_v35 = vpop.permute.xlu2 %6311 }
 0xc21   : > { %v13479_v47 = vsel %vm681_vm3, %v6148_v7, %v6152_v58  ;;  %v6156_v18 = vsel %vm681_vm3, %v6152_v58, %v6148_v7  ;;  %v6150_v13 = vpop.permute.xlu0 %6149 }
 0xc22   : > { %v6159_v15 = vmul.f32 %v6156_v18, %v15532_v12  ;;  %v13486_v37 = vsel %vm681_vm3, %v6146_v36, %v6150_v13  ;;  %v6155_v62 = vsel %vm681_vm3, %v6150_v13, %v6146_v36  ;;  %vm15536_vm3 = vmmov %vm15533_vm13 }
 0xc23   : > { %v6157_v53 = vmul.f32 %v6155_v62, %v15532_v12  ;;  %vm15537_vm2 = vmmov %vm15536_vm3 }
 0xc24   : > { %6556 = vmatpush.msrb.mxu2 %v6159_v15  ;;  %s449_s0 = scalar_lea.vmem %s15590_s14, %s15587_s20 }
 0xc26   : > { %6557 = vmatpush.msrb.mxu2 %v6157_v53 }
 0xc28   : > { %v6336_v63 = vpop.permute.xlu1 %6335  ;;  %v6130_v21 = vpop.permute.xlu2 %6129 }
 0xc29   : > { %v6338_v38 = vsel %vm15533_vm13, %v6332_v14, %v6336_v63  ;;  %v13495_v5 = vsel %vm15534_vm14, %v6336_v63, %v6332_v14  ;;  %v6128_v19 = vpop.permute.xlu0 %6127  ;;  %vm15557_vm13 = vmmov %vm15551_vm10 }
 0xc2a   : > { %v6343_v44 = vmul.f32 %v6338_v38, %v15535_v4  ;;  %vm15558_vm14 = vmmov %vm15553_vm11 }
 0xc2c   : > { %6572 = vmatpush.msra.mxu1 %v6343_v44 }
 0xc30   : > { %v6330_v57 = vpop.permute.xlu1 %6329  ;;  %v6108_v33 = vpop.permute.xlu2 %6107 }
 0xc31   : > { %v6337_v60 = vsel %vm15536_vm3, %v6330_v57, %v6334_v46  ;;  %v13502_v55 = vsel %vm15537_vm2, %v6334_v46, %v6330_v57  ;;  %v6316_v39 = vpop.permute.xlu0 %6315  ;;  %vm6525_vm3 = vcmask 130048   ;;  %vm15560_vm2 = vmmov %vm15555_vm12 }
 0xc32   : > { %v6341_v1 = vmul.f32 %v6337_v60, %v15535_v4  ;;  %v6318_v48 = vsel %vm15538_vm0, %v6312_v35, %v6316_v39  ;;  %v13509_v58 = vsel %vm15539_vm1, %v6316_v39, %v6312_v35  ;;  %vm15565_vm1 = vmmov %vm15547_vm7 }
 0xc33   : > { %v6323_v17 = vmul.f32 %v6318_v48, %v15540_v0 }
 0xc34   : > { %6573 = vmatpush.msra.mxu1 %v6341_v1 }
 0xc36   : > { %6574 = vmatpush.msra.mxu1 %v6323_v17 }
 0xc38   : > { %v6132_v59 = vpop.permute.xlu1 %6131  ;;  %v13519_v42 = vpop.permute.xlu2 %6295 }
 0xc39   : > { %v13514_v3 = vsel %vm665_vm4, %v6128_v19, %v6132_v59  ;;  %v6136_v36 = vsel %vm665_vm4, %v6132_v59, %v6128_v19  ;;  %v6310_v40 = vpop.permute.xlu0 %6309  ;;  %v15548_v19 = vld [vmem:[#allocation46_spill] sm:$0xff] }
 0xc3a   : > { %v6139_v41 = vmul.f32 %v6136_v36, %v15541_v29  ;;  %v15552_v36 = vld [vmem:[#allocation36_spill] sm:$0xff] }
 0xc3c   : > { %6558 = vmatpush.msrb.mxu2 %v6139_v41  ;;  %v15554_v41 = vld [vmem:[#allocation48_spill] sm:$0xff] }
 0xc40   : > { %v6126_v45 = vpop.permute.xlu1 %6125  ;;  %v13535_v35 = vpop.permute.xlu2 %6289 }
 0xc41   : > { %v13523_v46 = vsel %vm665_vm4, %v6126_v45, %v6130_v21  ;;  %v6135_v23 = vsel %vm665_vm4, %v6130_v21, %v6126_v45  ;;  %v6112_v14 = vpop.permute.xlu0 %6111  ;;  %vm15546_vm4 = vmmov %vm15538_vm0  ;;  %vm15561_vm0 = vcmp.lt.s32.totalorder %v7177_v34, 112 }
 0xc42   : > { %v6137_v32 = vmul.f32 %v6135_v23, %v15541_v29  ;;  %v13530_v31 = vsel %vm15542_vm15, %v6108_v33, %v6112_v14  ;;  %v6116_v43 = vsel %vm15543_vm6, %v6112_v14, %v6108_v33  ;;  %vm15566_vm15 = vcmp.lt.s32.totalorder %v7177_v34, 113  ;;  %vm15567_vm6 = vmmov %vm15561_vm0 }
 0xc43   : > { %v6119_v7 = vmul.f32 %v6116_v43, %v15544_v54 }
 0xc44   : > { %6559 = vmatpush.msrb.mxu2 %v6137_v32 }
 0xc46   : > { %6560 = vmatpush.msrb.mxu2 %v6119_v7 }
 0xc48   : > { %v6314_v18 = vpop.permute.xlu1 %6313  ;;  %v13559_v21 = vpop.permute.xlu2 %6395 }
 0xc49   : > { %v6317_v13 = vsel %vm15545_vm5, %v6310_v40, %v6314_v18  ;;  %v13541_v12 = vsel %vm15546_vm4, %v6314_v18, %v6310_v40  ;;  %v13543_v15 = vpop.permute.xlu0 %6105  ;;  %vm15568_vm5 = vmmov %vm15550_vm9 }
 0xc4a   : > { %v6321_v62 = vmul.f32 %v6317_v13, %v15540_v0  ;;  %vm15570_vm4 = vmmov %vm15565_vm1 }
 0xc4c   : > { %6575 = vmatpush.msra.mxu1 %v6321_v62 }
 0xc50   : > { %v13546_v53 = vpop.permute.xlu1 %6291  ;;  %v13571_v0 = vpop.permute.xlu2 %6271 }
 0xc51   : > { %v6298_v63 = vsel %vm15547_vm7, %v13546_v53, %v13519_v42  ;;  %v13552_v38 = vpop.permute.xlu0 %6293  ;;  %vm15572_vm7 = vmmov %vm15560_vm2 }
 0xc52   : > { %v6303_v4 = vmul.f32 %v6298_v63, %v15548_v19  ;;  %v6297_v44 = vsel %vm15549_vm8, %v13535_v35, %v13552_v38  ;;  %vm15574_vm8 = vmmov %vm15553_vm11 }
 0xc53   : > { %v6301_v57 = vmul.f32 %v6297_v44, %v15548_v19  ;;  %v6521_v44 = vperm.slane %v13356_v10, 3 }
 0xc54   : > { %6576 = vmatpush.msra.mxu1 %v6303_v4 }
 0xc56   : > { %6577 = vmatpush.msra.mxu1 %v6301_v57  ;;  %v15559_v57 = vld [vmem:[#allocation7_spill] sm:$0xff] }
 0xc58   : > { %v13562_v60 = vpop.permute.xlu1 %6109  ;;  %v13587_v23 = vpop.permute.xlu2 %6393 }
 0xc59   : > { %v6115_v39 = vsel %vm15550_vm9, %v13562_v60, %v13543_v15  ;;  %v13568_v1 = vpop.permute.xlu0 %6087  ;;  %vm15575_vm9 = vmmov %vm15560_vm2 }
 0xc5a   : > { %v6117_v48 = vmul.f32 %v6115_v39, %v15544_v54  ;;  %v15556_v54 = vld [vmem:[#allocation18_spill] sm:$0xff]  ;;  %v6224_v39 = vmul.f32 %v13368_v6, %v15559_v57  ;;  %v6202_v6 = vmul.f32 %v13389_v24, %v15449_v20  ;;  %v6182_v24 = vmul.f32 %v13424_v56, %v15475_v25 }
 0xc5b   : > { %v15562_v56 = vld [vmem:[#allocation50_spill] sm:$0xff] }
 0xc5c   : > { %6561 = vmatpush.msrb.mxu2 %v6117_v48 }
 0xc60   : > { %v13573_v17 = vpop.permute.xlu1 %6391  ;;  %v13600_v13 = vpop.permute.xlu2 %6269 }
 0xc61   : > { %v6398_v33 = vsel %vm15551_vm10, %v13573_v17, %v13559_v21  ;;  %v13579_v59 = vpop.permute.xlu0 %6275  ;;  %vm15576_vm10 = vmmov %vm15574_vm8 }
 0xc62   : > { %v6403_v40 = vmul.f32 %v6398_v33, %v15552_v36  ;;  %v6278_v29 = vsel %vm15553_vm11, %v13571_v0, %v13579_v59  ;;  %v6222_v33 = vmul.f32 %v13384_v27, %v15559_v57  ;;  %vm15577_vm11 = vmmov %vm15557_vm13 }
 0xc63   : > { %v6283_v45 = vmul.f32 %v6278_v29, %v15554_v41  ;;  %v6519_v29 = vperm.slane %v13356_v10, 1 }
 0xc64   : > { %6602 = vmatpush.msra.mxu3 %v6403_v40 }
 0xc65   : > { %6578 = vmatpush.msra.mxu1 %v6283_v45  ;;  %v6184_v45 = vmul.f32 %v13417_v30, %v15475_v25  ;;  %v6364_v30 = vmul.f32 %v13467_v8, %v15482_v2  ;;  %v6362_v25 = vmul.f32 %v13457_v16, %v15482_v2  ;;  %v6344_v8 = vmul.f32 %v13495_v5, %v15485_v11 }
 0xc66   : > { %v6342_v2 = vmul.f32 %v13502_v55, %v15485_v11  ;;  %v6300_v11 = vsel %vm15565_vm1, %v13519_v42, %v13546_v53  ;;  %v15569_v42 = vld [vmem:[#allocation17_spill] sm:$0xff] }
 0xc67   : > { %v6120_v53 = vmul.f32 %v13530_v31, %v15569_v42  ;;  %v6280_v31 = vsel %vm15574_vm8, %v13579_v59, %v13571_v0  ;;  %v6400_v0 = vsel %vm15577_vm11, %v13559_v21, %v13573_v17  ;;  %v15578_v59 = vld [vmem:[#allocation49_spill] sm:$0xff] }
 0xc68   : > { %v13589_v14 = vpop.permute.xlu1 %6091 }
 0xc69   : > { %v6096_v32 = vsel %vm15555_vm12, %v13589_v14, %v13568_v1  ;;  %v13595_v43 = vpop.permute.xlu0 %6085  ;;  %vm15579_vm12 = vmmov %vm15561_vm0 }
 0xc6a   : > { %v6099_v7 = vmul.f32 %v6096_v32, %v15556_v54  ;;  %v13638_v32 = vpop.permute.xlu2 %6255 }
 0xc6c   : > { %6562 = vmatpush.msrb.mxu2 %v6099_v7 }
 0xc70   : > { %v13598_v18 = vpop.permute.xlu1 %6389 }
 0xc71   : > { %v6397_v62 = vsel %vm15557_vm13, %v13598_v18, %v13587_v23  ;;  %v13606_v63 = vpop.permute.xlu0 %6273  ;;  %vm15580_vm13 = vmmov %vm15566_vm15 }
 0xc72   : > { %v6401_v19 = vmul.f32 %v6397_v62, %v15552_v36  ;;  %v6277_v4 = vsel %vm15558_vm14, %v13600_v13, %v13606_v63  ;;  %v6204_v36 = vmul.f32 %v13401_v61, %v15449_v20  ;;  %v6384_v61 = vmul.f32 %v13437_v28, %v15462_v9  ;;  %vm15581_vm14 = vmmov %vm15577_vm11 }
 0xc73   : > { %v6281_v48 = vmul.f32 %v6277_v4, %v15554_v41  ;;  %v15564_v4 = vld [vmem:[#allocation15_spill] sm:$0xff] }
 0xc74   : > { %6603 = vmatpush.msra.mxu3 %v6401_v19  ;;  %v6138_v57 = vmul.f32 %v13523_v46, %v15564_v4 }
 0xc75   : > { %6579 = vmatpush.msra.mxu1 %v6281_v48  ;;  %6853 = vmatmul.msk.f32.vlgmr.msra.gmra.mxu3 %vm6525_vm3, %v6521_v44  ;;  %v15571_v48 = vld [vmem:[#allocation47_spill] sm:$0xff] }
 0xc76   : > { %6628 = vmatpush.msrb.mxu3 %v6224_v39  ;;  %v6299_v39 = vsel %vm15570_vm4, %v13552_v38, %v13535_v35 }
 0xc77   : > { %v6302_v35 = vmul.f32 %v6299_v39, %v15571_v48 }
 0xc78   : > { %6629 = vmatpush.msrb.mxu3 %v6222_v33  ;;  %v13624_v40 = vpop.permute.xlu1 %6089  ;;  %v6304_v33 = vmul.f32 %v6300_v11, %v15571_v48 }
 0xc79   : > { %v6095_v27 = vsel %vm15560_vm2, %v13624_v40, %v13595_v43  ;;  %v13640_v20 = vpop.permute.xlu0 %6249  ;;  %v6093_v38 = vsel %vm15575_vm9, %v13595_v43, %v13624_v40  ;;  %vm15582_vm2 = vmmov %vm15561_vm0 }
 0xc7a   : > { %6630 = vmatpush.msrb.mxu3 %v6204_v36  ;;  %v6097_v41 = vmul.f32 %v6095_v27, %v15556_v54  ;;  %v6382_v54 = vmul.f32 %v13452_v22, %v15462_v9  ;;  %v15563_v9 = vld [vmem:[#allocation13_spill] sm:$0xff]  ;;  %v6284_v36 = vmul.f32 %v6280_v31, %v15578_v59  ;;  %v6098_v40 = vmul.f32 %v6093_v38, %v15445_v51 }
 0xc7b   : > { %v6160_v22 = vmul.f32 %v13479_v47, %v15563_v9  ;;  %v6158_v19 = vmul.f32 %v13486_v37, %v15563_v9  ;;  %v6140_v47 = vmul.f32 %v13514_v3, %v15564_v4  ;;  %v6113_v3 = vsel %vm15568_vm5, %v13543_v15, %v13562_v60 }
 0xc7c   : > { %6631 = vmatpush.msrb.mxu3 %v6202_v6  ;;  %6563 = vmatpush.msrb.mxu2 %v6097_v41  ;;  %v6118_v60 = vmul.f32 %v6113_v3, %v15569_v42 }
 0xc7d   : > { %6564 = vmatmul.f32.vlgmr.msrb.gmra.mxu2 %v6519_v29 }
 0xc7e   : > { %6632 = vmatpush.msrb.mxu3 %v6184_v45  ;;  %6648 = vmatpush.msra.mxu2 %v6384_v61  ;;  %v6404_v45 = vmul.f32 %v6400_v0, %v15463_v49  ;;  %v15583_v61 = vld [vmem:[#allocation51_spill] sm:$0xff] }
 0xc80   : > { %6633 = vmatpush.msrb.mxu3 %v6182_v24  ;;  %6649 = vmatpush.msra.mxu2 %v6382_v54  ;;  %v6252_v28 = vpop.permute.xlu1 %6251  ;;  %v15586_v54 = vld [vmem:[#allocation53_spill] sm:$0xff] }
 0xc81   : > { %v6258_v7 = vsel %vm15561_vm0, %v6252_v28, %v13638_v32  ;;  %v6236_v16 = vpop.permute.xlu0 %6235  ;;  %v6260_v27 = vsel %vm15579_vm12, %v13638_v32, %v6252_v28  ;;  %vm15584_vm0 = vmmov %vm15580_vm13 }
 0xc82   : > { %6634 = vmatpush.msrb.mxu3 %v13109_v52  ;;  %v6263_v62 = vmul.f32 %v6258_v7, %v15562_v56  ;;  %6650 = vmatpush.msra.mxu2 %v6364_v30  ;;  %v6232_v52 = vpop.permute.xlu2 %6231  ;;  %v6264_v32 = vmul.f32 %v6260_v27, %v15583_v61  ;;  %vm15585_vm1 = vmmov %vm15584_vm0 }
 0xc83   : > { %v6238_v37 = vsel %vm15566_vm15, %v6232_v52, %v6236_v16  ;;  %v6240_v24 = vsel %vm15584_vm0, %v6236_v16, %v6232_v52  ;;  %vm6695_vm15 = vcmask 1040384  }
 0xc84   : > { %6635 = vmatpush.msrb.mxu3 %v13103_v26  ;;  %6651 = vmatpush.msra.mxu2 %v6362_v25  ;;  %v6324_v26 = vmul.f32 %v13509_v58, %v15488_v50  ;;  %v6322_v58 = vmul.f32 %v13541_v12, %v15488_v50  ;;  %v6094_v50 = vsel %vm15572_vm7, %v13568_v1, %v13589_v14  ;;  %v15573_v12 = vld [vmem:[#allocation52_spill] sm:$0xff] }
 0xc85   : > { %6580 = vmatpush.msra.mxu1 %v6263_v62  ;;  %v6243_v15 = vmul.f32 %v6238_v37, %v15573_v12  ;;  %v6100_v1 = vmul.f32 %v6094_v50, %v15445_v51  ;;  %v6279_v14 = vsel %vm15576_vm10, %v13606_v63, %v13600_v13  ;;  %v6520_v63 = vperm.slane %v13356_v10, 2 }
 0xc86   : > { %6636 = vmatpush.msrb.mxu3 %v6160_v22  ;;  %6652 = vmatpush.msra.mxu2 %v6344_v8  ;;  %v6282_v41 = vmul.f32 %v6279_v14, %v15578_v59  ;;  %v6399_v51 = vsel %vm15581_vm14, %v13587_v23, %v13598_v18  ;;  %v6244_v30 = vmul.f32 %v6240_v24, %v15586_v54 }
 0xc87   : > { %v6402_v23 = vmul.f32 %v6399_v51, %v15463_v49 }
 0xc88   : > { %6637 = vmatpush.msrb.mxu3 %v6158_v19  ;;  %6653 = vmatpush.msra.mxu2 %v6342_v2  ;;  %v6254_v5 = vpop.permute.xlu1 %6253  ;;  %v6625_v19 = vpop.f32.mrf.mxu0 }
 0xc89   : > { %v6257_v55 = vsel %vm15567_vm6, %v13640_v20, %v6254_v5  ;;  %v6259_v17 = vsel %vm15582_vm2, %v6254_v5, %v13640_v20  ;;  %v6514_v49 = vpop.permute.xlu0 %6513 }
 0xc8a   : > { %6638 = vmatpush.msrb.mxu3 %v6140_v47  ;;  %v6261_v46 = vmul.f32 %v6257_v55, %v15562_v56  ;;  %6654 = vmatpush.msra.mxu2 %v6324_v26  ;;  %v6234_v6 = vpop.permute.xlu2 %6233  ;;  %v6262_v18 = vmul.f32 %v6259_v17, %v15583_v61  ;;  %v6516_v7 = vperm.slane %v6514_v49, 0 }
 0xc8c   : > { %6639 = vmatpush.msrb.mxu3 %v6138_v57  ;;  %6655 = vmatpush.msra.mxu2 %v6322_v58  ;;  %v6626_v16 = vadd.f32 %v6625_v19, %v6516_v7 }
 0xc8d   : > { %6581 = vmatpush.msra.mxu1 %v6261_v46  ;;  %v15589_v46 = vlaneseq }
 0xc8e   : > { %6640 = vmatpush.msrb.mxu3 %v6120_v53  ;;  %6656 = vmatpush.msra.mxu2 %v6304_v33 }
 0xc8f   : > { %6582 = vmatpush.msra.mxu1 %v6243_v15 }
 0xc90   : > { %6641 = vmatpush.msrb.mxu3 %v6118_v60  ;;  %6657 = vmatpush.msra.mxu2 %v6302_v35  ;;  %v6230_v43 = vpop.permute.xlu1 %6229 }
 0xc91   : > { %v6237_v13 = vsel %vm15580_vm13, %v6230_v43, %v6234_v6  ;;  %v6239_v20 = vsel %vm15585_vm1, %v6234_v6, %v6230_v43 }
 0xc92   : > { %6642 = vmatpush.msrb.mxu3 %v6100_v1  ;;  %v6241_v21 = vmul.f32 %v6237_v13, %v15573_v12  ;;  %6658 = vmatpush.msra.mxu2 %v6284_v36  ;;  %v6242_v28 = vmul.f32 %v6239_v20, %v15586_v54 }
 0xc94   : > { %6643 = vmatpush.msrb.mxu3 %v6098_v40  ;;  %6659 = vmatpush.msra.mxu2 %v6282_v41 }
 0xc95   : > { %6583 = vmatpush.msra.mxu1 %v6241_v21  ;;  %6644 = vmatmul.f32.vlgmr.msrb.gmra.mxu3 %v6519_v29  ;;  %v6545_v29 = vpop.f32.mrf.mxu3 }
 0xc96   : > { %6584 = vmatmul.f32.vlgmr.msra.gmra.mxu1 %v6520_v63  ;;  %6660 = vmatpush.msra.mxu2 %v6264_v32  ;;  %v6546_v56 = vadd.f32 %v6545_v29, %v6516_v7 }
 0xc97   : > { %6682 = vmatpush.msrb.mxu1 %v6404_v45 }
 0xc98   : > { %6661 = vmatpush.msra.mxu2 %v6262_v18 }
 0xc99   : > { %6683 = vmatpush.msrb.mxu1 %v6402_v23 }
 0xc9a   : > { %6662 = vmatpush.msra.mxu2 %v6244_v30 }
 0xc9c   : > { %6663 = vmatpush.msra.mxu2 %v6242_v28 }
 0xc9d   : > { %6664 = vmatmul.f32.vlgmr.msra.gmra.mxu2 %v6520_v63 }
 0xc9e   : > { %6854 = vmatmul.msk.f32.vlgmr.msrb.gmra.mxu1 %vm6525_vm3, %v6521_v44  ;;  %vm6700_vm3 = vcmp.lt.s32.totalorder %v15589_v46, 256 }
 0xcf8   : > { %v6605_v62 = vpop.f32.mrf.mxu3 }
 0xd00   : > { %v6565_v25 = vpop.f32.mrf.mxu2 }
 0xd01   : > { %v6566_v34 = vadd.f32 %v6565_v25, %v6546_v56 }
 0xd13   : > { %v6585_v9 = vpop.f32.mrf.mxu1 }
 0xd14   : > { %v6586_v22 = vadd.f32 %v6585_v9, %v6566_v34 }
 0xd16   : > { %v6606_v8 = vadd.f32 %v6605_v62, %v6586_v22 }
 0xd18   : > { %v6688_v2 = vmax.f32 %v6606_v8, 0.0  ;;  %v6645_v52 = vpop.f32.mrf.mxu3 }
 0xd19   : > { %v6646_v47 = vadd.f32 %v6645_v52, %v6626_v16 }
 0xd1a   : > { %v6690_v4 = vadd.f32 0.60206, %v6688_v2 }
 0xd1b   : > { %v6685_v26 = vpop.f32.mrf.mxu1 }
 0xd1c   : > { %v6703_v5 = vmul.f32 2.3025851, %v6690_v4 }
 0xd1e   : > { %v6705_v37 = vmul.f32 1.442695, %v6703_v5 }
 0xd20   : > { %v6665_v10 = vpop.f32.mrf.mxu2  ;;  %6894 = vpow2.f32 %v6705_v37 }
 0xd21   : > { %v6666_v44 = vadd.f32 %v6665_v10, %v6646_v47 }
 0xd23   : > { %v6686_v57 = vadd.f32 %v6685_v26, %v6666_v44 }
 0xd25   : > { %v6689_v11 = vmax.f32 %v6686_v57, 0.0 }
 0xd26   : > { %v6895_v39 = vpop.eup %6894 }
 0xd27   : > { %v6691_v55 = vadd.f32 0.60206, %v6689_v11  ;;  %v6709_v33 = vsel %vm6695_vm15, %v6895_v39, 0.0 }
 0xd29   : > { %v6694_v58 = vrot.slane %v6691_v55, 7  ;;  %v6704_v3 = vmul.f32 2.3025851, %v6691_v55 }
 0xd2b   : > { %v6707_v42 = vmul.f32 1.442695, %v6704_v3  ;;  %v6696_v53 = vsel %vm6695_vm15, %v6690_v4, %v6694_v58 }
 0xd2c   : > { %6702 = vst.msk [vmem:[%s446_s11] sm:$0x3] %vm6700_vm3, %v6696_v53 }
 0xd2d   : > { %6896 = vpow2.f32 %v6707_v42 }
 0xd33   : > { %v6897_v48 = vpop.eup %6896 }
 0xd34   : > { %v6710_v50 = vsel %vm6695_vm15, %v6897_v48, 0.0 }
 0xd35   : > { %v6711_v12 = vadd.f32 %v6710_v50, %v6709_v33 }
 0xd37   : > { %6712 = vadd.xlane.f32.xlu1 %v6711_v12 }
 0xdaa   : > { %v6713_v15 = vpop.xlane.xlu1 %6712 }
 0xdab   : > { %6715 = vst [vmem:[%s449_s0] sm:$0x1] %v6713_v15 }
 0xdac PF: > { %s15591_s1 = sld [smem:[#allocation4_spill]] }
 0xdb2   : > { %s26_s27 = sadd.s32 1, %s15591_s1  }
 0xdb3   : > { %p23_p4 = scmp.ge.s32.totalorder %s26_s27, 4  }
 0xdb5   :  { %25 = sbr.rel (!%p23_p4) target bundleno = 13 (0xd), region = 133 }

</bundles_post_ra>
